<compile_context>
chip_gen: v6e
topology: v6e:2x2x1
jax: 0.10.0
libtpu: 0.0.40
codegen_flags: <defaults>
</compile_context>

<pallas_src>
import jax
import jax.numpy as jnp
from jax.experimental import pallas as pl
from jax.experimental.pallas import tpu as pltpu


# ------------------------------ tiling helpers ------------------------------

def _pick_tm(m):
    """Large row tiles amortize per-step overhead (v6e/v5e) while keeping
    >= 2 grid steps when M >= 256 so v7x's second TensorCore is not idle."""
    if m >= 1024:
        tm = 512
    elif m >= 256:
        tm = (m + 1) // 2
    else:
        tm = m
    return max(8, ((tm + 7) // 8) * 8)


def _pad_rows(x, mp):
    m = x.shape[0]
    return x if mp == m else jnp.pad(x, ((0, mp - m), (0, 0)))


# ------------------------------ Pallas kernels ------------------------------

def _apply_act(y, act):
    if act == "relu":
        return jnp.maximum(y, 0.0)
    if act == "sigmoid":
        return jax.nn.sigmoid(y)
    return y


def _make_matmul_kernel(act):
    def kernel(x_ref, w_ref, b_ref, o_ref):
        y = jnp.dot(x_ref[...], w_ref[...],
                    preferred_element_type=jnp.float32) + b_ref[...]
        o_ref[...] = _apply_act(y, act)
    return kernel


def fused_matmul(x, w, b, act="none"):
    """act(x @ w + b).  Every conv / conv-transpose / shortcut in the model is
    exactly one call of this kernel; BatchNorm is pre-folded into (w, b) and
    the residual add is fused via K-concatenation, so no separate elementwise
    HBM passes remain on the conv path."""
    m, k = x.shape
    c = w.shape[1]
    tm = _pick_tm(m)
    mp = ((m + tm - 1) // tm) * tm
    out = pl.pallas_call(
        _make_matmul_kernel(act),
        out_shape=jax.ShapeDtypeStruct((mp, c), jnp.float32),
        grid=(mp // tm,),
        in_specs=[
            pl.BlockSpec((tm, k), lambda i: (i, 0)),
            pl.BlockSpec((k, c), lambda i: (0, 0)),   # weights stay resident
            pl.BlockSpec((1, c), lambda i: (0, 0)),
        ],
        out_specs=pl.BlockSpec((tm, c), lambda i: (i, 0)),
        compiler_params=pltpu.CompilerParams(
            dimension_semantics=("parallel",)),
    )(_pad_rows(x, mp), w, b.reshape(1, c))
    return out[:m] if mp != m else out


def _affine_relu_kernel(x_ref, s_ref, b_ref, o_ref):
    o_ref[...] = jnp.maximum(x_ref[...] * s_ref[...] + b_ref[...], 0.0)


def affine_relu(x2d, scale, shift):
    """relu(x * scale + shift): the pre-conv BatchNorm0 + ReLU of a ResBlock
    (cannot be folded into the following conv because of its zero padding)."""
    m, c = x2d.shape
    tm = _pick_tm(m)
    mp = ((m + tm - 1) // tm) * tm
    out = pl.pallas_call(
        _affine_relu_kernel,
        out_shape=jax.ShapeDtypeStruct((mp, c), jnp.float32),
        grid=(mp // tm,),
        in_specs=[
            pl.BlockSpec((tm, c), lambda i: (i, 0)),
            pl.BlockSpec((1, c), lambda i: (0, 0)),
            pl.BlockSpec((1, c), lambda i: (0, 0)),
        ],
        out_specs=pl.BlockSpec((tm, c), lambda i: (i, 0)),
        compiler_params=pltpu.CompilerParams(
            dimension_semantics=("parallel",)),
    )(_pad_rows(x2d, mp), scale.reshape(1, c), shift.reshape(1, c))
    return out[:m] if mp != m else out


# -------------------------------- conv glue --------------------------------
# im2col / weight reshaping is kept as thin XLA glue around the Pallas matmul.

def _im2col_3x3(x):
    """NHWC -> (N*H*W, 9*C) patches for a 3x3 / stride-1 / pad-1 conv."""
    n, h, w, c = x.shape
    xp = jnp.pad(x, ((0, 0), (1, 1), (1, 1), (0, 0)))
    cols = [xp[:, kh:kh + h, kw:kw + w, :]
            for kh in range(3) for kw in range(3)]
    return jnp.concatenate(cols, axis=-1).reshape(n * h * w, 9 * c)


def _conv_w_to_mat(w_oihw):
    """(Cout, Cin, 3, 3) -> (9*Cin, Cout), matching _im2col_3x3 column order."""
    cout = w_oihw.shape[0]
    return jnp.transpose(w_oihw, (2, 3, 1, 0)).reshape(-1, cout)


def _convT_phase_weight(w_iohw):
    """ConvTranspose2d(k=3, s=2, p=1, op=1) weight (Cin, Cout, 3, 3) as a
    (4*Cin, 4*Cout) matrix.  Rows: 2x2 input-neighbourhood taps (di, dj);
    columns: the 4 output sub-pixel phases (ey, ex):
        out[2a+ey, 2b+ex] = sum_{di,dj} in_pad[a+di, b+dj] @ W[:, :, kh, kw]
    with kh = kh(ey, di), kw = kw(ex, dj).  Avoids the 4x MXU/HBM waste of a
    zero-stuffed direct-conv lowering."""
    cin, cout = w_iohw.shape[0], w_iohw.shape[1]

    def tap(e, d):          # kernel index contributing to phase e from tap d
        if e == 0:
            return 1 if d == 0 else None
        return 2 if d == 0 else 0

    zero = jnp.zeros((cin, cout), jnp.float32)
    row_blocks = []
    for di in range(2):
        for dj in range(2):
            col_blocks = []
            for ey in range(2):
                for ex in range(2):
                    kh, kw = tap(ey, di), tap(ex, dj)
                    col_blocks.append(zero if kh is None or kw is None
                                      else w_iohw[:, :, kh, kw])
            row_blocks.append(jnp.concatenate(col_blocks, axis=1))
    return jnp.concatenate(row_blocks, axis=0)


def conv_transpose_fused(x, w_mat, b_vec):
    """ConvTranspose2d(k=3, s=2, p=1, op=1) + folded BN + ReLU as ONE fused
    matmul over all 4 output phases (lane-dense 4*Cout output columns)."""
    n, h, w, c = x.shape
    cout = w_mat.shape[1] // 4
    xp = jnp.pad(x, ((0, 0), (0, 1), (0, 1), (0, 0)))       # bottom/right halo
    taps = [xp[:, di:di + h, dj:dj + w, :]
            for di in range(2) for dj in range(2)]
    patches = jnp.concatenate(taps, axis=-1).reshape(n * h * w, 4 * c)
    y = fused_matmul(patches, w_mat, b_vec, act="relu")      # (M, 4*Cout)
    y = y.reshape(n, h, w, 2, 2, cout)                       # (.., ey, ex, co)
    y = jnp.transpose(y, (0, 1, 3, 2, 4, 5)).reshape(n, 2 * h, 2 * w, cout)
    return y


# -------------------------------- parameters --------------------------------

def _nrm(key, shape, scale=0.05):
    return scale * jax.random.normal(key, shape, jnp.float32)


def init_bn(key, c):
    k1, k2, k3, k4 = jax.random.split(key, 4)
    return {"gamma": 1.0 + 0.1 * jax.random.normal(k1, (c,), jnp.float32),
            "beta": 0.1 * jax.random.normal(k2, (c,), jnp.float32),
            "mean": 0.1 * jax.random.normal(k3, (c,), jnp.float32),
            "var": 1.0 + 0.1 * jax.random.uniform(k4, (c,), jnp.float32)}


def bn_fold(bn, eps=1e-5):
    scale = bn["gamma"] / jnp.sqrt(bn["var"] + eps)
    shift = bn["beta"] - bn["mean"] * scale
    return scale, shift


def init_resblock(key, cin, cout):
    ks = jax.random.split(key, 8)
    p = {"bn0": init_bn(ks[0], cin),
         "conv1_w": _nrm(ks[1], (cout, cin, 3, 3)),
         "conv1_b": _nrm(ks[2], (cout,)),
         "bn1": init_bn(ks[3], cout),
         "conv2_w": _nrm(ks[4], (cout, cout, 3, 3)),
         "conv2_b": _nrm(ks[5], (cout,))}
    if cin != cout:
        p["sc_w"] = _nrm(ks[6], (cout, cin, 1, 1))    # 1x1 conv, no bias
        p["sc_bn"] = init_bn(ks[7], cout)
    return p


def init_params(key, input_nc=256, internal_nc=64, output_nc=3):
    ks = jax.random.split(key, 8)
    return {
        "rb_in": init_resblock(ks[0], input_nc, internal_nc),
        "up1_w": _nrm(ks[1], (internal_nc, internal_nc, 3, 3)),  # (Cin,Cout,kh,kw)
        "up1_b": _nrm(ks[2], (internal_nc,)),
        "up1_bn": init_bn(ks[3], internal_nc),
        "up2_w": _nrm(ks[4], (internal_nc, internal_nc, 3, 3)),
        "up2_b": _nrm(ks[5], (internal_nc,)),
        "up2_bn": init_bn(ks[6], internal_nc),
        "rb_out": init_resblock(ks[7], internal_nc, output_nc),
    }


# ------------------------- one-time parameter prep ---------------------------

def _prepare_resblock(rb):
    """Fold eval-mode BatchNorms into the conv weights/biases and fuse the
    shortcut (1x1 conv + BN, or identity) into conv2 via K-concatenation."""
    s0, t0 = bn_fold(rb["bn0"])
    s1, t1 = bn_fold(rb["bn1"])
    w1 = _conv_w_to_mat(rb["conv1_w"]) * s1[None, :]          # bn1 folded
    b1 = rb["conv1_b"] * s1 + t1
    w2 = _conv_w_to_mat(rb["conv2_w"])
    cout = rb["conv2_w"].shape[0]
    if "sc_w" in rb:
        cin = rb["sc_w"].shape[1]
        ssc, tsc = bn_fold(rb["sc_bn"])
        wsc = rb["sc_w"].reshape(cout, cin).T * ssc[None, :]  # sc BN folded
        bsc = tsc
    else:                                                     # identity shortcut
        wsc = jnp.eye(cout, dtype=jnp.float32)
        bsc = jnp.zeros((cout,), jnp.float32)
    return {"bn0_scale": s0, "bn0_shift": t0,
            "w1": w1, "b1": b1,
            "w2sc": jnp.concatenate([w2, wsc], axis=0),       # (9*Cmid+Cin, Cout)
            "b2sc": rb["conv2_b"] + bsc}


def _prepare_upconv(w_iohw, b, bn):
    s, t = bn_fold(bn)
    s4, t4, b4 = jnp.tile(s, 4), jnp.tile(t, 4), jnp.tile(b, 4)
    wmat = _convT_phase_weight(w_iohw) * s4[None, :]          # BN folded
    return {"w": wmat, "b": b4 * s4 + t4}


def prepare_params(params):
    """BN folding, im2col weight layout and convT phase decomposition done
    once, so the jitted forward runs only 8 Pallas calls."""
    return {"rb_in": _prepare_resblock(params["rb_in"]),
            "up1": _prepare_upconv(params["up1_w"], params["up1_b"],
                                   params["up1_bn"]),
            "up2": _prepare_upconv(params["up2_w"], params["up2_b"],
                                   params["up2_bn"]),
            "rb_out": _prepare_resblock(params["rb_out"])}


# ---------------------------------- forward ----------------------------------

def _resblock(x, pp, post_act):
    """ResBlock + the nn.Sequential activation that follows it:
    one affine+relu kernel and two fused matmul kernels."""
    n, h, w, cin = x.shape
    x2 = x.reshape(n * h * w, cin)
    a = affine_relu(x2, pp["bn0_scale"], pp["bn0_shift"]).reshape(n, h, w, cin)
    cout = pp["w1"].shape[1]
    hmid = fused_matmul(_im2col_3x3(a), pp["w1"], pp["b1"], act="relu")
    hmid = hmid.reshape(n, h, w, cout)
    # conv2 and the (1x1 conv + BN) shortcut share one matmul via K-concat;
    # the post-block ReLU / Sigmoid rides the epilogue.
    xcat = jnp.concatenate([_im2col_3x3(hmid), x2], axis=1)
    out = fused_matmul(xcat, pp["w2sc"], pp["b2sc"], act=post_act)
    return out.reshape(n, h, w, cout)


def forward(x_nchw, pp):
    x = jnp.transpose(x_nchw, (0, 2, 3, 1)).astype(jnp.float32)   # NCHW -> NHWC

    out = _resblock(x, pp["rb_in"], post_act="relu")   # ResBlock(256->64) + ReLU
    out = conv_transpose_fused(out, pp["up1"]["w"], pp["up1"]["b"])  # 8 -> 16
    out = conv_transpose_fused(out, pp["up2"]["w"], pp["up2"]["b"])  # 16 -> 32
    out = _resblock(out, pp["rb_out"], post_act="sigmoid")  # ResBlock(64->3)+Sigmoid

    return jnp.transpose(out, (0, 3, 1, 2))                       # NHWC -> NCHW


# ----------------------------------- main ------------------------------------

if __name__ == "__main__":
    key = jax.random.PRNGKey(0)
    kp, kx = jax.random.split(key)

    INPUT_NC, INTERNAL_NC, OUTPUT_NC = 256, 64, 3
    INPUT_DIM, OUTPUT_DIM, BATCH = 8, 32, 2

    params = init_params(kp, INPUT_NC, INTERNAL_NC, OUTPUT_NC)
    prepared = prepare_params(params)      # one-time BN folding / weight prep
    x = jax.random.normal(kx, (BATCH, INPUT_NC, INPUT_DIM, INPUT_DIM),
                          jnp.float32)

    fwd = jax.jit(forward)
    y = fwd(x, prepared)
    jax.block_until_ready(y)

    assert y.shape == (BATCH, OUTPUT_NC, OUTPUT_DIM, OUTPUT_DIM), y.shape
    assert bool(jnp.all(jnp.isfinite(y)))
    assert bool(jnp.all((y >= 0.0) & (y <= 1.0)))   # sigmoid output range
    print("KERNEL_OK")
</pallas_src>

<mosaic_0001>
module attributes {stable_mosaic.version = 11 : i64} {
  func.func @_affine_relu_kernel(%arg0: i32, %arg1: memref<128x256xf32, #tpu.memory_space<vmem>>, %arg2: memref<1x256xf32, #tpu.memory_space<vmem>>, %arg3: memref<1x256xf32, #tpu.memory_space<vmem>>, %arg4: memref<128x256xf32, #tpu.memory_space<vmem>>) attributes {dimension_semantics = [#tpu.dimension_semantics<parallel>], iteration_bounds = array<i64: 1>, scalar_prefetch = 0 : i64, scratch_operands = 0 : i64, tpu.core_type = #tpu.core_type<tc>, window_params = [{transform_indices = @transform_0, window_bounds = array<i64: 128, 256>}, {pipeline_mode = #tpu.pipeline_mode<synchronous>, transform_indices = @transform_1, window_bounds = array<i64: 1, 256>}, {pipeline_mode = #tpu.pipeline_mode<synchronous>, transform_indices = @transform_2, window_bounds = array<i64: 1, 256>}, {transform_indices = @transform_3, window_bounds = array<i64: 128, 256>}]} {
    %c0 = arith.constant 0 : index
    %c0_0 = arith.constant 0 : index
    %0 = vector.load %arg1[%c0, %c0_0] : memref<128x256xf32, #tpu.memory_space<vmem>>, vector<128x256xf32>
    %c0_1 = arith.constant 0 : index
    %c0_2 = arith.constant 0 : index
    %1 = vector.load %arg2[%c0_1, %c0_2] : memref<1x256xf32, #tpu.memory_space<vmem>>, vector<1x256xf32>
    %2 = vector.broadcast %1 : vector<1x256xf32> to vector<128x256xf32>
    %3 = arith.mulf %0, %2 : vector<128x256xf32>
    %c0_3 = arith.constant 0 : index
    %c0_4 = arith.constant 0 : index
    %4 = vector.load %arg3[%c0_3, %c0_4] : memref<1x256xf32, #tpu.memory_space<vmem>>, vector<1x256xf32>
    %5 = vector.broadcast %4 : vector<1x256xf32> to vector<128x256xf32>
    %6 = arith.addf %3, %5 : vector<128x256xf32>
    %cst = arith.constant 0.000000e+00 : f32
    %7 = vector.broadcast %cst : f32 to vector<128x256xf32>
    %8 = arith.maximumf %6, %7 : vector<128x256xf32>
    %c0_5 = arith.constant 0 : index
    %c0_6 = arith.constant 0 : index
    %9 = vector.load %arg4[%c0_5, %c0_6] : memref<128x256xf32, #tpu.memory_space<vmem>>, vector<128x256xf32>
    tpu.vector_store %arg4[%c0_5, %c0_6], %8 {strides = array<i32>} : memref<128x256xf32, #tpu.memory_space<vmem>>, vector<128x256xf32>,
    return
  }
  func.func @transform_0(%arg0: i32) -> (i32, i32) {
    %c0_i32 = arith.constant 0 : i32
    %c0_i32_0 = arith.constant 0 : i32
    return %arg0, %c0_i32 : i32, i32
  }
  func.func @transform_1(%arg0: i32) -> (i32, i32) {
    %c0_i32 = arith.constant 0 : i32
    %c0_i32_0 = arith.constant 0 : i32
    %c0_i32_1 = arith.constant 0 : i32
    return %c0_i32, %c0_i32_0 : i32, i32
  }
  func.func @transform_2(%arg0: i32) -> (i32, i32) {
    %c0_i32 = arith.constant 0 : i32
    %c0_i32_0 = arith.constant 0 : i32
    %c0_i32_1 = arith.constant 0 : i32
    return %c0_i32, %c0_i32_0 : i32, i32
  }
  func.func @transform_3(%arg0: i32) -> (i32, i32) {
    %c0_i32 = arith.constant 0 : i32
    %c0_i32_0 = arith.constant 0 : i32
    return %arg0, %c0_i32 : i32, i32
  }
}

module attributes {stable_mosaic.version = 11 : i64} {
  func.func @kernel(%arg0: i32, %arg1: memref<128x2304xf32, #tpu.memory_space<vmem>>, %arg2: memref<2304x64xf32, #tpu.memory_space<vmem>>, %arg3: memref<1x64xf32, #tpu.memory_space<vmem>>, %arg4: memref<128x64xf32, #tpu.memory_space<vmem>>) attributes {dimension_semantics = [#tpu.dimension_semantics<parallel>], iteration_bounds = array<i64: 1>, scalar_prefetch = 0 : i64, scratch_operands = 0 : i64, tpu.core_type = #tpu.core_type<tc>, window_params = [{transform_indices = @transform_0, window_bounds = array<i64: 128, 2304>}, {pipeline_mode = #tpu.pipeline_mode<synchronous>, transform_indices = @transform_1, window_bounds = array<i64: 2304, 64>}, {pipeline_mode = #tpu.pipeline_mode<synchronous>, transform_indices = @transform_2, window_bounds = array<i64: 1, 64>}, {transform_indices = @transform_3, window_bounds = array<i64: 128, 64>}]} {
    %c0 = arith.constant 0 : index
    %c0_0 = arith.constant 0 : index
    %0 = vector.load %arg1[%c0, %c0_0] : memref<128x2304xf32, #tpu.memory_space<vmem>>, vector<128x2304xf32>
    %c0_1 = arith.constant 0 : index
    %c0_2 = arith.constant 0 : index
    %1 = vector.load %arg2[%c0_1, %c0_2] : memref<2304x64xf32, #tpu.memory_space<vmem>>, vector<2304x64xf32>
    %cst = arith.constant dense<0.000000e+00> : vector<128x64xf32>
    %2 = tpu.matmul %0, %1, %cst {dimension_numbers = #tpu.dot_dimension_numbers<[1], [0], [0], [1], [0, 0, 1, 1], [], []>} : vector<128x2304xf32>, vector<2304x64xf32>, vector<128x64xf32> -> vector<128x64xf32>
    %c0_3 = arith.constant 0 : index
    %c0_4 = arith.constant 0 : index
    %3 = vector.load %arg3[%c0_3, %c0_4] : memref<1x64xf32, #tpu.memory_space<vmem>>, vector<1x64xf32>
    %4 = vector.broadcast %3 : vector<1x64xf32> to vector<128x64xf32>
    %5 = arith.addf %2, %4 : vector<128x64xf32>
    %cst_5 = arith.constant 0.000000e+00 : f32
    %6 = vector.broadcast %cst_5 : f32 to vector<128x64xf32>
    %7 = arith.maximumf %5, %6 : vector<128x64xf32>
    %c0_6 = arith.constant 0 : index
    %c0_7 = arith.constant 0 : index
    %8 = vector.load %arg4[%c0_6, %c0_7] : memref<128x64xf32, #tpu.memory_space<vmem>>, vector<128x64xf32>
    tpu.vector_store %arg4[%c0_6, %c0_7], %7 {strides = array<i32>} : memref<128x64xf32, #tpu.memory_space<vmem>>, vector<128x64xf32>,
    return
  }
  func.func @transform_0(%arg0: i32) -> (i32, i32) {
    %c0_i32 = arith.constant 0 : i32
    %c0_i32_0 = arith.constant 0 : i32
    return %arg0, %c0_i32 : i32, i32
  }
  func.func @transform_1(%arg0: i32) -> (i32, i32) {
    %c0_i32 = arith.constant 0 : i32
    %c0_i32_0 = arith.constant 0 : i32
    %c0_i32_1 = arith.constant 0 : i32
    return %c0_i32, %c0_i32_0 : i32, i32
  }
  func.func @transform_2(%arg0: i32) -> (i32, i32) {
    %c0_i32 = arith.constant 0 : i32
    %c0_i32_0 = arith.constant 0 : i32
    %c0_i32_1 = arith.constant 0 : i32
    return %c0_i32, %c0_i32_0 : i32, i32
  }
  func.func @transform_3(%arg0: i32) -> (i32, i32) {
    %c0_i32 = arith.constant 0 : i32
    %c0_i32_0 = arith.constant 0 : i32
    return %arg0, %c0_i32 : i32, i32
  }
}

module attributes {stable_mosaic.version = 11 : i64} {
  func.func @kernel(%arg0: i32, %arg1: memref<128x832xf32, #tpu.memory_space<vmem>>, %arg2: memref<832x64xf32, #tpu.memory_space<vmem>>, %arg3: memref<1x64xf32, #tpu.memory_space<vmem>>, %arg4: memref<128x64xf32, #tpu.memory_space<vmem>>) attributes {dimension_semantics = [#tpu.dimension_semantics<parallel>], iteration_bounds = array<i64: 1>, scalar_prefetch = 0 : i64, scratch_operands = 0 : i64, tpu.core_type = #tpu.core_type<tc>, window_params = [{transform_indices = @transform_0, window_bounds = array<i64: 128, 832>}, {pipeline_mode = #tpu.pipeline_mode<synchronous>, transform_indices = @transform_1, window_bounds = array<i64: 832, 64>}, {pipeline_mode = #tpu.pipeline_mode<synchronous>, transform_indices = @transform_2, window_bounds = array<i64: 1, 64>}, {transform_indices = @transform_3, window_bounds = array<i64: 128, 64>}]} {
    %c0 = arith.constant 0 : index
    %c0_0 = arith.constant 0 : index
    %0 = vector.load %arg1[%c0, %c0_0] : memref<128x832xf32, #tpu.memory_space<vmem>>, vector<128x832xf32>
    %c0_1 = arith.constant 0 : index
    %c0_2 = arith.constant 0 : index
    %1 = vector.load %arg2[%c0_1, %c0_2] : memref<832x64xf32, #tpu.memory_space<vmem>>, vector<832x64xf32>
    %cst = arith.constant dense<0.000000e+00> : vector<128x64xf32>
    %2 = tpu.matmul %0, %1, %cst {dimension_numbers = #tpu.dot_dimension_numbers<[1], [0], [0], [1], [0, 0, 1, 1], [], []>} : vector<128x832xf32>, vector<832x64xf32>, vector<128x64xf32> -> vector<128x64xf32>
    %c0_3 = arith.constant 0 : index
    %c0_4 = arith.constant 0 : index
    %3 = vector.load %arg3[%c0_3, %c0_4] : memref<1x64xf32, #tpu.memory_space<vmem>>, vector<1x64xf32>
    %4 = vector.broadcast %3 : vector<1x64xf32> to vector<128x64xf32>
    %5 = arith.addf %2, %4 : vector<128x64xf32>
    %cst_5 = arith.constant 0.000000e+00 : f32
    %6 = vector.broadcast %cst_5 : f32 to vector<128x64xf32>
    %7 = arith.maximumf %5, %6 : vector<128x64xf32>
    %c0_6 = arith.constant 0 : index
    %c0_7 = arith.constant 0 : index
    %8 = vector.load %arg4[%c0_6, %c0_7] : memref<128x64xf32, #tpu.memory_space<vmem>>, vector<128x64xf32>
    tpu.vector_store %arg4[%c0_6, %c0_7], %7 {strides = array<i32>} : memref<128x64xf32, #tpu.memory_space<vmem>>, vector<128x64xf32>,
    return
  }
  func.func @transform_0(%arg0: i32) -> (i32, i32) {
    %c0_i32 = arith.constant 0 : i32
    %c0_i32_0 = arith.constant 0 : i32
    return %arg0, %c0_i32 : i32, i32
  }
  func.func @transform_1(%arg0: i32) -> (i32, i32) {
    %c0_i32 = arith.constant 0 : i32
    %c0_i32_0 = arith.constant 0 : i32
    %c0_i32_1 = arith.constant 0 : i32
    return %c0_i32, %c0_i32_0 : i32, i32
  }
  func.func @transform_2(%arg0: i32) -> (i32, i32) {
    %c0_i32 = arith.constant 0 : i32
    %c0_i32_0 = arith.constant 0 : i32
    %c0_i32_1 = arith.constant 0 : i32
    return %c0_i32, %c0_i32_0 : i32, i32
  }
  func.func @transform_3(%arg0: i32) -> (i32, i32) {
    %c0_i32 = arith.constant 0 : i32
    %c0_i32_0 = arith.constant 0 : i32
    return %arg0, %c0_i32 : i32, i32
  }
}

module attributes {stable_mosaic.version = 11 : i64} {
  func.func @kernel(%arg0: i32, %arg1: memref<128x256xf32, #tpu.memory_space<vmem>>, %arg2: memref<256x256xf32, #tpu.memory_space<vmem>>, %arg3: memref<1x256xf32, #tpu.memory_space<vmem>>, %arg4: memref<128x256xf32, #tpu.memory_space<vmem>>) attributes {dimension_semantics = [#tpu.dimension_semantics<parallel>], iteration_bounds = array<i64: 1>, scalar_prefetch = 0 : i64, scratch_operands = 0 : i64, tpu.core_type = #tpu.core_type<tc>, window_params = [{transform_indices = @transform_0, window_bounds = array<i64: 128, 256>}, {pipeline_mode = #tpu.pipeline_mode<synchronous>, transform_indices = @transform_1, window_bounds = array<i64: 256, 256>}, {pipeline_mode = #tpu.pipeline_mode<synchronous>, transform_indices = @transform_2, window_bounds = array<i64: 1, 256>}, {transform_indices = @transform_3, window_bounds = array<i64: 128, 256>}]} {
    %c0 = arith.constant 0 : index
    %c0_0 = arith.constant 0 : index
    %0 = vector.load %arg1[%c0, %c0_0] : memref<128x256xf32, #tpu.memory_space<vmem>>, vector<128x256xf32>
    %c0_1 = arith.constant 0 : index
    %c0_2 = arith.constant 0 : index
    %1 = vector.load %arg2[%c0_1, %c0_2] : memref<256x256xf32, #tpu.memory_space<vmem>>, vector<256x256xf32>
    %cst = arith.constant dense<0.000000e+00> : vector<128x256xf32>
    %2 = tpu.matmul %0, %1, %cst {dimension_numbers = #tpu.dot_dimension_numbers<[1], [0], [0], [1], [0, 0, 1, 1], [], []>} : vector<128x256xf32>, vector<256x256xf32>, vector<128x256xf32> -> vector<128x256xf32>
    %c0_3 = arith.constant 0 : index
    %c0_4 = arith.constant 0 : index
    %3 = vector.load %arg3[%c0_3, %c0_4] : memref<1x256xf32, #tpu.memory_space<vmem>>, vector<1x256xf32>
    %4 = vector.broadcast %3 : vector<1x256xf32> to vector<128x256xf32>
    %5 = arith.addf %2, %4 : vector<128x256xf32>
    %cst_5 = arith.constant 0.000000e+00 : f32
    %6 = vector.broadcast %cst_5 : f32 to vector<128x256xf32>
    %7 = arith.maximumf %5, %6 : vector<128x256xf32>
    %c0_6 = arith.constant 0 : index
    %c0_7 = arith.constant 0 : index
    %8 = vector.load %arg4[%c0_6, %c0_7] : memref<128x256xf32, #tpu.memory_space<vmem>>, vector<128x256xf32>
    tpu.vector_store %arg4[%c0_6, %c0_7], %7 {strides = array<i32>} : memref<128x256xf32, #tpu.memory_space<vmem>>, vector<128x256xf32>,
    return
  }
  func.func @transform_0(%arg0: i32) -> (i32, i32) {
    %c0_i32 = arith.constant 0 : i32
    %c0_i32_0 = arith.constant 0 : i32
    return %arg0, %c0_i32 : i32, i32
  }
  func.func @transform_1(%arg0: i32) -> (i32, i32) {
    %c0_i32 = arith.constant 0 : i32
    %c0_i32_0 = arith.constant 0 : i32
    %c0_i32_1 = arith.constant 0 : i32
    return %c0_i32, %c0_i32_0 : i32, i32
  }
  func.func @transform_2(%arg0: i32) -> (i32, i32) {
    %c0_i32 = arith.constant 0 : i32
    %c0_i32_0 = arith.constant 0 : i32
    %c0_i32_1 = arith.constant 0 : i32
    return %c0_i32, %c0_i32_0 : i32, i32
  }
  func.func @transform_3(%arg0: i32) -> (i32, i32) {
    %c0_i32 = arith.constant 0 : i32
    %c0_i32_0 = arith.constant 0 : i32
    return %arg0, %c0_i32 : i32, i32
  }
}

module attributes {stable_mosaic.version = 11 : i64} {
  func.func @kernel(%arg0: i32, %arg1: memref<256x256xf32, #tpu.memory_space<vmem>>, %arg2: memref<256x256xf32, #tpu.memory_space<vmem>>, %arg3: memref<1x256xf32, #tpu.memory_space<vmem>>, %arg4: memref<256x256xf32, #tpu.memory_space<vmem>>) attributes {dimension_semantics = [#tpu.dimension_semantics<parallel>], iteration_bounds = array<i64: 2>, scalar_prefetch = 0 : i64, scratch_operands = 0 : i64, tpu.core_type = #tpu.core_type<tc>, window_params = [{transform_indices = @transform_0, window_bounds = array<i64: 256, 256>}, {pipeline_mode = #tpu.pipeline_mode<synchronous>, transform_indices = @transform_1, window_bounds = array<i64: 256, 256>}, {pipeline_mode = #tpu.pipeline_mode<synchronous>, transform_indices = @transform_2, window_bounds = array<i64: 1, 256>}, {transform_indices = @transform_3, window_bounds = array<i64: 256, 256>}]} {
    %c0 = arith.constant 0 : index
    %c0_0 = arith.constant 0 : index
    %0 = vector.load %arg1[%c0, %c0_0] : memref<256x256xf32, #tpu.memory_space<vmem>>, vector<256x256xf32>
    %c0_1 = arith.constant 0 : index
    %c0_2 = arith.constant 0 : index
    %1 = vector.load %arg2[%c0_1, %c0_2] : memref<256x256xf32, #tpu.memory_space<vmem>>, vector<256x256xf32>
    %cst = arith.constant dense<0.000000e+00> : vector<256x256xf32>
    %2 = tpu.matmul %0, %1, %cst {dimension_numbers = #tpu.dot_dimension_numbers<[1], [0], [0], [1], [0, 0, 1, 1], [], []>} : vector<256x256xf32>, vector<256x256xf32>, vector<256x256xf32> -> vector<256x256xf32>
    %c0_3 = arith.constant 0 : index
    %c0_4 = arith.constant 0 : index
    %3 = vector.load %arg3[%c0_3, %c0_4] : memref<1x256xf32, #tpu.memory_space<vmem>>, vector<1x256xf32>
    %4 = vector.broadcast %3 : vector<1x256xf32> to vector<256x256xf32>
    %5 = arith.addf %2, %4 : vector<256x256xf32>
    %cst_5 = arith.constant 0.000000e+00 : f32
    %6 = vector.broadcast %cst_5 : f32 to vector<256x256xf32>
    %7 = arith.maximumf %5, %6 : vector<256x256xf32>
    %c0_6 = arith.constant 0 : index
    %c0_7 = arith.constant 0 : index
    %8 = vector.load %arg4[%c0_6, %c0_7] : memref<256x256xf32, #tpu.memory_space<vmem>>, vector<256x256xf32>
    tpu.vector_store %arg4[%c0_6, %c0_7], %7 {strides = array<i32>} : memref<256x256xf32, #tpu.memory_space<vmem>>, vector<256x256xf32>,
    return
  }
  func.func @transform_0(%arg0: i32) -> (i32, i32) {
    %c0_i32 = arith.constant 0 : i32
    %c0_i32_0 = arith.constant 0 : i32
    return %arg0, %c0_i32 : i32, i32
  }
  func.func @transform_1(%arg0: i32) -> (i32, i32) {
    %c0_i32 = arith.constant 0 : i32
    %c0_i32_0 = arith.constant 0 : i32
    %c0_i32_1 = arith.constant 0 : i32
    return %c0_i32, %c0_i32_0 : i32, i32
  }
  func.func @transform_2(%arg0: i32) -> (i32, i32) {
    %c0_i32 = arith.constant 0 : i32
    %c0_i32_0 = arith.constant 0 : i32
    %c0_i32_1 = arith.constant 0 : i32
    return %c0_i32, %c0_i32_0 : i32, i32
  }
  func.func @transform_3(%arg0: i32) -> (i32, i32) {
    %c0_i32 = arith.constant 0 : i32
    %c0_i32_0 = arith.constant 0 : i32
    return %arg0, %c0_i32 : i32, i32
  }
}

module attributes {stable_mosaic.version = 11 : i64} {
  func.func @_affine_relu_kernel(%arg0: i32, %arg1: memref<512x64xf32, #tpu.memory_space<vmem>>, %arg2: memref<1x64xf32, #tpu.memory_space<vmem>>, %arg3: memref<1x64xf32, #tpu.memory_space<vmem>>, %arg4: memref<512x64xf32, #tpu.memory_space<vmem>>) attributes {dimension_semantics = [#tpu.dimension_semantics<parallel>], iteration_bounds = array<i64: 4>, scalar_prefetch = 0 : i64, scratch_operands = 0 : i64, tpu.core_type = #tpu.core_type<tc>, window_params = [{transform_indices = @transform_0, window_bounds = array<i64: 512, 64>}, {pipeline_mode = #tpu.pipeline_mode<synchronous>, transform_indices = @transform_1, window_bounds = array<i64: 1, 64>}, {pipeline_mode = #tpu.pipeline_mode<synchronous>, transform_indices = @transform_2, window_bounds = array<i64: 1, 64>}, {transform_indices = @transform_3, window_bounds = array<i64: 512, 64>}]} {
    %c0 = arith.constant 0 : index
    %c0_0 = arith.constant 0 : index
    %0 = vector.load %arg1[%c0, %c0_0] : memref<512x64xf32, #tpu.memory_space<vmem>>, vector<512x64xf32>
    %c0_1 = arith.constant 0 : index
    %c0_2 = arith.constant 0 : index
    %1 = vector.load %arg2[%c0_1, %c0_2] : memref<1x64xf32, #tpu.memory_space<vmem>>, vector<1x64xf32>
    %2 = vector.broadcast %1 : vector<1x64xf32> to vector<512x64xf32>
    %3 = arith.mulf %0, %2 : vector<512x64xf32>
    %c0_3 = arith.constant 0 : index
    %c0_4 = arith.constant 0 : index
    %4 = vector.load %arg3[%c0_3, %c0_4] : memref<1x64xf32, #tpu.memory_space<vmem>>, vector<1x64xf32>
    %5 = vector.broadcast %4 : vector<1x64xf32> to vector<512x64xf32>
    %6 = arith.addf %3, %5 : vector<512x64xf32>
    %cst = arith.constant 0.000000e+00 : f32
    %7 = vector.broadcast %cst : f32 to vector<512x64xf32>
    %8 = arith.maximumf %6, %7 : vector<512x64xf32>
    %c0_5 = arith.constant 0 : index
    %c0_6 = arith.constant 0 : index
    %9 = vector.load %arg4[%c0_5, %c0_6] : memref<512x64xf32, #tpu.memory_space<vmem>>, vector<512x64xf32>
    tpu.vector_store %arg4[%c0_5, %c0_6], %8 {strides = array<i32>} : memref<512x64xf32, #tpu.memory_space<vmem>>, vector<512x64xf32>,
    return
  }
  func.func @transform_0(%arg0: i32) -> (i32, i32) {
    %c0_i32 = arith.constant 0 : i32
    %c0_i32_0 = arith.constant 0 : i32
    return %arg0, %c0_i32 : i32, i32
  }
  func.func @transform_1(%arg0: i32) -> (i32, i32) {
    %c0_i32 = arith.constant 0 : i32
    %c0_i32_0 = arith.constant 0 : i32
    %c0_i32_1 = arith.constant 0 : i32
    return %c0_i32, %c0_i32_0 : i32, i32
  }
  func.func @transform_2(%arg0: i32) -> (i32, i32) {
    %c0_i32 = arith.constant 0 : i32
    %c0_i32_0 = arith.constant 0 : i32
    %c0_i32_1 = arith.constant 0 : i32
    return %c0_i32, %c0_i32_0 : i32, i32
  }
  func.func @transform_3(%arg0: i32) -> (i32, i32) {
    %c0_i32 = arith.constant 0 : i32
    %c0_i32_0 = arith.constant 0 : i32
    return %arg0, %c0_i32 : i32, i32
  }
}

module attributes {stable_mosaic.version = 11 : i64} {
  func.func @kernel(%arg0: i32, %arg1: memref<512x576xf32, #tpu.memory_space<vmem>>, %arg2: memref<576x3xf32, #tpu.memory_space<vmem>>, %arg3: memref<1x3xf32, #tpu.memory_space<vmem>>, %arg4: memref<512x3xf32, #tpu.memory_space<vmem>>) attributes {dimension_semantics = [#tpu.dimension_semantics<parallel>], iteration_bounds = array<i64: 4>, scalar_prefetch = 0 : i64, scratch_operands = 0 : i64, tpu.core_type = #tpu.core_type<tc>, window_params = [{transform_indices = @transform_0, window_bounds = array<i64: 512, 576>}, {pipeline_mode = #tpu.pipeline_mode<synchronous>, transform_indices = @transform_1, window_bounds = array<i64: 576, 3>}, {pipeline_mode = #tpu.pipeline_mode<synchronous>, transform_indices = @transform_2, window_bounds = array<i64: 1, 3>}, {transform_indices = @transform_3, window_bounds = array<i64: 512, 3>}]} {
    %c0 = arith.constant 0 : index
    %c0_0 = arith.constant 0 : index
    %0 = vector.load %arg1[%c0, %c0_0] : memref<512x576xf32, #tpu.memory_space<vmem>>, vector<512x576xf32>
    %c0_1 = arith.constant 0 : index
    %c0_2 = arith.constant 0 : index
    %1 = vector.load %arg2[%c0_1, %c0_2] : memref<576x3xf32, #tpu.memory_space<vmem>>, vector<576x3xf32>
    %cst = arith.constant dense<0.000000e+00> : vector<512x3xf32>
    %2 = tpu.matmul %0, %1, %cst {dimension_numbers = #tpu.dot_dimension_numbers<[1], [0], [0], [1], [0, 0, 1, 1], [], []>} : vector<512x576xf32>, vector<576x3xf32>, vector<512x3xf32> -> vector<512x3xf32>
    %c0_3 = arith.constant 0 : index
    %c0_4 = arith.constant 0 : index
    %3 = vector.load %arg3[%c0_3, %c0_4] : memref<1x3xf32, #tpu.memory_space<vmem>>, vector<1x3xf32>
    %4 = vector.broadcast %3 : vector<1x3xf32> to vector<512x3xf32>
    %5 = arith.addf %2, %4 : vector<512x3xf32>
    %cst_5 = arith.constant 0.000000e+00 : f32
    %6 = vector.broadcast %cst_5 : f32 to vector<512x3xf32>
    %7 = arith.maximumf %5, %6 : vector<512x3xf32>
    %c0_6 = arith.constant 0 : index
    %c0_7 = arith.constant 0 : index
    %8 = vector.load %arg4[%c0_6, %c0_7] : memref<512x3xf32, #tpu.memory_space<vmem>>, vector<512x3xf32>
    tpu.vector_store %arg4[%c0_6, %c0_7], %7 {strides = array<i32>} : memref<512x3xf32, #tpu.memory_space<vmem>>, vector<512x3xf32>,
    return
  }
  func.func @transform_0(%arg0: i32) -> (i32, i32) {
    %c0_i32 = arith.constant 0 : i32
    %c0_i32_0 = arith.constant 0 : i32
    return %arg0, %c0_i32 : i32, i32
  }
  func.func @transform_1(%arg0: i32) -> (i32, i32) {
    %c0_i32 = arith.constant 0 : i32
    %c0_i32_0 = arith.constant 0 : i32
    %c0_i32_1 = arith.constant 0 : i32
    return %c0_i32, %c0_i32_0 : i32, i32
  }
  func.func @transform_2(%arg0: i32) -> (i32, i32) {
    %c0_i32 = arith.constant 0 : i32
    %c0_i32_0 = arith.constant 0 : i32
    %c0_i32_1 = arith.constant 0 : i32
    return %c0_i32, %c0_i32_0 : i32, i32
  }
  func.func @transform_3(%arg0: i32) -> (i32, i32) {
    %c0_i32 = arith.constant 0 : i32
    %c0_i32_0 = arith.constant 0 : i32
    return %arg0, %c0_i32 : i32, i32
  }
}

module attributes {stable_mosaic.version = 11 : i64} {
  func.func @kernel(%arg0: i32, %arg1: memref<512x91xf32, #tpu.memory_space<vmem>>, %arg2: memref<91x3xf32, #tpu.memory_space<vmem>>, %arg3: memref<1x3xf32, #tpu.memory_space<vmem>>, %arg4: memref<512x3xf32, #tpu.memory_space<vmem>>) attributes {dimension_semantics = [#tpu.dimension_semantics<parallel>], iteration_bounds = array<i64: 4>, scalar_prefetch = 0 : i64, scratch_operands = 0 : i64, tpu.core_type = #tpu.core_type<tc>, window_params = [{transform_indices = @transform_0, window_bounds = array<i64: 512, 91>}, {pipeline_mode = #tpu.pipeline_mode<synchronous>, transform_indices = @transform_1, window_bounds = array<i64: 91, 3>}, {pipeline_mode = #tpu.pipeline_mode<synchronous>, transform_indices = @transform_2, window_bounds = array<i64: 1, 3>}, {transform_indices = @transform_3, window_bounds = array<i64: 512, 3>}]} {
    %c0 = arith.constant 0 : index
    %c0_0 = arith.constant 0 : index
    %0 = vector.load %arg1[%c0, %c0_0] : memref<512x91xf32, #tpu.memory_space<vmem>>, vector<512x91xf32>
    %c0_1 = arith.constant 0 : index
    %c0_2 = arith.constant 0 : index
    %1 = vector.load %arg2[%c0_1, %c0_2] : memref<91x3xf32, #tpu.memory_space<vmem>>, vector<91x3xf32>
    %cst = arith.constant dense<0.000000e+00> : vector<512x3xf32>
    %2 = tpu.matmul %0, %1, %cst {dimension_numbers = #tpu.dot_dimension_numbers<[1], [0], [0], [1], [0, 0, 1, 1], [], []>} : vector<512x91xf32>, vector<91x3xf32>, vector<512x3xf32> -> vector<512x3xf32>
    %c0_3 = arith.constant 0 : index
    %c0_4 = arith.constant 0 : index
    %3 = vector.load %arg3[%c0_3, %c0_4] : memref<1x3xf32, #tpu.memory_space<vmem>>, vector<1x3xf32>
    %4 = vector.broadcast %3 : vector<1x3xf32> to vector<512x3xf32>
    %5 = arith.addf %2, %4 : vector<512x3xf32>
    %6 = arith.negf %5 : vector<512x3xf32>
    %7 = math.exp %6 : vector<512x3xf32>
    %cst_5 = arith.constant 1.000000e+00 : f32
    %8 = vector.broadcast %cst_5 : f32 to vector<512x3xf32>
    %9 = arith.addf %8, %7 : vector<512x3xf32>
    %10 = arith.divf %8, %9 : vector<512x3xf32>
    %c0_6 = arith.constant 0 : index
    %c0_7 = arith.constant 0 : index
    %11 = vector.load %arg4[%c0_6, %c0_7] : memref<512x3xf32, #tpu.memory_space<vmem>>, vector<512x3xf32>
    tpu.vector_store %arg4[%c0_6, %c0_7], %10 {strides = array<i32>} : memref<512x3xf32, #tpu.memory_space<vmem>>, vector<512x3xf32>,
    return
  }
  func.func @transform_0(%arg0: i32) -> (i32, i32) {
    %c0_i32 = arith.constant 0 : i32
    %c0_i32_0 = arith.constant 0 : i32
    return %arg0, %c0_i32 : i32, i32
  }
  func.func @transform_1(%arg0: i32) -> (i32, i32) {
    %c0_i32 = arith.constant 0 : i32
    %c0_i32_0 = arith.constant 0 : i32
    %c0_i32_1 = arith.constant 0 : i32
    return %c0_i32, %c0_i32_0 : i32, i32
  }
  func.func @transform_2(%arg0: i32) -> (i32, i32) {
    %c0_i32 = arith.constant 0 : i32
    %c0_i32_0 = arith.constant 0 : i32
    %c0_i32_1 = arith.constant 0 : i32
    return %c0_i32, %c0_i32_0 : i32, i32
  }
  func.func @transform_3(%arg0: i32) -> (i32, i32) {
    %c0_i32 = arith.constant 0 : i32
    %c0_i32_0 = arith.constant 0 : i32
    return %arg0, %c0_i32 : i32, i32
  }
}

</mosaic_0001>

<bundles_post_ra>
// kernel: forward.8
= control target key start
LH: loop header
LB: loop body
LE: loop exit
PB: predicated region body
PF: predicated region fallthrough
CT: control target
= control target key end

     0   :  { %8 = vsyncpa [#allocation3], 0  ;;  %s512_s0 = inlined_call_operand.hbm [shape: f32[128,256], index: 0, kind: input, shape index: {}]   ;;  %s513_s1 = inlined_call_operand.hbm [shape: f32[1,256], index: 1, kind: input, shape index: {}]   ;;  %s514_s2 = inlined_call_operand.hbm [shape: f32[1,256], index: 2, kind: input, shape index: {}]   ;;  %s515_s3 = inlined_call_operand.vmem [shape: f32[128,256], index: 3, kind: output, shape index: {}]  }
   0x1   :  { %9 = vsyncpa [#allocation5], 0  ;;  %s310_s12 = smov [#allocation4]   ;;  %s311_s14 = smov [#allocation2]  }
   0x2   :  { %s28_s13 = sshll.u32 %s310_s12, 4  ;;  %s15_s15 = sshll.u32 %s311_s14, 4  ;;  %s29_s13 = int_to_ptr.vmem [resolvable:$true] %s28_s13  ;;  %s16_s15 = int_to_ptr.vmem [resolvable:$true] %s15_s15 }
   0x3   :  { %s254_s16 = scalar_lea.vmem %s29_s13, 32  ;;  %p259_p1 = scmp.lt.s32.totalorder %s29_s13, %s29_s13 }
   0x4   :  { %p255_p0 = scmp.ne.s32.totalorder %s29_s13, %s254_s16  ;;  %p260_p2 = scmp.lt.s32.totalorder %s254_s16, %s254_s16 }
   0x6   :  { %p261_p3 = por %p260_p2, %p259_p1 }
   0x8   :  { %p262_p4 = pnand %p261_p3, %p255_p0 }
   0xa   :  { %265 = shalt.err (!%p262_p4)
}
   0xb   :  { %31 = dma.hbm_to_vmem [thread:$0]  %s513_s1, 32, %s29_s13, [#allocation5]  }
   0xc   :  { %s274_s19 = scalar_lea.vmem %s16_s15, 4096  ;;  %p279_p6 = scmp.lt.s32.totalorder %s16_s15, %s16_s15 }
   0xd   :  { %p275_p5 = scmp.ne.s32.totalorder %s16_s15, %s274_s19  ;;  %p280_p7 = scmp.lt.s32.totalorder %s274_s19, %s274_s19 }
   0xf   :  { %p281_p8 = por %p280_p7, %p279_p6 }
  0x11   :  { %p282_p9 = pnand %p281_p8, %p275_p5 }
  0x13   :  { %285 = shalt.err (!%p282_p9)
}
  0x14   :  { %s312_s20 = smov 256   ;;  %s313_s21 = smov 16  }
  0x15   :  { %21 = dma.hbm_to_vmem [thread:$0]  %s512_s0, 4096, %s16_s15, [#allocation3], %s312_s20, %s312_s20, %s313_s21  }
  0x16   :  { %s314_s24 = smov [#allocation6]  }
  0x17   :  { %s38_s25 = sshll.u32 %s314_s24, 4  ;;  %s39_s25 = int_to_ptr.vmem [resolvable:$true] %s38_s25 }
  0x18   :  { %s294_s26 = scalar_lea.vmem %s39_s25, 32  ;;  %p299_p11 = scmp.lt.s32.totalorder %s39_s25, %s39_s25 }
  0x19   :  { %p295_p10 = scmp.ne.s32.totalorder %s39_s25, %s294_s26  ;;  %p300_p12 = scmp.lt.s32.totalorder %s294_s26, %s294_s26 }
  0x1b   :  { %p301_p13 = por %p300_p12, %p299_p11 }
  0x1d   :  { %p302_p0 = pnand %p301_p13, %p295_p10 }
  0x1f   :  { %305 = shalt.err (!%p302_p0)
}
  0x20   :  { %41 = dma.hbm_to_vmem [thread:$0]  %s514_s2, 32, %s39_s25, [#allocation5]  }
  0x21   :  { %306 = dma.done.wait [#allocation3], 4096  }
  0x22   :  { %307 = vsyncadd [#allocation3], 4294963200 }
  0x23   :  { %308 = dma.done.wait [#allocation5], 64  }
  0x24   :  { %309 = vsyncadd [#allocation5], 4294967232  ;;  %v85_v0 = vlaneseq  ;;  %v51_v4 = vld [vmem:[#allocation2] sm:$0xff]  ;;  %v52_v9 = vld [vmem:[#allocation2 + $0x8] sm:$0xff] }
  0x25   :  { %v83_v5 = vld [vmem:[#allocation4] sm:$0x3]  ;;  %v127_v6 = vld [vmem:[#allocation6] sm:$0x3]  ;;  %v53_v12 = vld [vmem:[#allocation2 + $0x10] sm:$0xff] }
  0x26   :  { %v86_v1 = vshrl.u32 %v85_v0, 7  ;;  %v54_v13 = vld [vmem:[#allocation2 + $0x18] sm:$0xff]  ;;  %v55_v14 = vld [vmem:[#allocation2 + $0x20] sm:$0xff]  ;;  %v56_v15 = vld [vmem:[#allocation2 + $0x28] sm:$0xff] }
  0x27   :  { %v57_v16 = vld [vmem:[#allocation2 + $0x30] sm:$0xff]  ;;  %v58_v21 = vld [vmem:[#allocation2 + $0x38] sm:$0xff]  ;;  %v59_v30 = vld [vmem:[#allocation2 + $0x40] sm:$0xff] }
  0x28   :  { %v87_v2 = vsub.s32 0, %v86_v1  ;;  %v91_v3 = vsub.s32 1, %v86_v1  ;;  %v60_v31 = vld [vmem:[#allocation2 + $0x48] sm:$0xff]  ;;  %v61_v32 = vld [vmem:[#allocation2 + $0x50] sm:$0xff]  ;;  %v62_v37 = vld [vmem:[#allocation2 + $0x58] sm:$0xff] }
  0x29   :  { %v63_v38 = vld [vmem:[#allocation2 + $0x60] sm:$0xff]  ;;  %v64_v39 = vld [vmem:[#allocation2 + $0x68] sm:$0xff]  ;;  %v65_v44 = vld [vmem:[#allocation2 + $0x70] sm:$0xff] }
  0x2a   :  { %v344_v7 = vrot.slane %v83_v5, %v87_v2  ;;  %v346_v8 = vrot.slane %v127_v6, %v87_v2  ;;  %v348_v10 = vrot.slane %v83_v5, %v91_v3  ;;  %v350_v11 = vrot.slane %v127_v6, %v91_v3  ;;  %v66_v45 = vld [vmem:[#allocation2 + $0x78] sm:$0xff]  ;;  %v67_v62 = vld [vmem:[#allocation2 + $0x80] sm:$0xff]  ;;  %v68_v63 = vld [vmem:[#allocation2 + $0x88] sm:$0xff] }
  0x2b   :  { %v69_v0 = vld [vmem:[#allocation2 + $0x90] sm:$0xff]  ;;  %v70_v5 = vld [vmem:[#allocation2 + $0x98] sm:$0xff]  ;;  %v71_v6 = vld [vmem:[#allocation2 + $0xa0] sm:$0xff] }
  0x2c   :  { %v95_v17 = vmul.f32 %v344_v7, %v51_v4  ;;  %v96_v18 = vmul.f32 %v348_v10, %v52_v9  ;;  %v97_v19 = vmul.f32 %v344_v7, %v53_v12  ;;  %v98_v20 = vmul.f32 %v348_v10, %v54_v13  ;;  %v72_v9 = vld [vmem:[#allocation2 + $0xa8] sm:$0xff] }
  0x2d   :  { %v99_v22 = vmul.f32 %v344_v7, %v55_v14  ;;  %v100_v23 = vmul.f32 %v348_v10, %v56_v15  ;;  %v101_v24 = vmul.f32 %v344_v7, %v57_v16  ;;  %v102_v25 = vmul.f32 %v348_v10, %v58_v21  ;;  %v73_v16 = vld [vmem:[#allocation2 + $0xb0] sm:$0xff] }
  0x2e   :  { %v139_v26 = vadd.f32 %v346_v8, %v95_v17  ;;  %v140_v27 = vadd.f32 %v350_v11, %v96_v18  ;;  %v141_v28 = vadd.f32 %v346_v8, %v97_v19  ;;  %v142_v29 = vadd.f32 %v350_v11, %v98_v20  ;;  %v74_v17 = vld [vmem:[#allocation2 + $0xb8] sm:$0xff] }
  0x2f   :  { %v143_v33 = vadd.f32 %v346_v8, %v99_v22  ;;  %v144_v34 = vadd.f32 %v350_v11, %v100_v23  ;;  %v145_v35 = vadd.f32 %v346_v8, %v101_v24  ;;  %v146_v36 = vadd.f32 %v350_v11, %v102_v25 }
  0x30   :  { %v171_v40 = vmax.f32 %v139_v26, 0.0  ;;  %v172_v41 = vmax.f32 %v140_v27, 0.0  ;;  %v173_v42 = vmax.f32 %v141_v28, 0.0  ;;  %v174_v43 = vmax.f32 %v142_v29, 0.0 }
  0x31   :  { %v175_v46 = vmax.f32 %v143_v33, 0.0  ;;  %v176_v47 = vmax.f32 %v144_v34, 0.0  ;;  %v177_v48 = vmax.f32 %v145_v35, 0.0  ;;  %v178_v49 = vmax.f32 %v146_v36, 0.0  ;;  %v75_v34 = vld [vmem:[#allocation2 + $0xc0] sm:$0xff]  ;;  %v76_v35 = vld [vmem:[#allocation2 + $0xc8] sm:$0xff] }
  0x32   :  { %203 = vst [vmem:[%s515_s3] sm:$0xff] %v171_v40  ;;  %204 = vst [vmem:[%s515_s3 + $0x8] sm:$0xff] %v172_v41  ;;  %v103_v50 = vmul.f32 %v344_v7, %v59_v30  ;;  %v104_v51 = vmul.f32 %v348_v10, %v60_v31  ;;  %v105_v52 = vmul.f32 %v344_v7, %v61_v32  ;;  %v77_v36 = vld [vmem:[#allocation2 + $0xd0] sm:$0xff]  ;;  %v78_v41 = vld [vmem:[#allocation2 + $0xd8] sm:$0xff] }
  0x33   :  { %205 = vst [vmem:[%s515_s3 + $0x10] sm:$0xff] %v173_v42  ;;  %206 = vst [vmem:[%s515_s3 + $0x18] sm:$0xff] %v174_v43  ;;  %v106_v53 = vmul.f32 %v348_v10, %v62_v37  ;;  %v107_v54 = vmul.f32 %v344_v7, %v63_v38  ;;  %v108_v55 = vmul.f32 %v348_v10, %v64_v39  ;;  %v79_v42 = vld [vmem:[#allocation2 + $0xe0] sm:$0xff]  ;;  %v80_v43 = vld [vmem:[#allocation2 + $0xe8] sm:$0xff] }
  0x34   :  { %207 = vst [vmem:[%s515_s3 + $0x20] sm:$0xff] %v175_v46  ;;  %208 = vst [vmem:[%s515_s3 + $0x28] sm:$0xff] %v176_v47  ;;  %v109_v56 = vmul.f32 %v344_v7, %v65_v44  ;;  %v110_v57 = vmul.f32 %v348_v10, %v66_v45  ;;  %v147_v58 = vadd.f32 %v346_v8, %v103_v50 }
  0x35   :  { %209 = vst [vmem:[%s515_s3 + $0x30] sm:$0xff] %v177_v48  ;;  %210 = vst [vmem:[%s515_s3 + $0x38] sm:$0xff] %v178_v49  ;;  %v148_v59 = vadd.f32 %v350_v11, %v104_v51  ;;  %v149_v60 = vadd.f32 %v346_v8, %v105_v52  ;;  %v150_v61 = vadd.f32 %v350_v11, %v106_v53  ;;  %v81_v48 = vld [vmem:[#allocation2 + $0xf0] sm:$0xff]  ;;  %v82_v49 = vld [vmem:[#allocation2 + $0xf8] sm:$0xff] }
  0x36   :  { %v151_v1 = vadd.f32 %v346_v8, %v107_v54  ;;  %v152_v2 = vadd.f32 %v350_v11, %v108_v55  ;;  %v153_v3 = vadd.f32 %v346_v8, %v109_v56  ;;  %v154_v4 = vadd.f32 %v350_v11, %v110_v57 }
  0x37   :  { %v179_v12 = vmax.f32 %v147_v58, 0.0  ;;  %v180_v13 = vmax.f32 %v148_v59, 0.0  ;;  %v181_v14 = vmax.f32 %v149_v60, 0.0  ;;  %v182_v15 = vmax.f32 %v150_v61, 0.0 }
  0x38   :  { %v183_v18 = vmax.f32 %v151_v1, 0.0  ;;  %v184_v19 = vmax.f32 %v152_v2, 0.0  ;;  %v185_v20 = vmax.f32 %v153_v3, 0.0  ;;  %v186_v21 = vmax.f32 %v154_v4, 0.0 }
  0x39   :  { %211 = vst [vmem:[%s515_s3 + $0x40] sm:$0xff] %v179_v12  ;;  %212 = vst [vmem:[%s515_s3 + $0x48] sm:$0xff] %v180_v13  ;;  %v111_v22 = vmul.f32 %v344_v7, %v67_v62  ;;  %v112_v23 = vmul.f32 %v348_v10, %v68_v63  ;;  %v113_v24 = vmul.f32 %v344_v7, %v69_v0 }
  0x3a   :  { %213 = vst [vmem:[%s515_s3 + $0x50] sm:$0xff] %v181_v14  ;;  %214 = vst [vmem:[%s515_s3 + $0x58] sm:$0xff] %v182_v15  ;;  %v114_v25 = vmul.f32 %v348_v10, %v70_v5  ;;  %v115_v26 = vmul.f32 %v344_v7, %v71_v6  ;;  %v116_v27 = vmul.f32 %v348_v10, %v72_v9 }
  0x3b   :  { %215 = vst [vmem:[%s515_s3 + $0x60] sm:$0xff] %v183_v18  ;;  %216 = vst [vmem:[%s515_s3 + $0x68] sm:$0xff] %v184_v19  ;;  %v117_v28 = vmul.f32 %v344_v7, %v73_v16  ;;  %v118_v29 = vmul.f32 %v348_v10, %v74_v17  ;;  %v155_v30 = vadd.f32 %v346_v8, %v111_v22 }
  0x3c   :  { %217 = vst [vmem:[%s515_s3 + $0x70] sm:$0xff] %v185_v20  ;;  %218 = vst [vmem:[%s515_s3 + $0x78] sm:$0xff] %v186_v21  ;;  %v156_v31 = vadd.f32 %v350_v11, %v112_v23  ;;  %v157_v32 = vadd.f32 %v346_v8, %v113_v24  ;;  %v158_v33 = vadd.f32 %v350_v11, %v114_v25 }
  0x3d   :  { %v159_v37 = vadd.f32 %v346_v8, %v115_v26  ;;  %v160_v38 = vadd.f32 %v350_v11, %v116_v27  ;;  %v161_v39 = vadd.f32 %v346_v8, %v117_v28  ;;  %v162_v40 = vadd.f32 %v350_v11, %v118_v29 }
  0x3e   :  { %v187_v44 = vmax.f32 %v155_v30, 0.0  ;;  %v188_v45 = vmax.f32 %v156_v31, 0.0  ;;  %v189_v46 = vmax.f32 %v157_v32, 0.0  ;;  %v190_v47 = vmax.f32 %v158_v33, 0.0 }
  0x3f   :  { %v191_v50 = vmax.f32 %v159_v37, 0.0  ;;  %v192_v51 = vmax.f32 %v160_v38, 0.0  ;;  %v193_v52 = vmax.f32 %v161_v39, 0.0  ;;  %v194_v53 = vmax.f32 %v162_v40, 0.0 }
  0x40   :  { %219 = vst [vmem:[%s515_s3 + $0x80] sm:$0xff] %v187_v44  ;;  %220 = vst [vmem:[%s515_s3 + $0x88] sm:$0xff] %v188_v45  ;;  %v119_v54 = vmul.f32 %v344_v7, %v75_v34  ;;  %v120_v55 = vmul.f32 %v348_v10, %v76_v35  ;;  %v121_v56 = vmul.f32 %v344_v7, %v77_v36 }
  0x41   :  { %221 = vst [vmem:[%s515_s3 + $0x90] sm:$0xff] %v189_v46  ;;  %222 = vst [vmem:[%s515_s3 + $0x98] sm:$0xff] %v190_v47  ;;  %v122_v57 = vmul.f32 %v348_v10, %v78_v41  ;;  %v123_v58 = vmul.f32 %v344_v7, %v79_v42  ;;  %v124_v59 = vmul.f32 %v348_v10, %v80_v43 }
  0x42   :  { %223 = vst [vmem:[%s515_s3 + $0xa0] sm:$0xff] %v191_v50  ;;  %224 = vst [vmem:[%s515_s3 + $0xa8] sm:$0xff] %v192_v51  ;;  %v125_v60 = vmul.f32 %v344_v7, %v81_v48  ;;  %v126_v61 = vmul.f32 %v348_v10, %v82_v49  ;;  %v163_v62 = vadd.f32 %v346_v8, %v119_v54 }
  0x43   :  { %225 = vst [vmem:[%s515_s3 + $0xb0] sm:$0xff] %v193_v52  ;;  %226 = vst [vmem:[%s515_s3 + $0xb8] sm:$0xff] %v194_v53  ;;  %v164_v63 = vadd.f32 %v350_v11, %v120_v55  ;;  %v165_v0 = vadd.f32 %v346_v8, %v121_v56  ;;  %v166_v1 = vadd.f32 %v350_v11, %v122_v57 }
  0x44   :  { %v167_v2 = vadd.f32 %v346_v8, %v123_v58  ;;  %v168_v3 = vadd.f32 %v350_v11, %v124_v59  ;;  %v169_v4 = vadd.f32 %v346_v8, %v125_v60  ;;  %v170_v5 = vadd.f32 %v350_v11, %v126_v61 }
  0x45   :  { %v195_v6 = vmax.f32 %v163_v62, 0.0  ;;  %v196_v7 = vmax.f32 %v164_v63, 0.0  ;;  %v197_v9 = vmax.f32 %v165_v0, 0.0  ;;  %v198_v10 = vmax.f32 %v166_v1, 0.0 }
  0x46   :  { %v199_v12 = vmax.f32 %v167_v2, 0.0  ;;  %v200_v13 = vmax.f32 %v168_v3, 0.0  ;;  %v201_v14 = vmax.f32 %v169_v4, 0.0  ;;  %v202_v15 = vmax.f32 %v170_v5, 0.0 }
  0x47   :  { %227 = vst [vmem:[%s515_s3 + $0xc0] sm:$0xff] %v195_v6  ;;  %228 = vst [vmem:[%s515_s3 + $0xc8] sm:$0xff] %v196_v7 }
  0x48   :  { %229 = vst [vmem:[%s515_s3 + $0xd0] sm:$0xff] %v197_v9  ;;  %230 = vst [vmem:[%s515_s3 + $0xd8] sm:$0xff] %v198_v10 }
  0x49   :  { %231 = vst [vmem:[%s515_s3 + $0xe0] sm:$0xff] %v199_v12  ;;  %232 = vst [vmem:[%s515_s3 + $0xe8] sm:$0xff] %v200_v13 }
  0x4a   :  { %233 = vst [vmem:[%s515_s3 + $0xf0] sm:$0xff] %v201_v14  ;;  %234 = vst [vmem:[%s515_s3 + $0xf8] sm:$0xff] %v202_v15 }
  0x4b   :  { %239 = vsyncpa [#allocation3], 1 }
  0x4c   :  { %240 = vsyncpa [#allocation5], 1 }

// kernel: forward.11
= control target key start
LH: loop header
LB: loop body
LE: loop exit
PB: predicated region body
PF: predicated region fallthrough
CT: control target
= control target key end

     0   :  { %s858_s1 = inlined_call_operand.vmem [shape: f32[256,256], index: 1, kind: input, shape index: {}]   ;;  %s859_s0 = inlined_call_operand.vmem [shape: f32[128,256], index: 0, kind: input, shape index: {}]   ;;  %s860_s2 = inlined_call_operand.vmem [shape: f32[1,256], index: 2, kind: input, shape index: {}]   ;;  %s861_s3 = inlined_call_operand.vmem [shape: f32[128,256], index: 3, kind: output, shape index: {}]  }
   0x1   :  { %v77_v0 = vld [vmem:[%s858_s1 + $0xf8] sm:$0xff]  ;;  %v76_v1 = vld [vmem:[%s858_s1 + $0xf0] sm:$0xff]  ;;  %v75_v2 = vld [vmem:[%s858_s1 + $0xe8] sm:$0xff] }
   0x2   :  { %122 = vmatprep.subr.mxu0 %v77_v0  ;;  %351 = vmatprep.subr.mxu1 %v77_v0  ;;  %v74_v3 = vld [vmem:[%s858_s1 + $0xe0] sm:$0xff]  ;;  %v73_v4 = vld [vmem:[%s858_s1 + $0xd8] sm:$0xff]  ;;  %v72_v5 = vld [vmem:[%s858_s1 + $0xd0] sm:$0xff] }
   0x3   :  { %123 = vmatpush1.msra.mxu0 %v76_v1  ;;  %383 = vmatpush1.msra.mxu1 %v76_v1  ;;  %v71_v6 = vld [vmem:[%s858_s1 + $0xc8] sm:$0xff]  ;;  %v70_v7 = vld [vmem:[%s858_s1 + $0xc0] sm:$0xff]  ;;  %v69_v8 = vld [vmem:[%s858_s1 + $0xb8] sm:$0xff] }
   0x4   :  { %124 = vmatprep.subr.mxu0 %v75_v2  ;;  %352 = vmatprep.subr.mxu1 %v75_v2  ;;  %v68_v9 = vld [vmem:[%s858_s1 + $0xb0] sm:$0xff]  ;;  %v67_v10 = vld [vmem:[%s858_s1 + $0xa8] sm:$0xff]  ;;  %v66_v11 = vld [vmem:[%s858_s1 + $0xa0] sm:$0xff] }
   0x5   :  { %125 = vmatpush1.msra.mxu0 %v74_v3  ;;  %384 = vmatpush1.msra.mxu1 %v74_v3  ;;  %v65_v12 = vld [vmem:[%s858_s1 + $0x98] sm:$0xff]  ;;  %v64_v13 = vld [vmem:[%s858_s1 + $0x90] sm:$0xff]  ;;  %v63_v14 = vld [vmem:[%s858_s1 + $0x88] sm:$0xff] }
   0x6   :  { %126 = vmatprep.subr.mxu0 %v73_v4  ;;  %353 = vmatprep.subr.mxu1 %v73_v4  ;;  %v62_v15 = vld [vmem:[%s858_s1 + $0x80] sm:$0xff]  ;;  %v61_v16 = vld [vmem:[%s858_s1 + $0x78] sm:$0xff]  ;;  %v60_v17 = vld [vmem:[%s858_s1 + $0x70] sm:$0xff] }
   0x7   :  { %127 = vmatpush1.msra.mxu0 %v72_v5  ;;  %385 = vmatpush1.msra.mxu1 %v72_v5  ;;  %v59_v18 = vld [vmem:[%s858_s1 + $0x68] sm:$0xff]  ;;  %v58_v19 = vld [vmem:[%s858_s1 + $0x60] sm:$0xff]  ;;  %v57_v20 = vld [vmem:[%s858_s1 + $0x58] sm:$0xff] }
   0x8   :  { %128 = vmatprep.subr.mxu0 %v71_v6  ;;  %354 = vmatprep.subr.mxu1 %v71_v6  ;;  %v56_v21 = vld [vmem:[%s858_s1 + $0x50] sm:$0xff]  ;;  %v55_v22 = vld [vmem:[%s858_s1 + $0x48] sm:$0xff]  ;;  %v54_v23 = vld [vmem:[%s858_s1 + $0x40] sm:$0xff] }
   0x9   :  { %129 = vmatpush1.msra.mxu0 %v70_v7  ;;  %386 = vmatpush1.msra.mxu1 %v70_v7  ;;  %v53_v24 = vld [vmem:[%s858_s1 + $0x38] sm:$0xff]  ;;  %v52_v25 = vld [vmem:[%s858_s1 + $0x30] sm:$0xff]  ;;  %v51_v26 = vld [vmem:[%s858_s1 + $0x28] sm:$0xff] }
   0xa   :  { %130 = vmatprep.subr.mxu0 %v69_v8  ;;  %355 = vmatprep.subr.mxu1 %v69_v8  ;;  %v50_v27 = vld [vmem:[%s858_s1 + $0x20] sm:$0xff]  ;;  %v49_v28 = vld [vmem:[%s858_s1 + $0x18] sm:$0xff]  ;;  %v48_v29 = vld [vmem:[%s858_s1 + $0x10] sm:$0xff] }
   0xb   :  { %131 = vmatpush1.msra.mxu0 %v68_v9  ;;  %387 = vmatpush1.msra.mxu1 %v68_v9  ;;  %v47_v30 = vld [vmem:[%s858_s1 + $0x8] sm:$0xff]  ;;  %v46_v31 = vld [vmem:[%s858_s1] sm:$0xff]  ;;  %v109_v32 = vld [vmem:[%s858_s1 + $0x1f8] sm:$0xff] }
   0xc   :  { %132 = vmatprep.subr.mxu0 %v67_v10  ;;  %356 = vmatprep.subr.mxu1 %v67_v10  ;;  %v108_v33 = vld [vmem:[%s858_s1 + $0x1f0] sm:$0xff]  ;;  %v107_v34 = vld [vmem:[%s858_s1 + $0x1e8] sm:$0xff]  ;;  %v106_v35 = vld [vmem:[%s858_s1 + $0x1e0] sm:$0xff] }
   0xd   :  { %133 = vmatpush1.msra.mxu0 %v66_v11  ;;  %388 = vmatpush1.msra.mxu1 %v66_v11  ;;  %v105_v36 = vld [vmem:[%s858_s1 + $0x1d8] sm:$0xff]  ;;  %v104_v37 = vld [vmem:[%s858_s1 + $0x1d0] sm:$0xff]  ;;  %v103_v38 = vld [vmem:[%s858_s1 + $0x1c8] sm:$0xff] }
   0xe   :  { %134 = vmatprep.subr.mxu0 %v65_v12  ;;  %357 = vmatprep.subr.mxu1 %v65_v12  ;;  %v102_v39 = vld [vmem:[%s858_s1 + $0x1c0] sm:$0xff]  ;;  %v101_v40 = vld [vmem:[%s858_s1 + $0x1b8] sm:$0xff]  ;;  %v100_v41 = vld [vmem:[%s858_s1 + $0x1b0] sm:$0xff] }
   0xf   :  { %135 = vmatpush1.msra.mxu0 %v64_v13  ;;  %389 = vmatpush1.msra.mxu1 %v64_v13  ;;  %v99_v42 = vld [vmem:[%s858_s1 + $0x1a8] sm:$0xff]  ;;  %v98_v43 = vld [vmem:[%s858_s1 + $0x1a0] sm:$0xff]  ;;  %v97_v44 = vld [vmem:[%s858_s1 + $0x198] sm:$0xff] }
  0x10   :  { %136 = vmatprep.subr.mxu0 %v63_v14  ;;  %358 = vmatprep.subr.mxu1 %v63_v14  ;;  %v96_v45 = vld [vmem:[%s858_s1 + $0x190] sm:$0xff]  ;;  %v95_v46 = vld [vmem:[%s858_s1 + $0x188] sm:$0xff]  ;;  %v94_v47 = vld [vmem:[%s858_s1 + $0x180] sm:$0xff] }
  0x11   :  { %137 = vmatpush1.msra.mxu0 %v62_v15  ;;  %390 = vmatpush1.msra.mxu1 %v62_v15  ;;  %v93_v48 = vld [vmem:[%s858_s1 + $0x178] sm:$0xff]  ;;  %v92_v49 = vld [vmem:[%s858_s1 + $0x170] sm:$0xff]  ;;  %v91_v50 = vld [vmem:[%s858_s1 + $0x168] sm:$0xff] }
  0x12   :  { %138 = vmatprep.subr.mxu0 %v61_v16  ;;  %359 = vmatprep.subr.mxu1 %v61_v16  ;;  %v90_v51 = vld [vmem:[%s858_s1 + $0x160] sm:$0xff]  ;;  %v89_v52 = vld [vmem:[%s858_s1 + $0x158] sm:$0xff]  ;;  %v88_v53 = vld [vmem:[%s858_s1 + $0x150] sm:$0xff] }
  0x13   :  { %139 = vmatpush1.msra.mxu0 %v60_v17  ;;  %391 = vmatpush1.msra.mxu1 %v60_v17  ;;  %v87_v54 = vld [vmem:[%s858_s1 + $0x148] sm:$0xff]  ;;  %v86_v55 = vld [vmem:[%s858_s1 + $0x140] sm:$0xff]  ;;  %v85_v56 = vld [vmem:[%s858_s1 + $0x138] sm:$0xff] }
  0x14   :  { %140 = vmatprep.subr.mxu0 %v59_v18  ;;  %360 = vmatprep.subr.mxu1 %v59_v18  ;;  %v84_v57 = vld [vmem:[%s858_s1 + $0x130] sm:$0xff]  ;;  %v83_v58 = vld [vmem:[%s858_s1 + $0x128] sm:$0xff]  ;;  %v82_v59 = vld [vmem:[%s858_s1 + $0x120] sm:$0xff] }
  0x15   :  { %141 = vmatpush1.msra.mxu0 %v58_v19  ;;  %392 = vmatpush1.msra.mxu1 %v58_v19  ;;  %v81_v60 = vld [vmem:[%s858_s1 + $0x118] sm:$0xff]  ;;  %v80_v61 = vld [vmem:[%s858_s1 + $0x110] sm:$0xff]  ;;  %v79_v62 = vld [vmem:[%s858_s1 + $0x108] sm:$0xff] }
  0x16   :  { %142 = vmatprep.subr.mxu0 %v57_v20  ;;  %361 = vmatprep.subr.mxu1 %v57_v20  ;;  %v78_v63 = vld [vmem:[%s858_s1 + $0x100] sm:$0xff]  ;;  %v15_v0 = vld [vmem:[%s859_s0 + $0x8] sm:$0xff]  ;;  %v17_v4 = vld [vmem:[%s859_s0 + $0x18] sm:$0xff] }
  0x17   :  { %143 = vmatpush1.msra.mxu0 %v56_v21  ;;  %393 = vmatpush1.msra.mxu1 %v56_v21  ;;  %v31_v1 = vld [vmem:[%s859_s0 + $0x88] sm:$0xff]  ;;  %v14_v2 = vld [vmem:[%s859_s0] sm:$0xff]  ;;  %v33_v5 = vld [vmem:[%s859_s0 + $0x98] sm:$0xff] }
  0x18   :  { %144 = vmatprep.subr.mxu0 %v55_v22  ;;  %362 = vmatprep.subr.mxu1 %v55_v22  ;;  %v30_v3 = vld [vmem:[%s859_s0 + $0x80] sm:$0xff]  ;;  %v16_v6 = vld [vmem:[%s859_s0 + $0x10] sm:$0xff]  ;;  %v19_v8 = vld [vmem:[%s859_s0 + $0x28] sm:$0xff] }
  0x19   :  { %145 = vmatpush1.msra.mxu0 %v54_v23  ;;  %394 = vmatpush1.msra.mxu1 %v54_v23  ;;  %v32_v7 = vld [vmem:[%s859_s0 + $0x90] sm:$0xff]  ;;  %v35_v9 = vld [vmem:[%s859_s0 + $0xa8] sm:$0xff]  ;;  %v18_v10 = vld [vmem:[%s859_s0 + $0x20] sm:$0xff] }
  0x1a   :  { %146 = vmatprep.subr.mxu0 %v53_v24  ;;  %363 = vmatprep.subr.mxu1 %v53_v24  ;;  %v34_v11 = vld [vmem:[%s859_s0 + $0xa0] sm:$0xff]  ;;  %v21_v12 = vld [vmem:[%s859_s0 + $0x38] sm:$0xff]  ;;  %v20_v14 = vld [vmem:[%s859_s0 + $0x30] sm:$0xff] }
  0x1b   :  { %147 = vmatpush1.msra.mxu0 %v52_v25  ;;  %395 = vmatpush1.msra.mxu1 %v52_v25  ;;  %v37_v13 = vld [vmem:[%s859_s0 + $0xb8] sm:$0xff]  ;;  %v36_v15 = vld [vmem:[%s859_s0 + $0xb0] sm:$0xff]  ;;  %v23_v16 = vld [vmem:[%s859_s0 + $0x48] sm:$0xff] }
  0x1c   :  { %148 = vmatprep.subr.mxu0 %v51_v26  ;;  %364 = vmatprep.subr.mxu1 %v51_v26  ;;  %v39_v17 = vld [vmem:[%s859_s0 + $0xc8] sm:$0xff]  ;;  %v22_v18 = vld [vmem:[%s859_s0 + $0x40] sm:$0xff]  ;;  %v25_v20 = vld [vmem:[%s859_s0 + $0x58] sm:$0xff] }
  0x1d   :  { %149 = vmatpush1.msra.mxu0 %v50_v27  ;;  %396 = vmatpush1.msra.mxu1 %v50_v27  ;;  %v38_v19 = vld [vmem:[%s859_s0 + $0xc0] sm:$0xff]  ;;  %v41_v21 = vld [vmem:[%s859_s0 + $0xd8] sm:$0xff]  ;;  %v24_v22 = vld [vmem:[%s859_s0 + $0x50] sm:$0xff] }
  0x1e   :  { %150 = vmatprep.subr.mxu0 %v49_v28  ;;  %365 = vmatprep.subr.mxu1 %v49_v28  ;;  %v40_v23 = vld [vmem:[%s859_s0 + $0xd0] sm:$0xff]  ;;  %v27_v24 = vld [vmem:[%s859_s0 + $0x68] sm:$0xff]  ;;  %v26_v26 = vld [vmem:[%s859_s0 + $0x60] sm:$0xff] }
  0x1f   :  { %151 = vmatpush1.msra.mxu0 %v48_v29  ;;  %397 = vmatpush1.msra.mxu1 %v48_v29  ;;  %v43_v25 = vld [vmem:[%s859_s0 + $0xe8] sm:$0xff]  ;;  %v42_v27 = vld [vmem:[%s859_s0 + $0xe0] sm:$0xff]  ;;  %v29_v28 = vld [vmem:[%s859_s0 + $0x78] sm:$0xff] }
  0x20   :  { %152 = vmatprep.subr.mxu0 %v47_v30  ;;  %366 = vmatprep.subr.mxu1 %v47_v30  ;;  %v45_v29 = vld [vmem:[%s859_s0 + $0xf8] sm:$0xff]  ;;  %v28_v30 = vld [vmem:[%s859_s0 + $0x70] sm:$0xff] }
  0x21   :  { %153 = vmatpush1.msra.mxu0 %v46_v31  ;;  %398 = vmatpush1.msra.mxu1 %v46_v31  ;;  %v44_v31 = vld [vmem:[%s859_s0 + $0xf0] sm:$0xff] }
  0x22   :  { %154 = vmatprep.subr.mxu0 %v109_v32  ;;  %367 = vmatprep.subr.mxu1 %v109_v32  ;;  %v112_v32 = vlaneseq }
  0x23   :  { %155 = vmatpush2.msra.mxu0 %v108_v33  ;;  %399 = vmatpush2.msra.mxu1 %v108_v33 }
  0x24   :  { %156 = vmatprep.subr.mxu0 %v107_v34  ;;  %368 = vmatprep.subr.mxu1 %v107_v34  ;;  %v113_v33 = vshrl.u32 %v112_v32, 7 }
  0x25   :  { %157 = vmatpush2.msra.mxu0 %v106_v35  ;;  %400 = vmatpush2.msra.mxu1 %v106_v35  ;;  %v110_v35 = vld [vmem:[%s860_s2] sm:$0x3] }
  0x26   :  { %158 = vmatprep.subr.mxu0 %v105_v36  ;;  %369 = vmatprep.subr.mxu1 %v105_v36  ;;  %v114_v34 = vsub.s32 0, %v113_v33  ;;  %v118_v36 = vsub.s32 1, %v113_v33 }
  0x27   :  { %159 = vmatpush2.msra.mxu0 %v104_v37  ;;  %401 = vmatpush2.msra.mxu1 %v104_v37 }
  0x28   :  { %160 = vmatprep.subr.mxu0 %v103_v38  ;;  %370 = vmatprep.subr.mxu1 %v103_v38  ;;  %v726_v37 = vrot.slane %v110_v35, %v114_v34  ;;  %v728_v38 = vrot.slane %v110_v35, %v118_v36 }
  0x29   :  { %161 = vmatpush2.msra.mxu0 %v102_v39  ;;  %402 = vmatpush2.msra.mxu1 %v102_v39 }
  0x2a   :  { %162 = vmatprep.subr.mxu0 %v101_v40  ;;  %371 = vmatprep.subr.mxu1 %v101_v40 }
  0x2b   :  { %163 = vmatpush2.msra.mxu0 %v100_v41  ;;  %403 = vmatpush2.msra.mxu1 %v100_v41 }
  0x2c   :  { %164 = vmatprep.subr.mxu0 %v99_v42  ;;  %372 = vmatprep.subr.mxu1 %v99_v42 }
  0x2d   :  { %165 = vmatpush2.msra.mxu0 %v98_v43  ;;  %404 = vmatpush2.msra.mxu1 %v98_v43 }
  0x2e   :  { %166 = vmatprep.subr.mxu0 %v97_v44  ;;  %373 = vmatprep.subr.mxu1 %v97_v44 }
  0x2f   :  { %167 = vmatpush2.msra.mxu0 %v96_v45  ;;  %405 = vmatpush2.msra.mxu1 %v96_v45 }
  0x30   :  { %168 = vmatprep.subr.mxu0 %v95_v46  ;;  %374 = vmatprep.subr.mxu1 %v95_v46 }
  0x31   :  { %169 = vmatpush2.msra.mxu0 %v94_v47  ;;  %406 = vmatpush2.msra.mxu1 %v94_v47 }
  0x32   :  { %170 = vmatprep.subr.mxu0 %v93_v48  ;;  %375 = vmatprep.subr.mxu1 %v93_v48 }
  0x33   :  { %171 = vmatpush2.msra.mxu0 %v92_v49  ;;  %407 = vmatpush2.msra.mxu1 %v92_v49 }
  0x34   :  { %172 = vmatprep.subr.mxu0 %v91_v50  ;;  %376 = vmatprep.subr.mxu1 %v91_v50 }
  0x35   :  { %173 = vmatpush2.msra.mxu0 %v90_v51  ;;  %408 = vmatpush2.msra.mxu1 %v90_v51 }
  0x36   :  { %174 = vmatprep.subr.mxu0 %v89_v52  ;;  %377 = vmatprep.subr.mxu1 %v89_v52 }
  0x37   :  { %175 = vmatpush2.msra.mxu0 %v88_v53  ;;  %409 = vmatpush2.msra.mxu1 %v88_v53 }
  0x38   :  { %176 = vmatprep.subr.mxu0 %v87_v54  ;;  %378 = vmatprep.subr.mxu1 %v87_v54 }
  0x39   :  { %177 = vmatpush2.msra.mxu0 %v86_v55  ;;  %410 = vmatpush2.msra.mxu1 %v86_v55 }
  0x3a   :  { %178 = vmatprep.subr.mxu0 %v85_v56  ;;  %379 = vmatprep.subr.mxu1 %v85_v56 }
  0x3b   :  { %179 = vmatpush2.msra.mxu0 %v84_v57  ;;  %411 = vmatpush2.msra.mxu1 %v84_v57 }
  0x3c   :  { %180 = vmatprep.subr.mxu0 %v83_v58  ;;  %380 = vmatprep.subr.mxu1 %v83_v58 }
  0x3d   :  { %181 = vmatpush2.msra.mxu0 %v82_v59  ;;  %412 = vmatpush2.msra.mxu1 %v82_v59 }
  0x3e   :  { %182 = vmatprep.subr.mxu0 %v81_v60  ;;  %381 = vmatprep.subr.mxu1 %v81_v60 }
  0x3f   :  { %183 = vmatpush2.msra.mxu0 %v80_v61  ;;  %413 = vmatpush2.msra.mxu1 %v80_v61 }
  0x40   :  { %184 = vmatprep.subr.mxu0 %v79_v62  ;;  %382 = vmatprep.subr.mxu1 %v79_v62 }
  0x41   :  { %185 = vmatpush2.msra.mxu0 %v78_v63  ;;  %414 = vmatpush2.msra.mxu1 %v78_v63 }
  0x42   :  { %186 = vmatprep.mubr.f32.mxu0 %v15_v0  ;;  %234 = vmatprep.mubr.f32.mxu1 %v31_v1 }
  0x43   :  { %187 = vmatmul.mubr.f32.vlgmr.msra.gmra.mxu0 %v14_v2  ;;  %235 = vmatmul.mubr.f32.vlgmr.msra.gmra.mxu1 %v30_v3 }
  0x44   :  { %192 = vmatprep.mubr.f32.mxu0 %v17_v4  ;;  %240 = vmatprep.mubr.f32.mxu1 %v33_v5 }
  0x47   :  { %193 = vmatmul.mubr.f32.gmra.mxu0 %v16_v6  ;;  %241 = vmatmul.mubr.f32.gmra.mxu1 %v32_v7 }
  0x48   :  { %198 = vmatprep.mubr.f32.mxu0 %v19_v8  ;;  %246 = vmatprep.mubr.f32.mxu1 %v35_v9 }
  0x4b   :  { %199 = vmatmul.mubr.f32.gmra.mxu0 %v18_v10  ;;  %247 = vmatmul.mubr.f32.gmra.mxu1 %v34_v11 }
  0x4c   :  { %204 = vmatprep.mubr.f32.mxu0 %v21_v12  ;;  %252 = vmatprep.mubr.f32.mxu1 %v37_v13 }
  0x4f   :  { %205 = vmatmul.mubr.f32.gmra.mxu0 %v20_v14  ;;  %253 = vmatmul.mubr.f32.gmra.mxu1 %v36_v15 }
  0x50   :  { %210 = vmatprep.mubr.f32.mxu0 %v23_v16  ;;  %258 = vmatprep.mubr.f32.mxu1 %v39_v17 }
  0x53   :  { %211 = vmatmul.mubr.f32.gmra.mxu0 %v22_v18  ;;  %259 = vmatmul.mubr.f32.gmra.mxu1 %v38_v19 }
  0x54   :  { %216 = vmatprep.mubr.f32.mxu0 %v25_v20  ;;  %264 = vmatprep.mubr.f32.mxu1 %v41_v21 }
  0x57   :  { %217 = vmatmul.mubr.f32.gmra.mxu0 %v24_v22  ;;  %265 = vmatmul.mubr.f32.gmra.mxu1 %v40_v23 }
  0x58   :  { %222 = vmatprep.mubr.f32.mxu0 %v27_v24  ;;  %270 = vmatprep.mubr.f32.mxu1 %v43_v25 }
  0x5b   :  { %223 = vmatmul.mubr.f32.gmra.mxu0 %v26_v26  ;;  %271 = vmatmul.mubr.f32.gmra.mxu1 %v42_v27 }
  0x5c   :  { %228 = vmatprep.mubr.f32.mxu0 %v29_v28  ;;  %276 = vmatprep.mubr.f32.mxu1 %v45_v29 }
  0x5f   :  { %229 = vmatmul.mubr.f32.gmra.mxu0 %v28_v30  ;;  %277 = vmatmul.mubr.f32.gmra.mxu1 %v44_v31 }
 0x103   :  { %v188_v39 = vpop.f32.mrf.mxu0  ;;  %v236_v40 = vpop.f32.mrf.mxu1 }
 0x104   :  { %v189_v41 = vadd.f32 %v188_v39, %v726_v37  ;;  %v237_v42 = vadd.f32 %v236_v40, %v726_v37 }
 0x105   :  { %v190_v43 = vpop.f32.mrf.mxu0  ;;  %v238_v44 = vpop.f32.mrf.mxu1 }
 0x106   :  { %v283_v45 = vmax.f32 %v189_v41, 0.0  ;;  %v299_v46 = vmax.f32 %v237_v42, 0.0  ;;  %v191_v47 = vadd.f32 %v190_v43, %v728_v38  ;;  %v239_v48 = vadd.f32 %v238_v44, %v728_v38 }
 0x107   :  { %v194_v49 = vpop.f32.mrf.mxu0  ;;  %v242_v50 = vpop.f32.mrf.mxu1 }
 0x108   :  { %315 = vst [vmem:[%s861_s3] sm:$0xff] %v283_v45  ;;  %331 = vst [vmem:[%s861_s3 + $0x80] sm:$0xff] %v299_v46  ;;  %v284_v51 = vmax.f32 %v191_v47, 0.0  ;;  %v300_v52 = vmax.f32 %v239_v48, 0.0  ;;  %v195_v53 = vadd.f32 %v194_v49, %v726_v37  ;;  %v243_v54 = vadd.f32 %v242_v50, %v726_v37 }
 0x109   :  { %v196_v55 = vpop.f32.mrf.mxu0  ;;  %v244_v56 = vpop.f32.mrf.mxu1 }
 0x10a   :  { %316 = vst [vmem:[%s861_s3 + $0x8] sm:$0xff] %v284_v51  ;;  %332 = vst [vmem:[%s861_s3 + $0x88] sm:$0xff] %v300_v52  ;;  %v285_v57 = vmax.f32 %v195_v53, 0.0  ;;  %v301_v58 = vmax.f32 %v243_v54, 0.0  ;;  %v197_v59 = vadd.f32 %v196_v55, %v728_v38  ;;  %v245_v60 = vadd.f32 %v244_v56, %v728_v38 }
 0x10b   :  { %v200_v61 = vpop.f32.mrf.mxu0  ;;  %v248_v62 = vpop.f32.mrf.mxu1 }
 0x10c   :  { %317 = vst [vmem:[%s861_s3 + $0x10] sm:$0xff] %v285_v57  ;;  %333 = vst [vmem:[%s861_s3 + $0x90] sm:$0xff] %v301_v58  ;;  %v286_v63 = vmax.f32 %v197_v59, 0.0  ;;  %v302_v0 = vmax.f32 %v245_v60, 0.0  ;;  %v201_v1 = vadd.f32 %v200_v61, %v726_v37  ;;  %v249_v2 = vadd.f32 %v248_v62, %v726_v37 }
 0x10d   :  { %v202_v3 = vpop.f32.mrf.mxu0  ;;  %v250_v4 = vpop.f32.mrf.mxu1 }
 0x10e   :  { %318 = vst [vmem:[%s861_s3 + $0x18] sm:$0xff] %v286_v63  ;;  %334 = vst [vmem:[%s861_s3 + $0x98] sm:$0xff] %v302_v0  ;;  %v287_v5 = vmax.f32 %v201_v1, 0.0  ;;  %v303_v6 = vmax.f32 %v249_v2, 0.0  ;;  %v203_v7 = vadd.f32 %v202_v3, %v728_v38  ;;  %v251_v8 = vadd.f32 %v250_v4, %v728_v38 }
 0x10f   :  { %v206_v9 = vpop.f32.mrf.mxu0  ;;  %v254_v10 = vpop.f32.mrf.mxu1 }
 0x110   :  { %319 = vst [vmem:[%s861_s3 + $0x20] sm:$0xff] %v287_v5  ;;  %335 = vst [vmem:[%s861_s3 + $0xa0] sm:$0xff] %v303_v6  ;;  %v288_v11 = vmax.f32 %v203_v7, 0.0  ;;  %v304_v12 = vmax.f32 %v251_v8, 0.0  ;;  %v207_v13 = vadd.f32 %v206_v9, %v726_v37  ;;  %v255_v14 = vadd.f32 %v254_v10, %v726_v37 }
 0x111   :  { %v208_v15 = vpop.f32.mrf.mxu0  ;;  %v256_v16 = vpop.f32.mrf.mxu1 }
 0x112   :  { %320 = vst [vmem:[%s861_s3 + $0x28] sm:$0xff] %v288_v11  ;;  %336 = vst [vmem:[%s861_s3 + $0xa8] sm:$0xff] %v304_v12  ;;  %v289_v17 = vmax.f32 %v207_v13, 0.0  ;;  %v305_v18 = vmax.f32 %v255_v14, 0.0  ;;  %v209_v19 = vadd.f32 %v208_v15, %v728_v38  ;;  %v257_v20 = vadd.f32 %v256_v16, %v728_v38 }
 0x113   :  { %v212_v21 = vpop.f32.mrf.mxu0  ;;  %v260_v22 = vpop.f32.mrf.mxu1 }
 0x114   :  { %321 = vst [vmem:[%s861_s3 + $0x30] sm:$0xff] %v289_v17  ;;  %337 = vst [vmem:[%s861_s3 + $0xb0] sm:$0xff] %v305_v18  ;;  %v290_v23 = vmax.f32 %v209_v19, 0.0  ;;  %v306_v24 = vmax.f32 %v257_v20, 0.0  ;;  %v213_v25 = vadd.f32 %v212_v21, %v726_v37  ;;  %v261_v26 = vadd.f32 %v260_v22, %v726_v37 }
 0x115   :  { %v214_v27 = vpop.f32.mrf.mxu0  ;;  %v262_v28 = vpop.f32.mrf.mxu1 }
 0x116   :  { %322 = vst [vmem:[%s861_s3 + $0x38] sm:$0xff] %v290_v23  ;;  %338 = vst [vmem:[%s861_s3 + $0xb8] sm:$0xff] %v306_v24  ;;  %v291_v29 = vmax.f32 %v213_v25, 0.0  ;;  %v307_v30 = vmax.f32 %v261_v26, 0.0  ;;  %v215_v31 = vadd.f32 %v214_v27, %v728_v38  ;;  %v263_v32 = vadd.f32 %v262_v28, %v728_v38 }
 0x117   :  { %v218_v33 = vpop.f32.mrf.mxu0  ;;  %v266_v34 = vpop.f32.mrf.mxu1 }
 0x118   :  { %323 = vst [vmem:[%s861_s3 + $0x40] sm:$0xff] %v291_v29  ;;  %339 = vst [vmem:[%s861_s3 + $0xc0] sm:$0xff] %v307_v30  ;;  %v292_v35 = vmax.f32 %v215_v31, 0.0  ;;  %v308_v36 = vmax.f32 %v263_v32, 0.0  ;;  %v219_v39 = vadd.f32 %v218_v33, %v726_v37  ;;  %v267_v40 = vadd.f32 %v266_v34, %v726_v37 }
 0x119   :  { %v220_v41 = vpop.f32.mrf.mxu0  ;;  %v268_v42 = vpop.f32.mrf.mxu1 }
 0x11a   :  { %324 = vst [vmem:[%s861_s3 + $0x48] sm:$0xff] %v292_v35  ;;  %340 = vst [vmem:[%s861_s3 + $0xc8] sm:$0xff] %v308_v36  ;;  %v293_v43 = vmax.f32 %v219_v39, 0.0  ;;  %v309_v44 = vmax.f32 %v267_v40, 0.0  ;;  %v221_v45 = vadd.f32 %v220_v41, %v728_v38  ;;  %v269_v46 = vadd.f32 %v268_v42, %v728_v38 }
 0x11b   :  { %v224_v47 = vpop.f32.mrf.mxu0  ;;  %v272_v48 = vpop.f32.mrf.mxu1 }
 0x11c   :  { %325 = vst [vmem:[%s861_s3 + $0x50] sm:$0xff] %v293_v43  ;;  %341 = vst [vmem:[%s861_s3 + $0xd0] sm:$0xff] %v309_v44  ;;  %v294_v49 = vmax.f32 %v221_v45, 0.0  ;;  %v310_v50 = vmax.f32 %v269_v46, 0.0  ;;  %v225_v51 = vadd.f32 %v224_v47, %v726_v37  ;;  %v273_v52 = vadd.f32 %v272_v48, %v726_v37 }
 0x11d   :  { %v226_v53 = vpop.f32.mrf.mxu0  ;;  %v274_v54 = vpop.f32.mrf.mxu1 }
 0x11e   :  { %326 = vst [vmem:[%s861_s3 + $0x58] sm:$0xff] %v294_v49  ;;  %342 = vst [vmem:[%s861_s3 + $0xd8] sm:$0xff] %v310_v50  ;;  %v295_v55 = vmax.f32 %v225_v51, 0.0  ;;  %v311_v56 = vmax.f32 %v273_v52, 0.0  ;;  %v227_v57 = vadd.f32 %v226_v53, %v728_v38  ;;  %v275_v58 = vadd.f32 %v274_v54, %v728_v38 }
 0x11f   :  { %v230_v59 = vpop.f32.mrf.mxu0  ;;  %v278_v60 = vpop.f32.mrf.mxu1 }
 0x120   :  { %327 = vst [vmem:[%s861_s3 + $0x60] sm:$0xff] %v295_v55  ;;  %343 = vst [vmem:[%s861_s3 + $0xe0] sm:$0xff] %v311_v56  ;;  %v296_v61 = vmax.f32 %v227_v57, 0.0  ;;  %v312_v62 = vmax.f32 %v275_v58, 0.0  ;;  %v231_v63 = vadd.f32 %v230_v59, %v726_v37  ;;  %v279_v0 = vadd.f32 %v278_v60, %v726_v37 }
 0x121   :  { %v232_v1 = vpop.f32.mrf.mxu0  ;;  %v280_v2 = vpop.f32.mrf.mxu1 }
 0x122   :  { %328 = vst [vmem:[%s861_s3 + $0x68] sm:$0xff] %v296_v61  ;;  %344 = vst [vmem:[%s861_s3 + $0xe8] sm:$0xff] %v312_v62  ;;  %v297_v3 = vmax.f32 %v231_v63, 0.0  ;;  %v313_v4 = vmax.f32 %v279_v0, 0.0  ;;  %v233_v5 = vadd.f32 %v232_v1, %v728_v38  ;;  %v281_v6 = vadd.f32 %v280_v2, %v728_v38 }
 0x124   :  { %329 = vst [vmem:[%s861_s3 + $0x70] sm:$0xff] %v297_v3  ;;  %345 = vst [vmem:[%s861_s3 + $0xf0] sm:$0xff] %v313_v4  ;;  %v298_v37 = vmax.f32 %v233_v5, 0.0  ;;  %v314_v7 = vmax.f32 %v281_v6, 0.0 }
 0x126   :  { %330 = vst [vmem:[%s861_s3 + $0x78] sm:$0xff] %v298_v37  ;;  %346 = vst [vmem:[%s861_s3 + $0xf8] sm:$0xff] %v314_v7 }

// kernel: forward.9
= control target key start
LH: loop header
LB: loop body
LE: loop exit
PB: predicated region body
PF: predicated region fallthrough
CT: control target
= control target key end

     0   :  { %vm1918_vm0 = vcmask 523264   ;;  %s4849_s1 = inlined_call_operand.vmem [shape: f32[2304,64], index: 1, kind: input, shape index: {}]   ;;  %s4850_s0 = inlined_call_operand.vmem [shape: f32[128,2304], index: 0, kind: input, shape index: {}]   ;;  %s4851_s2 = inlined_call_operand.vmem [shape: f32[1,64], index: 2, kind: input, shape index: {}]   ;;  %s4852_s3 = inlined_call_operand.vmem [shape: f32[128,64], index: 3, kind: output, shape index: {}]  }
   0x1   :  { %v333_v0 = vld [vmem:[%s4849_s1 + $0xf8] sm:$0xff]  ;;  %v332_v2 = vld [vmem:[%s4849_s1 + $0xf0] sm:$0xff]  ;;  %v331_v4 = vld [vmem:[%s4849_s1 + $0xe8] sm:$0xff] }
   0x2   :  { %v317_v1 = vld [vmem:[%s4849_s1 + $0x78] sm:$0xff]  ;;  %2660 = vmatprep.subr.mxu1 %v333_v0  ;;  %1940 = vmatprep.subr.mxu0 %v333_v0  ;;  %v316_v3 = vld [vmem:[%s4849_s1 + $0x70] sm:$0xff]  ;;  %v315_v5 = vld [vmem:[%s4849_s1 + $0x68] sm:$0xff] }
   0x3   :  { %2676 = vmatpush3.msra.mxu1 %v317_v1  ;;  %1941 = vmatpush3.msra.mxu0 %v317_v1  ;;  %v330_v6 = vld [vmem:[%s4849_s1 + $0xe0] sm:$0xff]  ;;  %v329_v8 = vld [vmem:[%s4849_s1 + $0xd8] sm:$0xff]  ;;  %v328_v10 = vld [vmem:[%s4849_s1 + $0xd0] sm:$0xff] }
   0x4   :  { %2661 = vmatprep.subr.mxu1 %v332_v2  ;;  %1942 = vmatprep.subr.mxu0 %v332_v2  ;;  %v314_v7 = vld [vmem:[%s4849_s1 + $0x60] sm:$0xff]  ;;  %v313_v9 = vld [vmem:[%s4849_s1 + $0x58] sm:$0xff]  ;;  %v312_v11 = vld [vmem:[%s4849_s1 + $0x50] sm:$0xff] }
   0x5   :  { %2677 = vmatpush3.msra.mxu1 %v316_v3  ;;  %1943 = vmatpush3.msra.mxu0 %v316_v3  ;;  %v327_v12 = vld [vmem:[%s4849_s1 + $0xc8] sm:$0xff]  ;;  %v326_v14 = vld [vmem:[%s4849_s1 + $0xc0] sm:$0xff]  ;;  %v325_v16 = vld [vmem:[%s4849_s1 + $0xb8] sm:$0xff] }
   0x6   :  { %2662 = vmatprep.subr.mxu1 %v331_v4  ;;  %1944 = vmatprep.subr.mxu0 %v331_v4  ;;  %v311_v13 = vld [vmem:[%s4849_s1 + $0x48] sm:$0xff]  ;;  %v310_v15 = vld [vmem:[%s4849_s1 + $0x40] sm:$0xff]  ;;  %v309_v17 = vld [vmem:[%s4849_s1 + $0x38] sm:$0xff] }
   0x7   :  { %2678 = vmatpush3.msra.mxu1 %v315_v5  ;;  %1945 = vmatpush3.msra.mxu0 %v315_v5  ;;  %v324_v18 = vld [vmem:[%s4849_s1 + $0xb0] sm:$0xff]  ;;  %v323_v20 = vld [vmem:[%s4849_s1 + $0xa8] sm:$0xff]  ;;  %v322_v22 = vld [vmem:[%s4849_s1 + $0xa0] sm:$0xff] }
   0x8   :  { %2663 = vmatprep.subr.mxu1 %v330_v6  ;;  %1946 = vmatprep.subr.mxu0 %v330_v6  ;;  %v308_v19 = vld [vmem:[%s4849_s1 + $0x30] sm:$0xff]  ;;  %v307_v21 = vld [vmem:[%s4849_s1 + $0x28] sm:$0xff]  ;;  %v306_v23 = vld [vmem:[%s4849_s1 + $0x20] sm:$0xff] }
   0x9   :  { %2679 = vmatpush3.msra.mxu1 %v314_v7  ;;  %1947 = vmatpush3.msra.mxu0 %v314_v7  ;;  %v321_v24 = vld [vmem:[%s4849_s1 + $0x98] sm:$0xff]  ;;  %v320_v26 = vld [vmem:[%s4849_s1 + $0x90] sm:$0xff]  ;;  %v319_v28 = vld [vmem:[%s4849_s1 + $0x88] sm:$0xff] }
   0xa   :  { %2664 = vmatprep.subr.mxu1 %v329_v8  ;;  %1948 = vmatprep.subr.mxu0 %v329_v8  ;;  %v305_v25 = vld [vmem:[%s4849_s1 + $0x18] sm:$0xff]  ;;  %v304_v27 = vld [vmem:[%s4849_s1 + $0x10] sm:$0xff]  ;;  %v303_v29 = vld [vmem:[%s4849_s1 + $0x8] sm:$0xff] }
   0xb   :  { %2680 = vmatpush3.msra.mxu1 %v313_v9  ;;  %1949 = vmatpush3.msra.mxu0 %v313_v9  ;;  %v318_v30 = vld [vmem:[%s4849_s1 + $0x80] sm:$0xff]  ;;  %v159_v32 = vld [vmem:[%s4850_s0 + $0x488] sm:$0xff]  ;;  %v365_v35 = vld [vmem:[%s4849_s1 + $0x1f8] sm:$0xff] }
   0xc   :  { %2665 = vmatprep.subr.mxu1 %v328_v10  ;;  %1950 = vmatprep.subr.mxu0 %v328_v10  ;;  %v302_v31 = vld [vmem:[%s4849_s1] sm:$0xff]  ;;  %v15_v33 = vld [vmem:[%s4850_s0 + $0x8] sm:$0xff]  ;;  %v349_v37 = vld [vmem:[%s4849_s1 + $0x178] sm:$0xff] }
   0xd   :  { %2681 = vmatpush3.msra.mxu1 %v312_v11  ;;  %1951 = vmatpush3.msra.mxu0 %v312_v11  ;;  %v158_v34 = vld [vmem:[%s4850_s0 + $0x480] sm:$0xff]  ;;  %v397_v38 = vld [vmem:[%s4849_s1 + $0x2f8] sm:$0xff]  ;;  %v364_v39 = vld [vmem:[%s4849_s1 + $0x1f0] sm:$0xff] }
   0xe   :  { %2666 = vmatprep.subr.mxu1 %v327_v12  ;;  %1952 = vmatprep.subr.mxu0 %v327_v12  ;;  %v14_v36 = vld [vmem:[%s4850_s0] sm:$0xff]  ;;  %v381_v40 = vld [vmem:[%s4849_s1 + $0x278] sm:$0xff]  ;;  %v348_v42 = vld [vmem:[%s4849_s1 + $0x170] sm:$0xff] }
   0xf   :  { %2682 = vmatpush3.msra.mxu1 %v311_v13  ;;  %1953 = vmatpush3.msra.mxu0 %v311_v13  ;;  %v177_v41 = vld [vmem:[%s4850_s0 + $0x518] sm:$0xff]  ;;  %v396_v43 = vld [vmem:[%s4849_s1 + $0x2f0] sm:$0xff]  ;;  %v363_v46 = vld [vmem:[%s4849_s1 + $0x1e8] sm:$0xff] }
  0x10   :  { %2667 = vmatprep.subr.mxu1 %v326_v14  ;;  %1954 = vmatprep.subr.mxu0 %v326_v14  ;;  %v33_v44 = vld [vmem:[%s4850_s0 + $0x98] sm:$0xff]  ;;  %v176_v45 = vld [vmem:[%s4850_s0 + $0x510] sm:$0xff]  ;;  %v347_v49 = vld [vmem:[%s4849_s1 + $0x168] sm:$0xff] }
  0x11   :  { %2683 = vmatpush3.msra.mxu1 %v310_v15  ;;  %1955 = vmatpush3.msra.mxu0 %v310_v15  ;;  %v380_v47 = vld [vmem:[%s4849_s1 + $0x270] sm:$0xff]  ;;  %v395_v50 = vld [vmem:[%s4849_s1 + $0x2e8] sm:$0xff]  ;;  %v362_v51 = vld [vmem:[%s4849_s1 + $0x1e0] sm:$0xff] }
  0x12   :  { %2668 = vmatprep.subr.mxu1 %v325_v16  ;;  %1956 = vmatprep.subr.mxu0 %v325_v16  ;;  %v32_v48 = vld [vmem:[%s4850_s0 + $0x90] sm:$0xff]  ;;  %v379_v52 = vld [vmem:[%s4849_s1 + $0x268] sm:$0xff]  ;;  %v346_v54 = vld [vmem:[%s4849_s1 + $0x160] sm:$0xff] }
  0x13   :  { %2684 = vmatpush3.msra.mxu1 %v309_v17  ;;  %1957 = vmatpush3.msra.mxu0 %v309_v17  ;;  %v195_v53 = vld [vmem:[%s4850_s0 + $0x5a8] sm:$0xff]  ;;  %v394_v55 = vld [vmem:[%s4849_s1 + $0x2e0] sm:$0xff]  ;;  %v361_v58 = vld [vmem:[%s4849_s1 + $0x1d8] sm:$0xff] }
  0x14   :  { %2669 = vmatprep.subr.mxu1 %v324_v18  ;;  %1958 = vmatprep.subr.mxu0 %v324_v18  ;;  %v51_v56 = vld [vmem:[%s4850_s0 + $0x128] sm:$0xff]  ;;  %v194_v57 = vld [vmem:[%s4850_s0 + $0x5a0] sm:$0xff]  ;;  %v345_v61 = vld [vmem:[%s4849_s1 + $0x158] sm:$0xff] }
  0x15   :  { %2685 = vmatpush3.msra.mxu1 %v308_v19  ;;  %1959 = vmatpush3.msra.mxu0 %v308_v19  ;;  %v378_v59 = vld [vmem:[%s4849_s1 + $0x260] sm:$0xff]  ;;  %v393_v62 = vld [vmem:[%s4849_s1 + $0x2d8] sm:$0xff]  ;;  %v360_v63 = vld [vmem:[%s4849_s1 + $0x1d0] sm:$0xff] }
  0x16   :  { %2670 = vmatprep.subr.mxu1 %v323_v20  ;;  %1960 = vmatprep.subr.mxu0 %v323_v20  ;;  %v50_v60 = vld [vmem:[%s4850_s0 + $0x120] sm:$0xff]  ;;  %v377_v0 = vld [vmem:[%s4849_s1 + $0x258] sm:$0xff]  ;;  %v344_v2 = vld [vmem:[%s4849_s1 + $0x150] sm:$0xff] }
  0x17   :  { %2686 = vmatpush3.msra.mxu1 %v307_v21  ;;  %1961 = vmatpush3.msra.mxu0 %v307_v21  ;;  %v213_v1 = vld [vmem:[%s4850_s0 + $0x638] sm:$0xff]  ;;  %v392_v3 = vld [vmem:[%s4849_s1 + $0x2d0] sm:$0xff]  ;;  %v359_v6 = vld [vmem:[%s4849_s1 + $0x1c8] sm:$0xff] }
  0x18   :  { %2671 = vmatprep.subr.mxu1 %v322_v22  ;;  %1962 = vmatprep.subr.mxu0 %v322_v22  ;;  %v69_v4 = vld [vmem:[%s4850_s0 + $0x1b8] sm:$0xff]  ;;  %v212_v5 = vld [vmem:[%s4850_s0 + $0x630] sm:$0xff]  ;;  %v343_v9 = vld [vmem:[%s4849_s1 + $0x148] sm:$0xff] }
  0x19   :  { %2687 = vmatpush3.msra.mxu1 %v306_v23  ;;  %1963 = vmatpush3.msra.mxu0 %v306_v23  ;;  %v376_v7 = vld [vmem:[%s4849_s1 + $0x250] sm:$0xff]  ;;  %v391_v10 = vld [vmem:[%s4849_s1 + $0x2c8] sm:$0xff]  ;;  %v358_v11 = vld [vmem:[%s4849_s1 + $0x1c0] sm:$0xff] }
  0x1a   :  { %2672 = vmatprep.subr.mxu1 %v321_v24  ;;  %1964 = vmatprep.subr.mxu0 %v321_v24  ;;  %v68_v8 = vld [vmem:[%s4850_s0 + $0x1b0] sm:$0xff]  ;;  %v375_v12 = vld [vmem:[%s4849_s1 + $0x248] sm:$0xff]  ;;  %v342_v14 = vld [vmem:[%s4849_s1 + $0x140] sm:$0xff] }
  0x1b   :  { %2688 = vmatpush3.msra.mxu1 %v305_v25  ;;  %1965 = vmatpush3.msra.mxu0 %v305_v25  ;;  %v231_v13 = vld [vmem:[%s4850_s0 + $0x6c8] sm:$0xff]  ;;  %v390_v15 = vld [vmem:[%s4849_s1 + $0x2c0] sm:$0xff]  ;;  %v357_v18 = vld [vmem:[%s4849_s1 + $0x1b8] sm:$0xff] }
  0x1c   :  { %2673 = vmatprep.subr.mxu1 %v320_v26  ;;  %1966 = vmatprep.subr.mxu0 %v320_v26  ;;  %v87_v16 = vld [vmem:[%s4850_s0 + $0x248] sm:$0xff]  ;;  %v230_v17 = vld [vmem:[%s4850_s0 + $0x6c0] sm:$0xff]  ;;  %v341_v21 = vld [vmem:[%s4849_s1 + $0x138] sm:$0xff] }
  0x1d   :  { %2689 = vmatpush3.msra.mxu1 %v304_v27  ;;  %1967 = vmatpush3.msra.mxu0 %v304_v27  ;;  %v374_v19 = vld [vmem:[%s4849_s1 + $0x240] sm:$0xff]  ;;  %v389_v22 = vld [vmem:[%s4849_s1 + $0x2b8] sm:$0xff]  ;;  %v356_v23 = vld [vmem:[%s4849_s1 + $0x1b0] sm:$0xff] }
  0x1e   :  { %2674 = vmatprep.subr.mxu1 %v319_v28  ;;  %1968 = vmatprep.subr.mxu0 %v319_v28  ;;  %v86_v20 = vld [vmem:[%s4850_s0 + $0x240] sm:$0xff]  ;;  %v373_v24 = vld [vmem:[%s4849_s1 + $0x238] sm:$0xff]  ;;  %v340_v26 = vld [vmem:[%s4849_s1 + $0x130] sm:$0xff] }
  0x1f   :  { %2690 = vmatpush3.msra.mxu1 %v303_v29  ;;  %1969 = vmatpush3.msra.mxu0 %v303_v29  ;;  %v249_v25 = vld [vmem:[%s4850_s0 + $0x758] sm:$0xff]  ;;  %v388_v27 = vld [vmem:[%s4849_s1 + $0x2b0] sm:$0xff] }
  0x20   :  { %2675 = vmatprep.subr.mxu1 %v318_v30  ;;  %1970 = vmatprep.subr.mxu0 %v318_v30  ;;  %v105_v28 = vld [vmem:[%s4850_s0 + $0x2d8] sm:$0xff]  ;;  %v248_v29 = vld [vmem:[%s4850_s0 + $0x750] sm:$0xff]  ;;  %v355_v30 = vld [vmem:[%s4849_s1 + $0x1a8] sm:$0xff] }
  0x21   :  { %2691 = vmatpush3.msra.mxu1 %v302_v31  ;;  %701 = vmatprep.mubr.f32.mxu1 %v159_v32  ;;  %v104_v32 = vld [vmem:[%s4850_s0 + $0x2d0] sm:$0xff] }
  0x22   :  { %1971 = vmatpush3.msra.mxu0 %v302_v31  ;;  %661 = vmatprep.mubr.f32.mxu0 %v15_v33  ;;  %v372_v31 = vld [vmem:[%s4849_s1 + $0x230] sm:$0xff]  ;;  %v339_v33 = vld [vmem:[%s4849_s1 + $0x128] sm:$0xff] }
  0x23   :  { %702 = vmatmul.mubr.f32.vlgmr.msra.gmra.mxu1 %v158_v34  ;;  %2020 = vmatprep.subr.mxu1 %v365_v35  ;;  %v387_v34 = vld [vmem:[%s4849_s1 + $0x2a8] sm:$0xff]  ;;  %v354_v35 = vld [vmem:[%s4849_s1 + $0x1a0] sm:$0xff] }
  0x24   :  { %662 = vmatmul.mubr.f32.vlgmr.msra.gmra.mxu0 %v14_v36  ;;  %2021 = vmatpush3.msra.mxu1 %v349_v37  ;;  %v371_v36 = vld [vmem:[%s4849_s1 + $0x228] sm:$0xff] }
  0x25   :  { %2100 = vmatprep.subr.mxu0 %v397_v38  ;;  %2022 = vmatprep.subr.mxu1 %v364_v39  ;;  %v267_v37 = vld [vmem:[%s4850_s0 + $0x7e8] sm:$0xff]  ;;  %v338_v38 = vld [vmem:[%s4849_s1 + $0x120] sm:$0xff] }
  0x26   :  { %2101 = vmatpush3.msra.mxu0 %v381_v40  ;;  %706 = vmatprep.mubr.f32.mxu1 %v177_v41  ;;  %v386_v39 = vld [vmem:[%s4849_s1 + $0x2a0] sm:$0xff]  ;;  %v123_v40 = vld [vmem:[%s4850_s0 + $0x368] sm:$0xff] }
  0x27   :  { %2023 = vmatpush3.msra.mxu1 %v348_v42  ;;  %2102 = vmatprep.subr.mxu0 %v396_v43  ;;  %v266_v41 = vld [vmem:[%s4850_s0 + $0x7e0] sm:$0xff]  ;;  %v353_v42 = vld [vmem:[%s4849_s1 + $0x198] sm:$0xff] }
  0x28   :  { %666 = vmatprep.mubr.f32.mxu0 %v33_v44  ;;  %707 = vmatmul.mubr.f32.gmra.mxu1 %v176_v45  ;;  %v370_v43 = vld [vmem:[%s4849_s1 + $0x220] sm:$0xff]  ;;  %v337_v45 = vld [vmem:[%s4849_s1 + $0x118] sm:$0xff] }
  0x29   :  { %2024 = vmatprep.subr.mxu1 %v363_v46  ;;  %2103 = vmatpush3.msra.mxu0 %v380_v47  ;;  %v122_v44 = vld [vmem:[%s4850_s0 + $0x360] sm:$0xff]  ;;  %v385_v46 = vld [vmem:[%s4849_s1 + $0x298] sm:$0xff]  ;;  %v352_v47 = vld [vmem:[%s4849_s1 + $0x190] sm:$0xff] }
  0x2a   :  { %667 = vmatmul.mubr.f32.gmra.mxu0 %v32_v48  ;;  %2025 = vmatpush3.msra.mxu1 %v347_v49  ;;  %v369_v48 = vld [vmem:[%s4849_s1 + $0x218] sm:$0xff] }
  0x2b   :  { %2104 = vmatprep.subr.mxu0 %v395_v50  ;;  %2026 = vmatprep.subr.mxu1 %v362_v51  ;;  %v285_v49 = vld [vmem:[%s4850_s0 + $0x878] sm:$0xff]  ;;  %v336_v50 = vld [vmem:[%s4849_s1 + $0x110] sm:$0xff] }
  0x2c   :  { %2105 = vmatpush3.msra.mxu0 %v379_v52  ;;  %711 = vmatprep.mubr.f32.mxu1 %v195_v53  ;;  %v384_v51 = vld [vmem:[%s4849_s1 + $0x290] sm:$0xff]  ;;  %v141_v52 = vld [vmem:[%s4850_s0 + $0x3f8] sm:$0xff] }
  0x2d   :  { %2027 = vmatpush3.msra.mxu1 %v346_v54  ;;  %2106 = vmatprep.subr.mxu0 %v394_v55  ;;  %v284_v53 = vld [vmem:[%s4850_s0 + $0x870] sm:$0xff]  ;;  %v351_v54 = vld [vmem:[%s4849_s1 + $0x188] sm:$0xff] }
  0x2e   :  { %671 = vmatprep.mubr.f32.mxu0 %v51_v56  ;;  %712 = vmatmul.mubr.f32.gmra.mxu1 %v194_v57  ;;  %v368_v55 = vld [vmem:[%s4849_s1 + $0x210] sm:$0xff]  ;;  %v335_v57 = vld [vmem:[%s4849_s1 + $0x108] sm:$0xff] }
  0x2f   :  { %2028 = vmatprep.subr.mxu1 %v361_v58  ;;  %2107 = vmatpush3.msra.mxu0 %v378_v59  ;;  %v140_v56 = vld [vmem:[%s4850_s0 + $0x3f0] sm:$0xff]  ;;  %v383_v58 = vld [vmem:[%s4849_s1 + $0x288] sm:$0xff]  ;;  %v350_v59 = vld [vmem:[%s4849_s1 + $0x180] sm:$0xff] }
  0x30   :  { %672 = vmatmul.mubr.f32.gmra.mxu0 %v50_v60  ;;  %2029 = vmatpush3.msra.mxu1 %v345_v61  ;;  %v367_v60 = vld [vmem:[%s4849_s1 + $0x208] sm:$0xff]  ;;  %v334_v61 = vld [vmem:[%s4849_s1 + $0x100] sm:$0xff] }
  0x31   :  { %2108 = vmatprep.subr.mxu0 %v393_v62  ;;  %2030 = vmatprep.subr.mxu1 %v360_v63  ;;  %v17_v62 = vld [vmem:[%s4850_s0 + $0x18] sm:$0xff]  ;;  %v382_v63 = vld [vmem:[%s4849_s1 + $0x280] sm:$0xff] }
  0x32   :  { %2109 = vmatpush3.msra.mxu0 %v377_v0  ;;  %716 = vmatprep.mubr.f32.mxu1 %v213_v1  ;;  %v16_v0 = vld [vmem:[%s4850_s0 + $0x10] sm:$0xff]  ;;  %v366_v1 = vld [vmem:[%s4849_s1 + $0x200] sm:$0xff] }
  0x33   :  { %2031 = vmatpush3.msra.mxu1 %v344_v2  ;;  %2110 = vmatprep.subr.mxu0 %v392_v3  ;;  %v19_v2 = vld [vmem:[%s4850_s0 + $0x28] sm:$0xff]  ;;  %v429_v3 = vld [vmem:[%s4849_s1 + $0x3f8] sm:$0xff] }
  0x34   :  { %676 = vmatprep.mubr.f32.mxu0 %v69_v4  ;;  %717 = vmatmul.mubr.f32.gmra.mxu1 %v212_v5  ;;  %v18_v4 = vld [vmem:[%s4850_s0 + $0x20] sm:$0xff]  ;;  %v413_v5 = vld [vmem:[%s4849_s1 + $0x378] sm:$0xff] }
  0x35   :  { %2032 = vmatprep.subr.mxu1 %v359_v6  ;;  %2111 = vmatpush3.msra.mxu0 %v376_v7  ;;  %v461_v6 = vld [vmem:[%s4849_s1 + $0x4f8] sm:$0xff]  ;;  %v35_v7 = vld [vmem:[%s4850_s0 + $0xa8] sm:$0xff] }
  0x36   :  { %677 = vmatmul.mubr.f32.gmra.mxu0 %v68_v8  ;;  %2033 = vmatpush3.msra.mxu1 %v343_v9  ;;  %v445_v8 = vld [vmem:[%s4849_s1 + $0x478] sm:$0xff]  ;;  %v34_v9 = vld [vmem:[%s4850_s0 + $0xa0] sm:$0xff] }
  0x37   :  { %2112 = vmatprep.subr.mxu0 %v391_v10  ;;  %2034 = vmatprep.subr.mxu1 %v358_v11  ;;  %v37_v10 = vld [vmem:[%s4850_s0 + $0xb8] sm:$0xff]  ;;  %v428_v11 = vld [vmem:[%s4849_s1 + $0x3f0] sm:$0xff] }
  0x38   :  { %2113 = vmatpush3.msra.mxu0 %v375_v12  ;;  %721 = vmatprep.mubr.f32.mxu1 %v231_v13  ;;  %v36_v12 = vld [vmem:[%s4850_s0 + $0xb0] sm:$0xff] }
  0x39   :  { %2035 = vmatpush3.msra.mxu1 %v342_v14  ;;  %2114 = vmatprep.subr.mxu0 %v390_v15  ;;  %v412_v13 = vld [vmem:[%s4849_s1 + $0x370] sm:$0xff]  ;;  %v53_v15 = vld [vmem:[%s4850_s0 + $0x138] sm:$0xff] }
  0x3a   :  { %681 = vmatprep.mubr.f32.mxu0 %v87_v16  ;;  %722 = vmatmul.mubr.f32.gmra.mxu1 %v230_v17  ;;  %v460_v14 = vld [vmem:[%s4849_s1 + $0x4f0] sm:$0xff] }
  0x3b   :  { %2036 = vmatprep.subr.mxu1 %v357_v18  ;;  %2115 = vmatpush3.msra.mxu0 %v374_v19  ;;  %v444_v16 = vld [vmem:[%s4849_s1 + $0x470] sm:$0xff]  ;;  %v55_v18 = vld [vmem:[%s4850_s0 + $0x148] sm:$0xff] }
  0x3c   :  { %682 = vmatmul.mubr.f32.gmra.mxu0 %v86_v20  ;;  %2037 = vmatpush3.msra.mxu1 %v341_v21  ;;  %v52_v17 = vld [vmem:[%s4850_s0 + $0x130] sm:$0xff]  ;;  %v427_v19 = vld [vmem:[%s4849_s1 + $0x3e8] sm:$0xff]  ;;  %v54_v20 = vld [vmem:[%s4850_s0 + $0x140] sm:$0xff] }
  0x3d   :  { %2116 = vmatprep.subr.mxu0 %v389_v22  ;;  %2038 = vmatprep.subr.mxu1 %v356_v23  ;;  %v411_v21 = vld [vmem:[%s4849_s1 + $0x368] sm:$0xff] }
  0x3e   :  { %2117 = vmatpush3.msra.mxu0 %v373_v24  ;;  %726 = vmatprep.mubr.f32.mxu1 %v249_v25  ;;  %v459_v22 = vld [vmem:[%s4849_s1 + $0x4e8] sm:$0xff]  ;;  %v70_v25 = vld [vmem:[%s4850_s0 + $0x1c0] sm:$0xff] }
  0x3f   :  { %2039 = vmatpush3.msra.mxu1 %v340_v26  ;;  %2118 = vmatprep.subr.mxu0 %v388_v27  ;;  %v71_v23 = vld [vmem:[%s4850_s0 + $0x1c8] sm:$0xff]  ;;  %v73_v26 = vld [vmem:[%s4850_s0 + $0x1d8] sm:$0xff]  ;;  %v426_v27 = vld [vmem:[%s4849_s1 + $0x3e0] sm:$0xff] }
  0x40   :  { %686 = vmatprep.mubr.f32.mxu0 %v105_v28  ;;  %727 = vmatmul.mubr.f32.gmra.mxu1 %v248_v29  ;;  %v443_v24 = vld [vmem:[%s4849_s1 + $0x468] sm:$0xff]  ;;  %v72_v28 = vld [vmem:[%s4850_s0 + $0x1d0] sm:$0xff]  ;;  %v410_v29 = vld [vmem:[%s4849_s1 + $0x360] sm:$0xff] }
  0x41   :  { %2040 = vmatprep.subr.mxu1 %v355_v30  ;;  %2119 = vmatpush3.msra.mxu0 %v372_v31  ;;  %v458_v30 = vld [vmem:[%s4849_s1 + $0x4e0] sm:$0xff]  ;;  %v89_v31 = vld [vmem:[%s4850_s0 + $0x258] sm:$0xff] }
  0x42   :  { %687 = vmatmul.mubr.f32.gmra.mxu0 %v104_v32  ;;  %2041 = vmatpush3.msra.mxu1 %v339_v33  ;;  %v442_v32 = vld [vmem:[%s4849_s1 + $0x460] sm:$0xff]  ;;  %v88_v33 = vld [vmem:[%s4850_s0 + $0x250] sm:$0xff] }
  0x43   :  { %2120 = vmatprep.subr.mxu0 %v387_v34  ;;  %2042 = vmatprep.subr.mxu1 %v354_v35  ;;  %v91_v34 = vld [vmem:[%s4850_s0 + $0x268] sm:$0xff]  ;;  %v425_v35 = vld [vmem:[%s4849_s1 + $0x3d8] sm:$0xff] }
  0x44   :  { %2121 = vmatpush3.msra.mxu0 %v371_v36  ;;  %731 = vmatprep.mubr.f32.mxu1 %v267_v37  ;;  %v90_v36 = vld [vmem:[%s4850_s0 + $0x260] sm:$0xff]  ;;  %v409_v37 = vld [vmem:[%s4849_s1 + $0x358] sm:$0xff] }
  0x45   :  { %2043 = vmatpush3.msra.mxu1 %v338_v38  ;;  %2122 = vmatprep.subr.mxu0 %v386_v39  ;;  %v457_v38 = vld [vmem:[%s4849_s1 + $0x4d8] sm:$0xff]  ;;  %v107_v39 = vld [vmem:[%s4850_s0 + $0x2e8] sm:$0xff] }
  0x46   :  { %691 = vmatprep.mubr.f32.mxu0 %v123_v40  ;;  %732 = vmatmul.mubr.f32.gmra.mxu1 %v266_v41  ;;  %v441_v40 = vld [vmem:[%s4849_s1 + $0x458] sm:$0xff]  ;;  %v106_v41 = vld [vmem:[%s4850_s0 + $0x2e0] sm:$0xff] }
  0x47   :  { %2044 = vmatprep.subr.mxu1 %v353_v42  ;;  %2123 = vmatpush3.msra.mxu0 %v370_v43  ;;  %v109_v42 = vld [vmem:[%s4850_s0 + $0x2f8] sm:$0xff]  ;;  %v424_v43 = vld [vmem:[%s4849_s1 + $0x3d0] sm:$0xff] }
  0x48   :  { %692 = vmatmul.mubr.f32.gmra.mxu0 %v122_v44  ;;  %2045 = vmatpush3.msra.mxu1 %v337_v45  ;;  %v108_v44 = vld [vmem:[%s4850_s0 + $0x2f0] sm:$0xff] }
  0x49   :  { %2124 = vmatprep.subr.mxu0 %v385_v46  ;;  %2046 = vmatprep.subr.mxu1 %v352_v47  ;;  %v408_v45 = vld [vmem:[%s4849_s1 + $0x350] sm:$0xff]  ;;  %v125_v47 = vld [vmem:[%s4850_s0 + $0x378] sm:$0xff] }
  0x4a   :  { %2125 = vmatpush3.msra.mxu0 %v369_v48  ;;  %736 = vmatprep.mubr.f32.mxu1 %v285_v49  ;;  %v456_v46 = vld [vmem:[%s4849_s1 + $0x4d0] sm:$0xff] }
  0x4b   :  { %2047 = vmatpush3.msra.mxu1 %v336_v50  ;;  %2126 = vmatprep.subr.mxu0 %v384_v51  ;;  %v440_v48 = vld [vmem:[%s4849_s1 + $0x450] sm:$0xff]  ;;  %v127_v50 = vld [vmem:[%s4850_s0 + $0x388] sm:$0xff] }
  0x4c   :  { %696 = vmatprep.mubr.f32.mxu0 %v141_v52  ;;  %737 = vmatmul.mubr.f32.gmra.mxu1 %v284_v53  ;;  %v124_v49 = vld [vmem:[%s4850_s0 + $0x370] sm:$0xff]  ;;  %v423_v51 = vld [vmem:[%s4849_s1 + $0x3c8] sm:$0xff]  ;;  %v126_v52 = vld [vmem:[%s4850_s0 + $0x380] sm:$0xff] }
  0x4d   :  { %2048 = vmatprep.subr.mxu1 %v351_v54  ;;  %2127 = vmatpush3.msra.mxu0 %v368_v55  ;;  %v407_v53 = vld [vmem:[%s4849_s1 + $0x348] sm:$0xff] }
  0x4e   :  { %697 = vmatmul.mubr.f32.gmra.mxu0 %v140_v56  ;;  %2049 = vmatpush3.msra.mxu1 %v335_v57  ;;  %v455_v54 = vld [vmem:[%s4849_s1 + $0x4c8] sm:$0xff]  ;;  %v142_v57 = vld [vmem:[%s4850_s0 + $0x400] sm:$0xff] }
  0x4f   :  { %2128 = vmatprep.subr.mxu0 %v383_v58  ;;  %2050 = vmatprep.subr.mxu1 %v350_v59  ;;  %v143_v55 = vld [vmem:[%s4850_s0 + $0x408] sm:$0xff]  ;;  %v145_v58 = vld [vmem:[%s4850_s0 + $0x418] sm:$0xff]  ;;  %v422_v59 = vld [vmem:[%s4849_s1 + $0x3c0] sm:$0xff] }
  0x50   :  { %2129 = vmatpush3.msra.mxu0 %v367_v60  ;;  %2051 = vmatpush3.msra.mxu1 %v334_v61  ;;  %v439_v56 = vld [vmem:[%s4849_s1 + $0x448] sm:$0xff]  ;;  %v144_v60 = vld [vmem:[%s4850_s0 + $0x410] sm:$0xff]  ;;  %v406_v61 = vld [vmem:[%s4849_s1 + $0x340] sm:$0xff] }
  0x51   :  { %806 = vmatprep.mubr.f32.mxu1 %v17_v62  ;;  %2130 = vmatprep.subr.mxu0 %v382_v63  ;;  %v454_v62 = vld [vmem:[%s4849_s1 + $0x4c0] sm:$0xff]  ;;  %v161_v63 = vld [vmem:[%s4850_s0 + $0x498] sm:$0xff] }
  0x52   :  { %807 = vmatmul.mubr.f32.vlgmr.msra.gmra.mxu1 %v16_v0  ;;  %2131 = vmatpush3.msra.mxu0 %v366_v1  ;;  %v438_v0 = vld [vmem:[%s4849_s1 + $0x440] sm:$0xff]  ;;  %v160_v1 = vld [vmem:[%s4850_s0 + $0x490] sm:$0xff] }
  0x53   :  { %951 = vmatprep.mubr.f32.mxu0 %v19_v2  ;;  %2180 = vmatprep.subr.mxu1 %v429_v3  ;;  %v163_v2 = vld [vmem:[%s4850_s0 + $0x4a8] sm:$0xff]  ;;  %v421_v3 = vld [vmem:[%s4849_s1 + $0x3b8] sm:$0xff] }
  0x54   :  { %952 = vmatmul.mubr.f32.vlgmr.msra.gmra.mxu0 %v18_v4  ;;  %2181 = vmatpush3.msra.mxu1 %v413_v5  ;;  %v162_v4 = vld [vmem:[%s4850_s0 + $0x4a0] sm:$0xff]  ;;  %v405_v5 = vld [vmem:[%s4849_s1 + $0x338] sm:$0xff] }
  0x55   :  { %2260 = vmatprep.subr.mxu0 %v461_v6  ;;  %811 = vmatprep.mubr.f32.mxu1 %v35_v7  ;;  %v453_v6 = vld [vmem:[%s4849_s1 + $0x4b8] sm:$0xff]  ;;  %v179_v7 = vld [vmem:[%s4850_s0 + $0x528] sm:$0xff] }
  0x56   :  { %2261 = vmatpush3.msra.mxu0 %v445_v8  ;;  %812 = vmatmul.mubr.f32.gmra.mxu1 %v34_v9  ;;  %v437_v8 = vld [vmem:[%s4849_s1 + $0x438] sm:$0xff]  ;;  %v178_v9 = vld [vmem:[%s4850_s0 + $0x520] sm:$0xff] }
  0x57   :  { %956 = vmatprep.mubr.f32.mxu0 %v37_v10  ;;  %2182 = vmatprep.subr.mxu1 %v428_v11  ;;  %v181_v10 = vld [vmem:[%s4850_s0 + $0x538] sm:$0xff]  ;;  %v420_v11 = vld [vmem:[%s4849_s1 + $0x3b0] sm:$0xff] }
  0x58   :  { %957 = vmatmul.mubr.f32.gmra.mxu0 %v36_v12  ;;  %2183 = vmatpush3.msra.mxu1 %v412_v13  ;;  %v180_v12 = vld [vmem:[%s4850_s0 + $0x530] sm:$0xff] }
  0x59   :  { %2262 = vmatprep.subr.mxu0 %v460_v14  ;;  %816 = vmatprep.mubr.f32.mxu1 %v53_v15  ;;  %v404_v13 = vld [vmem:[%s4849_s1 + $0x330] sm:$0xff]  ;;  %v197_v15 = vld [vmem:[%s4850_s0 + $0x5b8] sm:$0xff] }
  0x5a   :  { %2263 = vmatpush3.msra.mxu0 %v444_v16  ;;  %817 = vmatmul.mubr.f32.gmra.mxu1 %v52_v17  ;;  %v452_v14 = vld [vmem:[%s4849_s1 + $0x4b0] sm:$0xff] }
  0x5b   :  { %961 = vmatprep.mubr.f32.mxu0 %v55_v18  ;;  %2184 = vmatprep.subr.mxu1 %v427_v19  ;;  %v436_v16 = vld [vmem:[%s4849_s1 + $0x430] sm:$0xff]  ;;  %v199_v18 = vld [vmem:[%s4850_s0 + $0x5c8] sm:$0xff] }
  0x5c   :  { %962 = vmatmul.mubr.f32.gmra.mxu0 %v54_v20  ;;  %2185 = vmatpush3.msra.mxu1 %v411_v21  ;;  %v196_v17 = vld [vmem:[%s4850_s0 + $0x5b0] sm:$0xff]  ;;  %v419_v19 = vld [vmem:[%s4849_s1 + $0x3a8] sm:$0xff]  ;;  %v198_v20 = vld [vmem:[%s4850_s0 + $0x5c0] sm:$0xff] }
  0x5d   :  { %2264 = vmatprep.subr.mxu0 %v459_v22  ;;  %821 = vmatprep.mubr.f32.mxu1 %v71_v23  ;;  %v403_v21 = vld [vmem:[%s4849_s1 + $0x328] sm:$0xff] }
  0x5e   :  { %2265 = vmatpush3.msra.mxu0 %v443_v24  ;;  %822 = vmatmul.mubr.f32.gmra.mxu1 %v70_v25  ;;  %v451_v22 = vld [vmem:[%s4849_s1 + $0x4a8] sm:$0xff]  ;;  %v214_v25 = vld [vmem:[%s4850_s0 + $0x640] sm:$0xff] }
  0x5f   :  { %966 = vmatprep.mubr.f32.mxu0 %v73_v26  ;;  %2186 = vmatprep.subr.mxu1 %v426_v27  ;;  %v215_v23 = vld [vmem:[%s4850_s0 + $0x648] sm:$0xff]  ;;  %v217_v26 = vld [vmem:[%s4850_s0 + $0x658] sm:$0xff]  ;;  %v418_v27 = vld [vmem:[%s4849_s1 + $0x3a0] sm:$0xff] }
  0x60   :  { %967 = vmatmul.mubr.f32.gmra.mxu0 %v72_v28  ;;  %2187 = vmatpush3.msra.mxu1 %v410_v29  ;;  %v435_v24 = vld [vmem:[%s4849_s1 + $0x428] sm:$0xff]  ;;  %v216_v28 = vld [vmem:[%s4850_s0 + $0x650] sm:$0xff]  ;;  %v402_v29 = vld [vmem:[%s4849_s1 + $0x320] sm:$0xff] }
  0x61   :  { %2266 = vmatprep.subr.mxu0 %v458_v30  ;;  %826 = vmatprep.mubr.f32.mxu1 %v89_v31  ;;  %v450_v30 = vld [vmem:[%s4849_s1 + $0x4a0] sm:$0xff]  ;;  %v233_v31 = vld [vmem:[%s4850_s0 + $0x6d8] sm:$0xff] }
  0x62   :  { %2267 = vmatpush3.msra.mxu0 %v442_v32  ;;  %827 = vmatmul.mubr.f32.gmra.mxu1 %v88_v33  ;;  %v434_v32 = vld [vmem:[%s4849_s1 + $0x420] sm:$0xff]  ;;  %v232_v33 = vld [vmem:[%s4850_s0 + $0x6d0] sm:$0xff] }
  0x63   :  { %971 = vmatprep.mubr.f32.mxu0 %v91_v34  ;;  %2188 = vmatprep.subr.mxu1 %v425_v35  ;;  %v235_v34 = vld [vmem:[%s4850_s0 + $0x6e8] sm:$0xff]  ;;  %v417_v35 = vld [vmem:[%s4849_s1 + $0x398] sm:$0xff] }
  0x64   :  { %972 = vmatmul.mubr.f32.gmra.mxu0 %v90_v36  ;;  %2189 = vmatpush3.msra.mxu1 %v409_v37  ;;  %v234_v36 = vld [vmem:[%s4850_s0 + $0x6e0] sm:$0xff]  ;;  %v401_v37 = vld [vmem:[%s4849_s1 + $0x318] sm:$0xff] }
  0x65   :  { %2268 = vmatprep.subr.mxu0 %v457_v38  ;;  %831 = vmatprep.mubr.f32.mxu1 %v107_v39  ;;  %v449_v38 = vld [vmem:[%s4849_s1 + $0x498] sm:$0xff]  ;;  %v251_v39 = vld [vmem:[%s4850_s0 + $0x768] sm:$0xff] }
  0x66   :  { %2269 = vmatpush3.msra.mxu0 %v441_v40  ;;  %832 = vmatmul.mubr.f32.gmra.mxu1 %v106_v41  ;;  %v433_v40 = vld [vmem:[%s4849_s1 + $0x418] sm:$0xff]  ;;  %v250_v41 = vld [vmem:[%s4850_s0 + $0x760] sm:$0xff] }
  0x67   :  { %976 = vmatprep.mubr.f32.mxu0 %v109_v42  ;;  %2190 = vmatprep.subr.mxu1 %v424_v43  ;;  %v253_v42 = vld [vmem:[%s4850_s0 + $0x778] sm:$0xff]  ;;  %v416_v43 = vld [vmem:[%s4849_s1 + $0x390] sm:$0xff] }
  0x68   :  { %977 = vmatmul.mubr.f32.gmra.mxu0 %v108_v44  ;;  %2191 = vmatpush3.msra.mxu1 %v408_v45  ;;  %v252_v44 = vld [vmem:[%s4850_s0 + $0x770] sm:$0xff] }
  0x69   :  { %2270 = vmatprep.subr.mxu0 %v456_v46  ;;  %836 = vmatprep.mubr.f32.mxu1 %v125_v47  ;;  %v400_v45 = vld [vmem:[%s4849_s1 + $0x310] sm:$0xff]  ;;  %v269_v47 = vld [vmem:[%s4850_s0 + $0x7f8] sm:$0xff] }
  0x6a   :  { %2271 = vmatpush3.msra.mxu0 %v440_v48  ;;  %837 = vmatmul.mubr.f32.gmra.mxu1 %v124_v49  ;;  %v448_v46 = vld [vmem:[%s4849_s1 + $0x490] sm:$0xff] }
  0x6b   :  { %981 = vmatprep.mubr.f32.mxu0 %v127_v50  ;;  %2192 = vmatprep.subr.mxu1 %v423_v51  ;;  %v432_v48 = vld [vmem:[%s4849_s1 + $0x410] sm:$0xff]  ;;  %v271_v50 = vld [vmem:[%s4850_s0 + $0x808] sm:$0xff] }
  0x6c   :  { %982 = vmatmul.mubr.f32.gmra.mxu0 %v126_v52  ;;  %2193 = vmatpush3.msra.mxu1 %v407_v53  ;;  %v268_v49 = vld [vmem:[%s4850_s0 + $0x7f0] sm:$0xff]  ;;  %v415_v51 = vld [vmem:[%s4849_s1 + $0x388] sm:$0xff]  ;;  %v270_v52 = vld [vmem:[%s4850_s0 + $0x800] sm:$0xff] }
  0x6d   :  { %2272 = vmatprep.subr.mxu0 %v455_v54  ;;  %841 = vmatprep.mubr.f32.mxu1 %v143_v55  ;;  %v399_v53 = vld [vmem:[%s4849_s1 + $0x308] sm:$0xff] }
  0x6e   :  { %2273 = vmatpush3.msra.mxu0 %v439_v56  ;;  %842 = vmatmul.mubr.f32.gmra.mxu1 %v142_v57  ;;  %v447_v54 = vld [vmem:[%s4849_s1 + $0x488] sm:$0xff]  ;;  %v286_v57 = vld [vmem:[%s4850_s0 + $0x880] sm:$0xff] }
  0x6f   :  { %986 = vmatprep.mubr.f32.mxu0 %v145_v58  ;;  %2194 = vmatprep.subr.mxu1 %v422_v59  ;;  %v287_v55 = vld [vmem:[%s4850_s0 + $0x888] sm:$0xff]  ;;  %v289_v58 = vld [vmem:[%s4850_s0 + $0x898] sm:$0xff]  ;;  %v414_v59 = vld [vmem:[%s4849_s1 + $0x380] sm:$0xff] }
  0x70   :  { %987 = vmatmul.mubr.f32.gmra.mxu0 %v144_v60  ;;  %2195 = vmatpush3.msra.mxu1 %v406_v61  ;;  %v431_v56 = vld [vmem:[%s4849_s1 + $0x408] sm:$0xff]  ;;  %v288_v60 = vld [vmem:[%s4850_s0 + $0x890] sm:$0xff]  ;;  %v398_v61 = vld [vmem:[%s4849_s1 + $0x300] sm:$0xff] }
  0x71   :  { %2274 = vmatprep.subr.mxu0 %v454_v62  ;;  %846 = vmatprep.mubr.f32.mxu1 %v161_v63  ;;  %v446_v62 = vld [vmem:[%s4849_s1 + $0x480] sm:$0xff]  ;;  %v21_v63 = vld [vmem:[%s4850_s0 + $0x38] sm:$0xff] }
  0x72   :  { %2275 = vmatpush3.msra.mxu0 %v438_v0  ;;  %847 = vmatmul.mubr.f32.gmra.mxu1 %v160_v1  ;;  %v430_v0 = vld [vmem:[%s4849_s1 + $0x400] sm:$0xff]  ;;  %v20_v1 = vld [vmem:[%s4850_s0 + $0x30] sm:$0xff] }
  0x73   :  { %991 = vmatprep.mubr.f32.mxu0 %v163_v2  ;;  %2196 = vmatprep.subr.mxu1 %v421_v3  ;;  %v23_v2 = vld [vmem:[%s4850_s0 + $0x48] sm:$0xff]  ;;  %v493_v3 = vld [vmem:[%s4849_s1 + $0x5f8] sm:$0xff] }
  0x74   :  { %992 = vmatmul.mubr.f32.gmra.mxu0 %v162_v4  ;;  %2197 = vmatpush3.msra.mxu1 %v405_v5  ;;  %v22_v4 = vld [vmem:[%s4850_s0 + $0x40] sm:$0xff]  ;;  %v477_v5 = vld [vmem:[%s4849_s1 + $0x578] sm:$0xff] }
  0x75   :  { %2276 = vmatprep.subr.mxu0 %v453_v6  ;;  %851 = vmatprep.mubr.f32.mxu1 %v179_v7  ;;  %v525_v6 = vld [vmem:[%s4849_s1 + $0x6f8] sm:$0xff]  ;;  %v39_v7 = vld [vmem:[%s4850_s0 + $0xc8] sm:$0xff] }
  0x76   :  { %2277 = vmatpush3.msra.mxu0 %v437_v8  ;;  %852 = vmatmul.mubr.f32.gmra.mxu1 %v178_v9  ;;  %v509_v8 = vld [vmem:[%s4849_s1 + $0x678] sm:$0xff]  ;;  %v38_v9 = vld [vmem:[%s4850_s0 + $0xc0] sm:$0xff] }
  0x77   :  { %996 = vmatprep.mubr.f32.mxu0 %v181_v10  ;;  %2198 = vmatprep.subr.mxu1 %v420_v11  ;;  %v41_v10 = vld [vmem:[%s4850_s0 + $0xd8] sm:$0xff]  ;;  %v492_v11 = vld [vmem:[%s4849_s1 + $0x5f0] sm:$0xff] }
  0x78   :  { %997 = vmatmul.mubr.f32.gmra.mxu0 %v180_v12  ;;  %2199 = vmatpush3.msra.mxu1 %v404_v13  ;;  %v40_v12 = vld [vmem:[%s4850_s0 + $0xd0] sm:$0xff] }
  0x79   :  { %2278 = vmatprep.subr.mxu0 %v452_v14  ;;  %856 = vmatprep.mubr.f32.mxu1 %v197_v15  ;;  %v476_v13 = vld [vmem:[%s4849_s1 + $0x570] sm:$0xff]  ;;  %v57_v15 = vld [vmem:[%s4850_s0 + $0x158] sm:$0xff] }
  0x7a   :  { %2279 = vmatpush3.msra.mxu0 %v436_v16  ;;  %857 = vmatmul.mubr.f32.gmra.mxu1 %v196_v17  ;;  %v524_v14 = vld [vmem:[%s4849_s1 + $0x6f0] sm:$0xff] }
  0x7b   :  { %1001 = vmatprep.mubr.f32.mxu0 %v199_v18  ;;  %2200 = vmatprep.subr.mxu1 %v419_v19  ;;  %v508_v16 = vld [vmem:[%s4849_s1 + $0x670] sm:$0xff]  ;;  %v59_v18 = vld [vmem:[%s4850_s0 + $0x168] sm:$0xff] }
  0x7c   :  { %1002 = vmatmul.mubr.f32.gmra.mxu0 %v198_v20  ;;  %2201 = vmatpush3.msra.mxu1 %v403_v21  ;;  %v56_v17 = vld [vmem:[%s4850_s0 + $0x150] sm:$0xff]  ;;  %v491_v19 = vld [vmem:[%s4849_s1 + $0x5e8] sm:$0xff]  ;;  %v58_v20 = vld [vmem:[%s4850_s0 + $0x160] sm:$0xff] }
  0x7d   :  { %2280 = vmatprep.subr.mxu0 %v451_v22  ;;  %861 = vmatprep.mubr.f32.mxu1 %v215_v23  ;;  %v475_v21 = vld [vmem:[%s4849_s1 + $0x568] sm:$0xff] }
  0x7e   :  { %2281 = vmatpush3.msra.mxu0 %v435_v24  ;;  %862 = vmatmul.mubr.f32.gmra.mxu1 %v214_v25  ;;  %v523_v22 = vld [vmem:[%s4849_s1 + $0x6e8] sm:$0xff]  ;;  %v74_v25 = vld [vmem:[%s4850_s0 + $0x1e0] sm:$0xff] }
  0x7f   :  { %1006 = vmatprep.mubr.f32.mxu0 %v217_v26  ;;  %2202 = vmatprep.subr.mxu1 %v418_v27  ;;  %v75_v23 = vld [vmem:[%s4850_s0 + $0x1e8] sm:$0xff]  ;;  %v77_v26 = vld [vmem:[%s4850_s0 + $0x1f8] sm:$0xff]  ;;  %v490_v27 = vld [vmem:[%s4849_s1 + $0x5e0] sm:$0xff] }
  0x80   :  { %1007 = vmatmul.mubr.f32.gmra.mxu0 %v216_v28  ;;  %2203 = vmatpush3.msra.mxu1 %v402_v29  ;;  %v507_v24 = vld [vmem:[%s4849_s1 + $0x668] sm:$0xff]  ;;  %v76_v28 = vld [vmem:[%s4850_s0 + $0x1f0] sm:$0xff]  ;;  %v474_v29 = vld [vmem:[%s4849_s1 + $0x560] sm:$0xff] }
  0x81   :  { %2282 = vmatprep.subr.mxu0 %v450_v30  ;;  %866 = vmatprep.mubr.f32.mxu1 %v233_v31  ;;  %v522_v30 = vld [vmem:[%s4849_s1 + $0x6e0] sm:$0xff]  ;;  %v93_v31 = vld [vmem:[%s4850_s0 + $0x278] sm:$0xff] }
  0x82   :  { %2283 = vmatpush3.msra.mxu0 %v434_v32  ;;  %867 = vmatmul.mubr.f32.gmra.mxu1 %v232_v33  ;;  %v506_v32 = vld [vmem:[%s4849_s1 + $0x660] sm:$0xff]  ;;  %v92_v33 = vld [vmem:[%s4850_s0 + $0x270] sm:$0xff] }
  0x83   :  { %1011 = vmatprep.mubr.f32.mxu0 %v235_v34  ;;  %2204 = vmatprep.subr.mxu1 %v417_v35  ;;  %v95_v34 = vld [vmem:[%s4850_s0 + $0x288] sm:$0xff]  ;;  %v489_v35 = vld [vmem:[%s4849_s1 + $0x5d8] sm:$0xff] }
  0x84   :  { %1012 = vmatmul.mubr.f32.gmra.mxu0 %v234_v36  ;;  %2205 = vmatpush3.msra.mxu1 %v401_v37  ;;  %v94_v36 = vld [vmem:[%s4850_s0 + $0x280] sm:$0xff]  ;;  %v473_v37 = vld [vmem:[%s4849_s1 + $0x558] sm:$0xff] }
  0x85   :  { %2284 = vmatprep.subr.mxu0 %v449_v38  ;;  %871 = vmatprep.mubr.f32.mxu1 %v251_v39  ;;  %v521_v38 = vld [vmem:[%s4849_s1 + $0x6d8] sm:$0xff]  ;;  %v111_v39 = vld [vmem:[%s4850_s0 + $0x308] sm:$0xff] }
  0x86   :  { %2285 = vmatpush3.msra.mxu0 %v433_v40  ;;  %872 = vmatmul.mubr.f32.gmra.mxu1 %v250_v41  ;;  %v505_v40 = vld [vmem:[%s4849_s1 + $0x658] sm:$0xff]  ;;  %v110_v41 = vld [vmem:[%s4850_s0 + $0x300] sm:$0xff] }
  0x87   :  { %1016 = vmatprep.mubr.f32.mxu0 %v253_v42  ;;  %2206 = vmatprep.subr.mxu1 %v416_v43  ;;  %v113_v42 = vld [vmem:[%s4850_s0 + $0x318] sm:$0xff]  ;;  %v488_v43 = vld [vmem:[%s4849_s1 + $0x5d0] sm:$0xff] }
  0x88   :  { %1017 = vmatmul.mubr.f32.gmra.mxu0 %v252_v44  ;;  %2207 = vmatpush3.msra.mxu1 %v400_v45  ;;  %v112_v44 = vld [vmem:[%s4850_s0 + $0x310] sm:$0xff] }
  0x89   :  { %2286 = vmatprep.subr.mxu0 %v448_v46  ;;  %876 = vmatprep.mubr.f32.mxu1 %v269_v47  ;;  %v472_v45 = vld [vmem:[%s4849_s1 + $0x550] sm:$0xff]  ;;  %v129_v47 = vld [vmem:[%s4850_s0 + $0x398] sm:$0xff] }
  0x8a   :  { %2287 = vmatpush3.msra.mxu0 %v432_v48  ;;  %877 = vmatmul.mubr.f32.gmra.mxu1 %v268_v49  ;;  %v520_v46 = vld [vmem:[%s4849_s1 + $0x6d0] sm:$0xff] }
  0x8b   :  { %1021 = vmatprep.mubr.f32.mxu0 %v271_v50  ;;  %2208 = vmatprep.subr.mxu1 %v415_v51  ;;  %v504_v48 = vld [vmem:[%s4849_s1 + $0x650] sm:$0xff]  ;;  %v131_v50 = vld [vmem:[%s4850_s0 + $0x3a8] sm:$0xff] }
  0x8c   :  { %1022 = vmatmul.mubr.f32.gmra.mxu0 %v270_v52  ;;  %2209 = vmatpush3.msra.mxu1 %v399_v53  ;;  %v128_v49 = vld [vmem:[%s4850_s0 + $0x390] sm:$0xff]  ;;  %v487_v51 = vld [vmem:[%s4849_s1 + $0x5c8] sm:$0xff]  ;;  %v130_v52 = vld [vmem:[%s4850_s0 + $0x3a0] sm:$0xff] }
  0x8d   :  { %2288 = vmatprep.subr.mxu0 %v447_v54  ;;  %881 = vmatprep.mubr.f32.mxu1 %v287_v55  ;;  %v471_v53 = vld [vmem:[%s4849_s1 + $0x548] sm:$0xff] }
  0x8e   :  { %2289 = vmatpush3.msra.mxu0 %v431_v56  ;;  %882 = vmatmul.mubr.f32.gmra.mxu1 %v286_v57  ;;  %v519_v54 = vld [vmem:[%s4849_s1 + $0x6c8] sm:$0xff]  ;;  %v146_v57 = vld [vmem:[%s4850_s0 + $0x420] sm:$0xff] }
  0x8f   :  { %1026 = vmatprep.mubr.f32.mxu0 %v289_v58  ;;  %2210 = vmatprep.subr.mxu1 %v414_v59  ;;  %v147_v55 = vld [vmem:[%s4850_s0 + $0x428] sm:$0xff]  ;;  %v149_v58 = vld [vmem:[%s4850_s0 + $0x438] sm:$0xff]  ;;  %v486_v59 = vld [vmem:[%s4849_s1 + $0x5c0] sm:$0xff] }
  0x90   :  { %1027 = vmatmul.mubr.f32.gmra.mxu0 %v288_v60  ;;  %2211 = vmatpush3.msra.mxu1 %v398_v61  ;;  %v503_v56 = vld [vmem:[%s4849_s1 + $0x648] sm:$0xff]  ;;  %v148_v60 = vld [vmem:[%s4850_s0 + $0x430] sm:$0xff]  ;;  %v470_v61 = vld [vmem:[%s4849_s1 + $0x540] sm:$0xff] }
  0x91   :  { %2290 = vmatprep.subr.mxu0 %v446_v62  ;;  %1096 = vmatprep.mubr.f32.mxu1 %v21_v63  ;;  %v518_v62 = vld [vmem:[%s4849_s1 + $0x6c0] sm:$0xff]  ;;  %v165_v63 = vld [vmem:[%s4850_s0 + $0x4b8] sm:$0xff] }
  0x92   :  { %2291 = vmatpush3.msra.mxu0 %v430_v0  ;;  %1097 = vmatmul.mubr.f32.vlgmr.msra.gmra.mxu1 %v20_v1  ;;  %v502_v0 = vld [vmem:[%s4849_s1 + $0x640] sm:$0xff]  ;;  %v164_v1 = vld [vmem:[%s4850_s0 + $0x4b0] sm:$0xff] }
  0x93   :  { %1241 = vmatprep.mubr.f32.mxu0 %v23_v2  ;;  %2340 = vmatprep.subr.mxu1 %v493_v3  ;;  %v167_v2 = vld [vmem:[%s4850_s0 + $0x4c8] sm:$0xff]  ;;  %v485_v3 = vld [vmem:[%s4849_s1 + $0x5b8] sm:$0xff] }
  0x94   :  { %1242 = vmatmul.mubr.f32.vlgmr.msra.gmra.mxu0 %v22_v4  ;;  %2341 = vmatpush3.msra.mxu1 %v477_v5  ;;  %v166_v4 = vld [vmem:[%s4850_s0 + $0x4c0] sm:$0xff]  ;;  %v469_v5 = vld [vmem:[%s4849_s1 + $0x538] sm:$0xff] }
  0x95   :  { %2420 = vmatprep.subr.mxu0 %v525_v6  ;;  %1101 = vmatprep.mubr.f32.mxu1 %v39_v7  ;;  %v517_v6 = vld [vmem:[%s4849_s1 + $0x6b8] sm:$0xff]  ;;  %v183_v7 = vld [vmem:[%s4850_s0 + $0x548] sm:$0xff] }
  0x96   :  { %2421 = vmatpush3.msra.mxu0 %v509_v8  ;;  %1102 = vmatmul.mubr.f32.gmra.mxu1 %v38_v9  ;;  %v501_v8 = vld [vmem:[%s4849_s1 + $0x638] sm:$0xff]  ;;  %v182_v9 = vld [vmem:[%s4850_s0 + $0x540] sm:$0xff] }
  0x97   :  { %1246 = vmatprep.mubr.f32.mxu0 %v41_v10  ;;  %2342 = vmatprep.subr.mxu1 %v492_v11  ;;  %v185_v10 = vld [vmem:[%s4850_s0 + $0x558] sm:$0xff]  ;;  %v484_v11 = vld [vmem:[%s4849_s1 + $0x5b0] sm:$0xff] }
  0x98   :  { %1247 = vmatmul.mubr.f32.gmra.mxu0 %v40_v12  ;;  %2343 = vmatpush3.msra.mxu1 %v476_v13  ;;  %v184_v12 = vld [vmem:[%s4850_s0 + $0x550] sm:$0xff] }
  0x99   :  { %2422 = vmatprep.subr.mxu0 %v524_v14  ;;  %1106 = vmatprep.mubr.f32.mxu1 %v57_v15  ;;  %v468_v13 = vld [vmem:[%s4849_s1 + $0x530] sm:$0xff]  ;;  %v201_v15 = vld [vmem:[%s4850_s0 + $0x5d8] sm:$0xff] }
  0x9a   :  { %2423 = vmatpush3.msra.mxu0 %v508_v16  ;;  %1107 = vmatmul.mubr.f32.gmra.mxu1 %v56_v17  ;;  %v516_v14 = vld [vmem:[%s4849_s1 + $0x6b0] sm:$0xff] }
  0x9b   :  { %1251 = vmatprep.mubr.f32.mxu0 %v59_v18  ;;  %2344 = vmatprep.subr.mxu1 %v491_v19  ;;  %v500_v16 = vld [vmem:[%s4849_s1 + $0x630] sm:$0xff]  ;;  %v203_v18 = vld [vmem:[%s4850_s0 + $0x5e8] sm:$0xff] }
  0x9c   :  { %1252 = vmatmul.mubr.f32.gmra.mxu0 %v58_v20  ;;  %2345 = vmatpush3.msra.mxu1 %v475_v21  ;;  %v200_v17 = vld [vmem:[%s4850_s0 + $0x5d0] sm:$0xff]  ;;  %v483_v19 = vld [vmem:[%s4849_s1 + $0x5a8] sm:$0xff]  ;;  %v202_v20 = vld [vmem:[%s4850_s0 + $0x5e0] sm:$0xff] }
  0x9d   :  { %2424 = vmatprep.subr.mxu0 %v523_v22  ;;  %1111 = vmatprep.mubr.f32.mxu1 %v75_v23  ;;  %v467_v21 = vld [vmem:[%s4849_s1 + $0x528] sm:$0xff] }
  0x9e   :  { %2425 = vmatpush3.msra.mxu0 %v507_v24  ;;  %1112 = vmatmul.mubr.f32.gmra.mxu1 %v74_v25  ;;  %v515_v22 = vld [vmem:[%s4849_s1 + $0x6a8] sm:$0xff]  ;;  %v218_v25 = vld [vmem:[%s4850_s0 + $0x660] sm:$0xff] }
  0x9f   :  { %1256 = vmatprep.mubr.f32.mxu0 %v77_v26  ;;  %2346 = vmatprep.subr.mxu1 %v490_v27  ;;  %v219_v23 = vld [vmem:[%s4850_s0 + $0x668] sm:$0xff]  ;;  %v221_v26 = vld [vmem:[%s4850_s0 + $0x678] sm:$0xff]  ;;  %v482_v27 = vld [vmem:[%s4849_s1 + $0x5a0] sm:$0xff] }
  0xa0   :  { %1257 = vmatmul.mubr.f32.gmra.mxu0 %v76_v28  ;;  %2347 = vmatpush3.msra.mxu1 %v474_v29  ;;  %v499_v24 = vld [vmem:[%s4849_s1 + $0x628] sm:$0xff]  ;;  %v220_v28 = vld [vmem:[%s4850_s0 + $0x670] sm:$0xff]  ;;  %v466_v29 = vld [vmem:[%s4849_s1 + $0x520] sm:$0xff] }
  0xa1   :  { %2426 = vmatprep.subr.mxu0 %v522_v30  ;;  %1116 = vmatprep.mubr.f32.mxu1 %v93_v31  ;;  %v514_v30 = vld [vmem:[%s4849_s1 + $0x6a0] sm:$0xff]  ;;  %v237_v31 = vld [vmem:[%s4850_s0 + $0x6f8] sm:$0xff] }
  0xa2   :  { %2427 = vmatpush3.msra.mxu0 %v506_v32  ;;  %1117 = vmatmul.mubr.f32.gmra.mxu1 %v92_v33  ;;  %v498_v32 = vld [vmem:[%s4849_s1 + $0x620] sm:$0xff]  ;;  %v236_v33 = vld [vmem:[%s4850_s0 + $0x6f0] sm:$0xff] }
  0xa3   :  { %1261 = vmatprep.mubr.f32.mxu0 %v95_v34  ;;  %2348 = vmatprep.subr.mxu1 %v489_v35  ;;  %v239_v34 = vld [vmem:[%s4850_s0 + $0x708] sm:$0xff]  ;;  %v481_v35 = vld [vmem:[%s4849_s1 + $0x598] sm:$0xff] }
  0xa4   :  { %1262 = vmatmul.mubr.f32.gmra.mxu0 %v94_v36  ;;  %2349 = vmatpush3.msra.mxu1 %v473_v37  ;;  %v238_v36 = vld [vmem:[%s4850_s0 + $0x700] sm:$0xff]  ;;  %v465_v37 = vld [vmem:[%s4849_s1 + $0x518] sm:$0xff] }
  0xa5   :  { %2428 = vmatprep.subr.mxu0 %v521_v38  ;;  %1121 = vmatprep.mubr.f32.mxu1 %v111_v39  ;;  %v513_v38 = vld [vmem:[%s4849_s1 + $0x698] sm:$0xff]  ;;  %v255_v39 = vld [vmem:[%s4850_s0 + $0x788] sm:$0xff] }
  0xa6   :  { %2429 = vmatpush3.msra.mxu0 %v505_v40  ;;  %1122 = vmatmul.mubr.f32.gmra.mxu1 %v110_v41  ;;  %v497_v40 = vld [vmem:[%s4849_s1 + $0x618] sm:$0xff]  ;;  %v254_v41 = vld [vmem:[%s4850_s0 + $0x780] sm:$0xff] }
  0xa7   :  { %1266 = vmatprep.mubr.f32.mxu0 %v113_v42  ;;  %2350 = vmatprep.subr.mxu1 %v488_v43  ;;  %v257_v42 = vld [vmem:[%s4850_s0 + $0x798] sm:$0xff]  ;;  %v480_v43 = vld [vmem:[%s4849_s1 + $0x590] sm:$0xff] }
  0xa8   :  { %1267 = vmatmul.mubr.f32.gmra.mxu0 %v112_v44  ;;  %2351 = vmatpush3.msra.mxu1 %v472_v45  ;;  %v256_v44 = vld [vmem:[%s4850_s0 + $0x790] sm:$0xff] }
  0xa9   :  { %2430 = vmatprep.subr.mxu0 %v520_v46  ;;  %1126 = vmatprep.mubr.f32.mxu1 %v129_v47  ;;  %v464_v45 = vld [vmem:[%s4849_s1 + $0x510] sm:$0xff]  ;;  %v273_v47 = vld [vmem:[%s4850_s0 + $0x818] sm:$0xff] }
  0xaa   :  { %2431 = vmatpush3.msra.mxu0 %v504_v48  ;;  %1127 = vmatmul.mubr.f32.gmra.mxu1 %v128_v49  ;;  %v512_v46 = vld [vmem:[%s4849_s1 + $0x690] sm:$0xff] }
  0xab   :  { %1271 = vmatprep.mubr.f32.mxu0 %v131_v50  ;;  %2352 = vmatprep.subr.mxu1 %v487_v51  ;;  %v496_v48 = vld [vmem:[%s4849_s1 + $0x610] sm:$0xff]  ;;  %v275_v50 = vld [vmem:[%s4850_s0 + $0x828] sm:$0xff] }
  0xac   :  { %1272 = vmatmul.mubr.f32.gmra.mxu0 %v130_v52  ;;  %2353 = vmatpush3.msra.mxu1 %v471_v53  ;;  %v272_v49 = vld [vmem:[%s4850_s0 + $0x810] sm:$0xff]  ;;  %v479_v51 = vld [vmem:[%s4849_s1 + $0x588] sm:$0xff]  ;;  %v274_v52 = vld [vmem:[%s4850_s0 + $0x820] sm:$0xff] }
  0xad   :  { %2432 = vmatprep.subr.mxu0 %v519_v54  ;;  %1131 = vmatprep.mubr.f32.mxu1 %v147_v55  ;;  %v463_v53 = vld [vmem:[%s4849_s1 + $0x508] sm:$0xff] }
  0xae   :  { %2433 = vmatpush3.msra.mxu0 %v503_v56  ;;  %1132 = vmatmul.mubr.f32.gmra.mxu1 %v146_v57  ;;  %v511_v54 = vld [vmem:[%s4849_s1 + $0x688] sm:$0xff]  ;;  %v290_v57 = vld [vmem:[%s4850_s0 + $0x8a0] sm:$0xff] }
  0xaf   :  { %1276 = vmatprep.mubr.f32.mxu0 %v149_v58  ;;  %2354 = vmatprep.subr.mxu1 %v486_v59  ;;  %v291_v55 = vld [vmem:[%s4850_s0 + $0x8a8] sm:$0xff]  ;;  %v293_v58 = vld [vmem:[%s4850_s0 + $0x8b8] sm:$0xff]  ;;  %v478_v59 = vld [vmem:[%s4849_s1 + $0x580] sm:$0xff] }
  0xb0   :  { %1277 = vmatmul.mubr.f32.gmra.mxu0 %v148_v60  ;;  %2355 = vmatpush3.msra.mxu1 %v470_v61  ;;  %v495_v56 = vld [vmem:[%s4849_s1 + $0x608] sm:$0xff]  ;;  %v292_v60 = vld [vmem:[%s4850_s0 + $0x8b0] sm:$0xff]  ;;  %v462_v61 = vld [vmem:[%s4849_s1 + $0x500] sm:$0xff] }
  0xb1   :  { %2434 = vmatprep.subr.mxu0 %v518_v62  ;;  %1136 = vmatprep.mubr.f32.mxu1 %v165_v63  ;;  %v510_v62 = vld [vmem:[%s4849_s1 + $0x680] sm:$0xff]  ;;  %v25_v63 = vld [vmem:[%s4850_s0 + $0x58] sm:$0xff] }
  0xb2   :  { %2435 = vmatpush3.msra.mxu0 %v502_v0  ;;  %1137 = vmatmul.mubr.f32.gmra.mxu1 %v164_v1  ;;  %v494_v0 = vld [vmem:[%s4849_s1 + $0x600] sm:$0xff]  ;;  %v24_v1 = vld [vmem:[%s4850_s0 + $0x50] sm:$0xff] }
  0xb3   :  { %1281 = vmatprep.mubr.f32.mxu0 %v167_v2  ;;  %2356 = vmatprep.subr.mxu1 %v485_v3  ;;  %v27_v2 = vld [vmem:[%s4850_s0 + $0x68] sm:$0xff]  ;;  %v557_v3 = vld [vmem:[%s4849_s1 + $0x7f8] sm:$0xff] }
  0xb4   :  { %1282 = vmatmul.mubr.f32.gmra.mxu0 %v166_v4  ;;  %2357 = vmatpush3.msra.mxu1 %v469_v5  ;;  %v26_v4 = vld [vmem:[%s4850_s0 + $0x60] sm:$0xff]  ;;  %v541_v5 = vld [vmem:[%s4849_s1 + $0x778] sm:$0xff] }
  0xb5   :  { %2436 = vmatprep.subr.mxu0 %v517_v6  ;;  %1141 = vmatprep.mubr.f32.mxu1 %v183_v7  ;;  %v589_v6 = vld [vmem:[%s4849_s1 + $0x8f8] sm:$0xff]  ;;  %v43_v7 = vld [vmem:[%s4850_s0 + $0xe8] sm:$0xff] }
  0xb6   :  { %2437 = vmatpush3.msra.mxu0 %v501_v8  ;;  %1142 = vmatmul.mubr.f32.gmra.mxu1 %v182_v9  ;;  %v573_v8 = vld [vmem:[%s4849_s1 + $0x878] sm:$0xff]  ;;  %v42_v9 = vld [vmem:[%s4850_s0 + $0xe0] sm:$0xff] }
  0xb7   :  { %1286 = vmatprep.mubr.f32.mxu0 %v185_v10  ;;  %2358 = vmatprep.subr.mxu1 %v484_v11  ;;  %v45_v10 = vld [vmem:[%s4850_s0 + $0xf8] sm:$0xff]  ;;  %v556_v11 = vld [vmem:[%s4849_s1 + $0x7f0] sm:$0xff] }
  0xb8   :  { %1287 = vmatmul.mubr.f32.gmra.mxu0 %v184_v12  ;;  %2359 = vmatpush3.msra.mxu1 %v468_v13  ;;  %v44_v12 = vld [vmem:[%s4850_s0 + $0xf0] sm:$0xff] }
  0xb9   :  { %2438 = vmatprep.subr.mxu0 %v516_v14  ;;  %1146 = vmatprep.mubr.f32.mxu1 %v201_v15  ;;  %v540_v13 = vld [vmem:[%s4849_s1 + $0x770] sm:$0xff]  ;;  %v61_v15 = vld [vmem:[%s4850_s0 + $0x178] sm:$0xff] }
  0xba   :  { %2439 = vmatpush3.msra.mxu0 %v500_v16  ;;  %1147 = vmatmul.mubr.f32.gmra.mxu1 %v200_v17  ;;  %v588_v14 = vld [vmem:[%s4849_s1 + $0x8f0] sm:$0xff] }
  0xbb   :  { %1291 = vmatprep.mubr.f32.mxu0 %v203_v18  ;;  %2360 = vmatprep.subr.mxu1 %v483_v19  ;;  %v572_v16 = vld [vmem:[%s4849_s1 + $0x870] sm:$0xff]  ;;  %v63_v18 = vld [vmem:[%s4850_s0 + $0x188] sm:$0xff] }
  0xbc   :  { %1292 = vmatmul.mubr.f32.gmra.mxu0 %v202_v20  ;;  %2361 = vmatpush3.msra.mxu1 %v467_v21  ;;  %v60_v17 = vld [vmem:[%s4850_s0 + $0x170] sm:$0xff]  ;;  %v555_v19 = vld [vmem:[%s4849_s1 + $0x7e8] sm:$0xff]  ;;  %v62_v20 = vld [vmem:[%s4850_s0 + $0x180] sm:$0xff] }
  0xbd   :  { %2440 = vmatprep.subr.mxu0 %v515_v22  ;;  %1151 = vmatprep.mubr.f32.mxu1 %v219_v23  ;;  %v539_v21 = vld [vmem:[%s4849_s1 + $0x768] sm:$0xff] }
  0xbe   :  { %2441 = vmatpush3.msra.mxu0 %v499_v24  ;;  %1152 = vmatmul.mubr.f32.gmra.mxu1 %v218_v25  ;;  %v587_v22 = vld [vmem:[%s4849_s1 + $0x8e8] sm:$0xff]  ;;  %v78_v25 = vld [vmem:[%s4850_s0 + $0x200] sm:$0xff] }
  0xbf   :  { %1296 = vmatprep.mubr.f32.mxu0 %v221_v26  ;;  %2362 = vmatprep.subr.mxu1 %v482_v27  ;;  %v79_v23 = vld [vmem:[%s4850_s0 + $0x208] sm:$0xff]  ;;  %v81_v26 = vld [vmem:[%s4850_s0 + $0x218] sm:$0xff]  ;;  %v554_v27 = vld [vmem:[%s4849_s1 + $0x7e0] sm:$0xff] }
  0xc0   :  { %1297 = vmatmul.mubr.f32.gmra.mxu0 %v220_v28  ;;  %2363 = vmatpush3.msra.mxu1 %v466_v29  ;;  %v571_v24 = vld [vmem:[%s4849_s1 + $0x868] sm:$0xff]  ;;  %v80_v28 = vld [vmem:[%s4850_s0 + $0x210] sm:$0xff]  ;;  %v538_v29 = vld [vmem:[%s4849_s1 + $0x760] sm:$0xff] }
  0xc1   :  { %2442 = vmatprep.subr.mxu0 %v514_v30  ;;  %1156 = vmatprep.mubr.f32.mxu1 %v237_v31  ;;  %v586_v30 = vld [vmem:[%s4849_s1 + $0x8e0] sm:$0xff]  ;;  %v97_v31 = vld [vmem:[%s4850_s0 + $0x298] sm:$0xff] }
  0xc2   :  { %2443 = vmatpush3.msra.mxu0 %v498_v32  ;;  %1157 = vmatmul.mubr.f32.gmra.mxu1 %v236_v33  ;;  %v570_v32 = vld [vmem:[%s4849_s1 + $0x860] sm:$0xff]  ;;  %v96_v33 = vld [vmem:[%s4850_s0 + $0x290] sm:$0xff] }
  0xc3   :  { %1301 = vmatprep.mubr.f32.mxu0 %v239_v34  ;;  %2364 = vmatprep.subr.mxu1 %v481_v35  ;;  %v99_v34 = vld [vmem:[%s4850_s0 + $0x2a8] sm:$0xff]  ;;  %v553_v35 = vld [vmem:[%s4849_s1 + $0x7d8] sm:$0xff] }
  0xc4   :  { %1302 = vmatmul.mubr.f32.gmra.mxu0 %v238_v36  ;;  %2365 = vmatpush3.msra.mxu1 %v465_v37  ;;  %v98_v36 = vld [vmem:[%s4850_s0 + $0x2a0] sm:$0xff]  ;;  %v537_v37 = vld [vmem:[%s4849_s1 + $0x758] sm:$0xff] }
  0xc5   :  { %2444 = vmatprep.subr.mxu0 %v513_v38  ;;  %1161 = vmatprep.mubr.f32.mxu1 %v255_v39  ;;  %v585_v38 = vld [vmem:[%s4849_s1 + $0x8d8] sm:$0xff]  ;;  %v115_v39 = vld [vmem:[%s4850_s0 + $0x328] sm:$0xff] }
  0xc6   :  { %2445 = vmatpush3.msra.mxu0 %v497_v40  ;;  %1162 = vmatmul.mubr.f32.gmra.mxu1 %v254_v41  ;;  %v569_v40 = vld [vmem:[%s4849_s1 + $0x858] sm:$0xff]  ;;  %v114_v41 = vld [vmem:[%s4850_s0 + $0x320] sm:$0xff] }
  0xc7   :  { %1306 = vmatprep.mubr.f32.mxu0 %v257_v42  ;;  %2366 = vmatprep.subr.mxu1 %v480_v43  ;;  %v117_v43 = vld [vmem:[%s4850_s0 + $0x338] sm:$0xff] }
  0xc8   :  { %1307 = vmatmul.mubr.f32.gmra.mxu0 %v256_v44  ;;  %2367 = vmatpush3.msra.mxu1 %v464_v45  ;;  %v552_v44 = vld [vmem:[%s4849_s1 + $0x7d0] sm:$0xff] }
  0xc9   :  { %2446 = vmatprep.subr.mxu0 %v512_v46  ;;  %1166 = vmatprep.mubr.f32.mxu1 %v273_v47  ;;  %v116_v46 = vld [vmem:[%s4850_s0 + $0x330] sm:$0xff] }
  0xca   :  { %2447 = vmatpush3.msra.mxu0 %v496_v48  ;;  %1167 = vmatmul.mubr.f32.gmra.mxu1 %v272_v49  ;;  %v536_v47 = vld [vmem:[%s4849_s1 + $0x750] sm:$0xff] }
  0xcb   :  { %1311 = vmatprep.mubr.f32.mxu0 %v275_v50  ;;  %2368 = vmatprep.subr.mxu1 %v479_v51  ;;  %v584_v49 = vld [vmem:[%s4849_s1 + $0x8d0] sm:$0xff]  ;;  %v133_v50 = vld [vmem:[%s4850_s0 + $0x3b8] sm:$0xff] }
  0xcc   :  { %1312 = vmatmul.mubr.f32.gmra.mxu0 %v274_v52  ;;  %2369 = vmatpush3.msra.mxu1 %v463_v53  ;;  %v568_v53 = vld [vmem:[%s4849_s1 + $0x850] sm:$0xff] }
  0xcd   :  { %2448 = vmatprep.subr.mxu0 %v511_v54  ;;  %1171 = vmatprep.mubr.f32.mxu1 %v291_v55  ;;  %v132_v54 = vld [vmem:[%s4850_s0 + $0x3b0] sm:$0xff] }
  0xce   :  { %2449 = vmatpush3.msra.mxu0 %v495_v56  ;;  %1172 = vmatmul.mubr.f32.gmra.mxu1 %v290_v57  ;;  %v135_v56 = vld [vmem:[%s4850_s0 + $0x3c8] sm:$0xff] }
  0xcf   :  { %1316 = vmatprep.mubr.f32.mxu0 %v293_v58  ;;  %2370 = vmatprep.subr.mxu1 %v478_v59  ;;  %v551_v57 = vld [vmem:[%s4849_s1 + $0x7c8] sm:$0xff]  ;;  %v134_v59 = vld [vmem:[%s4850_s0 + $0x3c0] sm:$0xff] }
  0xd0   :  { %1317 = vmatmul.mubr.f32.gmra.mxu0 %v292_v60  ;;  %2371 = vmatpush3.msra.mxu1 %v462_v61  ;;  %v535_v60 = vld [vmem:[%s4849_s1 + $0x748] sm:$0xff] }
  0xd1   :  { %2450 = vmatprep.subr.mxu0 %v510_v62  ;;  %1386 = vmatprep.mubr.f32.mxu1 %v25_v63  ;;  %v583_v61 = vld [vmem:[%s4849_s1 + $0x8c8] sm:$0xff] }
  0xd2   :  { %2451 = vmatpush3.msra.mxu0 %v494_v0  ;;  %1387 = vmatmul.mubr.f32.vlgmr.msra.gmra.mxu1 %v24_v1  ;;  %v151_v62 = vld [vmem:[%s4850_s0 + $0x448] sm:$0xff] }
  0xd3   :  { %1531 = vmatprep.mubr.f32.mxu0 %v27_v2  ;;  %2500 = vmatprep.subr.mxu1 %v557_v3  ;;  %v567_v1 = vld [vmem:[%s4849_s1 + $0x848] sm:$0xff]  ;;  %v150_v2 = vld [vmem:[%s4850_s0 + $0x440] sm:$0xff] }
  0xd4   :  { %1532 = vmatmul.mubr.f32.vlgmr.msra.gmra.mxu0 %v26_v4  ;;  %2501 = vmatpush3.msra.mxu1 %v541_v5  ;;  %v153_v4 = vld [vmem:[%s4850_s0 + $0x458] sm:$0xff]  ;;  %v550_v5 = vld [vmem:[%s4849_s1 + $0x7c0] sm:$0xff] }
  0xd5   :  { %2580 = vmatprep.subr.mxu0 %v589_v6  ;;  %1391 = vmatprep.mubr.f32.mxu1 %v43_v7  ;;  %v152_v7 = vld [vmem:[%s4850_s0 + $0x450] sm:$0xff] }
  0xd6   :  { %2581 = vmatpush3.msra.mxu0 %v573_v8  ;;  %1392 = vmatmul.mubr.f32.gmra.mxu1 %v42_v9  ;;  %v534_v8 = vld [vmem:[%s4849_s1 + $0x740] sm:$0xff] }
  0xd7   :  { %1536 = vmatprep.mubr.f32.mxu0 %v45_v10  ;;  %2502 = vmatprep.subr.mxu1 %v556_v11  ;;  %v582_v10 = vld [vmem:[%s4849_s1 + $0x8c0] sm:$0xff]  ;;  %v169_v11 = vld [vmem:[%s4850_s0 + $0x4d8] sm:$0xff] }
  0xd8   :  { %1537 = vmatmul.mubr.f32.gmra.mxu0 %v44_v12  ;;  %2503 = vmatpush3.msra.mxu1 %v540_v13  ;;  %v566_v13 = vld [vmem:[%s4849_s1 + $0x840] sm:$0xff] }
  0xd9   :  { %2582 = vmatprep.subr.mxu0 %v588_v14  ;;  %1396 = vmatprep.mubr.f32.mxu1 %v61_v15  ;;  %v168_v14 = vld [vmem:[%s4850_s0 + $0x4d0] sm:$0xff]  ;;  %v171_v15 = vld [vmem:[%s4850_s0 + $0x4e8] sm:$0xff] }
  0xda   :  { %2583 = vmatpush3.msra.mxu0 %v572_v16  ;;  %1397 = vmatmul.mubr.f32.gmra.mxu1 %v60_v17  ;;  %v549_v16 = vld [vmem:[%s4849_s1 + $0x7b8] sm:$0xff] }
  0xdb   :  { %1541 = vmatprep.mubr.f32.mxu0 %v63_v18  ;;  %2504 = vmatprep.subr.mxu1 %v555_v19  ;;  %v170_v19 = vld [vmem:[%s4850_s0 + $0x4e0] sm:$0xff] }
  0xdc   :  { %1542 = vmatmul.mubr.f32.gmra.mxu0 %v62_v20  ;;  %2505 = vmatpush3.msra.mxu1 %v539_v21  ;;  %v533_v20 = vld [vmem:[%s4849_s1 + $0x738] sm:$0xff] }
  0xdd   :  { %2584 = vmatprep.subr.mxu0 %v587_v22  ;;  %1401 = vmatprep.mubr.f32.mxu1 %v79_v23  ;;  %v581_v22 = vld [vmem:[%s4849_s1 + $0x8b8] sm:$0xff]  ;;  %v187_v23 = vld [vmem:[%s4850_s0 + $0x568] sm:$0xff] }
  0xde   :  { %2585 = vmatpush3.msra.mxu0 %v571_v24  ;;  %1402 = vmatmul.mubr.f32.gmra.mxu1 %v78_v25  ;;  %v565_v25 = vld [vmem:[%s4849_s1 + $0x838] sm:$0xff] }
  0xdf   :  { %1546 = vmatprep.mubr.f32.mxu0 %v81_v26  ;;  %2506 = vmatprep.subr.mxu1 %v554_v27  ;;  %v186_v26 = vld [vmem:[%s4850_s0 + $0x560] sm:$0xff] }
  0xe0   :  { %1547 = vmatmul.mubr.f32.gmra.mxu0 %v80_v28  ;;  %2507 = vmatpush3.msra.mxu1 %v538_v29  ;;  %v189_v28 = vld [vmem:[%s4850_s0 + $0x578] sm:$0xff]  ;;  %v548_v29 = vld [vmem:[%s4849_s1 + $0x7b0] sm:$0xff] }
  0xe1   :  { %2586 = vmatprep.subr.mxu0 %v586_v30  ;;  %1406 = vmatprep.mubr.f32.mxu1 %v97_v31  ;;  %v188_v31 = vld [vmem:[%s4850_s0 + $0x570] sm:$0xff] }
  0xe2   :  { %2587 = vmatpush3.msra.mxu0 %v570_v32  ;;  %1407 = vmatmul.mubr.f32.gmra.mxu1 %v96_v33  ;;  %v532_v32 = vld [vmem:[%s4849_s1 + $0x730] sm:$0xff] }
  0xe3   :  { %1551 = vmatprep.mubr.f32.mxu0 %v99_v34  ;;  %2508 = vmatprep.subr.mxu1 %v553_v35  ;;  %v1996_v42 = vpop.f32.mrf.mxu1  ;;  %v580_v33 = vld [vmem:[%s4849_s1 + $0x8b0] sm:$0xff]  ;;  %v205_v34 = vld [vmem:[%s4850_s0 + $0x5f8] sm:$0xff] }
  0xe4   :  { %1552 = vmatmul.mubr.f32.gmra.mxu0 %v98_v36  ;;  %2509 = vmatpush3.msra.mxu1 %v537_v37  ;;  %v1972_v45 = vpop.f32.mrf.mxu0  ;;  %v564_v37 = vld [vmem:[%s4849_s1 + $0x830] sm:$0xff] }
  0xe5   :  { %2588 = vmatprep.subr.mxu0 %v585_v38  ;;  %1411 = vmatprep.mubr.f32.mxu1 %v115_v39  ;;  %v1997_v48 = vpop.f32.mrf.mxu1  ;;  %v204_v38 = vld [vmem:[%s4850_s0 + $0x5f0] sm:$0xff] }
  0xe6   :  { %2589 = vmatpush3.msra.mxu0 %v569_v40  ;;  %1412 = vmatmul.mubr.f32.gmra.mxu1 %v114_v41  ;;  %v4008_v51 = vadd.f32 %v1997_v48, %v1996_v42  ;;  %v1973_v52 = vpop.f32.mrf.mxu0  ;;  %v207_v40 = vld [vmem:[%s4850_s0 + $0x608] sm:$0xff] }
  0xe7   :  { %1556 = vmatprep.mubr.f32.mxu0 %v117_v43  ;;  %2510 = vmatprep.subr.mxu1 %v552_v44  ;;  %v4016_v55 = vadd.f32 %v1973_v52, %v1972_v45  ;;  %v547_v41 = vld [vmem:[%s4849_s1 + $0x7a8] sm:$0xff]  ;;  %v206_v43 = vld [vmem:[%s4850_s0 + $0x600] sm:$0xff]  ;;  %v225_v52 = vld [vmem:[%s4850_s0 + $0x698] sm:$0xff] }
  0xe8   :  { %1557 = vmatmul.mubr.f32.gmra.mxu0 %v116_v46  ;;  %2511 = vmatpush3.msra.mxu1 %v536_v47  ;;  %v1999_v58 = vpop.f32.mrf.mxu1  ;;  %v531_v44 = vld [vmem:[%s4849_s1 + $0x728] sm:$0xff] }
  0xe9   :  { %2590 = vmatprep.subr.mxu0 %v584_v49  ;;  %1416 = vmatprep.mubr.f32.mxu1 %v133_v50  ;;  %v579_v46 = vld [vmem:[%s4849_s1 + $0x8a8] sm:$0xff]  ;;  %v222_v50 = vld [vmem:[%s4850_s0 + $0x680] sm:$0xff] }
  0xea   :  { %2591 = vmatpush3.msra.mxu0 %v568_v53  ;;  %1417 = vmatmul.mubr.f32.gmra.mxu1 %v132_v54  ;;  %v1975_v63 = vpop.f32.mrf.mxu0  ;;  %v2000_v0 = vpop.f32.mrf.mxu1  ;;  %v223_v47 = vld [vmem:[%s4850_s0 + $0x688] sm:$0xff]  ;;  %v546_v53 = vld [vmem:[%s4849_s1 + $0x7a0] sm:$0xff] }
  0xeb   :  { %1561 = vmatprep.mubr.f32.mxu0 %v135_v56  ;;  %2512 = vmatprep.subr.mxu1 %v551_v57  ;;  %v4042_v3 = vadd.f32 %v2000_v0, %v1999_v58  ;;  %v563_v49 = vld [vmem:[%s4849_s1 + $0x828] sm:$0xff]  ;;  %v224_v57 = vld [vmem:[%s4850_s0 + $0x690] sm:$0xff]  ;;  %v530_v58 = vld [vmem:[%s4849_s1 + $0x720] sm:$0xff] }
  0xec   :  { %1562 = vmatmul.mubr.f32.gmra.mxu0 %v134_v59  ;;  %2513 = vmatpush3.msra.mxu1 %v535_v60  ;;  %v1976_v6 = vpop.f32.mrf.mxu0  ;;  %v578_v60 = vld [vmem:[%s4849_s1 + $0x8a0] sm:$0xff]  ;;  %v240_v0 = vld [vmem:[%s4850_s0 + $0x710] sm:$0xff] }
  0xed   :  { %2592 = vmatprep.subr.mxu0 %v583_v61  ;;  %1421 = vmatprep.mubr.f32.mxu1 %v151_v62  ;;  %v4056_v9 = vadd.f32 %v1976_v6, %v1975_v63  ;;  %v241_v61 = vld [vmem:[%s4850_s0 + $0x718] sm:$0xff]  ;;  %v562_v63 = vld [vmem:[%s4849_s1 + $0x820] sm:$0xff] }
  0xee   :  { %2593 = vmatpush3.msra.mxu0 %v567_v1  ;;  %1422 = vmatmul.mubr.f32.gmra.mxu1 %v150_v2  ;;  %v2002_v12 = vpop.f32.mrf.mxu1  ;;  %v243_v2 = vld [vmem:[%s4850_s0 + $0x728] sm:$0xff]  ;;  %v242_v6 = vld [vmem:[%s4850_s0 + $0x720] sm:$0xff] }
  0xef   :  { %1566 = vmatprep.mubr.f32.mxu0 %v153_v4  ;;  %2514 = vmatprep.subr.mxu1 %v550_v5  ;;  %v545_v4 = vld [vmem:[%s4849_s1 + $0x798] sm:$0xff] }
  0xf0   :  { %1567 = vmatmul.mubr.f32.gmra.mxu0 %v152_v7  ;;  %2515 = vmatpush3.msra.mxu1 %v534_v8  ;;  %v1978_v17 = vpop.f32.mrf.mxu0  ;;  %v2003_v18 = vpop.f32.mrf.mxu1  ;;  %v529_v7 = vld [vmem:[%s4849_s1 + $0x718] sm:$0xff] }
  0xf1   :  { %2594 = vmatprep.subr.mxu0 %v582_v10  ;;  %1426 = vmatprep.mubr.f32.mxu1 %v169_v11  ;;  %v4082_v21 = vadd.f32 %v2003_v18, %v2002_v12  ;;  %v577_v8 = vld [vmem:[%s4849_s1 + $0x898] sm:$0xff]  ;;  %v259_v10 = vld [vmem:[%s4850_s0 + $0x7a8] sm:$0xff] }
  0xf2   :  { %2595 = vmatpush3.msra.mxu0 %v566_v13  ;;  %1427 = vmatmul.mubr.f32.gmra.mxu1 %v168_v14  ;;  %v1979_v24 = vpop.f32.mrf.mxu0  ;;  %v561_v13 = vld [vmem:[%s4849_s1 + $0x818] sm:$0xff]  ;;  %v258_v14 = vld [vmem:[%s4850_s0 + $0x7a0] sm:$0xff] }
  0xf3   :  { %1571 = vmatprep.mubr.f32.mxu0 %v171_v15  ;;  %2516 = vmatprep.subr.mxu1 %v549_v16  ;;  %v4096_v27 = vadd.f32 %v1979_v24, %v1978_v17  ;;  %v261_v16 = vld [vmem:[%s4850_s0 + $0x7b8] sm:$0xff]  ;;  %v544_v17 = vld [vmem:[%s4849_s1 + $0x790] sm:$0xff] }
  0xf4   :  { %1572 = vmatmul.mubr.f32.gmra.mxu0 %v170_v19  ;;  %2517 = vmatpush3.msra.mxu1 %v533_v20  ;;  %v2005_v30 = vpop.f32.mrf.mxu1  ;;  %v260_v19 = vld [vmem:[%s4850_s0 + $0x7b0] sm:$0xff]  ;;  %v277_v24 = vld [vmem:[%s4850_s0 + $0x838] sm:$0xff] }
  0xf5   :  { %2596 = vmatprep.subr.mxu0 %v581_v22  ;;  %1431 = vmatprep.mubr.f32.mxu1 %v187_v23  ;;  %v528_v20 = vld [vmem:[%s4849_s1 + $0x710] sm:$0xff] }
  0xf6   :  { %2597 = vmatpush3.msra.mxu0 %v565_v25  ;;  %1432 = vmatmul.mubr.f32.gmra.mxu1 %v186_v26  ;;  %v1981_v35 = vpop.f32.mrf.mxu0  ;;  %v2006_v36 = vpop.f32.mrf.mxu1  ;;  %v576_v23 = vld [vmem:[%s4849_s1 + $0x890] sm:$0xff] }
  0xf7   :  { %1576 = vmatprep.mubr.f32.mxu0 %v189_v28  ;;  %2518 = vmatprep.subr.mxu1 %v548_v29  ;;  %v4122_v39 = vadd.f32 %v2006_v36, %v2005_v30  ;;  %v560_v26 = vld [vmem:[%s4849_s1 + $0x810] sm:$0xff]  ;;  %v279_v29 = vld [vmem:[%s4850_s0 + $0x848] sm:$0xff] }
  0xf8   :  { %1577 = vmatmul.mubr.f32.gmra.mxu0 %v188_v31  ;;  %2519 = vmatpush3.msra.mxu1 %v532_v32  ;;  %v1982_v42 = vpop.f32.mrf.mxu0  ;;  %v276_v28 = vld [vmem:[%s4850_s0 + $0x830] sm:$0xff]  ;;  %v543_v30 = vld [vmem:[%s4849_s1 + $0x788] sm:$0xff] }
  0xf9   :  { %2598 = vmatprep.subr.mxu0 %v580_v33  ;;  %1436 = vmatprep.mubr.f32.mxu1 %v205_v34  ;;  %v4136_v45 = vadd.f32 %v1982_v42, %v1981_v35  ;;  %v278_v33 = vld [vmem:[%s4850_s0 + $0x840] sm:$0xff]  ;;  %v527_v34 = vld [vmem:[%s4849_s1 + $0x708] sm:$0xff] }
  0xfa   :  { %2599 = vmatpush3.msra.mxu0 %v564_v37  ;;  %1437 = vmatmul.mubr.f32.gmra.mxu1 %v204_v38  ;;  %v2008_v48 = vpop.f32.mrf.mxu1  ;;  %v575_v36 = vld [vmem:[%s4849_s1 + $0x888] sm:$0xff]  ;;  %v294_v42 = vld [vmem:[%s4850_s0 + $0x8c0] sm:$0xff] }
  0xfb   :  { %1581 = vmatprep.mubr.f32.mxu0 %v207_v40  ;;  %2520 = vmatprep.subr.mxu1 %v547_v41  ;;  %v295_v38 = vld [vmem:[%s4850_s0 + $0x8c8] sm:$0xff] }
  0xfc   :  { %1582 = vmatmul.mubr.f32.gmra.mxu0 %v206_v43  ;;  %2521 = vmatpush3.msra.mxu1 %v531_v44  ;;  %v1984_v54 = vpop.f32.mrf.mxu0  ;;  %v2009_v56 = vpop.f32.mrf.mxu1  ;;  %v559_v41 = vld [vmem:[%s4849_s1 + $0x808] sm:$0xff]  ;;  %v297_v44 = vld [vmem:[%s4850_s0 + $0x8d8] sm:$0xff] }
  0xfd   :  { %2600 = vmatprep.subr.mxu0 %v579_v46  ;;  %1441 = vmatprep.mubr.f32.mxu1 %v223_v47  ;;  %v4162_v59 = vadd.f32 %v2009_v56, %v2008_v48  ;;  %v542_v46 = vld [vmem:[%s4849_s1 + $0x780] sm:$0xff]  ;;  %v296_v47 = vld [vmem:[%s4850_s0 + $0x8d0] sm:$0xff] }
  0xfe   :  { %2601 = vmatpush3.msra.mxu0 %v563_v49  ;;  %1442 = vmatmul.mubr.f32.gmra.mxu1 %v222_v50  ;;  %v1985_v62 = vpop.f32.mrf.mxu0  ;;  %v526_v48 = vld [vmem:[%s4849_s1 + $0x700] sm:$0xff] }
  0xff   :  { %1586 = vmatprep.mubr.f32.mxu0 %v225_v52  ;;  %2522 = vmatprep.subr.mxu1 %v546_v53  ;;  %v4176_v1 = vadd.f32 %v1985_v62, %v1984_v54  ;;  %v574_v52 = vld [vmem:[%s4849_s1 + $0x880] sm:$0xff]  ;;  %v29_v53 = vld [vmem:[%s4850_s0 + $0x78] sm:$0xff] }
 0x100   :  { %1587 = vmatmul.mubr.f32.gmra.mxu0 %v224_v57  ;;  %2523 = vmatpush3.msra.mxu1 %v530_v58  ;;  %v2011_v5 = vpop.f32.mrf.mxu1  ;;  %v558_v56 = vld [vmem:[%s4849_s1 + $0x800] sm:$0xff]  ;;  %v28_v57 = vld [vmem:[%s4850_s0 + $0x70] sm:$0xff] }
 0x101   :  { %2602 = vmatprep.subr.mxu0 %v578_v60  ;;  %1446 = vmatprep.mubr.f32.mxu1 %v241_v61  ;;  %v31_v60 = vld [vmem:[%s4850_s0 + $0x88] sm:$0xff] }
 0x102   :  { %2603 = vmatpush3.msra.mxu0 %v562_v63  ;;  %1447 = vmatmul.mubr.f32.gmra.mxu1 %v240_v0  ;;  %v1987_v11 = vpop.f32.mrf.mxu0  ;;  %v2012_v12 = vpop.f32.mrf.mxu1  ;;  %v47_v61 = vld [vmem:[%s4850_s0 + $0x108] sm:$0xff]  ;;  %v30_v63 = vld [vmem:[%s4850_s0 + $0x80] sm:$0xff] }
 0x103   :  { %1591 = vmatprep.mubr.f32.mxu0 %v243_v2  ;;  %2524 = vmatprep.subr.mxu1 %v545_v4  ;;  %v4202_v15 = vadd.f32 %v2012_v12, %v2011_v5  ;;  %v4298_v0 = vld [vmem:[%s4851_s2] ss:$0 sm:$0xff]  ;;  %v49_v4 = vld [vmem:[%s4850_s0 + $0x118] sm:$0xff]  ;;  %v48_v12 = vld [vmem:[%s4850_s0 + $0x110] sm:$0xff] }
 0x104   :  { %1592 = vmatmul.mubr.f32.gmra.mxu0 %v242_v6  ;;  %2525 = vmatpush3.msra.mxu1 %v529_v7  ;;  %v1988_v18 = vpop.f32.mrf.mxu0  ;;  %v46_v5 = vld [vmem:[%s4850_s0 + $0x100] sm:$0xff] }
 0x105   :  { %2604 = vmatprep.subr.mxu0 %v577_v8  ;;  %1451 = vmatprep.mubr.f32.mxu1 %v259_v10  ;;  %v4216_v22 = vadd.f32 %v1988_v18, %v1987_v11  ;;  %v65_v8 = vld [vmem:[%s4850_s0 + $0x198] sm:$0xff]  ;;  %v664_v10 = vadd.f32 %v4016_v55, %v4298_v0  ;;  %v64_v55 = vld [vmem:[%s4850_s0 + $0x190] sm:$0xff] }
 0x106   :  { %2605 = vmatpush3.msra.mxu0 %v561_v13  ;;  %1452 = vmatmul.mubr.f32.gmra.mxu1 %v258_v14  ;;  %v2014_v25 = vpop.f32.mrf.mxu1 }
 0x107   :  { %1596 = vmatprep.mubr.f32.mxu0 %v261_v16  ;;  %2526 = vmatprep.subr.mxu1 %v544_v17  ;;  %v67_v16 = vld [vmem:[%s4850_s0 + $0x1a8] sm:$0xff] }
 0x108   :  { %1597 = vmatmul.mubr.f32.gmra.mxu0 %v260_v19  ;;  %2527 = vmatpush3.msra.mxu1 %v528_v20  ;;  %v1990_v31 = vpop.f32.mrf.mxu0  ;;  %v2015_v32 = vpop.f32.mrf.mxu1 }
 0x109   :  { %2606 = vmatprep.subr.mxu0 %v576_v23  ;;  %1456 = vmatprep.mubr.f32.mxu1 %v277_v24  ;;  %v4242_v35 = vadd.f32 %v2015_v32, %v2014_v25  ;;  %v83_v23 = vld [vmem:[%s4850_s0 + $0x228] sm:$0xff]  ;;  %v669_v24 = vadd.f32 %v4056_v9, %v4298_v0  ;;  %v82_v9 = vld [vmem:[%s4850_s0 + $0x220] sm:$0xff] }
 0x10a   :  { %2607 = vmatpush3.msra.mxu0 %v560_v26  ;;  %1457 = vmatmul.mubr.f32.gmra.mxu1 %v276_v28  ;;  %v1991_v37 = vpop.f32.mrf.mxu0  ;;  %v66_v28 = vld [vmem:[%s4850_s0 + $0x1a0] sm:$0xff] }
 0x10b   :  { %1601 = vmatprep.mubr.f32.mxu0 %v279_v29  ;;  %2528 = vmatprep.subr.mxu1 %v543_v30  ;;  %v4250_v40 = vadd.f32 %v1991_v37, %v1990_v31  ;;  %v85_v31 = vld [vmem:[%s4850_s0 + $0x238] sm:$0xff] }
 0x10c   :  { %1602 = vmatmul.mubr.f32.gmra.mxu0 %v278_v33  ;;  %2529 = vmatpush3.msra.mxu1 %v527_v34  ;;  %v2017_v43 = vpop.f32.mrf.mxu1  ;;  %v101_v37 = vld [vmem:[%s4850_s0 + $0x2b8] sm:$0xff] }
 0x10d   :  { %2608 = vmatprep.subr.mxu0 %v575_v36  ;;  %1461 = vmatprep.mubr.f32.mxu1 %v295_v38  ;;  %v674_v38 = vadd.f32 %v4096_v27, %v4298_v0  ;;  %v100_v27 = vld [vmem:[%s4850_s0 + $0x2b0] sm:$0xff] }
 0x10e   :  { %2609 = vmatpush3.msra.mxu0 %v559_v41  ;;  %1462 = vmatmul.mubr.f32.gmra.mxu1 %v294_v42  ;;  %v1993_v49 = vpop.f32.mrf.mxu0  ;;  %v2018_v50 = vpop.f32.mrf.mxu1 }
 0x10f   :  { %1606 = vmatprep.mubr.f32.mxu0 %v297_v44  ;;  %2530 = vmatprep.subr.mxu1 %v542_v46  ;;  %v4276_v54 = vadd.f32 %v2018_v50, %v2017_v43  ;;  %v84_v43 = vld [vmem:[%s4850_s0 + $0x230] sm:$0xff] }
 0x110   :  { %1607 = vmatmul.mubr.f32.gmra.mxu0 %v296_v47  ;;  %2531 = vmatpush3.msra.mxu1 %v526_v48  ;;  %v1994_v58 = vpop.f32.mrf.mxu0  ;;  %v103_v47 = vld [vmem:[%s4850_s0 + $0x2c8] sm:$0xff] }
 0x111   :  { %2610 = vmatprep.subr.mxu0 %v574_v52  ;;  %v4290_v62 = vadd.f32 %v1994_v58, %v1993_v49  ;;  %1676 = vmatprep.mubr.f32.mxu1 %v29_v53  ;;  %v119_v53 = vld [vmem:[%s4850_s0 + $0x348] sm:$0xff] }
 0x112   :  { %2611 = vmatpush3.msra.mxu0 %v558_v56  ;;  %v2052_v2 = vpop.f32.mrf.mxu1  ;;  %1677 = vmatmul.mubr.f32.vlgmr.msra.gmra.mxu1 %v28_v57  ;;  %v679_v56 = vadd.f32 %v4136_v45, %v4298_v0  ;;  %v118_v45 = vld [vmem:[%s4850_s0 + $0x340] sm:$0xff] }
 0x113   :  { %1821 = vmatprep.mubr.f32.mxu0 %v31_v60  ;;  %1681 = vmatprep.mubr.f32.mxu1 %v47_v61  ;;  %v102_v60 = vld [vmem:[%s4850_s0 + $0x2c0] sm:$0xff] }
 0x114   :  { %v2132_v6 = vpop.f32.mrf.mxu0  ;;  %1822 = vmatmul.mubr.f32.vlgmr.msra.gmra.mxu0 %v30_v63  ;;  %v2053_v7 = vpop.f32.mrf.mxu1 }
 0x115   :  { %v2054_v11 = vadd.f32 %v2053_v7, %v2052_v2  ;;  %1826 = vmatprep.mubr.f32.mxu0 %v49_v4  ;;  %v121_v2 = vld [vmem:[%s4850_s0 + $0x358] sm:$0xff] }
 0x116   :  { %v2133_v13 = vpop.f32.mrf.mxu0  ;;  %v2055_v14 = vpop.f32.mrf.mxu1  ;;  %1682 = vmatmul.mubr.f32.gmra.mxu1 %v46_v5 }
 0x117   :  { %v809_v17 = vadd.f32 %v2054_v11, %v664_v10  ;;  %v2134_v18 = vadd.f32 %v2133_v13, %v2132_v6  ;;  %1686 = vmatprep.mubr.f32.mxu1 %v65_v8  ;;  %v137_v8 = vld [vmem:[%s4850_s0 + $0x3d8] sm:$0xff]  ;;  %v684_v10 = vadd.f32 %v4176_v1, %v4298_v0  ;;  %v120_v13 = vld [vmem:[%s4850_s0 + $0x350] sm:$0xff] }
 0x118   :  { %v2135_v19 = vpop.f32.mrf.mxu0  ;;  %1827 = vmatmul.mubr.f32.gmra.mxu0 %v48_v12  ;;  %v2056_v20 = vpop.f32.mrf.mxu1  ;;  %v136_v1 = vld [vmem:[%s4850_s0 + $0x3d0] sm:$0xff] }
 0x119   :  { %v4325_v25 = vadd.f32 %v2134_v18, %v809_v17  ;;  %v2057_v26 = vadd.f32 %v2056_v20, %v2055_v14  ;;  %1831 = vmatprep.mubr.f32.mxu0 %v67_v16  ;;  %v139_v17 = vld [vmem:[%s4850_s0 + $0x3e8] sm:$0xff] }
 0x11a   :  { %v2136_v29 = vpop.f32.mrf.mxu0  ;;  %v2058_v30 = vpop.f32.mrf.mxu1  ;;  %1687 = vmatmul.mubr.f32.gmra.mxu1 %v64_v55 }
 0x11b   :  { %v814_v32 = vadd.f32 %v2057_v26, %v669_v24  ;;  %v2137_v33 = vadd.f32 %v2136_v29, %v2135_v19  ;;  %1691 = vmatprep.mubr.f32.mxu1 %v83_v23  ;;  %v155_v23 = vld [vmem:[%s4850_s0 + $0x468] sm:$0xff]  ;;  %v689_v24 = vadd.f32 %v4216_v22, %v4298_v0  ;;  %v138_v29 = vld [vmem:[%s4850_s0 + $0x3e0] sm:$0xff] }
 0x11c   :  { %v2138_v34 = vpop.f32.mrf.mxu0  ;;  %1832 = vmatmul.mubr.f32.gmra.mxu0 %v66_v28  ;;  %v2059_v36 = vpop.f32.mrf.mxu1  ;;  %v154_v22 = vld [vmem:[%s4850_s0 + $0x460] sm:$0xff] }
 0x11d   :  { %v4341_v41 = vadd.f32 %v2137_v33, %v814_v32  ;;  %v2060_v42 = vadd.f32 %v2059_v36, %v2058_v30  ;;  %1836 = vmatprep.mubr.f32.mxu0 %v85_v31  ;;  %v157_v32 = vld [vmem:[%s4850_s0 + $0x478] sm:$0xff] }
 0x11e   :  { %v2139_v44 = vpop.f32.mrf.mxu0  ;;  %v2061_v46 = vpop.f32.mrf.mxu1  ;;  %1692 = vmatmul.mubr.f32.gmra.mxu1 %v82_v9 }
 0x11f   :  { %v819_v48 = vadd.f32 %v2060_v42, %v674_v38  ;;  %v2140_v49 = vadd.f32 %v2139_v44, %v2138_v34  ;;  %1696 = vmatprep.mubr.f32.mxu1 %v101_v37  ;;  %v173_v37 = vld [vmem:[%s4850_s0 + $0x4f8] sm:$0xff]  ;;  %v694_v38 = vadd.f32 %v4250_v40, %v4298_v0  ;;  %v156_v44 = vld [vmem:[%s4850_s0 + $0x470] sm:$0xff] }
 0x120   :  { %v2141_v50 = vpop.f32.mrf.mxu0  ;;  %1837 = vmatmul.mubr.f32.gmra.mxu0 %v84_v43  ;;  %v2062_v52 = vpop.f32.mrf.mxu1  ;;  %v172_v40 = vld [vmem:[%s4850_s0 + $0x4f0] sm:$0xff] }
 0x121   :  { %v4357_v57 = vadd.f32 %v2140_v49, %v819_v48  ;;  %v2063_v58 = vadd.f32 %v2062_v52, %v2061_v46  ;;  %1841 = vmatprep.mubr.f32.mxu0 %v103_v47  ;;  %v175_v48 = vld [vmem:[%s4850_s0 + $0x508] sm:$0xff] }
 0x122   :  { %v2142_v61 = vpop.f32.mrf.mxu0  ;;  %v2064_v63 = vpop.f32.mrf.mxu1  ;;  %1697 = vmatmul.mubr.f32.gmra.mxu1 %v100_v27 }
 0x123   :  { %v824_v4 = vadd.f32 %v2063_v58, %v679_v56  ;;  %v2143_v5 = vadd.f32 %v2142_v61, %v2141_v50  ;;  %1701 = vmatprep.mubr.f32.mxu1 %v119_v53  ;;  %v191_v53 = vld [vmem:[%s4850_s0 + $0x588] sm:$0xff]  ;;  %v699_v56 = vadd.f32 %v4290_v62, %v4298_v0  ;;  %v174_v61 = vld [vmem:[%s4850_s0 + $0x500] sm:$0xff] }
 0x124   :  { %v2144_v6 = vpop.f32.mrf.mxu0  ;;  %1842 = vmatmul.mubr.f32.gmra.mxu0 %v102_v60  ;;  %v2065_v7 = vpop.f32.mrf.mxu1  ;;  %v190_v62 = vld [vmem:[%s4850_s0 + $0x580] sm:$0xff] }
 0x125   :  { %v4373_v11 = vadd.f32 %v2143_v5, %v824_v4  ;;  %v2066_v12 = vadd.f32 %v2065_v7, %v2064_v63  ;;  %1846 = vmatprep.mubr.f32.mxu0 %v121_v2  ;;  %v193_v4 = vld [vmem:[%s4850_s0 + $0x598] sm:$0xff] }
 0x126   :  { %v2145_v14 = vpop.f32.mrf.mxu0  ;;  %v2067_v16 = vpop.f32.mrf.mxu1  ;;  %1702 = vmatmul.mubr.f32.gmra.mxu1 %v118_v45 }
 0x127   :  { %v829_v18 = vadd.f32 %v2066_v12, %v684_v10  ;;  %v2146_v55 = vadd.f32 %v2145_v14, %v2144_v6  ;;  %1706 = vmatprep.mubr.f32.mxu1 %v137_v8  ;;  %v209_v8 = vld [vmem:[%s4850_s0 + $0x618] sm:$0xff]  ;;  %v704_v10 = vadd.f32 %v4008_v51, %v4298_v0  ;;  %v192_v14 = vld [vmem:[%s4850_s0 + $0x590] sm:$0xff] }
 0x128   :  { %v2147_v19 = vpop.f32.mrf.mxu0  ;;  %1847 = vmatmul.mubr.f32.gmra.mxu0 %v120_v13  ;;  %v2068_v20 = vpop.f32.mrf.mxu1  ;;  %v208_v51 = vld [vmem:[%s4850_s0 + $0x610] sm:$0xff] }
 0x129   :  { %v4389_v26 = vadd.f32 %v2146_v55, %v829_v18  ;;  %v2069_v28 = vadd.f32 %v2068_v20, %v2067_v16  ;;  %1851 = vmatprep.mubr.f32.mxu0 %v139_v17  ;;  %v211_v18 = vld [vmem:[%s4850_s0 + $0x628] sm:$0xff] }
 0x12a   :  { %v2148_v30 = vpop.f32.mrf.mxu0  ;;  %v2070_v31 = vpop.f32.mrf.mxu1  ;;  %1707 = vmatmul.mubr.f32.gmra.mxu1 %v136_v1 }
 0x12b   :  { %v834_v33 = vadd.f32 %v2069_v28, %v689_v24  ;;  %v2149_v9 = vadd.f32 %v2148_v30, %v2147_v19  ;;  %1711 = vmatprep.mubr.f32.mxu1 %v155_v23  ;;  %v227_v23 = vld [vmem:[%s4850_s0 + $0x6a8] sm:$0xff]  ;;  %v709_v24 = vadd.f32 %v4042_v3, %v4298_v0  ;;  %v210_v30 = vld [vmem:[%s4850_s0 + $0x620] sm:$0xff] }
 0x12c   :  { %v2150_v34 = vpop.f32.mrf.mxu0  ;;  %1852 = vmatmul.mubr.f32.gmra.mxu0 %v138_v29  ;;  %v2071_v36 = vpop.f32.mrf.mxu1  ;;  %v226_v3 = vld [vmem:[%s4850_s0 + $0x6a0] sm:$0xff] }
 0x12d   :  { %v4405_v42 = vadd.f32 %v2149_v9, %v834_v33  ;;  %v2072_v43 = vadd.f32 %v2071_v36, %v2070_v31  ;;  %1856 = vmatprep.mubr.f32.mxu0 %v157_v32  ;;  %v229_v33 = vld [vmem:[%s4850_s0 + $0x6b8] sm:$0xff] }
 0x12e   :  { %v2151_v46 = vpop.f32.mrf.mxu0  ;;  %v2073_v47 = vpop.f32.mrf.mxu1  ;;  %1712 = vmatmul.mubr.f32.gmra.mxu1 %v154_v22 }
 0x12f   :  { %v839_v49 = vadd.f32 %v2072_v43, %v694_v38  ;;  %v2152_v27 = vadd.f32 %v2151_v46, %v2150_v34  ;;  %1716 = vmatprep.mubr.f32.mxu1 %v173_v37  ;;  %v245_v37 = vld [vmem:[%s4850_s0 + $0x738] sm:$0xff]  ;;  %v714_v38 = vadd.f32 %v4082_v21, %v4298_v0  ;;  %v228_v46 = vld [vmem:[%s4850_s0 + $0x6b0] sm:$0xff] }
 0x130   :  { %v2153_v50 = vpop.f32.mrf.mxu0  ;;  %1857 = vmatmul.mubr.f32.gmra.mxu0 %v156_v44  ;;  %v2074_v52 = vpop.f32.mrf.mxu1  ;;  %v244_v21 = vld [vmem:[%s4850_s0 + $0x730] sm:$0xff] }
 0x131   :  { %v4421_v58 = vadd.f32 %v2152_v27, %v839_v49  ;;  %v2075_v60 = vadd.f32 %v2074_v52, %v2073_v47  ;;  %1861 = vmatprep.mubr.f32.mxu0 %v175_v48  ;;  %v247_v49 = vld [vmem:[%s4850_s0 + $0x748] sm:$0xff] }
 0x132   :  { %v2154_v63 = vpop.f32.mrf.mxu0  ;;  %v2076_v2 = vpop.f32.mrf.mxu1  ;;  %1717 = vmatmul.mubr.f32.gmra.mxu1 %v172_v40 }
 0x133   :  { %v844_v5 = vadd.f32 %v2075_v60, %v699_v56  ;;  %v2155_v45 = vadd.f32 %v2154_v63, %v2153_v50  ;;  %1721 = vmatprep.mubr.f32.mxu1 %v191_v53  ;;  %v263_v53 = vld [vmem:[%s4850_s0 + $0x7c8] sm:$0xff]  ;;  %v719_v56 = vadd.f32 %v4122_v39, %v4298_v0  ;;  %v246_v63 = vld [vmem:[%s4850_s0 + $0x740] sm:$0xff] }
 0x134   :  { %v2156_v6 = vpop.f32.mrf.mxu0  ;;  %1862 = vmatmul.mubr.f32.gmra.mxu0 %v174_v61  ;;  %v2077_v7 = vpop.f32.mrf.mxu1  ;;  %v262_v39 = vld [vmem:[%s4850_s0 + $0x7c0] sm:$0xff] }
 0x135   :  { %v4437_v12 = vadd.f32 %v2155_v45, %v844_v5  ;;  %v2078_v13 = vadd.f32 %v2077_v7, %v2076_v2  ;;  %1866 = vmatprep.mubr.f32.mxu0 %v193_v4  ;;  %v265_v5 = vld [vmem:[%s4850_s0 + $0x7d8] sm:$0xff] }
 0x136   :  { %v2157_v16 = vpop.f32.mrf.mxu0  ;;  %v2079_v17 = vpop.f32.mrf.mxu1  ;;  %1722 = vmatmul.mubr.f32.gmra.mxu1 %v190_v62 }
 0x137   :  { %v849_v55 = vadd.f32 %v2078_v13, %v704_v10  ;;  %v2158_v1 = vadd.f32 %v2157_v16, %v2156_v6  ;;  %1726 = vmatprep.mubr.f32.mxu1 %v209_v8  ;;  %v281_v8 = vld [vmem:[%s4850_s0 + $0x858] sm:$0xff]  ;;  %v724_v10 = vadd.f32 %v4162_v59, %v4298_v0  ;;  %v264_v16 = vld [vmem:[%s4850_s0 + $0x7d0] sm:$0xff] }
 0x138   :  { %v2159_v19 = vpop.f32.mrf.mxu0  ;;  %1867 = vmatmul.mubr.f32.gmra.mxu0 %v192_v14  ;;  %v2080_v20 = vpop.f32.mrf.mxu1  ;;  %v280_v59 = vld [vmem:[%s4850_s0 + $0x850] sm:$0xff] }
 0x139   :  { %v4453_v28 = vadd.f32 %v2158_v1, %v849_v55  ;;  %v2081_v29 = vadd.f32 %v2080_v20, %v2079_v17  ;;  %1871 = vmatprep.mubr.f32.mxu0 %v211_v18  ;;  %v283_v55 = vld [vmem:[%s4850_s0 + $0x868] sm:$0xff] }
 0x13a   :  { %v2160_v31 = vpop.f32.mrf.mxu0  ;;  %v2082_v32 = vpop.f32.mrf.mxu1  ;;  %1727 = vmatmul.mubr.f32.gmra.mxu1 %v208_v51 }
 0x13b   :  { %v854_v9 = vadd.f32 %v2081_v29, %v709_v24  ;;  %v2161_v22 = vadd.f32 %v2160_v31, %v2159_v19  ;;  %1731 = vmatprep.mubr.f32.mxu1 %v227_v23  ;;  %v299_v23 = vld [vmem:[%s4850_s0 + $0x8e8] sm:$0xff]  ;;  %v729_v24 = vadd.f32 %v4202_v15, %v4298_v0  ;;  %v282_v31 = vld [vmem:[%s4850_s0 + $0x860] sm:$0xff] }
 0x13c   :  { %v2162_v34 = vpop.f32.mrf.mxu0  ;;  %1872 = vmatmul.mubr.f32.gmra.mxu0 %v210_v30  ;;  %v2083_v36 = vpop.f32.mrf.mxu1  ;;  %v298_v15 = vld [vmem:[%s4850_s0 + $0x8e0] sm:$0xff] }
 0x13d   :  { %v4469_v43 = vadd.f32 %v2161_v22, %v854_v9  ;;  %v2084_v44 = vadd.f32 %v2083_v36, %v2082_v32  ;;  %1876 = vmatprep.mubr.f32.mxu0 %v229_v33  ;;  %v301_v9 = vld [vmem:[%s4850_s0 + $0x8f8] sm:$0xff] }
 0x13e   :  { %v2163_v47 = vpop.f32.mrf.mxu0  ;;  %v2085_v48 = vpop.f32.mrf.mxu1  ;;  %1732 = vmatmul.mubr.f32.gmra.mxu1 %v226_v3 }
 0x13f   :  { %v859_v27 = vadd.f32 %v2084_v44, %v714_v38  ;;  %v2164_v40 = vadd.f32 %v2163_v47, %v2162_v34  ;;  %1736 = vmatprep.mubr.f32.mxu1 %v245_v37  ;;  %v734_v37 = vadd.f32 %v4242_v35, %v4298_v0 }
 0x140   :  { %v2165_v50 = vpop.f32.mrf.mxu0  ;;  %1877 = vmatmul.mubr.f32.gmra.mxu0 %v228_v46  ;;  %v2086_v52 = vpop.f32.mrf.mxu1  ;;  %v300_v46 = vld [vmem:[%s4850_s0 + $0x8f0] sm:$0xff] }
 0x141   :  { %v4485_v60 = vadd.f32 %v2164_v40, %v859_v27  ;;  %v2087_v61 = vadd.f32 %v2086_v52, %v2085_v48  ;;  %1881 = vmatprep.mubr.f32.mxu0 %v247_v49 }
 0x142   :  { %v2166_v2 = vpop.f32.mrf.mxu0  ;;  %v2088_v4 = vpop.f32.mrf.mxu1  ;;  %1737 = vmatmul.mubr.f32.gmra.mxu1 %v244_v21 }
 0x143   :  { %v864_v45 = vadd.f32 %v2087_v61, %v719_v56  ;;  %v2167_v62 = vadd.f32 %v2166_v2, %v2165_v50  ;;  %1741 = vmatprep.mubr.f32.mxu1 %v263_v53  ;;  %v739_v50 = vadd.f32 %v4276_v54, %v4298_v0 }
 0x144   :  { %v2168_v6 = vpop.f32.mrf.mxu0  ;;  %1882 = vmatmul.mubr.f32.gmra.mxu0 %v246_v63  ;;  %v2089_v7 = vpop.f32.mrf.mxu1 }
 0x145   :  { %v4501_v13 = vadd.f32 %v2167_v62, %v864_v45  ;;  %v2090_v14 = vadd.f32 %v2089_v7, %v2088_v4  ;;  %1886 = vmatprep.mubr.f32.mxu0 %v265_v5 }
 0x146   :  { %v2169_v17 = vpop.f32.mrf.mxu0  ;;  %v2091_v18 = vpop.f32.mrf.mxu1  ;;  %1742 = vmatmul.mubr.f32.gmra.mxu1 %v262_v39 }
 0x147   :  { %v869_v1 = vadd.f32 %v2090_v14, %v724_v10  ;;  %v2170_v51 = vadd.f32 %v2169_v17, %v2168_v6  ;;  %1746 = vmatprep.mubr.f32.mxu1 %v281_v8 }
 0x148   :  { %v2171_v19 = vpop.f32.mrf.mxu0  ;;  %1887 = vmatmul.mubr.f32.gmra.mxu0 %v264_v16  ;;  %v2092_v20 = vpop.f32.mrf.mxu1 }
 0x149   :  { %v4517_v29 = vadd.f32 %v2170_v51, %v869_v1  ;;  %v2093_v30 = vadd.f32 %v2092_v20, %v2091_v18  ;;  %1891 = vmatprep.mubr.f32.mxu0 %v283_v55 }
 0x14a   :  { %v2172_v32 = vpop.f32.mrf.mxu0  ;;  %v2094_v33 = vpop.f32.mrf.mxu1  ;;  %1747 = vmatmul.mubr.f32.gmra.mxu1 %v280_v59 }
 0x14b   :  { %v874_v22 = vadd.f32 %v2093_v30, %v729_v24  ;;  %v2173_v3 = vadd.f32 %v2172_v32, %v2171_v19  ;;  %1751 = vmatprep.mubr.f32.mxu1 %v299_v23 }
 0x14c   :  { %v2174_v34 = vpop.f32.mrf.mxu0  ;;  %1892 = vmatmul.mubr.f32.gmra.mxu0 %v282_v31  ;;  %v2095_v36 = vpop.f32.mrf.mxu1 }
 0x14d   :  { %v4530_v38 = vadd.f32 %v2173_v3, %v874_v22  ;;  %v2096_v44 = vadd.f32 %v2095_v36, %v2094_v33  ;;  %1896 = vmatprep.mubr.f32.mxu0 %v301_v9 }
 0x14e   :  { %v2175_v47 = vpop.f32.mrf.mxu0  ;;  %v2097_v48 = vpop.f32.mrf.mxu1  ;;  %1752 = vmatmul.mubr.f32.gmra.mxu1 %v298_v15 }
 0x14f   :  { %v879_v49 = vadd.f32 %v2096_v44, %v734_v37  ;;  %v2176_v27 = vadd.f32 %v2175_v47, %v2174_v34 }
 0x150   :  { %v2177_v40 = vpop.f32.mrf.mxu0  ;;  %1897 = vmatmul.mubr.f32.gmra.mxu0 %v300_v46  ;;  %v2098_v21 = vpop.f32.mrf.mxu1 }
 0x151   :  { %v4537_v35 = vadd.f32 %v2176_v27, %v879_v49  ;;  %v2099_v52 = vadd.f32 %v2098_v21, %v2097_v48 }
 0x152   :  { %v2178_v53 = vpop.f32.mrf.mxu0  ;;  %v2212_v56 = vpop.f32.mrf.mxu1 }
 0x153   :  { %v884_v61 = vadd.f32 %v2099_v52, %v739_v50  ;;  %v2179_v63 = vadd.f32 %v2178_v53, %v2177_v40 }
 0x154   :  { %v2292_v2 = vpop.f32.mrf.mxu0  ;;  %v2213_v4 = vpop.f32.mrf.mxu1 }
 0x155   :  { %v4539_v5 = vadd.f32 %v2179_v63, %v884_v61  ;;  %v2214_v45 = vadd.f32 %v2213_v4, %v2212_v56 }
 0x156   :  { %v2293_v62 = vpop.f32.mrf.mxu0  ;;  %v2215_v39 = vpop.f32.mrf.mxu1 }
 0x157   :  { %v1099_v6 = vadd.f32 %v2214_v45, %v4325_v25  ;;  %v2294_v7 = vadd.f32 %v2293_v62, %v2292_v2 }
 0x158   :  { %v2295_v8 = vpop.f32.mrf.mxu0  ;;  %v2216_v10 = vpop.f32.mrf.mxu1 }
 0x159   :  { %v4542_v54 = vadd.f32 %v2294_v7, %v1099_v6  ;;  %v2217_v0 = vadd.f32 %v2216_v10, %v2215_v39 }
 0x15a   :  { %v2296_v14 = vpop.f32.mrf.mxu0  ;;  %v2218_v16 = vpop.f32.mrf.mxu1 }
 0x15b   :  { %v1104_v17 = vadd.f32 %v2217_v0, %v4341_v41  ;;  %v2297_v18 = vadd.f32 %v2296_v14, %v2295_v8 }
 0x15c   :  { %v2298_v55 = vpop.f32.mrf.mxu0  ;;  %v2219_v1 = vpop.f32.mrf.mxu1 }
 0x15d   :  { %v4545_v51 = vadd.f32 %v2297_v18, %v1104_v17  ;;  %v2220_v59 = vadd.f32 %v2219_v1, %v2218_v16 }
 0x15e   :  { %v2299_v19 = vpop.f32.mrf.mxu0  ;;  %v2221_v20 = vpop.f32.mrf.mxu1 }
 0x15f   :  { %v1109_v25 = vadd.f32 %v2220_v59, %v4357_v57  ;;  %v2300_v23 = vadd.f32 %v2299_v19, %v2298_v55 }
 0x160   :  { %v2301_v24 = vpop.f32.mrf.mxu0  ;;  %v2222_v30 = vpop.f32.mrf.mxu1 }
 0x161   :  { %v4548_v31 = vadd.f32 %v2300_v23, %v1109_v25  ;;  %v2223_v32 = vadd.f32 %v2222_v30, %v2221_v20 }
 0x162   :  { %v2302_v33 = vpop.f32.mrf.mxu0  ;;  %v2224_v9 = vpop.f32.mrf.mxu1 }
 0x163   :  { %v1114_v41 = vadd.f32 %v2223_v32, %v4373_v11  ;;  %v2303_v22 = vadd.f32 %v2302_v33, %v2301_v24 }
 0x164   :  { %v2304_v3 = vpop.f32.mrf.mxu0  ;;  %v2225_v15 = vpop.f32.mrf.mxu1 }
 0x165   :  { %v4551_v34 = vadd.f32 %v2303_v22, %v1114_v41  ;;  %v2226_v36 = vadd.f32 %v2225_v15, %v2224_v9 }
 0x166   :  { %v2305_v37 = vpop.f32.mrf.mxu0  ;;  %v2227_v44 = vpop.f32.mrf.mxu1 }
 0x167   :  { %v1119_v57 = vadd.f32 %v2226_v36, %v4389_v26  ;;  %v2306_v46 = vadd.f32 %v2305_v37, %v2304_v3 }
 0x168   :  { %v2307_v47 = vpop.f32.mrf.mxu0  ;;  %v2228_v48 = vpop.f32.mrf.mxu1 }
 0x169   :  { %v4554_v49 = vadd.f32 %v2306_v46, %v1119_v57  ;;  %v2229_v27 = vadd.f32 %v2228_v48, %v2227_v44 }
 0x16a   :  { %v2308_v40 = vpop.f32.mrf.mxu0  ;;  %v2230_v21 = vpop.f32.mrf.mxu1 }
 0x16b   :  { %v1124_v11 = vadd.f32 %v2229_v27, %v4405_v42  ;;  %v2309_v50 = vadd.f32 %v2308_v40, %v2307_v47 }
 0x16c   :  { %v2310_v52 = vpop.f32.mrf.mxu0  ;;  %v2231_v53 = vpop.f32.mrf.mxu1 }
 0x16d   :  { %v4557_v56 = vadd.f32 %v2309_v50, %v1124_v11  ;;  %v2232_v61 = vadd.f32 %v2231_v53, %v2230_v21 }
 0x16e   :  { %v2311_v63 = vpop.f32.mrf.mxu0  ;;  %v2233_v2 = vpop.f32.mrf.mxu1 }
 0x16f   :  { %v1129_v26 = vadd.f32 %v2232_v61, %v4421_v58  ;;  %v2312_v4 = vadd.f32 %v2311_v63, %v2310_v52 }
 0x170   :  { %v2313_v45 = vpop.f32.mrf.mxu0  ;;  %v2234_v62 = vpop.f32.mrf.mxu1 }
 0x171   :  { %v4560_v39 = vadd.f32 %v2312_v4, %v1129_v26  ;;  %v2235_v6 = vadd.f32 %v2234_v62, %v2233_v2 }
 0x172   :  { %v2314_v7 = vpop.f32.mrf.mxu0  ;;  %v2236_v8 = vpop.f32.mrf.mxu1 }
 0x173   :  { %v1134_v42 = vadd.f32 %v2235_v6, %v4437_v12  ;;  %v2315_v10 = vadd.f32 %v2314_v7, %v2313_v45 }
 0x174   :  { %v2316_v0 = vpop.f32.mrf.mxu0  ;;  %v2237_v14 = vpop.f32.mrf.mxu1 }
 0x175   :  { %v4563_v16 = vadd.f32 %v2315_v10, %v1134_v42  ;;  %v2238_v17 = vadd.f32 %v2237_v14, %v2236_v8 }
 0x176   :  { %v2317_v18 = vpop.f32.mrf.mxu0  ;;  %v2239_v55 = vpop.f32.mrf.mxu1 }
 0x177   :  { %v1139_v58 = vadd.f32 %v2238_v17, %v4453_v28  ;;  %v2318_v1 = vadd.f32 %v2317_v18, %v2316_v0 }
 0x178   :  { %v2319_v59 = vpop.f32.mrf.mxu0  ;;  %v2240_v19 = vpop.f32.mrf.mxu1 }
 0x179   :  { %v4566_v20 = vadd.f32 %v2318_v1, %v1139_v58  ;;  %v2241_v25 = vadd.f32 %v2240_v19, %v2239_v55 }
 0x17a   :  { %v2320_v23 = vpop.f32.mrf.mxu0  ;;  %v2242_v24 = vpop.f32.mrf.mxu1 }
 0x17b   :  { %v1144_v12 = vadd.f32 %v2241_v25, %v4469_v43  ;;  %v2321_v30 = vadd.f32 %v2320_v23, %v2319_v59 }
 0x17c   :  { %v2322_v32 = vpop.f32.mrf.mxu0  ;;  %v2243_v33 = vpop.f32.mrf.mxu1 }
 0x17d   :  { %v4569_v9 = vadd.f32 %v2321_v30, %v1144_v12  ;;  %v2244_v41 = vadd.f32 %v2243_v33, %v2242_v24 }
 0x17e   :  { %v2323_v22 = vpop.f32.mrf.mxu0  ;;  %v2245_v3 = vpop.f32.mrf.mxu1 }
 0x17f   :  { %v1149_v28 = vadd.f32 %v2244_v41, %v4485_v60  ;;  %v2324_v15 = vadd.f32 %v2323_v22, %v2322_v32 }
 0x180   :  { %v2325_v36 = vpop.f32.mrf.mxu0  ;;  %v2246_v37 = vpop.f32.mrf.mxu1 }
 0x181   :  { %v4572_v44 = vadd.f32 %v2324_v15, %v1149_v28  ;;  %v2247_v57 = vadd.f32 %v2246_v37, %v2245_v3 }
 0x182   :  { %v2326_v46 = vpop.f32.mrf.mxu0  ;;  %v2248_v47 = vpop.f32.mrf.mxu1 }
 0x183   :  { %4853 = vst [vmem:[#allocation2_spill] sm:$0xff] %v4572_v44  ;;  %v1154_v43 = vadd.f32 %v2247_v57, %v4501_v13  ;;  %v2327_v48 = vadd.f32 %v2326_v46, %v2325_v36 }
 0x184   :  { %v2328_v27 = vpop.f32.mrf.mxu0  ;;  %v2249_v40 = vpop.f32.mrf.mxu1 }
 0x185   :  { %v4575_v21 = vadd.f32 %v2327_v48, %v1154_v43  ;;  %v2250_v11 = vadd.f32 %v2249_v40, %v2248_v47 }
 0x186   :  { %v2329_v50 = vpop.f32.mrf.mxu0  ;;  %v2251_v52 = vpop.f32.mrf.mxu1 }
 0x187   :  { %4854 = vst [vmem:[#allocation3_spill] sm:$0xff] %v4575_v21  ;;  %v1159_v60 = vadd.f32 %v2250_v11, %v4517_v29  ;;  %v2330_v53 = vadd.f32 %v2329_v50, %v2328_v27 }
 0x188   :  { %v2331_v61 = vpop.f32.mrf.mxu0  ;;  %v2252_v63 = vpop.f32.mrf.mxu1 }
 0x189   :  { %v4578_v2 = vadd.f32 %v2330_v53, %v1159_v60  ;;  %v2253_v26 = vadd.f32 %v2252_v63, %v2251_v52 }
 0x18a   :  { %v2332_v4 = vpop.f32.mrf.mxu0  ;;  %v2254_v45 = vpop.f32.mrf.mxu1 }
 0x18b   :  { %4855 = vst [vmem:[#allocation4_spill] sm:$0xff] %v4578_v2  ;;  %v1164_v13 = vadd.f32 %v2253_v26, %v4530_v38  ;;  %v2333_v62 = vadd.f32 %v2332_v4, %v2331_v61 }
 0x18c   :  { %v2334_v6 = vpop.f32.mrf.mxu0  ;;  %v2255_v7 = vpop.f32.mrf.mxu1 }
 0x18d   :  { %v4581_v8 = vadd.f32 %v2333_v62, %v1164_v13  ;;  %v2256_v42 = vadd.f32 %v2255_v7, %v2254_v45 }
 0x18e   :  { %v2335_v10 = vpop.f32.mrf.mxu0  ;;  %v2257_v0 = vpop.f32.mrf.mxu1 }
 0x18f   :  { %4856 = vst [vmem:[#allocation5_spill] sm:$0xff] %v4581_v8  ;;  %v1169_v29 = vadd.f32 %v2256_v42, %v4537_v35  ;;  %v2336_v14 = vadd.f32 %v2335_v10, %v2334_v6 }
 0x190   :  { %v2337_v17 = vpop.f32.mrf.mxu0  ;;  %v2258_v18 = vpop.f32.mrf.mxu1 }
 0x191   :  { %v4584_v55 = vadd.f32 %v2336_v14, %v1169_v29  ;;  %v2259_v58 = vadd.f32 %v2258_v18, %v2257_v0 }
 0x192   :  { %v2338_v1 = vpop.f32.mrf.mxu0  ;;  %v2372_v59 = vpop.f32.mrf.mxu1 }
 0x193   :  { %4857 = vst [vmem:[#allocation6_spill] sm:$0xff] %v4584_v55  ;;  %v1174_v38 = vadd.f32 %v2259_v58, %v4539_v5  ;;  %v2339_v19 = vadd.f32 %v2338_v1, %v2337_v17 }
 0x194   :  { %v4587_v25 = vpop.f32.mrf.mxu0  ;;  %v2373_v23 = vpop.f32.mrf.mxu1 }
 0x195   :  { %v4589_v24 = vadd.f32 %v2339_v19, %v1174_v38 }
 0x196   :  { %v4591_v12 = vpop.f32.mrf.mxu0  ;;  %v2375_v30 = vpop.f32.mrf.mxu1 }
 0x197   :  { %4858 = vst [vmem:[#allocation7_spill] sm:$0xff] %v4589_v24 }
 0x198   :  { %v4593_v35 = vpop.f32.mrf.mxu0  ;;  %v2376_v32 = vpop.f32.mrf.mxu1 }
 0x19a   :  { %v4595_v33 = vpop.f32.mrf.mxu0  ;;  %v4597_v41 = vpop.f32.mrf.mxu1 }
 0x19c   :  { %v4599_v22 = vpop.f32.mrf.mxu0  ;;  %v4601_v3 = vpop.f32.mrf.mxu1 }
 0x19e   :  { %v4603_v5 = vpop.f32.mrf.mxu0  ;;  %v4605_v28 = vpop.f32.mrf.mxu1 }
 0x1a0   :  { %v4607_v15 = vpop.f32.mrf.mxu0  ;;  %v4609_v36 = vpop.f32.mrf.mxu1 }
 0x1a2   :  { %v4611_v37 = vpop.f32.mrf.mxu0  ;;  %v4613_v57 = vpop.f32.mrf.mxu1 }
 0x1a4   :  { %v4615_v46 = vpop.f32.mrf.mxu0  ;;  %v4617_v47 = vpop.f32.mrf.mxu1 }
 0x1a6   :  { %v4619_v43 = vpop.f32.mrf.mxu0  ;;  %v4621_v48 = vpop.f32.mrf.mxu1 }
 0x1a8   :  { %v4623_v27 = vpop.f32.mrf.mxu0  ;;  %v4625_v40 = vpop.f32.mrf.mxu1 }
 0x1aa   :  { %v4627_v11 = vpop.f32.mrf.mxu0  ;;  %v4629_v50 = vpop.f32.mrf.mxu1 }
 0x1ac   :  { %v4631_v52 = vpop.f32.mrf.mxu0  ;;  %v4633_v60 = vpop.f32.mrf.mxu1 }
 0x1ae   :  { %v4635_v53 = vpop.f32.mrf.mxu0  ;;  %v4637_v61 = vpop.f32.mrf.mxu1 }
 0x1b0   :  { %v4639_v63 = vpop.f32.mrf.mxu0  ;;  %v4641_v26 = vpop.f32.mrf.mxu1 }
 0x1b2   :  { %v4643_v4 = vpop.f32.mrf.mxu0  ;;  %v4645_v45 = vpop.f32.mrf.mxu1 }
 0x1b4   :  { %v4647_v13 = vpop.f32.mrf.mxu0  ;;  %v4649_v62 = vpop.f32.mrf.mxu1 }
 0x1b6   :  { %v4651_v6 = vpop.f32.mrf.mxu0  ;;  %v4653_v7 = vpop.f32.mrf.mxu1 }
 0x1b8   :  { %v4655_v42 = vpop.f32.mrf.mxu0  ;;  %v4657_v10 = vpop.f32.mrf.mxu1 }
 0x1ba   :  { %v4659_v0 = vpop.f32.mrf.mxu0  ;;  %v4661_v29 = vpop.f32.mrf.mxu1 }
 0x1bb   :  { %4859 = vst [vmem:[#allocation8_spill] sm:$0xff] %v4659_v0 }
 0x1bc   :  { %v4663_v14 = vpop.f32.mrf.mxu0  ;;  %v4665_v17 = vpop.f32.mrf.mxu1 }
 0x1bd   :  { %4860 = vst [vmem:[#allocation9_spill] sm:$0xff] %v4663_v14 }
 0x1be   :  { %v4667_v18 = vpop.f32.mrf.mxu0  ;;  %v4669_v58 = vpop.f32.mrf.mxu1 }
 0x1bf   :  { %4861 = vst [vmem:[#allocation10_spill] sm:$0xff] %v4667_v18  ;;  %4862 = vst [vmem:[#allocation11_spill] sm:$0xff] %v4669_v58 }
 0x1c0   :  { %v4671_v1 = vpop.f32.mrf.mxu0  ;;  %v4673_v38 = vpop.f32.mrf.mxu1 }
 0x1c1   :  { %4863 = vst [vmem:[#allocation12_spill] sm:$0xff] %v4671_v1  ;;  %4864 = vst [vmem:[#allocation13_spill] sm:$0xff] %v4673_v38 }
 0x1c2   :  { %v4675_v19 = vpop.f32.mrf.mxu0  ;;  %v4677_v24 = vpop.f32.mrf.mxu1 }
 0x1c3   :  { %4865 = vst [vmem:[#allocation14_spill] sm:$0xff] %v4675_v19  ;;  %4866 = vst [vmem:[#allocation15_spill] sm:$0xff] %v4677_v24  ;;  %v2374_v24 = vadd.f32 %v2373_v23, %v2372_v59 }
 0x1c4   :  { %v4679_v55 = vpop.f32.mrf.mxu0  ;;  %v4681_v8 = vpop.f32.mrf.mxu1 }
 0x1c5   :  { %4867 = vst [vmem:[#allocation16_spill] sm:$0xff] %v4679_v55  ;;  %4868 = vst [vmem:[#allocation17_spill] sm:$0xff] %v4681_v8 }
 0x1c6   :  { %v4683_v2 = vpop.f32.mrf.mxu0  ;;  %v4685_v21 = vpop.f32.mrf.mxu1 }
 0x1c7   :  { %4869 = vst [vmem:[#allocation18_spill] sm:$0xff] %v4683_v2  ;;  %4870 = vst [vmem:[#allocation19_spill] sm:$0xff] %v4685_v21  ;;  %v2377_v2 = vadd.f32 %v2376_v32, %v2375_v30  ;;  %v2380_v30 = vadd.f32 %v4601_v3, %v4597_v41 }
 0x1c8   :  { %v4687_v14 = vpop.f32.mrf.mxu0  ;;  %v4689_v18 = vpop.f32.mrf.mxu1 }
 0x1c9   :  { %4871 = vst [vmem:[#allocation20_spill] sm:$0xff] %v4687_v14  ;;  %4872 = vst [vmem:[#allocation21_spill] sm:$0xff] %v4689_v18  ;;  %v1389_v14 = vadd.f32 %v2374_v24, %v4542_v54 }
 0x1ca   :  { %v4691_v58 = vpop.f32.mrf.mxu0  ;;  %v4693_v1 = vpop.f32.mrf.mxu1 }
 0x1cb   :  { %4873 = vst [vmem:[#allocation22_spill] sm:$0xff] %v4691_v58  ;;  %4874 = vst [vmem:[#allocation23_spill] sm:$0xff] %v4693_v1 }
 0x1cc   :  { %v4695_v38 = vpop.f32.mrf.mxu0  ;;  %v4697_v19 = vpop.f32.mrf.mxu1 }
 0x1cd   :  { %4875 = vst [vmem:[#allocation24_spill] sm:$0xff] %v4695_v38  ;;  %4876 = vst [vmem:[#allocation25_spill] sm:$0xff] %v4697_v19  ;;  %v2454_v38 = vadd.f32 %v4591_v12, %v4587_v25  ;;  %v1394_v19 = vadd.f32 %v2377_v2, %v4545_v51  ;;  %v1399_v25 = vadd.f32 %v2380_v30, %v4548_v31 }
 0x1ce   :  { %v4699_v55 = vpop.f32.mrf.mxu0  ;;  %v4701_v8 = vpop.f32.mrf.mxu1  ;;  %v2383_v51 = vadd.f32 %v4609_v36, %v4605_v28 }
 0x1cf   :  { %4877 = vst [vmem:[#allocation26_spill] sm:$0xff] %v4699_v55  ;;  %4878 = vst [vmem:[#allocation27_spill] sm:$0xff] %v4701_v8  ;;  %v1534_v55 = vadd.f32 %v2454_v38, %v1389_v14 }
 0x1d0   :  { %v4703_v44 = vpop.f32.mrf.mxu0  ;;  %v4705_v21 = vpop.f32.mrf.mxu1  ;;  %v1404_v38 = vadd.f32 %v2383_v51, %v4551_v34 }
 0x1d1   :  { %4879 = vst [vmem:[#allocation28_spill] sm:$0xff] %v4703_v44  ;;  %4880 = vst [vmem:[#allocation29_spill] sm:$0xff] %v4705_v21  ;;  %v2457_v44 = vadd.f32 %v4595_v33, %v4593_v35  ;;  %v2460_v35 = vadd.f32 %v4603_v5, %v4599_v22 }
 0x1d2   :  { %v4708_v18 = vpop.f32.mrf.mxu0  ;;  %v2532_v58 = vpop.f32.mrf.mxu1 }
 0x1d3   :  { %4881 = vst [vmem:[#allocation30_spill] sm:$0xff] %v4708_v18  ;;  %v1539_v8 = vadd.f32 %v2457_v44, %v1394_v19  ;;  %v2386_v44 = vadd.f32 %v4617_v47, %v4613_v57  ;;  %v1544_v31 = vadd.f32 %v2460_v35, %v1399_v25 }
 0x1d4   :  { %v2612_v59 = vpop.f32.mrf.mxu0  ;;  %v2533_v23 = vpop.f32.mrf.mxu1 }
 0x1d5   :  { %v2534_v32 = vadd.f32 %v2533_v23, %v2532_v58  ;;  %v1409_v47 = vadd.f32 %v2386_v44, %v4554_v49 }
 0x1d6   :  { %v2613_v21 = vpop.f32.mrf.mxu0  ;;  %v2535_v54 = vpop.f32.mrf.mxu1 }
 0x1d7   :  { %v1679_v24 = vadd.f32 %v2534_v32, %v1534_v55  ;;  %v2614_v18 = vadd.f32 %v2613_v21, %v2612_v59  ;;  %v2389_v59 = vadd.f32 %v4625_v40, %v4621_v48  ;;  %v2392_v40 = vadd.f32 %v4633_v60, %v4629_v50 }
 0x1d8   :  { %v2615_v1 = vpop.f32.mrf.mxu0  ;;  %v2536_v0 = vpop.f32.mrf.mxu1 }
 0x1d9   :  { %v1824_v2 = vadd.f32 %v2614_v18, %v1679_v24  ;;  %v2537_v12 = vadd.f32 %v2536_v0, %v2535_v54  ;;  %v1414_v48 = vadd.f32 %v2389_v59, %v4557_v56  ;;  %v2395_v56 = vadd.f32 %v4641_v26, %v4637_v61 }
 0x1da   :  { %v2616_v41 = vpop.f32.mrf.mxu0  ;;  %v2538_v3 = vpop.f32.mrf.mxu1  ;;  %v1419_v44 = vadd.f32 %v2392_v40, %v4560_v39 }
 0x1db   :  { %v1902_v33 = vmax.f32 %v1824_v2, 0.0  ;;  %v1684_v14 = vadd.f32 %v2537_v12, %v1539_v8  ;;  %v2617_v55 = vadd.f32 %v2616_v41, %v2615_v1  ;;  %v2463_v8 = vadd.f32 %v4611_v37, %v4607_v15 }
 0x1dc   :  { %v2618_v21 = vpop.f32.mrf.mxu0  ;;  %v2539_v58 = vpop.f32.mrf.mxu1  ;;  %v2466_v15 = vadd.f32 %v4619_v43, %v4615_v46  ;;  %v1424_v26 = vadd.f32 %v2395_v56, %v4563_v16  ;;  %v4886_v56 = vld [vmem:[#allocation9_spill] sm:$0xff] }
 0x1dd   :  { %1919 = vst.msk [vmem:[%s4852_s3] sm:$0xff] %vm1918_vm0, %v1902_v33  ;;  %v1829_v28 = vadd.f32 %v2617_v55, %v1684_v14  ;;  %v2540_v36 = vadd.f32 %v2539_v58, %v2538_v3  ;;  %v1549_v34 = vadd.f32 %v2463_v8, %v1404_v38  ;;  %v2469_v3 = vadd.f32 %v4627_v11, %v4623_v27 }
 0x1de   :  { %v2619_v0 = vpop.f32.mrf.mxu0  ;;  %v2541_v22 = vpop.f32.mrf.mxu1  ;;  %v1554_v25 = vadd.f32 %v2466_v15, %v1409_v47  ;;  %v2472_v11 = vadd.f32 %v4635_v53, %v4631_v52  ;;  %v2475_v52 = vadd.f32 %v4643_v4, %v4639_v63 }
 0x1df   :  { %v1903_v5 = vmax.f32 %v1829_v28, 0.0  ;;  %v1689_v18 = vadd.f32 %v2540_v36, %v1544_v31  ;;  %v2620_v57 = vadd.f32 %v2619_v0, %v2618_v21  ;;  %v1559_v60 = vadd.f32 %v2469_v3, %v1414_v48  ;;  %v4885_v3 = vld [vmem:[#allocation13_spill] sm:$0xff] }
 0x1e0   :  { %v2621_v1 = vpop.f32.mrf.mxu0  ;;  %v2542_v19 = vpop.f32.mrf.mxu1  ;;  %v1564_v39 = vadd.f32 %v2472_v11, %v1419_v44 }
 0x1e1   :  { %1920 = vst.msk [vmem:[%s4852_s3 + $0x8] sm:$0xff] %vm1918_vm0, %v1903_v5  ;;  %v1834_v23 = vadd.f32 %v2620_v57, %v1689_v18  ;;  %v2543_v30 = vadd.f32 %v2542_v19, %v2541_v22  ;;  %v2398_v22 = vadd.f32 %v4649_v62, %v4645_v45  ;;  %v2401_v62 = vadd.f32 %v4657_v10, %v4653_v7 }
 0x1e2   :  { %v2622_v37 = vpop.f32.mrf.mxu0  ;;  %v2544_v32 = vpop.f32.mrf.mxu1 }
 0x1e3   :  { %v1904_v54 = vmax.f32 %v1834_v23, 0.0  ;;  %v1694_v49 = vadd.f32 %v2543_v30, %v1549_v34  ;;  %v2623_v24 = vadd.f32 %v2622_v37, %v2621_v1  ;;  %v1569_v1 = vadd.f32 %v2475_v52, %v1424_v26  ;;  %v4890_v26 = vld [vmem:[#allocation17_spill] sm:$0xff]  ;;  %v4892_v52 = vld [vmem:[#allocation14_spill] sm:$0xff] }
 0x1e4   :  { %v2624_v51 = vpop.f32.mrf.mxu0  ;;  %v2545_v2 = vpop.f32.mrf.mxu1  ;;  %v1429_v45 = vadd.f32 %v2398_v22, %v4566_v20  ;;  %v2478_v30 = vadd.f32 %v4651_v6, %v4647_v13  ;;  %v2404_v20 = vadd.f32 %v4665_v17, %v4661_v29  ;;  %v4882_v6 = vld [vmem:[#allocation8_spill] sm:$0xff]  ;;  %v4883_v17 = vld [vmem:[#allocation2_spill] sm:$0xff] }
 0x1e5   :  { %1921 = vst.msk [vmem:[%s4852_s3 + $0x10] sm:$0xff] %vm1918_vm0, %v1904_v54  ;;  %v1839_v12 = vadd.f32 %v2623_v24, %v1694_v49  ;;  %v2546_v46 = vadd.f32 %v2545_v2, %v2544_v32  ;;  %v1434_v49 = vadd.f32 %v2401_v62, %v4569_v9  ;;  %v2481_v2 = vadd.f32 %v4882_v6, %v4655_v42  ;;  %v4887_v42 = vld [vmem:[#allocation10_spill] sm:$0xff]  ;;  %v4899_v6 = vld [vmem:[#allocation23_spill] sm:$0xff] }
 0x1e6   :  { %v2625_v43 = vpop.f32.mrf.mxu0  ;;  %v2547_v41 = vpop.f32.mrf.mxu1  ;;  %v1574_v10 = vadd.f32 %v2478_v30, %v1429_v45 }
 0x1e7   :  { %v1905_v35 = vmax.f32 %v1839_v12, 0.0  ;;  %v1699_v33 = vadd.f32 %v2546_v46, %v1554_v25  ;;  %v2626_v14 = vadd.f32 %v2625_v43, %v2624_v51  ;;  %v1439_v12 = vadd.f32 %v2404_v20, %v4883_v17  ;;  %v4901_v17 = vld [vmem:[#allocation20_spill] sm:$0xff] }
 0x1e8   :  { %v2627_v55 = vpop.f32.mrf.mxu0  ;;  %v2548_v50 = vpop.f32.mrf.mxu1  ;;  %v1579_v9 = vadd.f32 %v2481_v2, %v1434_v49  ;;  %v4898_v49 = vld [vmem:[#allocation5_spill] sm:$0xff] }
 0x1e9   :  { %1922 = vst.msk [vmem:[%s4852_s3 + $0x18] sm:$0xff] %vm1918_vm0, %v1905_v35  ;;  %v1844_v21 = vadd.f32 %v2626_v14, %v1699_v33  ;;  %v2549_v58 = vadd.f32 %v2548_v50, %v2547_v41  ;;  %v4884_v41 = vld [vmem:[#allocation11_spill] sm:$0xff]  ;;  %v4900_v2 = vld [vmem:[#allocation25_spill] sm:$0xff] }
 0x1ea   :  { %v2628_v31 = vpop.f32.mrf.mxu0  ;;  %v2550_v27 = vpop.f32.mrf.mxu1  ;;  %v2407_v35 = vadd.f32 %v4885_v3, %v4884_v41 }
 0x1eb   :  { %v1906_v38 = vmax.f32 %v1844_v21, 0.0  ;;  %v1704_v28 = vadd.f32 %v2549_v58, %v1559_v60  ;;  %v2629_v61 = vadd.f32 %v2628_v31, %v2627_v55  ;;  %v2484_v55 = vadd.f32 %v4887_v42, %v4886_v56  ;;  %v4903_v42 = vld [vmem:[#allocation6_spill] sm:$0xff] }
 0x1ec   :  { %v2630_v36 = vpop.f32.mrf.mxu0  ;;  %v2551_v0 = vpop.f32.mrf.mxu1 }
 0x1ed   :  { %1923 = vst.msk [vmem:[%s4852_s3 + $0x20] sm:$0xff] %vm1918_vm0, %v1906_v38  ;;  %v1849_v8 = vadd.f32 %v2629_v61, %v1704_v28  ;;  %v2552_v5 = vadd.f32 %v2551_v0, %v2550_v27  ;;  %v1584_v31 = vadd.f32 %v2484_v55, %v1439_v12  ;;  %v4888_v38 = vld [vmem:[#allocation3_spill] sm:$0xff]  ;;  %v4902_v12 = vld [vmem:[#allocation22_spill] sm:$0xff] }
 0x1ee   :  { %v2631_v53 = vpop.f32.mrf.mxu0  ;;  %v2553_v18 = vpop.f32.mrf.mxu1  ;;  %v1444_v28 = vadd.f32 %v2407_v35, %v4888_v38  ;;  %v4889_v61 = vld [vmem:[#allocation15_spill] sm:$0xff]  ;;  %v4907_v38 = vld [vmem:[#allocation26_spill] sm:$0xff] }
 0x1ef   :  { %v1907_v57 = vmax.f32 %v1849_v8, 0.0  ;;  %v1709_v16 = vadd.f32 %v2552_v5, %v1564_v39  ;;  %v2632_v47 = vadd.f32 %v2631_v53, %v2630_v36  ;;  %v2410_v36 = vadd.f32 %v4890_v26, %v4889_v61  ;;  %v4891_v5 = vld [vmem:[#allocation12_spill] sm:$0xff] }
 0x1f0   :  { %v2633_v19 = vpop.f32.mrf.mxu0  ;;  %v2554_v34 = vpop.f32.mrf.mxu1  ;;  %v2487_v53 = vadd.f32 %v4892_v52, %v4891_v5 }
 0x1f1   :  { %1924 = vst.msk [vmem:[%s4852_s3 + $0x28] sm:$0xff] %vm1918_vm0, %v1907_v57  ;;  %v1854_v59 = vadd.f32 %v2632_v47, %v1709_v16  ;;  %v2555_v63 = vadd.f32 %v2554_v34, %v2553_v18  ;;  %v4893_v47 = vld [vmem:[#allocation19_spill] sm:$0xff] }
 0x1f2   :  { %v2634_v4 = vpop.f32.mrf.mxu0  ;;  %v2556_v23 = vpop.f32.mrf.mxu1  ;;  %v1589_v62 = vadd.f32 %v2487_v53, %v1444_v28 }
 0x1f3   :  { %v1908_v15 = vmax.f32 %v1854_v59, 0.0  ;;  %v1714_v37 = vadd.f32 %v2555_v63, %v1569_v1  ;;  %v2635_v32 = vadd.f32 %v2634_v4, %v2633_v19  ;;  %v4894_v1 = vld [vmem:[#allocation21_spill] sm:$0xff]  ;;  %v4895_v59 = vld [vmem:[#allocation4_spill] sm:$0xff] }
 0x1f4   :  { %v2636_v54 = vpop.f32.mrf.mxu0  ;;  %v2557_v7 = vpop.f32.mrf.mxu1  ;;  %v2413_v19 = vadd.f32 %v4894_v1, %v4893_v47  ;;  %v1449_v63 = vadd.f32 %v2410_v36, %v4895_v59  ;;  %v4910_v47 = vld [vmem:[#allocation30_spill] sm:$0xff] }
 0x1f5   :  { %1925 = vst.msk [vmem:[%s4852_s3 + $0x30] sm:$0xff] %vm1918_vm0, %v1908_v15  ;;  %v1859_v24 = vadd.f32 %v2635_v32, %v1714_v37  ;;  %v2558_v25 = vadd.f32 %v2557_v7, %v2556_v23  ;;  %v4896_v37 = vld [vmem:[#allocation16_spill] sm:$0xff]  ;;  %v4897_v32 = vld [vmem:[#allocation18_spill] sm:$0xff] }
 0x1f6   :  { %v2637_v51 = vpop.f32.mrf.mxu0  ;;  %v2559_v13 = vpop.f32.mrf.mxu1  ;;  %v2490_v20 = vadd.f32 %v4897_v32, %v4896_v37 }
 0x1f7   :  { %v1909_v48 = vmax.f32 %v1859_v24, 0.0  ;;  %v1719_v40 = vadd.f32 %v2558_v25, %v1574_v10  ;;  %v2638_v29 = vadd.f32 %v2637_v51, %v2636_v54  ;;  %v1454_v24 = vadd.f32 %v2413_v19, %v4898_v49 }
 0x1f8   :  { %v2639_v46 = vpop.f32.mrf.mxu0  ;;  %v2560_v43 = vpop.f32.mrf.mxu1 }
 0x1f9   :  { %1926 = vst.msk [vmem:[%s4852_s3 + $0x38] sm:$0xff] %vm1918_vm0, %v1909_v48  ;;  %v1864_v33 = vadd.f32 %v2638_v29, %v1719_v40  ;;  %v2561_v14 = vadd.f32 %v2560_v43, %v2559_v13  ;;  %v1594_v13 = vadd.f32 %v2490_v20, %v1449_v63  ;;  %v2416_v48 = vadd.f32 %v4900_v2, %v4899_v6 }
 0x1fa   :  { %v2640_v50 = vpop.f32.mrf.mxu0  ;;  %v2562_v60 = vpop.f32.mrf.mxu1 }
 0x1fb   :  { %v1910_v44 = vmax.f32 %v1864_v33, 0.0  ;;  %v1724_v21 = vadd.f32 %v2561_v14, %v1579_v9  ;;  %v2641_v58 = vadd.f32 %v2640_v50, %v2639_v46  ;;  %v2493_v46 = vadd.f32 %v4902_v12, %v4901_v17  ;;  %v4904_v50 = vld [vmem:[#allocation27_spill] sm:$0xff] }
 0x1fc   :  { %v2642_v27 = vpop.f32.mrf.mxu0  ;;  %v2563_v11 = vpop.f32.mrf.mxu1  ;;  %v1459_v55 = vadd.f32 %v2416_v48, %v4903_v42 }
 0x1fd   :  { %1927 = vst.msk [vmem:[%s4852_s3 + $0x40] sm:$0xff] %vm1918_vm0, %v1910_v44  ;;  %v1869_v0 = vadd.f32 %v2641_v58, %v1724_v21  ;;  %v2564_v39 = vadd.f32 %v2563_v11, %v2562_v60  ;;  %v1599_v33 = vadd.f32 %v2493_v46, %v1454_v24  ;;  %v4905_v60 = vld [vmem:[#allocation29_spill] sm:$0xff]  ;;  %v4906_v11 = vld [vmem:[#allocation24_spill] sm:$0xff] }
 0x1fe   :  { %v2643_v22 = vpop.f32.mrf.mxu0  ;;  %v2565_v8 = vpop.f32.mrf.mxu1  ;;  %v2419_v44 = vadd.f32 %v4905_v60, %v4904_v50  ;;  %v2496_v28 = vadd.f32 %v4907_v38, %v4906_v11 }
 0x1ff   :  { %v1911_v18 = vmax.f32 %v1869_v0, 0.0  ;;  %v1729_v57 = vadd.f32 %v2564_v39, %v1584_v31  ;;  %v2644_v16 = vadd.f32 %v2643_v22, %v2642_v27 }
 0x200   :  { %v2645_v34 = vpop.f32.mrf.mxu0  ;;  %v2566_v45 = vpop.f32.mrf.mxu1  ;;  %v1604_v22 = vadd.f32 %v2496_v28, %v1459_v55 }
 0x201   :  { %1928 = vst.msk [vmem:[%s4852_s3 + $0x48] sm:$0xff] %vm1918_vm0, %v1911_v18  ;;  %v1874_v4 = vadd.f32 %v2644_v16, %v1729_v57  ;;  %v2567_v23 = vadd.f32 %v2566_v45, %v2565_v8  ;;  %v4908_v8 = vld [vmem:[#allocation7_spill] sm:$0xff]  ;;  %v4909_v16 = vld [vmem:[#allocation28_spill] sm:$0xff] }
 0x202   :  { %v2646_v30 = vpop.f32.mrf.mxu0  ;;  %v2568_v15 = vpop.f32.mrf.mxu1  ;;  %v1464_v5 = vadd.f32 %v2419_v44, %v4908_v8  ;;  %v2499_v1 = vadd.f32 %v4910_v47, %v4909_v16 }
 0x203   :  { %v1912_v54 = vmax.f32 %v1874_v4, 0.0  ;;  %v1734_v7 = vadd.f32 %v2567_v23, %v1589_v62  ;;  %v2647_v10 = vadd.f32 %v2646_v30, %v2645_v34 }
 0x204   :  { %v2648_v25 = vpop.f32.mrf.mxu0  ;;  %v2569_v51 = vpop.f32.mrf.mxu1  ;;  %v1609_v63 = vadd.f32 %v2499_v1, %v1464_v5 }
 0x205   :  { %1929 = vst.msk [vmem:[%s4852_s3 + $0x50] sm:$0xff] %vm1918_vm0, %v1912_v54  ;;  %v1879_v40 = vadd.f32 %v2647_v10, %v1734_v7  ;;  %v2570_v29 = vadd.f32 %v2569_v51, %v2568_v15 }
 0x206   :  { %v2649_v43 = vpop.f32.mrf.mxu0  ;;  %v2571_v9 = vpop.f32.mrf.mxu1 }
 0x207   :  { %v1913_v41 = vmax.f32 %v1879_v40, 0.0  ;;  %v1739_v3 = vadd.f32 %v2570_v29, %v1594_v13  ;;  %v2650_v35 = vadd.f32 %v2649_v43, %v2648_v25 }
 0x208   :  { %v2651_v14 = vpop.f32.mrf.mxu0  ;;  %v2572_v56 = vpop.f32.mrf.mxu1 }
 0x209   :  { %1930 = vst.msk [vmem:[%s4852_s3 + $0x58] sm:$0xff] %vm1918_vm0, %v1913_v41  ;;  %v1884_v21 = vadd.f32 %v2650_v35, %v1739_v3  ;;  %v2573_v58 = vadd.f32 %v2572_v56, %v2571_v9 }
 0x20a   :  { %v2652_v31 = vpop.f32.mrf.mxu0  ;;  %v2574_v27 = vpop.f32.mrf.mxu1 }
 0x20b   :  { %v1914_v61 = vmax.f32 %v1884_v21, 0.0  ;;  %v1744_v26 = vadd.f32 %v2573_v58, %v1599_v33  ;;  %v2653_v36 = vadd.f32 %v2652_v31, %v2651_v14 }
 0x20c   :  { %v2654_v0 = vpop.f32.mrf.mxu0  ;;  %v2575_v39 = vpop.f32.mrf.mxu1 }
 0x20d   :  { %1931 = vst.msk [vmem:[%s4852_s3 + $0x60] sm:$0xff] %vm1918_vm0, %v1914_v61  ;;  %v1889_v52 = vadd.f32 %v2653_v36, %v1744_v26  ;;  %v2576_v53 = vadd.f32 %v2575_v39, %v2574_v27 }
 0x20e   :  { %v2655_v18 = vpop.f32.mrf.mxu0  ;;  %v2577_v57 = vpop.f32.mrf.mxu1 }
 0x20f   :  { %v1915_v19 = vmax.f32 %v1889_v52, 0.0  ;;  %v1749_v34 = vadd.f32 %v2576_v53, %v1604_v22  ;;  %v2656_v45 = vadd.f32 %v2655_v18, %v2654_v0 }
 0x210   :  { %v2657_v62 = vpop.f32.mrf.mxu0  ;;  %v2578_v59 = vpop.f32.mrf.mxu1 }
 0x211   :  { %1932 = vst.msk [vmem:[%s4852_s3 + $0x68] sm:$0xff] %vm1918_vm0, %v1915_v19  ;;  %v1894_v4 = vadd.f32 %v2656_v45, %v1749_v34  ;;  %v2579_v23 = vadd.f32 %v2578_v59, %v2577_v57 }
 0x212   :  { %v2658_v30 = vpop.f32.mrf.mxu0 }
 0x213   :  { %v1916_v15 = vmax.f32 %v1894_v4, 0.0  ;;  %v1754_v37 = vadd.f32 %v2579_v23, %v1609_v63  ;;  %v2659_v32 = vadd.f32 %v2658_v30, %v2657_v62 }
 0x215   :  { %1933 = vst.msk [vmem:[%s4852_s3 + $0x70] sm:$0xff] %vm1918_vm0, %v1916_v15  ;;  %v1899_v20 = vadd.f32 %v2659_v32, %v1754_v37 }
 0x217   :  { %v1917_v54 = vmax.f32 %v1899_v20, 0.0 }
 0x219   :  { %1934 = vst.msk [vmem:[%s4852_s3 + $0x78] sm:$0xff] %vm1918_vm0, %v1917_v54 }

// kernel: forward.10
= control target key start
LH: loop header
LB: loop body
LE: loop exit
PB: predicated region body
PF: predicated region fallthrough
CT: control target
= control target key end

     0   :  { %vm237_vm0 = vcmask 523264   ;;  %s2186_s1 = inlined_call_operand.vmem [shape: f32[832,64], index: 1, kind: input, shape index: {}]   ;;  %s2187_s0 = inlined_call_operand.vmem [shape: f32[128,832], index: 0, kind: input, shape index: {}]   ;;  %s2188_s2 = inlined_call_operand.vmem [shape: f32[1,64], index: 2, kind: input, shape index: {}]   ;;  %s2189_s3 = inlined_call_operand.vmem [shape: f32[128,64], index: 3, kind: output, shape index: {}]  }
   0x1   :  { %v157_v0 = vld [vmem:[%s2186_s1 + $0xf8] sm:$0xff]  ;;  %v156_v4 = vld [vmem:[%s2186_s1 + $0xf0] sm:$0xff]  ;;  %v155_v8 = vld [vmem:[%s2186_s1 + $0xe8] sm:$0xff] }
   0x2   :  { %v189_v1 = vld [vmem:[%s2186_s1 + $0x1f8] sm:$0xff]  ;;  %919 = vmatprep.subr.mxu0 %v157_v0  ;;  %v188_v5 = vld [vmem:[%s2186_s1 + $0x1f0] sm:$0xff]  ;;  %v187_v9 = vld [vmem:[%s2186_s1 + $0x1e8] sm:$0xff] }
   0x3   :  { %v141_v2 = vld [vmem:[%s2186_s1 + $0x78] sm:$0xff]  ;;  %999 = vmatprep.subr.mxu1 %v189_v1  ;;  %v140_v6 = vld [vmem:[%s2186_s1 + $0x70] sm:$0xff]  ;;  %v139_v10 = vld [vmem:[%s2186_s1 + $0x68] sm:$0xff] }
   0x4   :  { %v173_v3 = vld [vmem:[%s2186_s1 + $0x178] sm:$0xff]  ;;  %920 = vmatpush3.msra.mxu0 %v141_v2  ;;  %v172_v7 = vld [vmem:[%s2186_s1 + $0x170] sm:$0xff]  ;;  %v171_v11 = vld [vmem:[%s2186_s1 + $0x168] sm:$0xff] }
   0x5   :  { %1000 = vmatpush3.msra.mxu1 %v173_v3  ;;  %921 = vmatprep.subr.mxu0 %v156_v4  ;;  %v154_v12 = vld [vmem:[%s2186_s1 + $0xe0] sm:$0xff]  ;;  %v153_v16 = vld [vmem:[%s2186_s1 + $0xd8] sm:$0xff]  ;;  %v152_v20 = vld [vmem:[%s2186_s1 + $0xd0] sm:$0xff] }
   0x6   :  { %1001 = vmatprep.subr.mxu1 %v188_v5  ;;  %922 = vmatpush3.msra.mxu0 %v140_v6  ;;  %v186_v13 = vld [vmem:[%s2186_s1 + $0x1e0] sm:$0xff]  ;;  %v185_v17 = vld [vmem:[%s2186_s1 + $0x1d8] sm:$0xff]  ;;  %v184_v21 = vld [vmem:[%s2186_s1 + $0x1d0] sm:$0xff] }
   0x7   :  { %1002 = vmatpush3.msra.mxu1 %v172_v7  ;;  %923 = vmatprep.subr.mxu0 %v155_v8  ;;  %v138_v14 = vld [vmem:[%s2186_s1 + $0x60] sm:$0xff]  ;;  %v137_v18 = vld [vmem:[%s2186_s1 + $0x58] sm:$0xff]  ;;  %v136_v22 = vld [vmem:[%s2186_s1 + $0x50] sm:$0xff] }
   0x8   :  { %1003 = vmatprep.subr.mxu1 %v187_v9  ;;  %v170_v15 = vld [vmem:[%s2186_s1 + $0x160] sm:$0xff]  ;;  %924 = vmatpush3.msra.mxu0 %v139_v10  ;;  %v169_v19 = vld [vmem:[%s2186_s1 + $0x158] sm:$0xff]  ;;  %v168_v23 = vld [vmem:[%s2186_s1 + $0x150] sm:$0xff] }
   0x9   :  { %1004 = vmatpush3.msra.mxu1 %v171_v11  ;;  %925 = vmatprep.subr.mxu0 %v154_v12  ;;  %v151_v24 = vld [vmem:[%s2186_s1 + $0xc8] sm:$0xff]  ;;  %v150_v28 = vld [vmem:[%s2186_s1 + $0xc0] sm:$0xff]  ;;  %v149_v32 = vld [vmem:[%s2186_s1 + $0xb8] sm:$0xff] }
   0xa   :  { %1005 = vmatprep.subr.mxu1 %v186_v13  ;;  %926 = vmatpush3.msra.mxu0 %v138_v14  ;;  %v183_v25 = vld [vmem:[%s2186_s1 + $0x1c8] sm:$0xff]  ;;  %v182_v29 = vld [vmem:[%s2186_s1 + $0x1c0] sm:$0xff]  ;;  %v181_v33 = vld [vmem:[%s2186_s1 + $0x1b8] sm:$0xff] }
   0xb   :  { %1006 = vmatpush3.msra.mxu1 %v170_v15  ;;  %927 = vmatprep.subr.mxu0 %v153_v16  ;;  %v135_v26 = vld [vmem:[%s2186_s1 + $0x48] sm:$0xff]  ;;  %v134_v30 = vld [vmem:[%s2186_s1 + $0x40] sm:$0xff]  ;;  %v133_v34 = vld [vmem:[%s2186_s1 + $0x38] sm:$0xff] }
   0xc   :  { %1007 = vmatprep.subr.mxu1 %v185_v17  ;;  %928 = vmatpush3.msra.mxu0 %v137_v18  ;;  %v167_v27 = vld [vmem:[%s2186_s1 + $0x148] sm:$0xff]  ;;  %v166_v31 = vld [vmem:[%s2186_s1 + $0x140] sm:$0xff]  ;;  %v165_v35 = vld [vmem:[%s2186_s1 + $0x138] sm:$0xff] }
   0xd   :  { %1008 = vmatpush3.msra.mxu1 %v169_v19  ;;  %929 = vmatprep.subr.mxu0 %v152_v20  ;;  %v148_v36 = vld [vmem:[%s2186_s1 + $0xb0] sm:$0xff]  ;;  %v147_v40 = vld [vmem:[%s2186_s1 + $0xa8] sm:$0xff]  ;;  %v146_v44 = vld [vmem:[%s2186_s1 + $0xa0] sm:$0xff] }
   0xe   :  { %1009 = vmatprep.subr.mxu1 %v184_v21  ;;  %930 = vmatpush3.msra.mxu0 %v136_v22  ;;  %v180_v37 = vld [vmem:[%s2186_s1 + $0x1b0] sm:$0xff]  ;;  %v179_v41 = vld [vmem:[%s2186_s1 + $0x1a8] sm:$0xff]  ;;  %v178_v45 = vld [vmem:[%s2186_s1 + $0x1a0] sm:$0xff] }
   0xf   :  { %1010 = vmatpush3.msra.mxu1 %v168_v23  ;;  %931 = vmatprep.subr.mxu0 %v151_v24  ;;  %v132_v38 = vld [vmem:[%s2186_s1 + $0x30] sm:$0xff]  ;;  %v131_v42 = vld [vmem:[%s2186_s1 + $0x28] sm:$0xff]  ;;  %v130_v46 = vld [vmem:[%s2186_s1 + $0x20] sm:$0xff] }
  0x10   :  { %1011 = vmatprep.subr.mxu1 %v183_v25  ;;  %932 = vmatpush3.msra.mxu0 %v135_v26  ;;  %v164_v39 = vld [vmem:[%s2186_s1 + $0x130] sm:$0xff]  ;;  %v163_v43 = vld [vmem:[%s2186_s1 + $0x128] sm:$0xff]  ;;  %v162_v47 = vld [vmem:[%s2186_s1 + $0x120] sm:$0xff] }
  0x11   :  { %1012 = vmatpush3.msra.mxu1 %v167_v27  ;;  %933 = vmatprep.subr.mxu0 %v150_v28  ;;  %v145_v48 = vld [vmem:[%s2186_s1 + $0x98] sm:$0xff]  ;;  %v144_v52 = vld [vmem:[%s2186_s1 + $0x90] sm:$0xff]  ;;  %v143_v56 = vld [vmem:[%s2186_s1 + $0x88] sm:$0xff] }
  0x12   :  { %1013 = vmatprep.subr.mxu1 %v182_v29  ;;  %934 = vmatpush3.msra.mxu0 %v134_v30  ;;  %v177_v49 = vld [vmem:[%s2186_s1 + $0x198] sm:$0xff]  ;;  %v176_v53 = vld [vmem:[%s2186_s1 + $0x190] sm:$0xff]  ;;  %v175_v57 = vld [vmem:[%s2186_s1 + $0x188] sm:$0xff] }
  0x13   :  { %1014 = vmatpush3.msra.mxu1 %v166_v31  ;;  %935 = vmatprep.subr.mxu0 %v149_v32  ;;  %v129_v50 = vld [vmem:[%s2186_s1 + $0x18] sm:$0xff]  ;;  %v128_v54 = vld [vmem:[%s2186_s1 + $0x10] sm:$0xff]  ;;  %v127_v58 = vld [vmem:[%s2186_s1 + $0x8] sm:$0xff] }
  0x14   :  { %1015 = vmatprep.subr.mxu1 %v181_v33  ;;  %936 = vmatpush3.msra.mxu0 %v133_v34  ;;  %v161_v51 = vld [vmem:[%s2186_s1 + $0x118] sm:$0xff]  ;;  %v160_v55 = vld [vmem:[%s2186_s1 + $0x110] sm:$0xff]  ;;  %v159_v59 = vld [vmem:[%s2186_s1 + $0x108] sm:$0xff] }
  0x15   :  { %1016 = vmatpush3.msra.mxu1 %v165_v35  ;;  %937 = vmatprep.subr.mxu0 %v148_v36  ;;  %v142_v60 = vld [vmem:[%s2186_s1 + $0x80] sm:$0xff]  ;;  %v15_v63 = vld [vmem:[%s2187_s0 + $0x8] sm:$0xff]  ;;  %v17_v1 = vld [vmem:[%s2187_s0 + $0x18] sm:$0xff] }
  0x16   :  { %1017 = vmatprep.subr.mxu1 %v180_v37  ;;  %938 = vmatpush3.msra.mxu0 %v132_v38  ;;  %v174_v61 = vld [vmem:[%s2186_s1 + $0x180] sm:$0xff]  ;;  %v16_v3 = vld [vmem:[%s2187_s0 + $0x10] sm:$0xff]  ;;  %v221_v4 = vld [vmem:[%s2186_s1 + $0x2f8] sm:$0xff] }
  0x17   :  { %1018 = vmatpush3.msra.mxu1 %v164_v39  ;;  %939 = vmatprep.subr.mxu0 %v147_v40  ;;  %v126_v62 = vld [vmem:[%s2186_s1] sm:$0xff]  ;;  %v205_v6 = vld [vmem:[%s2186_s1 + $0x278] sm:$0xff]  ;;  %v24_v7 = vld [vmem:[%s2187_s0 + $0x50] sm:$0xff] }
  0x18   :  { %1019 = vmatprep.subr.mxu1 %v179_v41  ;;  %940 = vmatpush3.msra.mxu0 %v131_v42  ;;  %v158_v0 = vld [vmem:[%s2186_s1 + $0x100] sm:$0xff]  ;;  %v220_v8 = vld [vmem:[%s2186_s1 + $0x2f0] sm:$0xff]  ;;  %v21_v9 = vld [vmem:[%s2187_s0 + $0x38] sm:$0xff] }
  0x19   :  { %1020 = vmatpush3.msra.mxu1 %v163_v43  ;;  %941 = vmatprep.subr.mxu0 %v146_v44  ;;  %v14_v2 = vld [vmem:[%s2187_s0] sm:$0xff]  ;;  %v23_v10 = vld [vmem:[%s2187_s0 + $0x48] sm:$0xff]  ;;  %v204_v11 = vld [vmem:[%s2186_s1 + $0x270] sm:$0xff] }
  0x1a   :  { %1021 = vmatprep.subr.mxu1 %v178_v45  ;;  %942 = vmatpush3.msra.mxu0 %v130_v46  ;;  %v22_v5 = vld [vmem:[%s2187_s0 + $0x40] sm:$0xff]  ;;  %v29_v12 = vld [vmem:[%s2187_s0 + $0x78] sm:$0xff]  ;;  %v31_v13 = vld [vmem:[%s2187_s0 + $0x88] sm:$0xff] }
  0x1b   :  { %1022 = vmatpush3.msra.mxu1 %v162_v47  ;;  %943 = vmatprep.subr.mxu0 %v145_v48  ;;  %v219_v14 = vld [vmem:[%s2186_s1 + $0x2e8] sm:$0xff]  ;;  %v28_v15 = vld [vmem:[%s2187_s0 + $0x70] sm:$0xff]  ;;  %v30_v16 = vld [vmem:[%s2187_s0 + $0x80] sm:$0xff] }
  0x1c   :  { %1023 = vmatprep.subr.mxu1 %v177_v49  ;;  %944 = vmatpush3.msra.mxu0 %v129_v50  ;;  %v203_v17 = vld [vmem:[%s2186_s1 + $0x268] sm:$0xff]  ;;  %v36_v18 = vld [vmem:[%s2187_s0 + $0xb0] sm:$0xff]  ;;  %v38_v19 = vld [vmem:[%s2187_s0 + $0xc0] sm:$0xff] }
  0x1d   :  { %1024 = vmatpush3.msra.mxu1 %v161_v51  ;;  %945 = vmatprep.subr.mxu0 %v144_v52  ;;  %v218_v20 = vld [vmem:[%s2186_s1 + $0x2e0] sm:$0xff]  ;;  %v35_v21 = vld [vmem:[%s2187_s0 + $0xa8] sm:$0xff]  ;;  %v37_v22 = vld [vmem:[%s2187_s0 + $0xb8] sm:$0xff] }
  0x1e   :  { %1025 = vmatprep.subr.mxu1 %v176_v53  ;;  %946 = vmatpush3.msra.mxu0 %v128_v54  ;;  %v202_v23 = vld [vmem:[%s2186_s1 + $0x260] sm:$0xff]  ;;  %v43_v24 = vld [vmem:[%s2187_s0 + $0xe8] sm:$0xff]  ;;  %v45_v25 = vld [vmem:[%s2187_s0 + $0xf8] sm:$0xff] }
  0x1f   :  { %1026 = vmatpush3.msra.mxu1 %v160_v55  ;;  %947 = vmatprep.subr.mxu0 %v143_v56  ;;  %v217_v26 = vld [vmem:[%s2186_s1 + $0x2d8] sm:$0xff]  ;;  %v42_v27 = vld [vmem:[%s2187_s0 + $0xe0] sm:$0xff]  ;;  %v44_v28 = vld [vmem:[%s2187_s0 + $0xf0] sm:$0xff] }
  0x20   :  { %1027 = vmatprep.subr.mxu1 %v175_v57  ;;  %948 = vmatpush3.msra.mxu0 %v127_v58  ;;  %v201_v29 = vld [vmem:[%s2186_s1 + $0x258] sm:$0xff]  ;;  %v50_v30 = vld [vmem:[%s2187_s0 + $0x120] sm:$0xff]  ;;  %v52_v31 = vld [vmem:[%s2187_s0 + $0x130] sm:$0xff] }
  0x21   :  { %1028 = vmatpush3.msra.mxu1 %v159_v59  ;;  %949 = vmatprep.subr.mxu0 %v142_v60  ;;  %v216_v32 = vld [vmem:[%s2186_s1 + $0x2d0] sm:$0xff]  ;;  %v49_v33 = vld [vmem:[%s2187_s0 + $0x118] sm:$0xff]  ;;  %v51_v34 = vld [vmem:[%s2187_s0 + $0x128] sm:$0xff] }
  0x22   :  { %1029 = vmatprep.subr.mxu1 %v174_v61  ;;  %950 = vmatpush3.msra.mxu0 %v126_v62  ;;  %v200_v35 = vld [vmem:[%s2186_s1 + $0x250] sm:$0xff]  ;;  %v57_v36 = vld [vmem:[%s2187_s0 + $0x158] sm:$0xff]  ;;  %v59_v37 = vld [vmem:[%s2187_s0 + $0x168] sm:$0xff] }
  0x23   :  { %350 = vmatprep.mubr.f32.mxu0 %v15_v63  ;;  %1030 = vmatpush3.msra.mxu1 %v158_v0  ;;  %v215_v38 = vld [vmem:[%s2186_s1 + $0x2c8] sm:$0xff]  ;;  %v56_v39 = vld [vmem:[%s2187_s0 + $0x150] sm:$0xff]  ;;  %v58_v40 = vld [vmem:[%s2187_s0 + $0x160] sm:$0xff] }
  0x24   :  { %495 = vmatprep.mubr.f32.mxu1 %v17_v1  ;;  %351 = vmatmul.mubr.f32.vlgmr.msra.gmra.mxu0 %v14_v2  ;;  %v199_v41 = vld [vmem:[%s2186_s1 + $0x248] sm:$0xff]  ;;  %v64_v42 = vld [vmem:[%s2187_s0 + $0x190] sm:$0xff]  ;;  %v66_v43 = vld [vmem:[%s2187_s0 + $0x1a0] sm:$0xff] }
  0x25   :  { %496 = vmatmul.mubr.f32.vlgmr.msra.gmra.mxu1 %v16_v3  ;;  %1079 = vmatprep.subr.mxu0 %v221_v4  ;;  %v214_v44 = vld [vmem:[%s2186_s1 + $0x2c0] sm:$0xff]  ;;  %v63_v45 = vld [vmem:[%s2187_s0 + $0x188] sm:$0xff]  ;;  %v65_v46 = vld [vmem:[%s2187_s0 + $0x198] sm:$0xff] }
  0x26   :  { %355 = vmatprep.mubr.f32.mxu0 %v22_v5  ;;  %1080 = vmatpush3.msra.mxu0 %v205_v6  ;;  %v198_v47 = vld [vmem:[%s2186_s1 + $0x240] sm:$0xff]  ;;  %v71_v48 = vld [vmem:[%s2187_s0 + $0x1c8] sm:$0xff]  ;;  %v73_v49 = vld [vmem:[%s2187_s0 + $0x1d8] sm:$0xff] }
  0x27   :  { %500 = vmatprep.mubr.f32.mxu1 %v24_v7  ;;  %1223 = vmatprep.subr.mxu1 %v221_v4  ;;  %v213_v50 = vld [vmem:[%s2186_s1 + $0x2b8] sm:$0xff]  ;;  %v70_v51 = vld [vmem:[%s2187_s0 + $0x1c0] sm:$0xff]  ;;  %v72_v52 = vld [vmem:[%s2187_s0 + $0x1d0] sm:$0xff] }
  0x28   :  { %1081 = vmatprep.subr.mxu0 %v220_v8  ;;  %356 = vmatmul.mubr.f32.gmra.mxu0 %v21_v9  ;;  %v197_v53 = vld [vmem:[%s2186_s1 + $0x238] sm:$0xff]  ;;  %v78_v54 = vld [vmem:[%s2187_s0 + $0x200] sm:$0xff]  ;;  %v80_v55 = vld [vmem:[%s2187_s0 + $0x210] sm:$0xff] }
  0x29   :  { %501 = vmatmul.mubr.f32.gmra.mxu1 %v23_v10  ;;  %1082 = vmatpush3.msra.mxu0 %v204_v11  ;;  %v212_v56 = vld [vmem:[%s2186_s1 + $0x2b0] sm:$0xff]  ;;  %v77_v57 = vld [vmem:[%s2187_s0 + $0x1f8] sm:$0xff]  ;;  %v79_v58 = vld [vmem:[%s2187_s0 + $0x208] sm:$0xff] }
  0x2a   :  { %1239 = vmatpush3.msra.mxu1 %v205_v6  ;;  %360 = vmatprep.mubr.f32.mxu0 %v29_v12  ;;  %v196_v59 = vld [vmem:[%s2186_s1 + $0x230] sm:$0xff]  ;;  %v85_v60 = vld [vmem:[%s2187_s0 + $0x238] sm:$0xff]  ;;  %v87_v61 = vld [vmem:[%s2187_s0 + $0x248] sm:$0xff] }
  0x2b   :  { %505 = vmatprep.mubr.f32.mxu1 %v31_v13  ;;  %1224 = vmatprep.subr.mxu1 %v220_v8  ;;  %v211_v62 = vld [vmem:[%s2186_s1 + $0x2a8] sm:$0xff]  ;;  %v84_v63 = vld [vmem:[%s2187_s0 + $0x230] sm:$0xff]  ;;  %v86_v0 = vld [vmem:[%s2187_s0 + $0x240] sm:$0xff] }
  0x2c   :  { %1083 = vmatprep.subr.mxu0 %v219_v14  ;;  %361 = vmatmul.mubr.f32.gmra.mxu0 %v28_v15  ;;  %v195_v1 = vld [vmem:[%s2186_s1 + $0x228] sm:$0xff]  ;;  %v92_v2 = vld [vmem:[%s2187_s0 + $0x270] sm:$0xff]  ;;  %v94_v3 = vld [vmem:[%s2187_s0 + $0x280] sm:$0xff] }
  0x2d   :  { %506 = vmatmul.mubr.f32.gmra.mxu1 %v30_v16  ;;  %1084 = vmatpush3.msra.mxu0 %v203_v17  ;;  %v210_v4 = vld [vmem:[%s2186_s1 + $0x2a0] sm:$0xff]  ;;  %v91_v5 = vld [vmem:[%s2187_s0 + $0x268] sm:$0xff]  ;;  %v93_v6 = vld [vmem:[%s2187_s0 + $0x278] sm:$0xff] }
  0x2e   :  { %1240 = vmatpush3.msra.mxu1 %v204_v11  ;;  %365 = vmatprep.mubr.f32.mxu0 %v36_v18  ;;  %v194_v7 = vld [vmem:[%s2186_s1 + $0x220] sm:$0xff]  ;;  %v99_v8 = vld [vmem:[%s2187_s0 + $0x2a8] sm:$0xff]  ;;  %v101_v9 = vld [vmem:[%s2187_s0 + $0x2b8] sm:$0xff] }
  0x2f   :  { %510 = vmatprep.mubr.f32.mxu1 %v38_v19  ;;  %1225 = vmatprep.subr.mxu1 %v219_v14  ;;  %v209_v10 = vld [vmem:[%s2186_s1 + $0x298] sm:$0xff]  ;;  %v98_v11 = vld [vmem:[%s2187_s0 + $0x2a0] sm:$0xff]  ;;  %v100_v12 = vld [vmem:[%s2187_s0 + $0x2b0] sm:$0xff] }
  0x30   :  { %1085 = vmatprep.subr.mxu0 %v218_v20  ;;  %366 = vmatmul.mubr.f32.gmra.mxu0 %v35_v21  ;;  %v193_v13 = vld [vmem:[%s2186_s1 + $0x218] sm:$0xff]  ;;  %v106_v14 = vld [vmem:[%s2187_s0 + $0x2e0] sm:$0xff]  ;;  %v108_v15 = vld [vmem:[%s2187_s0 + $0x2f0] sm:$0xff] }
  0x31   :  { %511 = vmatmul.mubr.f32.gmra.mxu1 %v37_v22  ;;  %1086 = vmatpush3.msra.mxu0 %v202_v23  ;;  %v208_v16 = vld [vmem:[%s2186_s1 + $0x290] sm:$0xff]  ;;  %v107_v18 = vld [vmem:[%s2187_s0 + $0x2e8] sm:$0xff] }
  0x32   :  { %1241 = vmatpush3.msra.mxu1 %v203_v17  ;;  %370 = vmatprep.mubr.f32.mxu0 %v43_v24  ;;  %v105_v17 = vld [vmem:[%s2187_s0 + $0x2d8] sm:$0xff]  ;;  %v192_v19 = vld [vmem:[%s2186_s1 + $0x210] sm:$0xff]  ;;  %v115_v21 = vld [vmem:[%s2187_s0 + $0x328] sm:$0xff] }
  0x33   :  { %515 = vmatprep.mubr.f32.mxu1 %v45_v25  ;;  %1226 = vmatprep.subr.mxu1 %v218_v20  ;;  %v113_v20 = vld [vmem:[%s2187_s0 + $0x318] sm:$0xff]  ;;  %v207_v22 = vld [vmem:[%s2186_s1 + $0x288] sm:$0xff]  ;;  %v114_v24 = vld [vmem:[%s2187_s0 + $0x320] sm:$0xff] }
  0x34   :  { %1087 = vmatprep.subr.mxu0 %v217_v26  ;;  %371 = vmatmul.mubr.f32.gmra.mxu0 %v42_v27  ;;  %v191_v25 = vld [vmem:[%s2186_s1 + $0x208] sm:$0xff]  ;;  %v122_v27 = vld [vmem:[%s2187_s0 + $0x360] sm:$0xff] }
  0x35   :  { %516 = vmatmul.mubr.f32.gmra.mxu1 %v44_v28  ;;  %1088 = vmatpush3.msra.mxu0 %v201_v29  ;;  %v206_v28 = vld [vmem:[%s2186_s1 + $0x280] sm:$0xff] }
  0x36   :  { %1242 = vmatpush3.msra.mxu1 %v202_v23  ;;  %375 = vmatprep.mubr.f32.mxu0 %v50_v30  ;;  %v112_v23 = vld [vmem:[%s2187_s0 + $0x310] sm:$0xff]  ;;  %v121_v30 = vld [vmem:[%s2187_s0 + $0x358] sm:$0xff] }
  0x37   :  { %520 = vmatprep.mubr.f32.mxu1 %v52_v31  ;;  %1227 = vmatprep.subr.mxu1 %v217_v26  ;;  %v120_v26 = vld [vmem:[%s2187_s0 + $0x350] sm:$0xff]  ;;  %v190_v31 = vld [vmem:[%s2186_s1 + $0x200] sm:$0xff] }
  0x38   :  { %1089 = vmatprep.subr.mxu0 %v216_v32  ;;  %376 = vmatmul.mubr.f32.gmra.mxu0 %v49_v33  ;;  %v103_v33 = vld [vmem:[%s2187_s0 + $0x2c8] sm:$0xff] }
  0x39   :  { %521 = vmatmul.mubr.f32.gmra.mxu1 %v51_v34  ;;  %1090 = vmatpush3.msra.mxu0 %v200_v35  ;;  %v18_v34 = vld [vmem:[%s2187_s0 + $0x20] sm:$0xff] }
  0x3a   :  { %1243 = vmatpush3.msra.mxu1 %v201_v29  ;;  %380 = vmatprep.mubr.f32.mxu0 %v57_v36  ;;  %v119_v29 = vld [vmem:[%s2187_s0 + $0x348] sm:$0xff]  ;;  %v229_v36 = vld [vmem:[%s2186_s1 + $0x338] sm:$0xff] }
  0x3b   :  { %525 = vmatprep.mubr.f32.mxu1 %v59_v37  ;;  %1228 = vmatprep.subr.mxu1 %v216_v32  ;;  %v19_v32 = vld [vmem:[%s2187_s0 + $0x28] sm:$0xff]  ;;  %v26_v37 = vld [vmem:[%s2187_s0 + $0x60] sm:$0xff] }
  0x3c   :  { %1091 = vmatprep.subr.mxu0 %v215_v38  ;;  %381 = vmatmul.mubr.f32.gmra.mxu0 %v56_v39  ;;  %v228_v39 = vld [vmem:[%s2186_s1 + $0x330] sm:$0xff] }
  0x3d   :  { %526 = vmatmul.mubr.f32.gmra.mxu1 %v58_v40  ;;  %1092 = vmatpush3.msra.mxu0 %v199_v41  ;;  %v25_v40 = vld [vmem:[%s2187_s0 + $0x58] sm:$0xff] }
  0x3e   :  { %1244 = vmatpush3.msra.mxu1 %v200_v35  ;;  %385 = vmatprep.mubr.f32.mxu0 %v64_v42  ;;  %v102_v35 = vld [vmem:[%s2187_s0 + $0x2c0] sm:$0xff]  ;;  %v227_v42 = vld [vmem:[%s2186_s1 + $0x328] sm:$0xff] }
  0x3f   :  { %530 = vmatprep.mubr.f32.mxu1 %v66_v43  ;;  %1229 = vmatprep.subr.mxu1 %v215_v38  ;;  %v110_v38 = vld [vmem:[%s2187_s0 + $0x300] sm:$0xff]  ;;  %v33_v43 = vld [vmem:[%s2187_s0 + $0x98] sm:$0xff] }
  0x40   :  { %1093 = vmatprep.subr.mxu0 %v214_v44  ;;  %386 = vmatmul.mubr.f32.gmra.mxu0 %v63_v45  ;;  %v117_v45 = vld [vmem:[%s2187_s0 + $0x338] sm:$0xff] }
  0x41   :  { %531 = vmatmul.mubr.f32.gmra.mxu1 %v65_v46  ;;  %1094 = vmatpush3.msra.mxu0 %v198_v47  ;;  %v32_v46 = vld [vmem:[%s2187_s0 + $0x90] sm:$0xff] }
  0x42   :  { %1245 = vmatpush3.msra.mxu1 %v199_v41  ;;  %390 = vmatprep.mubr.f32.mxu0 %v71_v48  ;;  %v109_v41 = vld [vmem:[%s2187_s0 + $0x2f8] sm:$0xff] }
  0x43   :  { %535 = vmatprep.mubr.f32.mxu1 %v73_v49  ;;  %1230 = vmatprep.subr.mxu1 %v214_v44  ;;  %v226_v44 = vld [vmem:[%s2186_s1 + $0x320] sm:$0xff]  ;;  %v225_v48 = vld [vmem:[%s2186_s1 + $0x318] sm:$0xff]  ;;  %v40_v49 = vld [vmem:[%s2187_s0 + $0xd0] sm:$0xff] }
  0x44   :  { %1095 = vmatprep.subr.mxu0 %v213_v50  ;;  %391 = vmatmul.mubr.f32.gmra.mxu0 %v70_v51  ;;  %v124_v51 = vld [vmem:[%s2187_s0 + $0x370] sm:$0xff] }
  0x45   :  { %536 = vmatmul.mubr.f32.gmra.mxu1 %v72_v52  ;;  %1096 = vmatpush3.msra.mxu0 %v197_v53  ;;  %v39_v52 = vld [vmem:[%s2187_s0 + $0xc8] sm:$0xff] }
  0x46   :  { %1246 = vmatpush3.msra.mxu1 %v198_v47  ;;  %395 = vmatprep.mubr.f32.mxu0 %v78_v54  ;;  %v116_v47 = vld [vmem:[%s2187_s0 + $0x330] sm:$0xff]  ;;  %v223_v54 = vld [vmem:[%s2186_s1 + $0x308] sm:$0xff] }
  0x47   :  { %540 = vmatprep.mubr.f32.mxu1 %v80_v55  ;;  %1231 = vmatprep.subr.mxu1 %v213_v50  ;;  %v224_v50 = vld [vmem:[%s2186_s1 + $0x310] sm:$0xff]  ;;  %v47_v55 = vld [vmem:[%s2187_s0 + $0x108] sm:$0xff] }
  0x48   :  { %1097 = vmatprep.subr.mxu0 %v212_v56  ;;  %396 = vmatmul.mubr.f32.gmra.mxu0 %v77_v57  ;;  %v20_v57 = vld [vmem:[%s2187_s0 + $0x30] sm:$0xff] }
  0x49   :  { %541 = vmatmul.mubr.f32.gmra.mxu1 %v79_v58  ;;  %1098 = vmatpush3.msra.mxu0 %v196_v59  ;;  %v46_v58 = vld [vmem:[%s2187_s0 + $0x100] sm:$0xff] }
  0x4a   :  { %1247 = vmatpush3.msra.mxu1 %v197_v53  ;;  %400 = vmatprep.mubr.f32.mxu0 %v85_v60  ;;  %v123_v53 = vld [vmem:[%s2187_s0 + $0x368] sm:$0xff]  ;;  %v54_v60 = vld [vmem:[%s2187_s0 + $0x140] sm:$0xff] }
  0x4b   :  { %545 = vmatprep.mubr.f32.mxu1 %v87_v61  ;;  %1232 = vmatprep.subr.mxu1 %v212_v56  ;;  %v222_v56 = vld [vmem:[%s2186_s1 + $0x300] sm:$0xff] }
  0x4c   :  { %1099 = vmatprep.subr.mxu0 %v211_v62  ;;  %401 = vmatmul.mubr.f32.gmra.mxu0 %v84_v63  ;;  %v34_v61 = vld [vmem:[%s2187_s0 + $0xa0] sm:$0xff]  ;;  %v41_v63 = vld [vmem:[%s2187_s0 + $0xd8] sm:$0xff] }
  0x4d   :  { %546 = vmatmul.mubr.f32.gmra.mxu1 %v86_v0  ;;  %1100 = vmatpush3.msra.mxu0 %v195_v1  ;;  %v61_v0 = vld [vmem:[%s2187_s0 + $0x178] sm:$0xff] }
  0x4e   :  { %1248 = vmatpush3.msra.mxu1 %v196_v59  ;;  %405 = vmatprep.mubr.f32.mxu0 %v92_v2  ;;  %v27_v59 = vld [vmem:[%s2187_s0 + $0x68] sm:$0xff]  ;;  %v60_v2 = vld [vmem:[%s2187_s0 + $0x170] sm:$0xff] }
  0x4f   :  { %550 = vmatprep.mubr.f32.mxu1 %v94_v3  ;;  %1233 = vmatprep.subr.mxu1 %v211_v62  ;;  %v53_v62 = vld [vmem:[%s2187_s0 + $0x138] sm:$0xff]  ;;  %v55_v3 = vld [vmem:[%s2187_s0 + $0x148] sm:$0xff] }
  0x50   :  { %1101 = vmatprep.subr.mxu0 %v210_v4  ;;  %406 = vmatmul.mubr.f32.gmra.mxu0 %v91_v5  ;;  %v62_v5 = vld [vmem:[%s2187_s0 + $0x180] sm:$0xff] }
  0x51   :  { %551 = vmatmul.mubr.f32.gmra.mxu1 %v93_v6  ;;  %1102 = vmatpush3.msra.mxu0 %v194_v7  ;;  %v67_v6 = vld [vmem:[%s2187_s0 + $0x1a8] sm:$0xff] }
  0x52   :  { %1249 = vmatpush3.msra.mxu1 %v195_v1  ;;  %410 = vmatprep.mubr.f32.mxu0 %v99_v8  ;;  %v48_v1 = vld [vmem:[%s2187_s0 + $0x110] sm:$0xff]  ;;  %v75_v8 = vld [vmem:[%s2187_s0 + $0x1e8] sm:$0xff] }
  0x53   :  { %555 = vmatprep.mubr.f32.mxu1 %v101_v9  ;;  %1234 = vmatprep.subr.mxu1 %v210_v4  ;;  %v68_v4 = vld [vmem:[%s2187_s0 + $0x1b0] sm:$0xff] }
  0x54   :  { %1103 = vmatprep.subr.mxu0 %v209_v10  ;;  %411 = vmatmul.mubr.f32.gmra.mxu0 %v98_v11  ;;  %v76_v9 = vld [vmem:[%s2187_s0 + $0x1f0] sm:$0xff]  ;;  %v83_v11 = vld [vmem:[%s2187_s0 + $0x228] sm:$0xff] }
  0x55   :  { %556 = vmatmul.mubr.f32.gmra.mxu1 %v100_v12  ;;  %1104 = vmatpush3.msra.mxu0 %v193_v13  ;;  %v82_v12 = vld [vmem:[%s2187_s0 + $0x220] sm:$0xff] }
  0x56   :  { %1250 = vmatpush3.msra.mxu1 %v194_v7  ;;  %415 = vmatprep.mubr.f32.mxu0 %v106_v14  ;;  %v69_v7 = vld [vmem:[%s2187_s0 + $0x1b8] sm:$0xff] }
  0x57   :  { %560 = vmatprep.mubr.f32.mxu1 %v108_v15  ;;  %1235 = vmatprep.subr.mxu1 %v209_v10  ;;  %v74_v10 = vld [vmem:[%s2187_s0 + $0x1e0] sm:$0xff]  ;;  %v81_v14 = vld [vmem:[%s2187_s0 + $0x218] sm:$0xff] }
  0x58   :  { %1105 = vmatprep.subr.mxu0 %v208_v16  ;;  %416 = vmatmul.mubr.f32.gmra.mxu0 %v105_v17  ;;  %v97_v15 = vld [vmem:[%s2187_s0 + $0x298] sm:$0xff]  ;;  %v104_v17 = vld [vmem:[%s2187_s0 + $0x2d0] sm:$0xff] }
  0x59   :  { %561 = vmatmul.mubr.f32.gmra.mxu1 %v107_v18  ;;  %1106 = vmatpush3.msra.mxu0 %v192_v19  ;;  %v88_v18 = vld [vmem:[%s2187_s0 + $0x250] sm:$0xff] }
  0x5a   :  { %1251 = vmatpush3.msra.mxu1 %v193_v13  ;;  %420 = vmatprep.mubr.f32.mxu0 %v113_v20  ;;  %v90_v13 = vld [vmem:[%s2187_s0 + $0x260] sm:$0xff]  ;;  %v96_v20 = vld [vmem:[%s2187_s0 + $0x290] sm:$0xff] }
  0x5b   :  { %565 = vmatprep.mubr.f32.mxu1 %v115_v21  ;;  %1236 = vmatprep.subr.mxu1 %v208_v16  ;;  %v89_v16 = vld [vmem:[%s2187_s0 + $0x258] sm:$0xff]  ;;  %v118_v21 = vld [vmem:[%s2187_s0 + $0x340] sm:$0xff] }
  0x5c   :  { %1107 = vmatprep.subr.mxu0 %v207_v22  ;;  %421 = vmatmul.mubr.f32.gmra.mxu0 %v112_v23  ;;  %v125_v23 = vld [vmem:[%s2187_s0 + $0x378] sm:$0xff] }
  0x5d   :  { %566 = vmatmul.mubr.f32.gmra.mxu1 %v114_v24  ;;  %1108 = vmatpush3.msra.mxu0 %v191_v25 }
  0x5e   :  { %1252 = vmatpush3.msra.mxu1 %v192_v19  ;;  %425 = vmatprep.mubr.f32.mxu0 %v120_v26  ;;  %v111_v19 = vld [vmem:[%s2187_s0 + $0x308] sm:$0xff]  ;;  %v1942_v26 = vld [vmem:[%s2188_s2] ss:$0 sm:$0xff] }
  0x5f   :  { %570 = vmatprep.mubr.f32.mxu1 %v122_v27  ;;  %1237 = vmatprep.subr.mxu1 %v207_v22  ;;  %v95_v22 = vld [vmem:[%s2187_s0 + $0x288] sm:$0xff] }
  0x60   :  { %1109 = vmatprep.subr.mxu0 %v206_v28  ;;  %426 = vmatmul.mubr.f32.gmra.mxu0 %v119_v29 }
  0x61   :  { %571 = vmatmul.mubr.f32.gmra.mxu1 %v121_v30  ;;  %1110 = vmatpush3.msra.mxu0 %v190_v31 }
  0x62   :  { %1253 = vmatpush3.msra.mxu1 %v191_v25  ;;  %640 = vmatprep.mubr.f32.mxu0 %v19_v32 }
  0x63   :  { %1238 = vmatprep.subr.mxu1 %v206_v28  ;;  %700 = vmatprep.mubr.f32.mxu1 %v103_v33 }
  0x64   :  { %1254 = vmatpush3.msra.mxu1 %v190_v31  ;;  %641 = vmatmul.mubr.f32.vlgmr.msra.gmra.mxu0 %v18_v34 }
  0x65   :  { %701 = vmatmul.mubr.f32.vlgmr.msra.gmra.mxu1 %v102_v35  ;;  %1183 = vmatprep.subr.mxu1 %v229_v36 }
  0x66   :  { %645 = vmatprep.mubr.f32.mxu0 %v26_v37  ;;  %1184 = vmatpush3.msra.mxu1 %v229_v36 }
  0x67   :  { %705 = vmatprep.mubr.f32.mxu1 %v110_v38  ;;  %1185 = vmatprep.subr.mxu1 %v228_v39 }
  0x68   :  { %1186 = vmatpush3.msra.mxu1 %v228_v39  ;;  %646 = vmatmul.mubr.f32.gmra.mxu0 %v25_v40 }
  0x69   :  { %706 = vmatmul.mubr.f32.gmra.mxu1 %v109_v41  ;;  %1187 = vmatprep.subr.mxu1 %v227_v42 }
  0x6a   :  { %1188 = vmatpush3.msra.mxu1 %v227_v42  ;;  %650 = vmatprep.mubr.f32.mxu0 %v33_v43 }
  0x6b   :  { %1189 = vmatprep.subr.mxu1 %v226_v44  ;;  %710 = vmatprep.mubr.f32.mxu1 %v117_v45 }
  0x6c   :  { %1190 = vmatpush3.msra.mxu1 %v226_v44  ;;  %651 = vmatmul.mubr.f32.gmra.mxu0 %v32_v46 }
  0x6d   :  { %711 = vmatmul.mubr.f32.gmra.mxu1 %v116_v47  ;;  %1191 = vmatprep.subr.mxu1 %v225_v48 }
  0x6e   :  { %1192 = vmatpush3.msra.mxu1 %v225_v48  ;;  %655 = vmatprep.mubr.f32.mxu0 %v40_v49 }
  0x6f   :  { %1193 = vmatprep.subr.mxu1 %v224_v50  ;;  %715 = vmatprep.mubr.f32.mxu1 %v124_v51 }
  0x70   :  { %1194 = vmatpush3.msra.mxu1 %v224_v50  ;;  %656 = vmatmul.mubr.f32.gmra.mxu0 %v39_v52 }
  0x71   :  { %716 = vmatmul.mubr.f32.gmra.mxu1 %v123_v53  ;;  %1195 = vmatprep.subr.mxu1 %v223_v54 }
  0x72   :  { %1196 = vmatpush3.msra.mxu1 %v223_v54  ;;  %660 = vmatprep.mubr.f32.mxu0 %v47_v55 }
  0x73   :  { %1197 = vmatprep.subr.mxu1 %v222_v56  ;;  %1199 = vmatprep.mubr.msk.f32.mxu1 %vm237_vm0, %v20_v57 }
  0x74   :  { %1198 = vmatpush3.msra.mxu1 %v222_v56  ;;  %661 = vmatmul.mubr.f32.gmra.mxu0 %v46_v58 }
  0x75   :  { %1200 = vmatmul.mubr.msk.f32.vlgmr.msra.gmra.mxu1 %vm237_vm0, %v27_v59  ;;  %665 = vmatprep.mubr.f32.mxu0 %v54_v60 }
  0x76   :  { %1202 = vmatprep.mubr.msk.f32.mxu1 %vm237_vm0, %v34_v61 }
  0x78   :  { %666 = vmatmul.mubr.f32.gmra.mxu0 %v53_v62 }
  0x79   :  { %1203 = vmatmul.mubr.msk.f32.gmra.mxu1 %vm237_vm0, %v41_v63  ;;  %670 = vmatprep.mubr.f32.mxu0 %v61_v0 }
  0x7a   :  { %1205 = vmatprep.mubr.msk.f32.mxu1 %vm237_vm0, %v48_v1 }
  0x7c   :  { %671 = vmatmul.mubr.f32.gmra.mxu0 %v60_v2 }
  0x7d   :  { %1206 = vmatmul.mubr.msk.f32.gmra.mxu1 %vm237_vm0, %v55_v3  ;;  %675 = vmatprep.mubr.f32.mxu0 %v68_v4 }
  0x7e   :  { %1208 = vmatprep.mubr.msk.f32.mxu1 %vm237_vm0, %v62_v5 }
  0x80   :  { %676 = vmatmul.mubr.f32.gmra.mxu0 %v67_v6 }
  0x81   :  { %1209 = vmatmul.mubr.msk.f32.gmra.mxu1 %vm237_vm0, %v69_v7  ;;  %680 = vmatprep.mubr.f32.mxu0 %v75_v8 }
  0x82   :  { %1211 = vmatprep.mubr.msk.f32.mxu1 %vm237_vm0, %v76_v9 }
  0x84   :  { %681 = vmatmul.mubr.f32.gmra.mxu0 %v74_v10 }
  0x85   :  { %1212 = vmatmul.mubr.msk.f32.gmra.mxu1 %vm237_vm0, %v83_v11  ;;  %685 = vmatprep.mubr.f32.mxu0 %v82_v12 }
  0x86   :  { %1214 = vmatprep.mubr.msk.f32.mxu1 %vm237_vm0, %v90_v13 }
  0x88   :  { %686 = vmatmul.mubr.f32.gmra.mxu0 %v81_v14 }
  0x89   :  { %1215 = vmatmul.mubr.msk.f32.gmra.mxu1 %vm237_vm0, %v97_v15  ;;  %690 = vmatprep.mubr.f32.mxu0 %v89_v16 }
  0x8a   :  { %1217 = vmatprep.mubr.msk.f32.mxu1 %vm237_vm0, %v104_v17 }
  0x8c   :  { %691 = vmatmul.mubr.f32.gmra.mxu0 %v88_v18 }
  0x8d   :  { %1218 = vmatmul.mubr.msk.f32.gmra.mxu1 %vm237_vm0, %v111_v19  ;;  %695 = vmatprep.mubr.f32.mxu0 %v96_v20 }
  0x8e   :  { %1220 = vmatprep.mubr.msk.f32.mxu1 %vm237_vm0, %v118_v21 }
  0x90   :  { %696 = vmatmul.mubr.f32.gmra.mxu0 %v95_v22 }
  0x91   :  { %1221 = vmatmul.mubr.msk.f32.gmra.mxu1 %vm237_vm0, %v125_v23 }
  0xe4   :  { %v951_v24 = vpop.f32.mrf.mxu0 }
  0xe5   :  { %v1031_v25 = vpop.f32.mrf.mxu1 }
  0xe6   :  { %v952_v27 = vpop.f32.mrf.mxu0 }
  0xe7   :  { %v1032_v28 = vpop.f32.mrf.mxu1  ;;  %v953_v29 = vadd.f32 %v952_v27, %v951_v24 }
  0xe8   :  { %v1033_v30 = vadd.f32 %v1032_v28, %v1031_v25  ;;  %v954_v31 = vpop.f32.mrf.mxu0 }
  0xe9   :  { %v1034_v32 = vpop.f32.mrf.mxu1  ;;  %v353_v33 = vadd.f32 %v953_v29, %v1942_v26 }
  0xea   :  { %v955_v34 = vpop.f32.mrf.mxu0 }
  0xeb   :  { %v1035_v35 = vpop.f32.mrf.mxu1  ;;  %v1945_v36 = vadd.f32 %v1033_v30, %v353_v33  ;;  %v956_v37 = vadd.f32 %v955_v34, %v954_v31 }
  0xec   :  { %v1036_v38 = vadd.f32 %v1035_v35, %v1034_v32  ;;  %v957_v39 = vpop.f32.mrf.mxu0 }
  0xed   :  { %v1037_v40 = vpop.f32.mrf.mxu1  ;;  %v358_v41 = vadd.f32 %v956_v37, %v1942_v26 }
  0xee   :  { %v958_v42 = vpop.f32.mrf.mxu0 }
  0xef   :  { %v1038_v43 = vpop.f32.mrf.mxu1  ;;  %v1948_v44 = vadd.f32 %v1036_v38, %v358_v41  ;;  %v959_v45 = vadd.f32 %v958_v42, %v957_v39 }
  0xf0   :  { %v1039_v46 = vadd.f32 %v1038_v43, %v1037_v40  ;;  %v960_v47 = vpop.f32.mrf.mxu0 }
  0xf1   :  { %v1040_v48 = vpop.f32.mrf.mxu1  ;;  %v363_v49 = vadd.f32 %v959_v45, %v1942_v26 }
  0xf2   :  { %v961_v50 = vpop.f32.mrf.mxu0 }
  0xf3   :  { %v1041_v51 = vpop.f32.mrf.mxu1  ;;  %v1951_v52 = vadd.f32 %v1039_v46, %v363_v49  ;;  %v962_v53 = vadd.f32 %v961_v50, %v960_v47 }
  0xf4   :  { %v1042_v54 = vadd.f32 %v1041_v51, %v1040_v48  ;;  %v963_v55 = vpop.f32.mrf.mxu0 }
  0xf5   :  { %v1043_v56 = vpop.f32.mrf.mxu1  ;;  %v368_v57 = vadd.f32 %v962_v53, %v1942_v26 }
  0xf6   :  { %v964_v58 = vpop.f32.mrf.mxu0 }
  0xf7   :  { %v1044_v59 = vpop.f32.mrf.mxu1  ;;  %v1954_v60 = vadd.f32 %v1042_v54, %v368_v57  ;;  %v965_v61 = vadd.f32 %v964_v58, %v963_v55 }
  0xf8   :  { %v1045_v62 = vadd.f32 %v1044_v59, %v1043_v56  ;;  %v1956_v63 = vpop.f32.mrf.mxu0 }
  0xf9   :  { %v1958_v0 = vpop.f32.mrf.mxu1  ;;  %v373_v1 = vadd.f32 %v965_v61, %v1942_v26 }
  0xfa   :  { %v967_v2 = vpop.f32.mrf.mxu0 }
  0xfb   :  { %v1961_v3 = vpop.f32.mrf.mxu1  ;;  %v1963_v4 = vadd.f32 %v1045_v62, %v373_v1 }
  0xfc   :  { %v969_v5 = vpop.f32.mrf.mxu0 }
  0xfd   :  { %v1965_v6 = vpop.f32.mrf.mxu1 }
  0xfe   :  { %v970_v7 = vpop.f32.mrf.mxu0 }
  0xff   :  { %v1967_v8 = vpop.f32.mrf.mxu1 }
 0x100   :  { %v1969_v9 = vpop.f32.mrf.mxu0 }
 0x101   :  { %v1971_v10 = vpop.f32.mrf.mxu1 }
 0x102   :  { %v1973_v11 = vpop.f32.mrf.mxu0 }
 0x103   :  { %v1975_v12 = vpop.f32.mrf.mxu1 }
 0x104   :  { %v1977_v13 = vpop.f32.mrf.mxu0 }
 0x105   :  { %v1979_v14 = vpop.f32.mrf.mxu1 }
 0x106   :  { %v1981_v15 = vpop.f32.mrf.mxu0 }
 0x107   :  { %v1983_v16 = vpop.f32.mrf.mxu1 }
 0x108   :  { %v1985_v17 = vpop.f32.mrf.mxu0 }
 0x109   :  { %v1987_v18 = vpop.f32.mrf.mxu1 }
 0x10a   :  { %v1989_v19 = vpop.f32.mrf.mxu0 }
 0x10b   :  { %v1991_v20 = vpop.f32.mrf.mxu1 }
 0x10c   :  { %v1993_v21 = vpop.f32.mrf.mxu0 }
 0x10d   :  { %v1995_v22 = vpop.f32.mrf.mxu1 }
 0x10e   :  { %2190 = vst [vmem:[#allocation2_spill] sm:$0xff] %v1995_v22  ;;  %v1997_v23 = vpop.f32.mrf.mxu0 }
 0x10f   :  { %v1999_v24 = vpop.f32.mrf.mxu1 }
 0x110   :  { %2191 = vst [vmem:[#allocation3_spill] sm:$0xff] %v1999_v24  ;;  %v2001_v25 = vpop.f32.mrf.mxu0 }
 0x111   :  { %2192 = vst [vmem:[#allocation4_spill] sm:$0xff] %v2001_v25  ;;  %v2003_v27 = vpop.f32.mrf.mxu1 }
 0x112   :  { %2193 = vst [vmem:[#allocation5_spill] sm:$0xff] %v2003_v27  ;;  %v2005_v28 = vpop.f32.mrf.mxu0 }
 0x113   :  { %2194 = vst [vmem:[#allocation6_spill] sm:$0xff] %v2005_v28  ;;  %v2007_v29 = vpop.f32.mrf.mxu1 }
 0x114   :  { %2195 = vst [vmem:[#allocation7_spill] sm:$0xff] %v2007_v29  ;;  %v2009_v30 = vpop.f32.mrf.mxu0 }
 0x115   :  { %v2011_v31 = vpop.f32.mrf.mxu1 }
 0x116   :  { %v2013_v32 = vpop.f32.mrf.mxu0 }
 0x117   :  { %v2015_v33 = vpop.f32.mrf.mxu1 }
 0x118   :  { %v2017_v34 = vpop.f32.mrf.mxu0 }
 0x119   :  { %v2019_v35 = vpop.f32.mrf.mxu1 }
 0x11a   :  { %v2021_v37 = vpop.f32.mrf.mxu0 }
 0x11b   :  { %v2023_v38 = vpop.f32.mrf.mxu1 }
 0x11c   :  { %v2025_v39 = vpop.f32.mrf.mxu0 }
 0x11d   :  { %v2027_v40 = vpop.f32.mrf.mxu1 }
 0x11e   :  { %2196 = vst [vmem:[#allocation8_spill] sm:$0xff] %v2027_v40  ;;  %v2029_v41 = vpop.f32.mrf.mxu0  ;;  %v968_v40 = vadd.f32 %v967_v2, %v1956_v63 }
 0x11f   :  { %v2031_v42 = vpop.f32.mrf.mxu1 }
 0x120   :  { %2197 = vst [vmem:[#allocation9_spill] sm:$0xff] %v2031_v42  ;;  %v2033_v43 = vpop.f32.mrf.mxu0 }
 0x121   :  { %v2035_v45 = vpop.f32.mrf.mxu1 }
 0x122   :  { %2198 = vst [vmem:[#allocation10_spill] sm:$0xff] %v2035_v45  ;;  %v2037_v46 = vpop.f32.mrf.mxu0 }
 0x123   :  { %v2039_v47 = vpop.f32.mrf.mxu1 }
 0x124   :  { %2199 = vst [vmem:[#allocation11_spill] sm:$0xff] %v2039_v47  ;;  %v1111_v48 = vpop.f32.mrf.mxu0  ;;  %v971_v47 = vadd.f32 %v970_v7, %v969_v5  ;;  %v1051_v5 = vadd.f32 %v1967_v8, %v1965_v6 }
 0x125   :  { %v2041_v49 = vpop.f32.mrf.mxu1 }
 0x126   :  { %2200 = vst [vmem:[#allocation12_spill] sm:$0xff] %v2041_v49  ;;  %v1112_v50 = vpop.f32.mrf.mxu0 }
 0x127   :  { %v2043_v51 = vpop.f32.mrf.mxu1  ;;  %v1113_v27 = vadd.f32 %v1112_v50, %v1111_v48  ;;  %v1048_v48 = vadd.f32 %v1961_v3, %v1958_v0 }
 0x128   :  { %2201 = vst [vmem:[#allocation13_spill] sm:$0xff] %v2043_v51  ;;  %v1114_v53 = vpop.f32.mrf.mxu0 }
 0x129   :  { %v2045_v54 = vpop.f32.mrf.mxu1 }
 0x12a   :  { %v1115_v55 = vpop.f32.mrf.mxu0 }
 0x12b   :  { %v2047_v56 = vpop.f32.mrf.mxu1  ;;  %v1116_v62 = vadd.f32 %v1115_v55, %v1114_v53  ;;  %v643_v53 = vadd.f32 %v1113_v27, %v1945_v36  ;;  %v378_v55 = vadd.f32 %v968_v40, %v1942_v26 }
 0x12c   :  { %v1117_v57 = vpop.f32.mrf.mxu0 }
 0x12d   :  { %v2049_v58 = vpop.f32.mrf.mxu1  ;;  %v648_v49 = vadd.f32 %v1116_v62, %v1948_v44  ;;  %v383_v44 = vadd.f32 %v971_v47, %v1942_v26  ;;  %v523_v40 = vadd.f32 %v1048_v48, %v378_v55  ;;  %v1057_v55 = vadd.f32 %v1983_v16, %v1979_v14 }
 0x12e   :  { %2202 = vst [vmem:[#allocation14_spill] sm:$0xff] %v2049_v58  ;;  %v1118_v59 = vpop.f32.mrf.mxu0  ;;  %v1060_v16 = vadd.f32 %v1991_v20, %v1987_v18  ;;  %v998_v18 = vadd.f32 %v2037_v46, %v2033_v43  ;;  %v2204_v46 = vld [vmem:[#allocation2_spill] sm:$0xff] }
 0x12f   :  { %v2051_v61 = vpop.f32.mrf.mxu1  ;;  %v1119_v58 = vadd.f32 %v1118_v59, %v1117_v57  ;;  %v1054_v59 = vadd.f32 %v1975_v12, %v1971_v10 }
 0x130   :  { %2203 = vst [vmem:[#allocation15_spill] sm:$0xff] %v2051_v61  ;;  %v1120_v1 = vpop.f32.mrf.mxu0 }
 0x131   :  { %v2053_v29 = vpop.f32.mrf.mxu1 }
 0x132   :  { %v1121_v42 = vpop.f32.mrf.mxu0 }
 0x133   :  { %v2056_v28 = vpop.f32.mrf.mxu1  ;;  %v1122_v25 = vadd.f32 %v1121_v42, %v1120_v1 }
 0x134   :  { %v1123_v51 = vpop.f32.mrf.mxu0 }
 0x135   :  { %v1201_v45 = vpop.f32.mrf.mxu1  ;;  %v658_v42 = vadd.f32 %v1122_v25, %v1954_v60  ;;  %v974_v60 = vadd.f32 %v1973_v11, %v1969_v9 }
 0x136   :  { %v793_v24 = vadd.f32 %v1201_v45, %v648_v49  ;;  %v1124_v22 = vpop.f32.mrf.mxu0 }
 0x137   :  { %v787_v50 = vpop.f32.mrf.mxu1  ;;  %v1125_v36 = vadd.f32 %v1124_v22, %v1123_v51  ;;  %v977_v22 = vadd.f32 %v1981_v15, %v1977_v13  ;;  %v980_v15 = vadd.f32 %v1989_v19, %v1985_v17 }
 0x138   :  { %v867_v63 = vmax.f32 %v793_v24, 0.0  ;;  %v788_v2 = vadd.f32 %v787_v50, %v643_v53  ;;  %v1126_v61 = vpop.f32.mrf.mxu0  ;;  %v653_v24 = vadd.f32 %v1119_v58, %v1951_v52  ;;  %v528_v52 = vadd.f32 %v1051_v5, %v383_v44 }
 0x139   :  { %v1204_v7 = vpop.f32.mrf.mxu1  ;;  %v663_v57 = vadd.f32 %v1125_v36, %v1963_v4  ;;  %v388_v58 = vadd.f32 %v974_v60, %v1942_v26  ;;  %v393_v4 = vadd.f32 %v977_v22, %v1942_v26  ;;  %v992_v50 = vadd.f32 %v2021_v37, %v2017_v34  ;;  %v2207_v22 = vld [vmem:[#allocation11_spill] sm:$0xff] }
 0x13a   :  { %883 = vst.msk [vmem:[%s2189_s3 + $0x8] sm:$0xff] %vm237_vm0, %v867_v63  ;;  %v866_v27 = vmax.f32 %v788_v2, 0.0  ;;  %v803_v0 = vadd.f32 %v1204_v7, %v658_v42  ;;  %v1127_v3 = vpop.f32.mrf.mxu0  ;;  %v989_v2 = vadd.f32 %v2013_v32, %v2009_v30  ;;  %v398_v14 = vadd.f32 %v980_v15, %v1942_v26  ;;  %v2212_v15 = vld [vmem:[#allocation8_spill] sm:$0xff] }
 0x13b   :  { %v1128_v25 = vadd.f32 %v1127_v3, %v1126_v61  ;;  %v797_v45 = vpop.f32.mrf.mxu1  ;;  %v533_v19 = vadd.f32 %v1054_v59, %v388_v58  ;;  %v538_v30 = vadd.f32 %v1057_v55, %v393_v4  ;;  %v983_v32 = vadd.f32 %v1997_v23, %v1993_v21 }
 0x13c   :  { %882 = vst.msk [vmem:[%s2189_s3] sm:$0xff] %vm237_vm0, %v866_v27  ;;  %v869_v6 = vmax.f32 %v803_v0, 0.0  ;;  %v798_v8 = vadd.f32 %v797_v45, %v653_v24  ;;  %v1129_v47 = vpop.f32.mrf.mxu0  ;;  %v418_v36 = vadd.f32 %v992_v50, %v1942_v26  ;;  %v1072_v27 = vadd.f32 %v2023_v38, %v2019_v35 }
 0x13d   :  { %v668_v49 = vadd.f32 %v1128_v25, %v523_v40  ;;  %v1207_v51 = vpop.f32.mrf.mxu1  ;;  %v413_v3 = vadd.f32 %v989_v2, %v1942_v26  ;;  %v1069_v24 = vadd.f32 %v2015_v33, %v2011_v31  ;;  %v543_v23 = vadd.f32 %v1060_v16, %v398_v14  ;;  %v2205_v31 = vld [vmem:[#allocation3_spill] sm:$0xff] }
 0x13e   :  { %885 = vst.msk [vmem:[%s2189_s3 + $0x18] sm:$0xff] %vm237_vm0, %v869_v6  ;;  %v868_v9 = vmax.f32 %v798_v8, 0.0  ;;  %v1130_v11 = vpop.f32.mrf.mxu0  ;;  %v995_v25 = vadd.f32 %v2029_v41, %v2025_v39  ;;  %v1152_v35 = vadd.f32 %v2047_v56, %v2045_v54  ;;  %v403_v43 = vadd.f32 %v983_v32, %v1942_v26  ;;  %v2206_v41 = vld [vmem:[#allocation10_spill] sm:$0xff]  ;;  %v2208_v56 = vld [vmem:[#allocation12_spill] sm:$0xff]  ;;  %v2215_v2 = vld [vmem:[#allocation15_spill] sm:$0xff] }
 0x13f   :  { %v813_v61 = vadd.f32 %v1207_v51, %v668_v49  ;;  %v1131_v62 = vadd.f32 %v1130_v11, %v1129_v47  ;;  %v807_v13 = vpop.f32.mrf.mxu1  ;;  %v1063_v33 = vadd.f32 %v2205_v31, %v2204_v46  ;;  %v563_v47 = vadd.f32 %v1072_v27, %v418_v36  ;;  %v2209_v49 = vld [vmem:[#allocation13_spill] sm:$0xff]  ;;  %v2211_v11 = vld [vmem:[#allocation6_spill] sm:$0xff] }
 0x140   :  { %884 = vst.msk [vmem:[%s2189_s3 + $0x10] sm:$0xff] %vm237_vm0, %v868_v9  ;;  %v808_v1 = vadd.f32 %v807_v13, %v663_v57  ;;  %v1132_v53 = vpop.f32.mrf.mxu0  ;;  %v428_v39 = vadd.f32 %v998_v18, %v1942_v26  ;;  %v1078_v54 = vadd.f32 %v2207_v22, %v2206_v41  ;;  %v1149_v51 = vadd.f32 %v2209_v49, %v2208_v56  ;;  %v2210_v9 = vld [vmem:[#allocation4_spill] sm:$0xff] }
 0x141   :  { %v871_v48 = vmax.f32 %v813_v61, 0.0  ;;  %v1210_v10 = vpop.f32.mrf.mxu1  ;;  %v673_v12 = vadd.f32 %v1131_v62, %v528_v52  ;;  %v986_v57 = vadd.f32 %v2211_v11, %v2210_v9  ;;  %v558_v58 = vadd.f32 %v1069_v24, %v413_v3 }
 0x142   :  { %v870_v63 = vmax.f32 %v808_v1, 0.0  ;;  %v1133_v17 = vpop.f32.mrf.mxu0  ;;  %v423_v13 = vadd.f32 %v995_v25, %v1942_v26  ;;  %v2213_v1 = vld [vmem:[#allocation9_spill] sm:$0xff]  ;;  %v1158_v4 = vadd.f32 %v2056_v28, %v2053_v29 }
 0x143   :  { %887 = vst.msk [vmem:[%s2189_s3 + $0x28] sm:$0xff] %vm237_vm0, %v871_v48  ;;  %v1134_v42 = vadd.f32 %v1133_v17, %v1132_v53  ;;  %v817_v44 = vpop.f32.mrf.mxu1  ;;  %v1075_v53 = vadd.f32 %v2213_v1, %v2212_v15  ;;  %v708_v48 = vadd.f32 %v1152_v35, %v563_v47  ;;  %v573_v17 = vadd.f32 %v1078_v54, %v428_v39 }
 0x144   :  { %886 = vst.msk [vmem:[%s2189_s3 + $0x20] sm:$0xff] %vm237_vm0, %v870_v63  ;;  %v818_v34 = vadd.f32 %v817_v44, %v673_v12  ;;  %v1135_v37 = vpop.f32.mrf.mxu0  ;;  %v703_v16 = vadd.f32 %v1149_v51, %v558_v58 }
 0x145   :  { %v678_v5 = vadd.f32 %v1134_v42, %v533_v19  ;;  %v1213_v7 = vpop.f32.mrf.mxu1  ;;  %v2214_v19 = vld [vmem:[#allocation14_spill] sm:$0xff]  ;;  %v568_v36 = vadd.f32 %v1075_v53, %v423_v13 }
 0x146   :  { %v872_v20 = vmax.f32 %v818_v34, 0.0  ;;  %v1136_v0 = vpop.f32.mrf.mxu0  ;;  %v1155_v42 = vadd.f32 %v2215_v2, %v2214_v19  ;;  %v408_v34 = vadd.f32 %v986_v57, %v1942_v26 }
 0x147   :  { %v823_v40 = vadd.f32 %v1210_v10, %v678_v5  ;;  %v1137_v60 = vadd.f32 %v1136_v0, %v1135_v37  ;;  %v827_v21 = vpop.f32.mrf.mxu1  ;;  %v548_v10 = vadd.f32 %v1063_v33, %v403_v43  ;;  %v2216_v37 = vld [vmem:[#allocation5_spill] sm:$0xff]  ;;  %v718_v0 = vadd.f32 %v1158_v4, %v573_v17 }
 0x148   :  { %888 = vst.msk [vmem:[%s2189_s3 + $0x30] sm:$0xff] %vm237_vm0, %v872_v20  ;;  %v1138_v38 = vpop.f32.mrf.mxu0 }
 0x149   :  { %v873_v45 = vmax.f32 %v823_v40, 0.0  ;;  %v683_v6 = vadd.f32 %v1137_v60, %v538_v30  ;;  %v1216_v8 = vpop.f32.mrf.mxu1  ;;  %v2217_v30 = vld [vmem:[#allocation7_spill] sm:$0xff] }
 0x14a   :  { %v1139_v52 = vpop.f32.mrf.mxu0  ;;  %v1066_v32 = vadd.f32 %v2217_v30, %v2216_v37 }
 0x14b   :  { %889 = vst.msk [vmem:[%s2189_s3 + $0x38] sm:$0xff] %vm237_vm0, %v873_v45  ;;  %v828_v59 = vadd.f32 %v827_v21, %v683_v6  ;;  %v1140_v61 = vadd.f32 %v1139_v52, %v1138_v38  ;;  %v837_v62 = vpop.f32.mrf.mxu1 }
 0x14c   :  { %v1141_v55 = vpop.f32.mrf.mxu0 }
 0x14d   :  { %v874_v12 = vmax.f32 %v828_v59, 0.0  ;;  %v688_v50 = vadd.f32 %v1140_v61, %v543_v23  ;;  %v1219_v63 = vpop.f32.mrf.mxu1  ;;  %v713_v23 = vadd.f32 %v1155_v42, %v568_v36 }
 0x14e   :  { %v853_v44 = vadd.f32 %v1219_v63, %v708_v48  ;;  %v1142_v14 = vpop.f32.mrf.mxu0 }
 0x14f   :  { %890 = vst.msk [vmem:[%s2189_s3 + $0x40] sm:$0xff] %vm237_vm0, %v874_v12  ;;  %v833_v28 = vadd.f32 %v1213_v7, %v688_v50  ;;  %v1143_v29 = vadd.f32 %v1142_v14, %v1141_v55  ;;  %v847_v5 = vpop.f32.mrf.mxu1  ;;  %v553_v7 = vadd.f32 %v1066_v32, %v408_v34 }
 0x150   :  { %v879_v27 = vmax.f32 %v853_v44, 0.0  ;;  %v848_v18 = vadd.f32 %v847_v5, %v703_v16  ;;  %v1144_v20 = vpop.f32.mrf.mxu0 }
 0x151   :  { %v875_v3 = vmax.f32 %v833_v28, 0.0  ;;  %v693_v24 = vadd.f32 %v1143_v29, %v548_v10  ;;  %v1222_v40 = vpop.f32.mrf.mxu1 }
 0x152   :  { %895 = vst.msk [vmem:[%s2189_s3 + $0x68] sm:$0xff] %vm237_vm0, %v879_v27  ;;  %v878_v26 = vmax.f32 %v848_v18, 0.0  ;;  %v863_v60 = vadd.f32 %v1222_v40, %v718_v0  ;;  %v1145_v21 = vpop.f32.mrf.mxu0 }
 0x153   :  { %891 = vst.msk [vmem:[%s2189_s3 + $0x48] sm:$0xff] %vm237_vm0, %v875_v3  ;;  %v838_v25 = vadd.f32 %v837_v62, %v693_v24  ;;  %v1146_v35 = vadd.f32 %v1145_v21, %v1144_v20  ;;  %v857_v38 = vpop.f32.mrf.mxu1 }
 0x154   :  { %894 = vst.msk [vmem:[%s2189_s3 + $0x60] sm:$0xff] %vm237_vm0, %v878_v26  ;;  %v881_v43 = vmax.f32 %v863_v60, 0.0  ;;  %v858_v46 = vadd.f32 %v857_v38, %v713_v23 }
 0x155   :  { %v876_v31 = vmax.f32 %v838_v25, 0.0  ;;  %v698_v33 = vadd.f32 %v1146_v35, %v553_v7 }
 0x156   :  { %897 = vst.msk [vmem:[%s2189_s3 + $0x78] sm:$0xff] %vm237_vm0, %v881_v43  ;;  %v880_v45 = vmax.f32 %v858_v46, 0.0 }
 0x157   :  { %892 = vst.msk [vmem:[%s2189_s3 + $0x50] sm:$0xff] %vm237_vm0, %v876_v31  ;;  %v843_v6 = vadd.f32 %v1216_v8, %v698_v33 }
 0x158   :  { %896 = vst.msk [vmem:[%s2189_s3 + $0x70] sm:$0xff] %vm237_vm0, %v880_v45 }
 0x159   :  { %v877_v47 = vmax.f32 %v843_v6, 0.0 }
 0x15b   :  { %893 = vst.msk [vmem:[%s2189_s3 + $0x58] sm:$0xff] %vm237_vm0, %v877_v47 }

// kernel: forward.12
= control target key start
LH: loop header
LB: loop body
LE: loop exit
PB: predicated region body
PF: predicated region fallthrough
CT: control target
= control target key end

     0   :  { %s877_s12 = smov 0   ;;  %s1298_s0 = inlined_call_operand.vmem [shape: f32[512,256], index: 0, kind: input, shape index: {}]   ;;  %s1299_s1 = inlined_call_operand.vmem [shape: f32[256,256], index: 1, kind: input, shape index: {}]   ;;  %s1300_s2 = inlined_call_operand.vmem [shape: f32[1,256], index: 2, kind: input, shape index: {}]   ;;  %s1301_s3 = inlined_call_operand.vmem [shape: f32[512,256], index: 3, kind: output, shape index: {}]  }
   0x1 LB: > { %s762_s13 = sadd.s32 4294967295, %s855_s12   ;;  %p766_p0 = scmp.ge.s32.totalorder %s855_s12, 1  ;;  %s855_s12 = sphi %s877_s12, %s13_s12  }
   0x2   : > { %p139_p1 = scmp.lt.s32.totalorder %s855_s12, 3 }
   0x4   : > { %p140_p2 = pnand %p766_p0, %p139_p1 }
   0x5   : > { %s767_s8 = sshll.u32 (!%p140_p2), %s762_s13, 5 }
   0x6   : > { %143 = sbr.rel (%p140_p2) target bundleno = 337 (0x151), region = 32  ;;  %p166_p3 = scmp.lt.s32.totalorder (!%p140_p2), %s767_s8, 63 }
   0xb   : > { %v274_v0 = vld [vmem:[%s1299_s1 + $0xf8] sm:$0xff]  ;;  %v273_v1 = vld [vmem:[%s1299_s1 + $0xf0] sm:$0xff]  ;;  %v272_v2 = vld [vmem:[%s1299_s1 + $0xe8] sm:$0xff]  ;;  %s1303_s8 = smov (!%p166_p3, %s767_s8), 63 }
   0xc   : > { %319 = vmatprep.subr.mxu0 %v274_v0  ;;  %777 = vmatprep.subr.mxu1 %v274_v0  ;;  %v271_v3 = vld [vmem:[%s1299_s1 + $0xe0] sm:$0xff]  ;;  %v270_v4 = vld [vmem:[%s1299_s1 + $0xd8] sm:$0xff]  ;;  %v269_v5 = vld [vmem:[%s1299_s1 + $0xd0] sm:$0xff]  ;;  %s775_s5 = sshll.u32 %s1303_s8, 4 }
   0xd   : > { %320 = vmatpush1.msra.mxu0 %v273_v1  ;;  %809 = vmatpush1.msra.mxu1 %v273_v1  ;;  %v268_v6 = vld [vmem:[%s1299_s1 + $0xc8] sm:$0xff]  ;;  %v267_v7 = vld [vmem:[%s1299_s1 + $0xc0] sm:$0xff]  ;;  %v266_v8 = vld [vmem:[%s1299_s1 + $0xb8] sm:$0xff]  ;;  %s1081_s13 = scalar_lea.vmem %s1298_s0, %s775_s5  ;;  %s1167_s25 = scalar_lea.vmem %s1301_s3, %s775_s5 }
   0xe   : > { %321 = vmatprep.subr.mxu0 %v272_v2  ;;  %778 = vmatprep.subr.mxu1 %v272_v2  ;;  %v265_v9 = vld [vmem:[%s1299_s1 + $0xb0] sm:$0xff]  ;;  %v264_v10 = vld [vmem:[%s1299_s1 + $0xa8] sm:$0xff]  ;;  %v263_v11 = vld [vmem:[%s1299_s1 + $0xa0] sm:$0xff] }
   0xf   : > { %322 = vmatpush1.msra.mxu0 %v271_v3  ;;  %810 = vmatpush1.msra.mxu1 %v271_v3  ;;  %v262_v12 = vld [vmem:[%s1299_s1 + $0x98] sm:$0xff]  ;;  %v261_v13 = vld [vmem:[%s1299_s1 + $0x90] sm:$0xff]  ;;  %v260_v14 = vld [vmem:[%s1299_s1 + $0x88] sm:$0xff] }
  0x10   : > { %323 = vmatprep.subr.mxu0 %v270_v4  ;;  %779 = vmatprep.subr.mxu1 %v270_v4  ;;  %v259_v15 = vld [vmem:[%s1299_s1 + $0x80] sm:$0xff]  ;;  %v258_v16 = vld [vmem:[%s1299_s1 + $0x78] sm:$0xff]  ;;  %v257_v17 = vld [vmem:[%s1299_s1 + $0x70] sm:$0xff] }
  0x11   : > { %324 = vmatpush1.msra.mxu0 %v269_v5  ;;  %811 = vmatpush1.msra.mxu1 %v269_v5  ;;  %v256_v18 = vld [vmem:[%s1299_s1 + $0x68] sm:$0xff]  ;;  %v255_v19 = vld [vmem:[%s1299_s1 + $0x60] sm:$0xff]  ;;  %v254_v20 = vld [vmem:[%s1299_s1 + $0x58] sm:$0xff] }
  0x12   : > { %325 = vmatprep.subr.mxu0 %v268_v6  ;;  %780 = vmatprep.subr.mxu1 %v268_v6  ;;  %v253_v21 = vld [vmem:[%s1299_s1 + $0x50] sm:$0xff]  ;;  %v252_v22 = vld [vmem:[%s1299_s1 + $0x48] sm:$0xff]  ;;  %v251_v23 = vld [vmem:[%s1299_s1 + $0x40] sm:$0xff] }
  0x13   : > { %326 = vmatpush1.msra.mxu0 %v267_v7  ;;  %812 = vmatpush1.msra.mxu1 %v267_v7  ;;  %v250_v24 = vld [vmem:[%s1299_s1 + $0x38] sm:$0xff]  ;;  %v249_v25 = vld [vmem:[%s1299_s1 + $0x30] sm:$0xff]  ;;  %v248_v26 = vld [vmem:[%s1299_s1 + $0x28] sm:$0xff] }
  0x14   : > { %327 = vmatprep.subr.mxu0 %v266_v8  ;;  %781 = vmatprep.subr.mxu1 %v266_v8  ;;  %v247_v27 = vld [vmem:[%s1299_s1 + $0x20] sm:$0xff]  ;;  %v246_v28 = vld [vmem:[%s1299_s1 + $0x18] sm:$0xff]  ;;  %v245_v29 = vld [vmem:[%s1299_s1 + $0x10] sm:$0xff] }
  0x15   : > { %328 = vmatpush1.msra.mxu0 %v265_v9  ;;  %813 = vmatpush1.msra.mxu1 %v265_v9  ;;  %v244_v30 = vld [vmem:[%s1299_s1 + $0x8] sm:$0xff]  ;;  %v243_v31 = vld [vmem:[%s1299_s1] sm:$0xff]  ;;  %v306_v32 = vld [vmem:[%s1299_s1 + $0x1f8] sm:$0xff] }
  0x16   : > { %329 = vmatprep.subr.mxu0 %v264_v10  ;;  %782 = vmatprep.subr.mxu1 %v264_v10  ;;  %v305_v33 = vld [vmem:[%s1299_s1 + $0x1f0] sm:$0xff]  ;;  %v304_v34 = vld [vmem:[%s1299_s1 + $0x1e8] sm:$0xff]  ;;  %v303_v35 = vld [vmem:[%s1299_s1 + $0x1e0] sm:$0xff] }
  0x17   : > { %330 = vmatpush1.msra.mxu0 %v263_v11  ;;  %814 = vmatpush1.msra.mxu1 %v263_v11  ;;  %v302_v36 = vld [vmem:[%s1299_s1 + $0x1d8] sm:$0xff]  ;;  %v301_v37 = vld [vmem:[%s1299_s1 + $0x1d0] sm:$0xff]  ;;  %v300_v38 = vld [vmem:[%s1299_s1 + $0x1c8] sm:$0xff] }
  0x18   : > { %331 = vmatprep.subr.mxu0 %v262_v12  ;;  %783 = vmatprep.subr.mxu1 %v262_v12  ;;  %v299_v39 = vld [vmem:[%s1299_s1 + $0x1c0] sm:$0xff]  ;;  %v298_v40 = vld [vmem:[%s1299_s1 + $0x1b8] sm:$0xff]  ;;  %v297_v41 = vld [vmem:[%s1299_s1 + $0x1b0] sm:$0xff] }
  0x19   : > { %332 = vmatpush1.msra.mxu0 %v261_v13  ;;  %815 = vmatpush1.msra.mxu1 %v261_v13  ;;  %v296_v42 = vld [vmem:[%s1299_s1 + $0x1a8] sm:$0xff]  ;;  %v295_v43 = vld [vmem:[%s1299_s1 + $0x1a0] sm:$0xff]  ;;  %v294_v44 = vld [vmem:[%s1299_s1 + $0x198] sm:$0xff] }
  0x1a   : > { %333 = vmatprep.subr.mxu0 %v260_v14  ;;  %784 = vmatprep.subr.mxu1 %v260_v14  ;;  %v293_v45 = vld [vmem:[%s1299_s1 + $0x190] sm:$0xff]  ;;  %v292_v46 = vld [vmem:[%s1299_s1 + $0x188] sm:$0xff]  ;;  %v291_v47 = vld [vmem:[%s1299_s1 + $0x180] sm:$0xff] }
  0x1b   : > { %334 = vmatpush1.msra.mxu0 %v259_v15  ;;  %816 = vmatpush1.msra.mxu1 %v259_v15  ;;  %v290_v48 = vld [vmem:[%s1299_s1 + $0x178] sm:$0xff]  ;;  %v289_v49 = vld [vmem:[%s1299_s1 + $0x170] sm:$0xff]  ;;  %v288_v50 = vld [vmem:[%s1299_s1 + $0x168] sm:$0xff] }
  0x1c   : > { %335 = vmatprep.subr.mxu0 %v258_v16  ;;  %785 = vmatprep.subr.mxu1 %v258_v16  ;;  %v287_v51 = vld [vmem:[%s1299_s1 + $0x160] sm:$0xff]  ;;  %v286_v52 = vld [vmem:[%s1299_s1 + $0x158] sm:$0xff]  ;;  %v285_v53 = vld [vmem:[%s1299_s1 + $0x150] sm:$0xff] }
  0x1d   : > { %336 = vmatpush1.msra.mxu0 %v257_v17  ;;  %817 = vmatpush1.msra.mxu1 %v257_v17  ;;  %v284_v54 = vld [vmem:[%s1299_s1 + $0x148] sm:$0xff]  ;;  %v283_v55 = vld [vmem:[%s1299_s1 + $0x140] sm:$0xff]  ;;  %v282_v56 = vld [vmem:[%s1299_s1 + $0x138] sm:$0xff] }
  0x1e   : > { %337 = vmatprep.subr.mxu0 %v256_v18  ;;  %786 = vmatprep.subr.mxu1 %v256_v18  ;;  %v281_v57 = vld [vmem:[%s1299_s1 + $0x130] sm:$0xff]  ;;  %v280_v58 = vld [vmem:[%s1299_s1 + $0x128] sm:$0xff]  ;;  %v279_v59 = vld [vmem:[%s1299_s1 + $0x120] sm:$0xff] }
  0x1f   : > { %338 = vmatpush1.msra.mxu0 %v255_v19  ;;  %818 = vmatpush1.msra.mxu1 %v255_v19  ;;  %v278_v60 = vld [vmem:[%s1299_s1 + $0x118] sm:$0xff]  ;;  %v277_v61 = vld [vmem:[%s1299_s1 + $0x110] sm:$0xff]  ;;  %v276_v62 = vld [vmem:[%s1299_s1 + $0x108] sm:$0xff] }
  0x20   : > { %339 = vmatprep.subr.mxu0 %v254_v20  ;;  %787 = vmatprep.subr.mxu1 %v254_v20  ;;  %v275_v63 = vld [vmem:[%s1299_s1 + $0x100] sm:$0xff]  ;;  %v180_v0 = vld [vmem:[%s1081_s13 + $0x8] sm:$0xff]  ;;  %v182_v4 = vld [vmem:[%s1081_s13 + $0x18] sm:$0xff] }
  0x21   : > { %340 = vmatpush1.msra.mxu0 %v253_v21  ;;  %819 = vmatpush1.msra.mxu1 %v253_v21  ;;  %v212_v1 = vld [vmem:[%s1081_s13 + $0x108] sm:$0xff]  ;;  %v179_v2 = vld [vmem:[%s1081_s13] sm:$0xff]  ;;  %v214_v5 = vld [vmem:[%s1081_s13 + $0x118] sm:$0xff] }
  0x22   : > { %341 = vmatprep.subr.mxu0 %v252_v22  ;;  %788 = vmatprep.subr.mxu1 %v252_v22  ;;  %v211_v3 = vld [vmem:[%s1081_s13 + $0x100] sm:$0xff]  ;;  %v181_v6 = vld [vmem:[%s1081_s13 + $0x10] sm:$0xff]  ;;  %v184_v8 = vld [vmem:[%s1081_s13 + $0x28] sm:$0xff] }
  0x23   : > { %342 = vmatpush1.msra.mxu0 %v251_v23  ;;  %820 = vmatpush1.msra.mxu1 %v251_v23  ;;  %v213_v7 = vld [vmem:[%s1081_s13 + $0x110] sm:$0xff]  ;;  %v216_v9 = vld [vmem:[%s1081_s13 + $0x128] sm:$0xff]  ;;  %v183_v10 = vld [vmem:[%s1081_s13 + $0x20] sm:$0xff] }
  0x24   : > { %343 = vmatprep.subr.mxu0 %v250_v24  ;;  %789 = vmatprep.subr.mxu1 %v250_v24  ;;  %v215_v11 = vld [vmem:[%s1081_s13 + $0x120] sm:$0xff]  ;;  %v186_v12 = vld [vmem:[%s1081_s13 + $0x38] sm:$0xff]  ;;  %v185_v14 = vld [vmem:[%s1081_s13 + $0x30] sm:$0xff] }
  0x25   : > { %344 = vmatpush1.msra.mxu0 %v249_v25  ;;  %821 = vmatpush1.msra.mxu1 %v249_v25  ;;  %v218_v13 = vld [vmem:[%s1081_s13 + $0x138] sm:$0xff]  ;;  %v217_v15 = vld [vmem:[%s1081_s13 + $0x130] sm:$0xff]  ;;  %v188_v16 = vld [vmem:[%s1081_s13 + $0x48] sm:$0xff] }
  0x26   : > { %345 = vmatprep.subr.mxu0 %v248_v26  ;;  %790 = vmatprep.subr.mxu1 %v248_v26  ;;  %v220_v17 = vld [vmem:[%s1081_s13 + $0x148] sm:$0xff]  ;;  %v187_v18 = vld [vmem:[%s1081_s13 + $0x40] sm:$0xff]  ;;  %v190_v20 = vld [vmem:[%s1081_s13 + $0x58] sm:$0xff] }
  0x27   : > { %346 = vmatpush1.msra.mxu0 %v247_v27  ;;  %822 = vmatpush1.msra.mxu1 %v247_v27  ;;  %v219_v19 = vld [vmem:[%s1081_s13 + $0x140] sm:$0xff]  ;;  %v222_v21 = vld [vmem:[%s1081_s13 + $0x158] sm:$0xff]  ;;  %v189_v22 = vld [vmem:[%s1081_s13 + $0x50] sm:$0xff] }
  0x28   : > { %347 = vmatprep.subr.mxu0 %v246_v28  ;;  %791 = vmatprep.subr.mxu1 %v246_v28  ;;  %v221_v23 = vld [vmem:[%s1081_s13 + $0x150] sm:$0xff]  ;;  %v192_v24 = vld [vmem:[%s1081_s13 + $0x68] sm:$0xff]  ;;  %v191_v26 = vld [vmem:[%s1081_s13 + $0x60] sm:$0xff] }
  0x29   : > { %348 = vmatpush1.msra.mxu0 %v245_v29  ;;  %823 = vmatpush1.msra.mxu1 %v245_v29  ;;  %v224_v25 = vld [vmem:[%s1081_s13 + $0x168] sm:$0xff]  ;;  %v223_v27 = vld [vmem:[%s1081_s13 + $0x160] sm:$0xff]  ;;  %v194_v28 = vld [vmem:[%s1081_s13 + $0x78] sm:$0xff] }
  0x2a   : > { %349 = vmatprep.subr.mxu0 %v244_v30  ;;  %792 = vmatprep.subr.mxu1 %v244_v30  ;;  %v226_v29 = vld [vmem:[%s1081_s13 + $0x178] sm:$0xff]  ;;  %v193_v30 = vld [vmem:[%s1081_s13 + $0x70] sm:$0xff] }
  0x2b   : > { %350 = vmatpush1.msra.mxu0 %v243_v31  ;;  %824 = vmatpush1.msra.mxu1 %v243_v31  ;;  %v225_v31 = vld [vmem:[%s1081_s13 + $0x170] sm:$0xff] }
  0x2c   : > { %351 = vmatprep.subr.mxu0 %v306_v32  ;;  %793 = vmatprep.subr.mxu1 %v306_v32  ;;  %v196_v32 = vld [vmem:[%s1081_s13 + $0x88] sm:$0xff] }
  0x2d   : > { %352 = vmatpush2.msra.mxu0 %v305_v33  ;;  %825 = vmatpush2.msra.mxu1 %v305_v33  ;;  %v228_v33 = vld [vmem:[%s1081_s13 + $0x188] sm:$0xff] }
  0x2e   : > { %353 = vmatprep.subr.mxu0 %v304_v34  ;;  %794 = vmatprep.subr.mxu1 %v304_v34  ;;  %v195_v34 = vld [vmem:[%s1081_s13 + $0x80] sm:$0xff] }
  0x2f   : > { %354 = vmatpush2.msra.mxu0 %v303_v35  ;;  %826 = vmatpush2.msra.mxu1 %v303_v35  ;;  %v227_v35 = vld [vmem:[%s1081_s13 + $0x180] sm:$0xff] }
  0x30   : > { %355 = vmatprep.subr.mxu0 %v302_v36  ;;  %795 = vmatprep.subr.mxu1 %v302_v36  ;;  %v198_v36 = vld [vmem:[%s1081_s13 + $0x98] sm:$0xff] }
  0x31   : > { %356 = vmatpush2.msra.mxu0 %v301_v37  ;;  %827 = vmatpush2.msra.mxu1 %v301_v37  ;;  %v230_v37 = vld [vmem:[%s1081_s13 + $0x198] sm:$0xff] }
  0x32   : > { %357 = vmatprep.subr.mxu0 %v300_v38  ;;  %796 = vmatprep.subr.mxu1 %v300_v38  ;;  %v197_v38 = vld [vmem:[%s1081_s13 + $0x90] sm:$0xff] }
  0x33   : > { %358 = vmatpush2.msra.mxu0 %v299_v39  ;;  %828 = vmatpush2.msra.mxu1 %v299_v39  ;;  %v229_v39 = vld [vmem:[%s1081_s13 + $0x190] sm:$0xff] }
  0x34   : > { %359 = vmatprep.subr.mxu0 %v298_v40  ;;  %797 = vmatprep.subr.mxu1 %v298_v40  ;;  %v200_v40 = vld [vmem:[%s1081_s13 + $0xa8] sm:$0xff] }
  0x35   : > { %360 = vmatpush2.msra.mxu0 %v297_v41  ;;  %829 = vmatpush2.msra.mxu1 %v297_v41  ;;  %v232_v41 = vld [vmem:[%s1081_s13 + $0x1a8] sm:$0xff] }
  0x36   : > { %361 = vmatprep.subr.mxu0 %v296_v42  ;;  %798 = vmatprep.subr.mxu1 %v296_v42  ;;  %v199_v42 = vld [vmem:[%s1081_s13 + $0xa0] sm:$0xff] }
  0x37   : > { %362 = vmatpush2.msra.mxu0 %v295_v43  ;;  %830 = vmatpush2.msra.mxu1 %v295_v43  ;;  %v231_v43 = vld [vmem:[%s1081_s13 + $0x1a0] sm:$0xff] }
  0x38   : > { %363 = vmatprep.subr.mxu0 %v294_v44  ;;  %799 = vmatprep.subr.mxu1 %v294_v44  ;;  %v202_v44 = vld [vmem:[%s1081_s13 + $0xb8] sm:$0xff] }
  0x39   : > { %364 = vmatpush2.msra.mxu0 %v293_v45  ;;  %831 = vmatpush2.msra.mxu1 %v293_v45  ;;  %v234_v45 = vld [vmem:[%s1081_s13 + $0x1b8] sm:$0xff] }
  0x3a   : > { %365 = vmatprep.subr.mxu0 %v292_v46  ;;  %800 = vmatprep.subr.mxu1 %v292_v46  ;;  %v201_v46 = vld [vmem:[%s1081_s13 + $0xb0] sm:$0xff] }
  0x3b   : > { %366 = vmatpush2.msra.mxu0 %v291_v47  ;;  %832 = vmatpush2.msra.mxu1 %v291_v47  ;;  %v233_v47 = vld [vmem:[%s1081_s13 + $0x1b0] sm:$0xff] }
  0x3c   : > { %367 = vmatprep.subr.mxu0 %v290_v48  ;;  %801 = vmatprep.subr.mxu1 %v290_v48  ;;  %v204_v48 = vld [vmem:[%s1081_s13 + $0xc8] sm:$0xff] }
  0x3d   : > { %368 = vmatpush2.msra.mxu0 %v289_v49  ;;  %833 = vmatpush2.msra.mxu1 %v289_v49  ;;  %v236_v49 = vld [vmem:[%s1081_s13 + $0x1c8] sm:$0xff] }
  0x3e   : > { %369 = vmatprep.subr.mxu0 %v288_v50  ;;  %802 = vmatprep.subr.mxu1 %v288_v50  ;;  %v203_v50 = vld [vmem:[%s1081_s13 + $0xc0] sm:$0xff] }
  0x3f   : > { %370 = vmatpush2.msra.mxu0 %v287_v51  ;;  %834 = vmatpush2.msra.mxu1 %v287_v51  ;;  %v235_v51 = vld [vmem:[%s1081_s13 + $0x1c0] sm:$0xff] }
  0x40   : > { %371 = vmatprep.subr.mxu0 %v286_v52  ;;  %803 = vmatprep.subr.mxu1 %v286_v52  ;;  %v206_v52 = vld [vmem:[%s1081_s13 + $0xd8] sm:$0xff] }
  0x41   : > { %372 = vmatpush2.msra.mxu0 %v285_v53  ;;  %835 = vmatpush2.msra.mxu1 %v285_v53  ;;  %v238_v53 = vld [vmem:[%s1081_s13 + $0x1d8] sm:$0xff] }
  0x42   : > { %373 = vmatprep.subr.mxu0 %v284_v54  ;;  %804 = vmatprep.subr.mxu1 %v284_v54  ;;  %v205_v54 = vld [vmem:[%s1081_s13 + $0xd0] sm:$0xff] }
  0x43   : > { %374 = vmatpush2.msra.mxu0 %v283_v55  ;;  %836 = vmatpush2.msra.mxu1 %v283_v55  ;;  %v237_v55 = vld [vmem:[%s1081_s13 + $0x1d0] sm:$0xff] }
  0x44   : > { %375 = vmatprep.subr.mxu0 %v282_v56  ;;  %805 = vmatprep.subr.mxu1 %v282_v56  ;;  %v208_v56 = vld [vmem:[%s1081_s13 + $0xe8] sm:$0xff] }
  0x45   : > { %376 = vmatpush2.msra.mxu0 %v281_v57  ;;  %837 = vmatpush2.msra.mxu1 %v281_v57  ;;  %v240_v57 = vld [vmem:[%s1081_s13 + $0x1e8] sm:$0xff] }
  0x46   : > { %377 = vmatprep.subr.mxu0 %v280_v58  ;;  %806 = vmatprep.subr.mxu1 %v280_v58  ;;  %v207_v58 = vld [vmem:[%s1081_s13 + $0xe0] sm:$0xff] }
  0x47   : > { %378 = vmatpush2.msra.mxu0 %v279_v59  ;;  %838 = vmatpush2.msra.mxu1 %v279_v59  ;;  %v239_v59 = vld [vmem:[%s1081_s13 + $0x1e0] sm:$0xff] }
  0x48   : > { %379 = vmatprep.subr.mxu0 %v278_v60  ;;  %807 = vmatprep.subr.mxu1 %v278_v60  ;;  %v210_v60 = vld [vmem:[%s1081_s13 + $0xf8] sm:$0xff] }
  0x49   : > { %380 = vmatpush2.msra.mxu0 %v277_v61  ;;  %839 = vmatpush2.msra.mxu1 %v277_v61  ;;  %v242_v61 = vld [vmem:[%s1081_s13 + $0x1f8] sm:$0xff] }
  0x4a   : > { %381 = vmatprep.subr.mxu0 %v276_v62  ;;  %808 = vmatprep.subr.mxu1 %v276_v62  ;;  %v209_v62 = vld [vmem:[%s1081_s13 + $0xf0] sm:$0xff] }
  0x4b   : > { %382 = vmatpush2.msra.mxu0 %v275_v63  ;;  %840 = vmatpush2.msra.mxu1 %v275_v63  ;;  %v241_v63 = vld [vmem:[%s1081_s13 + $0x1f0] sm:$0xff] }
  0x4c   : > { %383 = vmatprep.mubr.f32.mxu0 %v180_v0  ;;  %479 = vmatprep.mubr.f32.mxu1 %v212_v1  ;;  %v309_v0 = vlaneseq }
  0x4d   : > { %384 = vmatmul.mubr.f32.vlgmr.msra.gmra.mxu0 %v179_v2  ;;  %480 = vmatmul.mubr.f32.vlgmr.msra.gmra.mxu1 %v211_v3  ;;  %v307_v3 = vld [vmem:[%s1300_s2] sm:$0x3] }
  0x4e   : > { %389 = vmatprep.mubr.f32.mxu0 %v182_v4  ;;  %485 = vmatprep.mubr.f32.mxu1 %v214_v5  ;;  %v310_v1 = vshrl.u32 %v309_v0, 7 }
  0x50   : > { %v311_v2 = vsub.s32 0, %v310_v1  ;;  %v315_v4 = vsub.s32 1, %v310_v1 }
  0x51   : > { %390 = vmatmul.mubr.f32.gmra.mxu0 %v181_v6  ;;  %486 = vmatmul.mubr.f32.gmra.mxu1 %v213_v7 }
  0x52   : > { %395 = vmatprep.mubr.f32.mxu0 %v184_v8  ;;  %491 = vmatprep.mubr.f32.mxu1 %v216_v9  ;;  %v1156_v5 = vrot.slane %v307_v3, %v311_v2  ;;  %v1158_v6 = vrot.slane %v307_v3, %v315_v4 }
  0x55   : > { %396 = vmatmul.mubr.f32.gmra.mxu0 %v183_v10  ;;  %492 = vmatmul.mubr.f32.gmra.mxu1 %v215_v11 }
  0x56   : > { %401 = vmatprep.mubr.f32.mxu0 %v186_v12  ;;  %497 = vmatprep.mubr.f32.mxu1 %v218_v13 }
  0x59   : > { %402 = vmatmul.mubr.f32.gmra.mxu0 %v185_v14  ;;  %498 = vmatmul.mubr.f32.gmra.mxu1 %v217_v15 }
  0x5a   : > { %407 = vmatprep.mubr.f32.mxu0 %v188_v16  ;;  %503 = vmatprep.mubr.f32.mxu1 %v220_v17 }
  0x5d   : > { %408 = vmatmul.mubr.f32.gmra.mxu0 %v187_v18  ;;  %504 = vmatmul.mubr.f32.gmra.mxu1 %v219_v19 }
  0x5e   : > { %413 = vmatprep.mubr.f32.mxu0 %v190_v20  ;;  %509 = vmatprep.mubr.f32.mxu1 %v222_v21 }
  0x61   : > { %414 = vmatmul.mubr.f32.gmra.mxu0 %v189_v22  ;;  %510 = vmatmul.mubr.f32.gmra.mxu1 %v221_v23 }
  0x62   : > { %419 = vmatprep.mubr.f32.mxu0 %v192_v24  ;;  %515 = vmatprep.mubr.f32.mxu1 %v224_v25 }
  0x65   : > { %420 = vmatmul.mubr.f32.gmra.mxu0 %v191_v26  ;;  %516 = vmatmul.mubr.f32.gmra.mxu1 %v223_v27 }
  0x66   : > { %425 = vmatprep.mubr.f32.mxu0 %v194_v28  ;;  %521 = vmatprep.mubr.f32.mxu1 %v226_v29 }
  0x69   : > { %426 = vmatmul.mubr.f32.gmra.mxu0 %v193_v30  ;;  %522 = vmatmul.mubr.f32.gmra.mxu1 %v225_v31 }
  0x6a   : > { %431 = vmatprep.mubr.f32.mxu0 %v196_v32  ;;  %527 = vmatprep.mubr.f32.mxu1 %v228_v33 }
  0x6d   : > { %432 = vmatmul.mubr.f32.gmra.mxu0 %v195_v34  ;;  %528 = vmatmul.mubr.f32.gmra.mxu1 %v227_v35 }
  0x6e   : > { %437 = vmatprep.mubr.f32.mxu0 %v198_v36  ;;  %533 = vmatprep.mubr.f32.mxu1 %v230_v37 }
  0x71   : > { %438 = vmatmul.mubr.f32.gmra.mxu0 %v197_v38  ;;  %534 = vmatmul.mubr.f32.gmra.mxu1 %v229_v39 }
  0x72   : > { %443 = vmatprep.mubr.f32.mxu0 %v200_v40  ;;  %539 = vmatprep.mubr.f32.mxu1 %v232_v41 }
  0x75   : > { %444 = vmatmul.mubr.f32.gmra.mxu0 %v199_v42  ;;  %540 = vmatmul.mubr.f32.gmra.mxu1 %v231_v43 }
  0x76   : > { %449 = vmatprep.mubr.f32.mxu0 %v202_v44  ;;  %545 = vmatprep.mubr.f32.mxu1 %v234_v45 }
  0x79   : > { %450 = vmatmul.mubr.f32.gmra.mxu0 %v201_v46  ;;  %546 = vmatmul.mubr.f32.gmra.mxu1 %v233_v47 }
  0x7a   : > { %455 = vmatprep.mubr.f32.mxu0 %v204_v48  ;;  %551 = vmatprep.mubr.f32.mxu1 %v236_v49 }
  0x7d   : > { %456 = vmatmul.mubr.f32.gmra.mxu0 %v203_v50  ;;  %552 = vmatmul.mubr.f32.gmra.mxu1 %v235_v51 }
  0x7e   : > { %461 = vmatprep.mubr.f32.mxu0 %v206_v52  ;;  %557 = vmatprep.mubr.f32.mxu1 %v238_v53 }
  0x81   : > { %462 = vmatmul.mubr.f32.gmra.mxu0 %v205_v54  ;;  %558 = vmatmul.mubr.f32.gmra.mxu1 %v237_v55 }
  0x82   : > { %467 = vmatprep.mubr.f32.mxu0 %v208_v56  ;;  %563 = vmatprep.mubr.f32.mxu1 %v240_v57 }
  0x85   : > { %468 = vmatmul.mubr.f32.gmra.mxu0 %v207_v58  ;;  %564 = vmatmul.mubr.f32.gmra.mxu1 %v239_v59 }
  0x86   : > { %473 = vmatprep.mubr.f32.mxu0 %v210_v60  ;;  %569 = vmatprep.mubr.f32.mxu1 %v242_v61 }
  0x89   : > { %474 = vmatmul.mubr.f32.gmra.mxu0 %v209_v62  ;;  %570 = vmatmul.mubr.f32.gmra.mxu1 %v241_v63 }
 0x10d   : > { %v385_v7 = vpop.f32.mrf.mxu0  ;;  %v481_v8 = vpop.f32.mrf.mxu1 }
 0x10e   : > { %v386_v9 = vadd.f32 %v385_v7, %v1156_v5  ;;  %v482_v10 = vadd.f32 %v481_v8, %v1156_v5 }
 0x10f   : > { %v387_v11 = vpop.f32.mrf.mxu0  ;;  %v483_v12 = vpop.f32.mrf.mxu1 }
 0x110   : > { %v576_v13 = vmax.f32 %v386_v9, 0.0  ;;  %v608_v14 = vmax.f32 %v482_v10, 0.0  ;;  %v388_v15 = vadd.f32 %v387_v11, %v1158_v6  ;;  %v484_v16 = vadd.f32 %v483_v12, %v1158_v6 }
 0x111   : > { %v391_v17 = vpop.f32.mrf.mxu0  ;;  %v487_v18 = vpop.f32.mrf.mxu1 }
 0x112   : > { %640 = vst [vmem:[%s1167_s25] sm:$0xff] %v576_v13  ;;  %672 = vst [vmem:[%s1167_s25 + $0x100] sm:$0xff] %v608_v14  ;;  %v577_v19 = vmax.f32 %v388_v15, 0.0  ;;  %v609_v20 = vmax.f32 %v484_v16, 0.0  ;;  %v392_v21 = vadd.f32 %v391_v17, %v1156_v5  ;;  %v488_v22 = vadd.f32 %v487_v18, %v1156_v5 }
 0x113   : > { %v393_v23 = vpop.f32.mrf.mxu0  ;;  %v489_v24 = vpop.f32.mrf.mxu1 }
 0x114   : > { %641 = vst [vmem:[%s1167_s25 + $0x8] sm:$0xff] %v577_v19  ;;  %673 = vst [vmem:[%s1167_s25 + $0x108] sm:$0xff] %v609_v20  ;;  %v578_v25 = vmax.f32 %v392_v21, 0.0  ;;  %v610_v26 = vmax.f32 %v488_v22, 0.0  ;;  %v394_v27 = vadd.f32 %v393_v23, %v1158_v6  ;;  %v490_v28 = vadd.f32 %v489_v24, %v1158_v6 }
 0x115   : > { %v397_v29 = vpop.f32.mrf.mxu0  ;;  %v493_v30 = vpop.f32.mrf.mxu1 }
 0x116   : > { %642 = vst [vmem:[%s1167_s25 + $0x10] sm:$0xff] %v578_v25  ;;  %674 = vst [vmem:[%s1167_s25 + $0x110] sm:$0xff] %v610_v26  ;;  %v579_v31 = vmax.f32 %v394_v27, 0.0  ;;  %v611_v32 = vmax.f32 %v490_v28, 0.0  ;;  %v398_v33 = vadd.f32 %v397_v29, %v1156_v5  ;;  %v494_v34 = vadd.f32 %v493_v30, %v1156_v5 }
 0x117   : > { %v399_v35 = vpop.f32.mrf.mxu0  ;;  %v495_v36 = vpop.f32.mrf.mxu1 }
 0x118   : > { %643 = vst [vmem:[%s1167_s25 + $0x18] sm:$0xff] %v579_v31  ;;  %675 = vst [vmem:[%s1167_s25 + $0x118] sm:$0xff] %v611_v32  ;;  %v580_v37 = vmax.f32 %v398_v33, 0.0  ;;  %v612_v38 = vmax.f32 %v494_v34, 0.0  ;;  %v400_v39 = vadd.f32 %v399_v35, %v1158_v6  ;;  %v496_v40 = vadd.f32 %v495_v36, %v1158_v6 }
 0x119   : > { %v403_v41 = vpop.f32.mrf.mxu0  ;;  %v499_v42 = vpop.f32.mrf.mxu1 }
 0x11a   : > { %644 = vst [vmem:[%s1167_s25 + $0x20] sm:$0xff] %v580_v37  ;;  %676 = vst [vmem:[%s1167_s25 + $0x120] sm:$0xff] %v612_v38  ;;  %v581_v43 = vmax.f32 %v400_v39, 0.0  ;;  %v613_v44 = vmax.f32 %v496_v40, 0.0  ;;  %v404_v45 = vadd.f32 %v403_v41, %v1156_v5  ;;  %v500_v46 = vadd.f32 %v499_v42, %v1156_v5 }
 0x11b   : > { %v405_v47 = vpop.f32.mrf.mxu0  ;;  %v501_v48 = vpop.f32.mrf.mxu1 }
 0x11c   : > { %645 = vst [vmem:[%s1167_s25 + $0x28] sm:$0xff] %v581_v43  ;;  %677 = vst [vmem:[%s1167_s25 + $0x128] sm:$0xff] %v613_v44  ;;  %v582_v49 = vmax.f32 %v404_v45, 0.0  ;;  %v614_v50 = vmax.f32 %v500_v46, 0.0  ;;  %v406_v51 = vadd.f32 %v405_v47, %v1158_v6  ;;  %v502_v52 = vadd.f32 %v501_v48, %v1158_v6 }
 0x11d   : > { %v409_v53 = vpop.f32.mrf.mxu0  ;;  %v505_v54 = vpop.f32.mrf.mxu1 }
 0x11e   : > { %646 = vst [vmem:[%s1167_s25 + $0x30] sm:$0xff] %v582_v49  ;;  %678 = vst [vmem:[%s1167_s25 + $0x130] sm:$0xff] %v614_v50  ;;  %v583_v55 = vmax.f32 %v406_v51, 0.0  ;;  %v615_v56 = vmax.f32 %v502_v52, 0.0  ;;  %v410_v57 = vadd.f32 %v409_v53, %v1156_v5  ;;  %v506_v58 = vadd.f32 %v505_v54, %v1156_v5 }
 0x11f   : > { %v411_v59 = vpop.f32.mrf.mxu0  ;;  %v507_v60 = vpop.f32.mrf.mxu1 }
 0x120   : > { %647 = vst [vmem:[%s1167_s25 + $0x38] sm:$0xff] %v583_v55  ;;  %679 = vst [vmem:[%s1167_s25 + $0x138] sm:$0xff] %v615_v56  ;;  %v584_v61 = vmax.f32 %v410_v57, 0.0  ;;  %v616_v62 = vmax.f32 %v506_v58, 0.0  ;;  %v412_v63 = vadd.f32 %v411_v59, %v1158_v6  ;;  %v508_v0 = vadd.f32 %v507_v60, %v1158_v6 }
 0x121   : > { %v415_v1 = vpop.f32.mrf.mxu0  ;;  %v511_v2 = vpop.f32.mrf.mxu1 }
 0x122   : > { %648 = vst [vmem:[%s1167_s25 + $0x40] sm:$0xff] %v584_v61  ;;  %680 = vst [vmem:[%s1167_s25 + $0x140] sm:$0xff] %v616_v62  ;;  %v585_v3 = vmax.f32 %v412_v63, 0.0  ;;  %v617_v4 = vmax.f32 %v508_v0, 0.0  ;;  %v416_v7 = vadd.f32 %v415_v1, %v1156_v5  ;;  %v512_v8 = vadd.f32 %v511_v2, %v1156_v5 }
 0x123   : > { %v417_v9 = vpop.f32.mrf.mxu0  ;;  %v513_v10 = vpop.f32.mrf.mxu1 }
 0x124   : > { %649 = vst [vmem:[%s1167_s25 + $0x48] sm:$0xff] %v585_v3  ;;  %681 = vst [vmem:[%s1167_s25 + $0x148] sm:$0xff] %v617_v4  ;;  %v586_v11 = vmax.f32 %v416_v7, 0.0  ;;  %v618_v12 = vmax.f32 %v512_v8, 0.0  ;;  %v418_v13 = vadd.f32 %v417_v9, %v1158_v6  ;;  %v514_v14 = vadd.f32 %v513_v10, %v1158_v6 }
 0x125   : > { %v421_v15 = vpop.f32.mrf.mxu0  ;;  %v517_v16 = vpop.f32.mrf.mxu1 }
 0x126   : > { %650 = vst [vmem:[%s1167_s25 + $0x50] sm:$0xff] %v586_v11  ;;  %682 = vst [vmem:[%s1167_s25 + $0x150] sm:$0xff] %v618_v12  ;;  %v587_v17 = vmax.f32 %v418_v13, 0.0  ;;  %v619_v18 = vmax.f32 %v514_v14, 0.0  ;;  %v422_v19 = vadd.f32 %v421_v15, %v1156_v5  ;;  %v518_v20 = vadd.f32 %v517_v16, %v1156_v5 }
 0x127   : > { %v423_v21 = vpop.f32.mrf.mxu0  ;;  %v519_v22 = vpop.f32.mrf.mxu1 }
 0x128   : > { %651 = vst [vmem:[%s1167_s25 + $0x58] sm:$0xff] %v587_v17  ;;  %683 = vst [vmem:[%s1167_s25 + $0x158] sm:$0xff] %v619_v18  ;;  %v588_v23 = vmax.f32 %v422_v19, 0.0  ;;  %v620_v24 = vmax.f32 %v518_v20, 0.0  ;;  %v424_v25 = vadd.f32 %v423_v21, %v1158_v6  ;;  %v520_v26 = vadd.f32 %v519_v22, %v1158_v6 }
 0x129   : > { %v427_v27 = vpop.f32.mrf.mxu0  ;;  %v523_v28 = vpop.f32.mrf.mxu1 }
 0x12a   : > { %652 = vst [vmem:[%s1167_s25 + $0x60] sm:$0xff] %v588_v23  ;;  %684 = vst [vmem:[%s1167_s25 + $0x160] sm:$0xff] %v620_v24  ;;  %v589_v29 = vmax.f32 %v424_v25, 0.0  ;;  %v621_v30 = vmax.f32 %v520_v26, 0.0  ;;  %v428_v31 = vadd.f32 %v427_v27, %v1156_v5  ;;  %v524_v32 = vadd.f32 %v523_v28, %v1156_v5 }
 0x12b   : > { %v429_v33 = vpop.f32.mrf.mxu0  ;;  %v525_v34 = vpop.f32.mrf.mxu1 }
 0x12c   : > { %653 = vst [vmem:[%s1167_s25 + $0x68] sm:$0xff] %v589_v29  ;;  %685 = vst [vmem:[%s1167_s25 + $0x168] sm:$0xff] %v621_v30  ;;  %v590_v35 = vmax.f32 %v428_v31, 0.0  ;;  %v622_v36 = vmax.f32 %v524_v32, 0.0  ;;  %v430_v37 = vadd.f32 %v429_v33, %v1158_v6  ;;  %v526_v38 = vadd.f32 %v525_v34, %v1158_v6 }
 0x12d   : > { %v433_v39 = vpop.f32.mrf.mxu0  ;;  %v529_v40 = vpop.f32.mrf.mxu1 }
 0x12e   : > { %654 = vst [vmem:[%s1167_s25 + $0x70] sm:$0xff] %v590_v35  ;;  %686 = vst [vmem:[%s1167_s25 + $0x170] sm:$0xff] %v622_v36  ;;  %v591_v41 = vmax.f32 %v430_v37, 0.0  ;;  %v623_v42 = vmax.f32 %v526_v38, 0.0  ;;  %v434_v43 = vadd.f32 %v433_v39, %v1156_v5  ;;  %v530_v44 = vadd.f32 %v529_v40, %v1156_v5 }
 0x12f   : > { %v435_v45 = vpop.f32.mrf.mxu0  ;;  %v531_v46 = vpop.f32.mrf.mxu1 }
 0x130   : > { %655 = vst [vmem:[%s1167_s25 + $0x78] sm:$0xff] %v591_v41  ;;  %687 = vst [vmem:[%s1167_s25 + $0x178] sm:$0xff] %v623_v42  ;;  %v592_v47 = vmax.f32 %v434_v43, 0.0  ;;  %v624_v48 = vmax.f32 %v530_v44, 0.0  ;;  %v436_v49 = vadd.f32 %v435_v45, %v1158_v6  ;;  %v532_v50 = vadd.f32 %v531_v46, %v1158_v6 }
 0x131   : > { %v439_v51 = vpop.f32.mrf.mxu0  ;;  %v535_v52 = vpop.f32.mrf.mxu1 }
 0x132   : > { %656 = vst [vmem:[%s1167_s25 + $0x80] sm:$0xff] %v592_v47  ;;  %688 = vst [vmem:[%s1167_s25 + $0x180] sm:$0xff] %v624_v48  ;;  %v593_v53 = vmax.f32 %v436_v49, 0.0  ;;  %v625_v54 = vmax.f32 %v532_v50, 0.0  ;;  %v440_v55 = vadd.f32 %v439_v51, %v1156_v5  ;;  %v536_v56 = vadd.f32 %v535_v52, %v1156_v5 }
 0x133   : > { %v441_v57 = vpop.f32.mrf.mxu0  ;;  %v537_v58 = vpop.f32.mrf.mxu1 }
 0x134   : > { %657 = vst [vmem:[%s1167_s25 + $0x88] sm:$0xff] %v593_v53  ;;  %689 = vst [vmem:[%s1167_s25 + $0x188] sm:$0xff] %v625_v54  ;;  %v594_v59 = vmax.f32 %v440_v55, 0.0  ;;  %v626_v60 = vmax.f32 %v536_v56, 0.0  ;;  %v442_v61 = vadd.f32 %v441_v57, %v1158_v6  ;;  %v538_v62 = vadd.f32 %v537_v58, %v1158_v6 }
 0x135   : > { %v445_v63 = vpop.f32.mrf.mxu0  ;;  %v541_v0 = vpop.f32.mrf.mxu1 }
 0x136   : > { %658 = vst [vmem:[%s1167_s25 + $0x90] sm:$0xff] %v594_v59  ;;  %690 = vst [vmem:[%s1167_s25 + $0x190] sm:$0xff] %v626_v60  ;;  %v595_v1 = vmax.f32 %v442_v61, 0.0  ;;  %v627_v2 = vmax.f32 %v538_v62, 0.0  ;;  %v446_v3 = vadd.f32 %v445_v63, %v1156_v5  ;;  %v542_v4 = vadd.f32 %v541_v0, %v1156_v5 }
 0x137   : > { %v447_v7 = vpop.f32.mrf.mxu0  ;;  %v543_v8 = vpop.f32.mrf.mxu1 }
 0x138   : > { %659 = vst [vmem:[%s1167_s25 + $0x98] sm:$0xff] %v595_v1  ;;  %691 = vst [vmem:[%s1167_s25 + $0x198] sm:$0xff] %v627_v2  ;;  %v596_v9 = vmax.f32 %v446_v3, 0.0  ;;  %v628_v10 = vmax.f32 %v542_v4, 0.0  ;;  %v448_v11 = vadd.f32 %v447_v7, %v1158_v6  ;;  %v544_v12 = vadd.f32 %v543_v8, %v1158_v6 }
 0x139   : > { %v451_v13 = vpop.f32.mrf.mxu0  ;;  %v547_v14 = vpop.f32.mrf.mxu1 }
 0x13a   : > { %660 = vst [vmem:[%s1167_s25 + $0xa0] sm:$0xff] %v596_v9  ;;  %692 = vst [vmem:[%s1167_s25 + $0x1a0] sm:$0xff] %v628_v10  ;;  %v597_v15 = vmax.f32 %v448_v11, 0.0  ;;  %v629_v16 = vmax.f32 %v544_v12, 0.0  ;;  %v452_v17 = vadd.f32 %v451_v13, %v1156_v5  ;;  %v548_v18 = vadd.f32 %v547_v14, %v1156_v5 }
 0x13b   : > { %v453_v19 = vpop.f32.mrf.mxu0  ;;  %v549_v20 = vpop.f32.mrf.mxu1 }
 0x13c   : > { %661 = vst [vmem:[%s1167_s25 + $0xa8] sm:$0xff] %v597_v15  ;;  %693 = vst [vmem:[%s1167_s25 + $0x1a8] sm:$0xff] %v629_v16  ;;  %v598_v21 = vmax.f32 %v452_v17, 0.0  ;;  %v630_v22 = vmax.f32 %v548_v18, 0.0  ;;  %v454_v23 = vadd.f32 %v453_v19, %v1158_v6  ;;  %v550_v24 = vadd.f32 %v549_v20, %v1158_v6 }
 0x13d   : > { %v457_v25 = vpop.f32.mrf.mxu0  ;;  %v553_v26 = vpop.f32.mrf.mxu1 }
 0x13e   : > { %662 = vst [vmem:[%s1167_s25 + $0xb0] sm:$0xff] %v598_v21  ;;  %694 = vst [vmem:[%s1167_s25 + $0x1b0] sm:$0xff] %v630_v22  ;;  %v599_v27 = vmax.f32 %v454_v23, 0.0  ;;  %v631_v28 = vmax.f32 %v550_v24, 0.0  ;;  %v458_v29 = vadd.f32 %v457_v25, %v1156_v5  ;;  %v554_v30 = vadd.f32 %v553_v26, %v1156_v5 }
 0x13f   : > { %v459_v31 = vpop.f32.mrf.mxu0  ;;  %v555_v32 = vpop.f32.mrf.mxu1 }
 0x140   : > { %663 = vst [vmem:[%s1167_s25 + $0xb8] sm:$0xff] %v599_v27  ;;  %695 = vst [vmem:[%s1167_s25 + $0x1b8] sm:$0xff] %v631_v28  ;;  %v600_v33 = vmax.f32 %v458_v29, 0.0  ;;  %v632_v34 = vmax.f32 %v554_v30, 0.0  ;;  %v460_v35 = vadd.f32 %v459_v31, %v1158_v6  ;;  %v556_v36 = vadd.f32 %v555_v32, %v1158_v6 }
 0x141   : > { %v463_v37 = vpop.f32.mrf.mxu0  ;;  %v559_v38 = vpop.f32.mrf.mxu1 }
 0x142   : > { %664 = vst [vmem:[%s1167_s25 + $0xc0] sm:$0xff] %v600_v33  ;;  %696 = vst [vmem:[%s1167_s25 + $0x1c0] sm:$0xff] %v632_v34  ;;  %v601_v39 = vmax.f32 %v460_v35, 0.0  ;;  %v633_v40 = vmax.f32 %v556_v36, 0.0  ;;  %v464_v41 = vadd.f32 %v463_v37, %v1156_v5  ;;  %v560_v42 = vadd.f32 %v559_v38, %v1156_v5 }
 0x143   : > { %v465_v43 = vpop.f32.mrf.mxu0  ;;  %v561_v44 = vpop.f32.mrf.mxu1 }
 0x144   : > { %665 = vst [vmem:[%s1167_s25 + $0xc8] sm:$0xff] %v601_v39  ;;  %697 = vst [vmem:[%s1167_s25 + $0x1c8] sm:$0xff] %v633_v40  ;;  %v602_v45 = vmax.f32 %v464_v41, 0.0  ;;  %v634_v46 = vmax.f32 %v560_v42, 0.0  ;;  %v466_v47 = vadd.f32 %v465_v43, %v1158_v6  ;;  %v562_v48 = vadd.f32 %v561_v44, %v1158_v6 }
 0x145   : > { %v469_v49 = vpop.f32.mrf.mxu0  ;;  %v565_v50 = vpop.f32.mrf.mxu1 }
 0x146   : > { %666 = vst [vmem:[%s1167_s25 + $0xd0] sm:$0xff] %v602_v45  ;;  %698 = vst [vmem:[%s1167_s25 + $0x1d0] sm:$0xff] %v634_v46  ;;  %v603_v51 = vmax.f32 %v466_v47, 0.0  ;;  %v635_v52 = vmax.f32 %v562_v48, 0.0  ;;  %v470_v53 = vadd.f32 %v469_v49, %v1156_v5  ;;  %v566_v54 = vadd.f32 %v565_v50, %v1156_v5 }
 0x147   : > { %v471_v55 = vpop.f32.mrf.mxu0  ;;  %v567_v56 = vpop.f32.mrf.mxu1 }
 0x148   : > { %667 = vst [vmem:[%s1167_s25 + $0xd8] sm:$0xff] %v603_v51  ;;  %699 = vst [vmem:[%s1167_s25 + $0x1d8] sm:$0xff] %v635_v52  ;;  %v604_v57 = vmax.f32 %v470_v53, 0.0  ;;  %v636_v58 = vmax.f32 %v566_v54, 0.0  ;;  %v472_v59 = vadd.f32 %v471_v55, %v1158_v6  ;;  %v568_v60 = vadd.f32 %v567_v56, %v1158_v6 }
 0x149   : > { %v475_v61 = vpop.f32.mrf.mxu0  ;;  %v571_v62 = vpop.f32.mrf.mxu1 }
 0x14a   : > { %668 = vst [vmem:[%s1167_s25 + $0xe0] sm:$0xff] %v604_v57  ;;  %700 = vst [vmem:[%s1167_s25 + $0x1e0] sm:$0xff] %v636_v58  ;;  %v605_v63 = vmax.f32 %v472_v59, 0.0  ;;  %v637_v0 = vmax.f32 %v568_v60, 0.0  ;;  %v476_v1 = vadd.f32 %v475_v61, %v1156_v5  ;;  %v572_v2 = vadd.f32 %v571_v62, %v1156_v5 }
 0x14b   : > { %v477_v3 = vpop.f32.mrf.mxu0  ;;  %v573_v4 = vpop.f32.mrf.mxu1 }
 0x14c   : > { %669 = vst [vmem:[%s1167_s25 + $0xe8] sm:$0xff] %v605_v63  ;;  %701 = vst [vmem:[%s1167_s25 + $0x1e8] sm:$0xff] %v637_v0  ;;  %v606_v7 = vmax.f32 %v476_v1, 0.0  ;;  %v638_v8 = vmax.f32 %v572_v2, 0.0  ;;  %v478_v9 = vadd.f32 %v477_v3, %v1158_v6  ;;  %v574_v10 = vadd.f32 %v573_v4, %v1158_v6 }
 0x14e   : > { %670 = vst [vmem:[%s1167_s25 + $0xf0] sm:$0xff] %v606_v7  ;;  %702 = vst [vmem:[%s1167_s25 + $0x1f0] sm:$0xff] %v638_v8  ;;  %v607_v11 = vmax.f32 %v478_v9, 0.0  ;;  %v639_v12 = vmax.f32 %v574_v10, 0.0 }
 0x150   : > { %671 = vst [vmem:[%s1167_s25 + $0xf8] sm:$0xff] %v607_v11  ;;  %703 = vst [vmem:[%s1167_s25 + $0x1f8] sm:$0xff] %v639_v12 }
 0x151 PF: > { %s13_s12 = sadd.s32 1, %s855_s12  }
 0x152   : > { %p10_p4 = scmp.ge.s32.totalorder %s13_s12, 4  }
 0x154   :  { %12 = sbr.rel (!%p10_p4) target bundleno = 1 (0x1), region = 62 }

// kernel: forward.13
= control target key start
LH: loop header
LB: loop body
LE: loop exit
PB: predicated region body
PF: predicated region fallthrough
CT: control target
= control target key end

     0   :  { %s614_s12 = smov 0   ;;  %s965_s0 = inlined_call_operand.vmem [shape: f32[2048,64], index: 0, kind: input, shape index: {}]   ;;  %s966_s1 = inlined_call_operand.vmem [shape: f32[1,64], index: 1, kind: input, shape index: {}]   ;;  %s967_s2 = inlined_call_operand.vmem [shape: f32[1,64], index: 2, kind: input, shape index: {}]   ;;  %s968_s3 = inlined_call_operand.vmem [shape: f32[2048,64], index: 3, kind: output, shape index: {}]  }
   0x1 LB: > { %s565_s13 = sadd.s32 4294967295, %s592_s12   ;;  %p569_p0 = scmp.ge.s32.totalorder %s592_s12, 1  ;;  %s592_s12 = sphi %s614_s12, %s13_s12  }
   0x2   : > { %p138_p1 = scmp.lt.s32.totalorder %s592_s12, 5 }
   0x4   : > { %p139_p2 = pnand %p569_p0, %p138_p1 }
   0x5   : > { %s570_s14 = sshll.u32 (!%p139_p2), %s565_s13, 6 }
   0x6   : > { %142 = sbr.rel (%p139_p2) target bundleno = 68 (0x44), region = 32  ;;  %p163_p3 = scmp.lt.s32.totalorder (!%p139_p2), %s570_s14, 255 }
   0xb   : > { %s970_s14 = smov (!%p163_p3, %s570_s14), 255  ;;  %v625_v0 = vld [vmem:[%s966_s1] ss:$0 sm:$0xff]  ;;  %vm444_vm0 = vcmask 523264  }
   0xc   : > { %s571_s15 = sshll.u32 %s970_s14, 3  ;;  %v635_v1 = vld [vmem:[%s967_s2] ss:$0 sm:$0xff] }
   0xd   : > { %s630_s20 = scalar_lea.vmem %s965_s0, %s571_s15  ;;  %s658_s25 = scalar_lea.vmem %s968_s3, %s571_s15 }
   0xe   : > { %v174_v2 = vld [vmem:[%s630_s20] sm:$0xff]  ;;  %v175_v3 = vld [vmem:[%s630_s20 + $0x8] sm:$0xff]  ;;  %v176_v4 = vld [vmem:[%s630_s20 + $0x10] sm:$0xff] }
   0xf   : > { %v245_v5 = vmul.f32 %v625_v0, %v174_v2  ;;  %v246_v6 = vmul.f32 %v625_v0, %v175_v3  ;;  %v247_v7 = vmul.f32 %v625_v0, %v176_v4  ;;  %v177_v8 = vld [vmem:[%s630_s20 + $0x18] sm:$0xff]  ;;  %v178_v9 = vld [vmem:[%s630_s20 + $0x20] sm:$0xff]  ;;  %v179_v10 = vld [vmem:[%s630_s20 + $0x28] sm:$0xff] }
  0x10   : > { %v248_v11 = vmul.f32 %v625_v0, %v177_v8  ;;  %v249_v12 = vmul.f32 %v625_v0, %v178_v9  ;;  %v250_v13 = vmul.f32 %v625_v0, %v179_v10  ;;  %v180_v14 = vld [vmem:[%s630_s20 + $0x30] sm:$0xff]  ;;  %v181_v15 = vld [vmem:[%s630_s20 + $0x38] sm:$0xff]  ;;  %v182_v24 = vld [vmem:[%s630_s20 + $0x40] sm:$0xff] }
  0x11   : > { %v316_v16 = vadd.f32 %v635_v1, %v245_v5  ;;  %v317_v17 = vadd.f32 %v635_v1, %v246_v6  ;;  %v318_v18 = vadd.f32 %v635_v1, %v247_v7  ;;  %v251_v19 = vmul.f32 %v625_v0, %v180_v14  ;;  %v183_v25 = vld [vmem:[%s630_s20 + $0x48] sm:$0xff]  ;;  %v184_v26 = vld [vmem:[%s630_s20 + $0x50] sm:$0xff]  ;;  %v185_v31 = vld [vmem:[%s630_s20 + $0x58] sm:$0xff] }
  0x12   : > { %v319_v20 = vadd.f32 %v635_v1, %v248_v11  ;;  %v320_v21 = vadd.f32 %v635_v1, %v249_v12  ;;  %v321_v22 = vadd.f32 %v635_v1, %v250_v13  ;;  %v252_v23 = vmul.f32 %v625_v0, %v181_v15  ;;  %v186_v32 = vld [vmem:[%s630_s20 + $0x60] sm:$0xff]  ;;  %v187_v33 = vld [vmem:[%s630_s20 + $0x68] sm:$0xff]  ;;  %v188_v38 = vld [vmem:[%s630_s20 + $0x70] sm:$0xff] }
  0x13   : > { %v380_v27 = vmax.f32 %v316_v16, 0.0  ;;  %v381_v28 = vmax.f32 %v317_v17, 0.0  ;;  %v382_v29 = vmax.f32 %v318_v18, 0.0  ;;  %v322_v30 = vadd.f32 %v635_v1, %v251_v19  ;;  %v189_v43 = vld [vmem:[%s630_s20 + $0x78] sm:$0xff]  ;;  %v190_v56 = vld [vmem:[%s630_s20 + $0x80] sm:$0xff]  ;;  %v191_v57 = vld [vmem:[%s630_s20 + $0x88] sm:$0xff] }
  0x14   : > { %v383_v34 = vmax.f32 %v319_v20, 0.0  ;;  %v384_v35 = vmax.f32 %v320_v21, 0.0  ;;  %v385_v36 = vmax.f32 %v321_v22, 0.0  ;;  %v323_v37 = vadd.f32 %v635_v1, %v252_v23  ;;  %v192_v58 = vld [vmem:[%s630_s20 + $0x90] sm:$0xff]  ;;  %v193_v63 = vld [vmem:[%s630_s20 + $0x98] sm:$0xff]  ;;  %v194_v2 = vld [vmem:[%s630_s20 + $0xa0] sm:$0xff] }
  0x15   : > { %445 = vst.msk [vmem:[%s658_s25] sm:$0xff] %vm444_vm0, %v380_v27  ;;  %446 = vst.msk [vmem:[%s658_s25 + $0x8] sm:$0xff] %vm444_vm0, %v381_v28  ;;  %v386_v39 = vmax.f32 %v322_v30, 0.0  ;;  %v253_v40 = vmul.f32 %v625_v0, %v182_v24  ;;  %v254_v41 = vmul.f32 %v625_v0, %v183_v25  ;;  %v255_v42 = vmul.f32 %v625_v0, %v184_v26  ;;  %v195_v3 = vld [vmem:[%s630_s20 + $0xa8] sm:$0xff]  ;;  %v196_v8 = vld [vmem:[%s630_s20 + $0xb0] sm:$0xff] }
  0x16   : > { %447 = vst.msk [vmem:[%s658_s25 + $0x10] sm:$0xff] %vm444_vm0, %v382_v29  ;;  %448 = vst.msk [vmem:[%s658_s25 + $0x18] sm:$0xff] %vm444_vm0, %v383_v34  ;;  %v387_v44 = vmax.f32 %v323_v37, 0.0  ;;  %v256_v45 = vmul.f32 %v625_v0, %v185_v31  ;;  %v257_v46 = vmul.f32 %v625_v0, %v186_v32  ;;  %v258_v47 = vmul.f32 %v625_v0, %v187_v33  ;;  %v197_v13 = vld [vmem:[%s630_s20 + $0xb8] sm:$0xff]  ;;  %v198_v26 = vld [vmem:[%s630_s20 + $0xc0] sm:$0xff] }
  0x17   : > { %449 = vst.msk [vmem:[%s658_s25 + $0x20] sm:$0xff] %vm444_vm0, %v384_v35  ;;  %450 = vst.msk [vmem:[%s658_s25 + $0x28] sm:$0xff] %vm444_vm0, %v385_v36  ;;  %v324_v48 = vadd.f32 %v635_v1, %v253_v40  ;;  %v325_v49 = vadd.f32 %v635_v1, %v254_v41  ;;  %v326_v50 = vadd.f32 %v635_v1, %v255_v42  ;;  %v199_v27 = vld [vmem:[%s630_s20 + $0xc8] sm:$0xff]  ;;  %v200_v28 = vld [vmem:[%s630_s20 + $0xd0] sm:$0xff] }
  0x18   : > { %451 = vst.msk [vmem:[%s658_s25 + $0x30] sm:$0xff] %vm444_vm0, %v386_v39  ;;  %v259_v51 = vmul.f32 %v625_v0, %v188_v38  ;;  %452 = vst.msk [vmem:[%s658_s25 + $0x38] sm:$0xff] %vm444_vm0, %v387_v44  ;;  %v327_v52 = vadd.f32 %v635_v1, %v256_v45  ;;  %v328_v53 = vadd.f32 %v635_v1, %v257_v46  ;;  %v201_v33 = vld [vmem:[%s630_s20 + $0xd8] sm:$0xff]  ;;  %v202_v34 = vld [vmem:[%s630_s20 + $0xe0] sm:$0xff] }
  0x19   : > { %v329_v54 = vadd.f32 %v635_v1, %v258_v47  ;;  %v260_v55 = vmul.f32 %v625_v0, %v189_v43  ;;  %v388_v59 = vmax.f32 %v324_v48, 0.0  ;;  %v389_v60 = vmax.f32 %v325_v49, 0.0  ;;  %v203_v35 = vld [vmem:[%s630_s20 + $0xe8] sm:$0xff]  ;;  %v204_v40 = vld [vmem:[%s630_s20 + $0xf0] sm:$0xff]  ;;  %v205_v45 = vld [vmem:[%s630_s20 + $0xf8] sm:$0xff] }
  0x1a   : > { %v390_v61 = vmax.f32 %v326_v50, 0.0  ;;  %v330_v62 = vadd.f32 %v635_v1, %v259_v51  ;;  %v391_v4 = vmax.f32 %v327_v52, 0.0  ;;  %v392_v5 = vmax.f32 %v328_v53, 0.0 }
  0x1b   : > { %v393_v6 = vmax.f32 %v329_v54, 0.0  ;;  %v331_v7 = vadd.f32 %v635_v1, %v260_v55  ;;  %453 = vst.msk [vmem:[%s658_s25 + $0x40] sm:$0xff] %vm444_vm0, %v388_v59  ;;  %454 = vst.msk [vmem:[%s658_s25 + $0x48] sm:$0xff] %vm444_vm0, %v389_v60  ;;  %v261_v10 = vmul.f32 %v625_v0, %v190_v56  ;;  %v262_v11 = vmul.f32 %v625_v0, %v191_v57  ;;  %v207_v59 = vld [vmem:[%s630_s20 + $0x108] sm:$0xff]  ;;  %v208_v60 = vld [vmem:[%s630_s20 + $0x110] sm:$0xff] }
  0x1c   : > { %455 = vst.msk [vmem:[%s658_s25 + $0x50] sm:$0xff] %vm444_vm0, %v390_v61  ;;  %v394_v9 = vmax.f32 %v330_v62, 0.0  ;;  %v263_v12 = vmul.f32 %v625_v0, %v192_v58  ;;  %456 = vst.msk [vmem:[%s658_s25 + $0x58] sm:$0xff] %vm444_vm0, %v391_v4  ;;  %v264_v15 = vmul.f32 %v625_v0, %v193_v63  ;;  %v265_v16 = vmul.f32 %v625_v0, %v194_v2  ;;  %v206_v58 = vld [vmem:[%s630_s20 + $0x100] sm:$0xff] }
  0x1d   : > { %457 = vst.msk [vmem:[%s658_s25 + $0x60] sm:$0xff] %vm444_vm0, %v392_v5  ;;  %458 = vst.msk [vmem:[%s658_s25 + $0x68] sm:$0xff] %vm444_vm0, %v393_v6  ;;  %v395_v14 = vmax.f32 %v331_v7, 0.0  ;;  %v266_v17 = vmul.f32 %v625_v0, %v195_v3  ;;  %v332_v18 = vadd.f32 %v635_v1, %v261_v10  ;;  %v333_v19 = vadd.f32 %v635_v1, %v262_v11  ;;  %v209_v3 = vld [vmem:[%s630_s20 + $0x118] sm:$0xff]  ;;  %v210_v4 = vld [vmem:[%s630_s20 + $0x120] sm:$0xff] }
  0x1e   : > { %459 = vst.msk [vmem:[%s658_s25 + $0x70] sm:$0xff] %vm444_vm0, %v394_v9  ;;  %v334_v20 = vadd.f32 %v635_v1, %v263_v12  ;;  %v267_v21 = vmul.f32 %v625_v0, %v196_v8  ;;  %v335_v22 = vadd.f32 %v635_v1, %v264_v15  ;;  %v336_v23 = vadd.f32 %v635_v1, %v265_v16  ;;  %v211_v5 = vld [vmem:[%s630_s20 + $0x128] sm:$0xff]  ;;  %v212_v10 = vld [vmem:[%s630_s20 + $0x130] sm:$0xff]  ;;  %v213_v15 = vld [vmem:[%s630_s20 + $0x138] sm:$0xff] }
  0x1f   : > { %460 = vst.msk [vmem:[%s658_s25 + $0x78] sm:$0xff] %vm444_vm0, %v395_v14  ;;  %v337_v24 = vadd.f32 %v635_v1, %v266_v17  ;;  %v268_v25 = vmul.f32 %v625_v0, %v197_v13  ;;  %v396_v29 = vmax.f32 %v332_v18, 0.0  ;;  %v397_v30 = vmax.f32 %v333_v19, 0.0 }
  0x20   : > { %v398_v31 = vmax.f32 %v334_v20, 0.0  ;;  %v338_v32 = vadd.f32 %v635_v1, %v267_v21  ;;  %v399_v36 = vmax.f32 %v335_v22, 0.0  ;;  %v400_v37 = vmax.f32 %v336_v23, 0.0 }
  0x21   : > { %v401_v38 = vmax.f32 %v337_v24, 0.0  ;;  %v339_v39 = vadd.f32 %v635_v1, %v268_v25  ;;  %461 = vst.msk [vmem:[%s658_s25 + $0x80] sm:$0xff] %vm444_vm0, %v396_v29  ;;  %462 = vst.msk [vmem:[%s658_s25 + $0x88] sm:$0xff] %vm444_vm0, %v397_v30  ;;  %v269_v42 = vmul.f32 %v625_v0, %v198_v26  ;;  %v270_v43 = vmul.f32 %v625_v0, %v199_v27  ;;  %v215_v29 = vld [vmem:[%s630_s20 + $0x148] sm:$0xff]  ;;  %v216_v30 = vld [vmem:[%s630_s20 + $0x150] sm:$0xff] }
  0x22   : > { %463 = vst.msk [vmem:[%s658_s25 + $0x90] sm:$0xff] %vm444_vm0, %v398_v31  ;;  %v402_v41 = vmax.f32 %v338_v32, 0.0  ;;  %v271_v44 = vmul.f32 %v625_v0, %v200_v28  ;;  %464 = vst.msk [vmem:[%s658_s25 + $0x98] sm:$0xff] %vm444_vm0, %v399_v36  ;;  %v272_v47 = vmul.f32 %v625_v0, %v201_v33  ;;  %v273_v48 = vmul.f32 %v625_v0, %v202_v34  ;;  %v214_v28 = vld [vmem:[%s630_s20 + $0x140] sm:$0xff] }
  0x23   : > { %465 = vst.msk [vmem:[%s658_s25 + $0xa0] sm:$0xff] %vm444_vm0, %v400_v37  ;;  %466 = vst.msk [vmem:[%s658_s25 + $0xa8] sm:$0xff] %vm444_vm0, %v401_v38  ;;  %v403_v46 = vmax.f32 %v339_v39, 0.0  ;;  %v274_v49 = vmul.f32 %v625_v0, %v203_v35  ;;  %v340_v50 = vadd.f32 %v635_v1, %v269_v42  ;;  %v341_v51 = vadd.f32 %v635_v1, %v270_v43  ;;  %v217_v35 = vld [vmem:[%s630_s20 + $0x158] sm:$0xff]  ;;  %v218_v36 = vld [vmem:[%s630_s20 + $0x160] sm:$0xff] }
  0x24   : > { %467 = vst.msk [vmem:[%s658_s25 + $0xb0] sm:$0xff] %vm444_vm0, %v402_v41  ;;  %v342_v52 = vadd.f32 %v635_v1, %v271_v44  ;;  %v275_v53 = vmul.f32 %v625_v0, %v204_v40  ;;  %v343_v54 = vadd.f32 %v635_v1, %v272_v47  ;;  %v344_v55 = vadd.f32 %v635_v1, %v273_v48  ;;  %v219_v37 = vld [vmem:[%s630_s20 + $0x168] sm:$0xff]  ;;  %v220_v42 = vld [vmem:[%s630_s20 + $0x170] sm:$0xff]  ;;  %v221_v47 = vld [vmem:[%s630_s20 + $0x178] sm:$0xff] }
  0x25   : > { %468 = vst.msk [vmem:[%s658_s25 + $0xb8] sm:$0xff] %vm444_vm0, %v403_v46  ;;  %v345_v56 = vadd.f32 %v635_v1, %v274_v49  ;;  %v276_v57 = vmul.f32 %v625_v0, %v205_v45  ;;  %v404_v61 = vmax.f32 %v340_v50, 0.0  ;;  %v405_v62 = vmax.f32 %v341_v51, 0.0 }
  0x26   : > { %v406_v63 = vmax.f32 %v342_v52, 0.0  ;;  %v346_v2 = vadd.f32 %v635_v1, %v275_v53  ;;  %v407_v6 = vmax.f32 %v343_v54, 0.0  ;;  %v408_v7 = vmax.f32 %v344_v55, 0.0 }
  0x27   : > { %v409_v8 = vmax.f32 %v345_v56, 0.0  ;;  %v347_v9 = vadd.f32 %v635_v1, %v276_v57  ;;  %469 = vst.msk [vmem:[%s658_s25 + $0xc0] sm:$0xff] %vm444_vm0, %v404_v61  ;;  %470 = vst.msk [vmem:[%s658_s25 + $0xc8] sm:$0xff] %vm444_vm0, %v405_v62  ;;  %v277_v12 = vmul.f32 %v625_v0, %v206_v58  ;;  %v278_v13 = vmul.f32 %v625_v0, %v207_v59  ;;  %v223_v61 = vld [vmem:[%s630_s20 + $0x188] sm:$0xff]  ;;  %v224_v62 = vld [vmem:[%s630_s20 + $0x190] sm:$0xff] }
  0x28   : > { %471 = vst.msk [vmem:[%s658_s25 + $0xd0] sm:$0xff] %vm444_vm0, %v406_v63  ;;  %v410_v11 = vmax.f32 %v346_v2, 0.0  ;;  %v279_v14 = vmul.f32 %v625_v0, %v208_v60  ;;  %472 = vst.msk [vmem:[%s658_s25 + $0xd8] sm:$0xff] %vm444_vm0, %v407_v6  ;;  %v280_v17 = vmul.f32 %v625_v0, %v209_v3  ;;  %v281_v18 = vmul.f32 %v625_v0, %v210_v4  ;;  %v222_v60 = vld [vmem:[%s630_s20 + $0x180] sm:$0xff] }
  0x29   : > { %473 = vst.msk [vmem:[%s658_s25 + $0xe0] sm:$0xff] %vm444_vm0, %v408_v7  ;;  %474 = vst.msk [vmem:[%s658_s25 + $0xe8] sm:$0xff] %vm444_vm0, %v409_v8  ;;  %v411_v16 = vmax.f32 %v347_v9, 0.0  ;;  %v282_v19 = vmul.f32 %v625_v0, %v211_v5  ;;  %v348_v20 = vadd.f32 %v635_v1, %v277_v12  ;;  %v349_v21 = vadd.f32 %v635_v1, %v278_v13  ;;  %v225_v5 = vld [vmem:[%s630_s20 + $0x198] sm:$0xff]  ;;  %v226_v6 = vld [vmem:[%s630_s20 + $0x1a0] sm:$0xff] }
  0x2a   : > { %475 = vst.msk [vmem:[%s658_s25 + $0xf0] sm:$0xff] %vm444_vm0, %v410_v11  ;;  %v350_v22 = vadd.f32 %v635_v1, %v279_v14  ;;  %v283_v23 = vmul.f32 %v625_v0, %v212_v10  ;;  %v351_v24 = vadd.f32 %v635_v1, %v280_v17  ;;  %v352_v25 = vadd.f32 %v635_v1, %v281_v18  ;;  %v227_v7 = vld [vmem:[%s630_s20 + $0x1a8] sm:$0xff]  ;;  %v228_v12 = vld [vmem:[%s630_s20 + $0x1b0] sm:$0xff]  ;;  %v229_v17 = vld [vmem:[%s630_s20 + $0x1b8] sm:$0xff] }
  0x2b   : > { %476 = vst.msk [vmem:[%s658_s25 + $0xf8] sm:$0xff] %vm444_vm0, %v411_v16  ;;  %v353_v26 = vadd.f32 %v635_v1, %v282_v19  ;;  %v284_v27 = vmul.f32 %v625_v0, %v213_v15  ;;  %v412_v31 = vmax.f32 %v348_v20, 0.0  ;;  %v413_v32 = vmax.f32 %v349_v21, 0.0 }
  0x2c   : > { %v414_v33 = vmax.f32 %v350_v22, 0.0  ;;  %v354_v34 = vadd.f32 %v635_v1, %v283_v23  ;;  %v415_v38 = vmax.f32 %v351_v24, 0.0  ;;  %v416_v39 = vmax.f32 %v352_v25, 0.0 }
  0x2d   : > { %v417_v40 = vmax.f32 %v353_v26, 0.0  ;;  %v355_v41 = vadd.f32 %v635_v1, %v284_v27  ;;  %477 = vst.msk [vmem:[%s658_s25 + $0x100] sm:$0xff] %vm444_vm0, %v412_v31  ;;  %478 = vst.msk [vmem:[%s658_s25 + $0x108] sm:$0xff] %vm444_vm0, %v413_v32  ;;  %v285_v44 = vmul.f32 %v625_v0, %v214_v28  ;;  %v286_v45 = vmul.f32 %v625_v0, %v215_v29  ;;  %v231_v31 = vld [vmem:[%s630_s20 + $0x1c8] sm:$0xff]  ;;  %v232_v32 = vld [vmem:[%s630_s20 + $0x1d0] sm:$0xff] }
  0x2e   : > { %479 = vst.msk [vmem:[%s658_s25 + $0x110] sm:$0xff] %vm444_vm0, %v414_v33  ;;  %v418_v43 = vmax.f32 %v354_v34, 0.0  ;;  %v287_v46 = vmul.f32 %v625_v0, %v216_v30  ;;  %480 = vst.msk [vmem:[%s658_s25 + $0x118] sm:$0xff] %vm444_vm0, %v415_v38  ;;  %v288_v49 = vmul.f32 %v625_v0, %v217_v35  ;;  %v289_v50 = vmul.f32 %v625_v0, %v218_v36  ;;  %v230_v30 = vld [vmem:[%s630_s20 + $0x1c0] sm:$0xff] }
  0x2f   : > { %481 = vst.msk [vmem:[%s658_s25 + $0x120] sm:$0xff] %vm444_vm0, %v416_v39  ;;  %482 = vst.msk [vmem:[%s658_s25 + $0x128] sm:$0xff] %vm444_vm0, %v417_v40  ;;  %v419_v48 = vmax.f32 %v355_v41, 0.0  ;;  %v290_v51 = vmul.f32 %v625_v0, %v219_v37  ;;  %v356_v52 = vadd.f32 %v635_v1, %v285_v44  ;;  %v357_v53 = vadd.f32 %v635_v1, %v286_v45  ;;  %v233_v37 = vld [vmem:[%s630_s20 + $0x1d8] sm:$0xff]  ;;  %v234_v38 = vld [vmem:[%s630_s20 + $0x1e0] sm:$0xff] }
  0x30   : > { %483 = vst.msk [vmem:[%s658_s25 + $0x130] sm:$0xff] %vm444_vm0, %v418_v43  ;;  %v358_v54 = vadd.f32 %v635_v1, %v287_v46  ;;  %v291_v55 = vmul.f32 %v625_v0, %v220_v42  ;;  %v359_v56 = vadd.f32 %v635_v1, %v288_v49  ;;  %v360_v57 = vadd.f32 %v635_v1, %v289_v50  ;;  %v235_v39 = vld [vmem:[%s630_s20 + $0x1e8] sm:$0xff]  ;;  %v236_v44 = vld [vmem:[%s630_s20 + $0x1f0] sm:$0xff]  ;;  %v237_v49 = vld [vmem:[%s630_s20 + $0x1f8] sm:$0xff] }
  0x31   : > { %484 = vst.msk [vmem:[%s658_s25 + $0x138] sm:$0xff] %vm444_vm0, %v419_v48  ;;  %v361_v58 = vadd.f32 %v635_v1, %v290_v51  ;;  %v292_v59 = vmul.f32 %v625_v0, %v221_v47  ;;  %v420_v63 = vmax.f32 %v356_v52, 0.0  ;;  %v421_v2 = vmax.f32 %v357_v53, 0.0 }
  0x32   : > { %v422_v3 = vmax.f32 %v358_v54, 0.0  ;;  %v362_v4 = vadd.f32 %v635_v1, %v291_v55  ;;  %v423_v8 = vmax.f32 %v359_v56, 0.0  ;;  %v424_v9 = vmax.f32 %v360_v57, 0.0 }
  0x33   : > { %v425_v10 = vmax.f32 %v361_v58, 0.0  ;;  %v363_v11 = vadd.f32 %v635_v1, %v292_v59  ;;  %485 = vst.msk [vmem:[%s658_s25 + $0x140] sm:$0xff] %vm444_vm0, %v420_v63  ;;  %486 = vst.msk [vmem:[%s658_s25 + $0x148] sm:$0xff] %vm444_vm0, %v421_v2  ;;  %v293_v14 = vmul.f32 %v625_v0, %v222_v60  ;;  %v294_v15 = vmul.f32 %v625_v0, %v223_v61 }
  0x34   : > { %487 = vst.msk [vmem:[%s658_s25 + $0x150] sm:$0xff] %vm444_vm0, %v422_v3  ;;  %v426_v13 = vmax.f32 %v362_v4, 0.0  ;;  %v295_v16 = vmul.f32 %v625_v0, %v224_v62  ;;  %488 = vst.msk [vmem:[%s658_s25 + $0x158] sm:$0xff] %vm444_vm0, %v423_v8  ;;  %v296_v19 = vmul.f32 %v625_v0, %v225_v5  ;;  %v297_v20 = vmul.f32 %v625_v0, %v226_v6 }
  0x35   : > { %489 = vst.msk [vmem:[%s658_s25 + $0x160] sm:$0xff] %vm444_vm0, %v424_v9  ;;  %490 = vst.msk [vmem:[%s658_s25 + $0x168] sm:$0xff] %vm444_vm0, %v425_v10  ;;  %v427_v18 = vmax.f32 %v363_v11, 0.0  ;;  %v298_v21 = vmul.f32 %v625_v0, %v227_v7  ;;  %v364_v22 = vadd.f32 %v635_v1, %v293_v14  ;;  %v365_v23 = vadd.f32 %v635_v1, %v294_v15 }
  0x36   : > { %491 = vst.msk [vmem:[%s658_s25 + $0x170] sm:$0xff] %vm444_vm0, %v426_v13  ;;  %v366_v24 = vadd.f32 %v635_v1, %v295_v16  ;;  %v299_v25 = vmul.f32 %v625_v0, %v228_v12  ;;  %v367_v26 = vadd.f32 %v635_v1, %v296_v19  ;;  %v368_v27 = vadd.f32 %v635_v1, %v297_v20 }
  0x37   : > { %492 = vst.msk [vmem:[%s658_s25 + $0x178] sm:$0xff] %vm444_vm0, %v427_v18  ;;  %v369_v28 = vadd.f32 %v635_v1, %v298_v21  ;;  %v300_v29 = vmul.f32 %v625_v0, %v229_v17  ;;  %v428_v33 = vmax.f32 %v364_v22, 0.0  ;;  %v429_v34 = vmax.f32 %v365_v23, 0.0 }
  0x38   : > { %v430_v35 = vmax.f32 %v366_v24, 0.0  ;;  %v370_v36 = vadd.f32 %v635_v1, %v299_v25  ;;  %v431_v40 = vmax.f32 %v367_v26, 0.0  ;;  %v432_v41 = vmax.f32 %v368_v27, 0.0 }
  0x39   : > { %v433_v42 = vmax.f32 %v369_v28, 0.0  ;;  %v371_v43 = vadd.f32 %v635_v1, %v300_v29  ;;  %493 = vst.msk [vmem:[%s658_s25 + $0x180] sm:$0xff] %vm444_vm0, %v428_v33  ;;  %494 = vst.msk [vmem:[%s658_s25 + $0x188] sm:$0xff] %vm444_vm0, %v429_v34  ;;  %v301_v46 = vmul.f32 %v625_v0, %v230_v30  ;;  %v302_v47 = vmul.f32 %v625_v0, %v231_v31 }
  0x3a   : > { %495 = vst.msk [vmem:[%s658_s25 + $0x190] sm:$0xff] %vm444_vm0, %v430_v35  ;;  %v434_v45 = vmax.f32 %v370_v36, 0.0  ;;  %v303_v48 = vmul.f32 %v625_v0, %v232_v32  ;;  %496 = vst.msk [vmem:[%s658_s25 + $0x198] sm:$0xff] %vm444_vm0, %v431_v40  ;;  %v304_v51 = vmul.f32 %v625_v0, %v233_v37  ;;  %v305_v52 = vmul.f32 %v625_v0, %v234_v38 }
  0x3b   : > { %497 = vst.msk [vmem:[%s658_s25 + $0x1a0] sm:$0xff] %vm444_vm0, %v432_v41  ;;  %498 = vst.msk [vmem:[%s658_s25 + $0x1a8] sm:$0xff] %vm444_vm0, %v433_v42  ;;  %v435_v50 = vmax.f32 %v371_v43, 0.0  ;;  %v306_v53 = vmul.f32 %v625_v0, %v235_v39  ;;  %v372_v54 = vadd.f32 %v635_v1, %v301_v46  ;;  %v373_v55 = vadd.f32 %v635_v1, %v302_v47 }
  0x3c   : > { %499 = vst.msk [vmem:[%s658_s25 + $0x1b0] sm:$0xff] %vm444_vm0, %v434_v45  ;;  %v374_v56 = vadd.f32 %v635_v1, %v303_v48  ;;  %v307_v57 = vmul.f32 %v625_v0, %v236_v44  ;;  %v375_v58 = vadd.f32 %v635_v1, %v304_v51  ;;  %v376_v59 = vadd.f32 %v635_v1, %v305_v52 }
  0x3d   : > { %500 = vst.msk [vmem:[%s658_s25 + $0x1b8] sm:$0xff] %vm444_vm0, %v435_v50  ;;  %v377_v60 = vadd.f32 %v635_v1, %v306_v53  ;;  %v308_v61 = vmul.f32 %v625_v0, %v237_v49  ;;  %v436_v62 = vmax.f32 %v372_v54, 0.0  ;;  %v437_v63 = vmax.f32 %v373_v55, 0.0 }
  0x3e   : > { %v438_v2 = vmax.f32 %v374_v56, 0.0  ;;  %v378_v3 = vadd.f32 %v635_v1, %v307_v57  ;;  %v439_v4 = vmax.f32 %v375_v58, 0.0  ;;  %v440_v5 = vmax.f32 %v376_v59, 0.0 }
  0x3f   : > { %v441_v6 = vmax.f32 %v377_v60, 0.0  ;;  %v379_v7 = vadd.f32 %v635_v1, %v308_v61  ;;  %501 = vst.msk [vmem:[%s658_s25 + $0x1c0] sm:$0xff] %vm444_vm0, %v436_v62  ;;  %502 = vst.msk [vmem:[%s658_s25 + $0x1c8] sm:$0xff] %vm444_vm0, %v437_v63 }
  0x40   : > { %503 = vst.msk [vmem:[%s658_s25 + $0x1d0] sm:$0xff] %vm444_vm0, %v438_v2  ;;  %v442_v8 = vmax.f32 %v378_v3, 0.0  ;;  %504 = vst.msk [vmem:[%s658_s25 + $0x1d8] sm:$0xff] %vm444_vm0, %v439_v4 }
  0x41   : > { %505 = vst.msk [vmem:[%s658_s25 + $0x1e0] sm:$0xff] %vm444_vm0, %v440_v5  ;;  %506 = vst.msk [vmem:[%s658_s25 + $0x1e8] sm:$0xff] %vm444_vm0, %v441_v6  ;;  %v443_v0 = vmax.f32 %v379_v7, 0.0 }
  0x42   : > { %507 = vst.msk [vmem:[%s658_s25 + $0x1f0] sm:$0xff] %vm444_vm0, %v442_v8 }
  0x43   : > { %508 = vst.msk [vmem:[%s658_s25 + $0x1f8] sm:$0xff] %vm444_vm0, %v443_v0 }
  0x44 PF: > { %s13_s12 = sadd.s32 1, %s592_s12  }
  0x45   : > { %p10_p4 = scmp.ge.s32.totalorder %s13_s12, 6  }
  0x47   :  { %12 = sbr.rel (!%p10_p4) target bundleno = 1 (0x1), region = 62 }

// kernel: forward.14
= control target key start
LH: loop header
LB: loop body
LE: loop exit
PB: predicated region body
PF: predicated region fallthrough
CT: control target
= control target key end

     0   :  { %s2473_s12 = smov 0   ;;  %s3760_s0 = inlined_call_operand.vmem [shape: f32[2048,576], index: 0, kind: input, shape index: {}]   ;;  %s3761_s1 = inlined_call_operand.vmem [shape: f32[576,3], index: 1, kind: input, shape index: {}]   ;;  %s3762_s2 = inlined_call_operand.vmem [shape: f32[1,3], index: 2, kind: input, shape index: {}]   ;;  %s3763_s3 = inlined_call_operand.vmem [shape: f32[2048,3], index: 3, kind: output, shape index: {}]  }
   0x1 LB: > { %s2109_s13 = sadd.s32 4294967295, %s2450_s12   ;;  %p2113_p0 = scmp.ge.s32.totalorder %s2450_s12, 1  ;;  %s2450_s12 = sphi %s2473_s12, %s13_s12  }
   0x2   : > { %p139_p1 = scmp.lt.s32.totalorder %s2450_s12, 5 }
   0x4   : > { %p140_p2 = pnand %p2113_p0, %p139_p1 }
   0x6   : > { %143 = sbr.rel (%p140_p2) target bundleno = 597 (0x255), region = 32 }
   0xb   : > { %v512_v0 = vld [vmem:[%s3761_s1 + $0x78] sm:$0xff]  ;;  %v2452_v1 = vmov 0.0   ;;  %v511_v2 = vld [vmem:[%s3761_s1 + $0x70] sm:$0xff]  ;;  %v510_v3 = vld [vmem:[%s3761_s1 + $0x68] sm:$0xff]  ;;  %s2114_s8 = sshll.u32 %s2109_s13, 6  ;;  %vm576_vm0 = vcmask 523264  }
   0xc   : > { %769 = vmatprep.subr.mxu0 %v2452_v1  ;;  %2369 = vmatprep.subr.mxu1 %v2452_v1  ;;  %v509_v4 = vld [vmem:[%s3761_s1 + $0x60] sm:$0xff]  ;;  %v508_v5 = vld [vmem:[%s3761_s1 + $0x58] sm:$0xff]  ;;  %v507_v6 = vld [vmem:[%s3761_s1 + $0x50] sm:$0xff]  ;;  %p165_p3 = scmp.lt.s32.totalorder %s2114_s8, 255  ;;  %vm1988_vm1 = vcmask 23552  }
   0xd   : > { %770 = vmatpush1.msra.mxu0 %v512_v0  ;;  %2401 = vmatpush1.msra.mxu1 %v512_v0  ;;  %v506_v7 = vld [vmem:[%s3761_s1 + $0x48] sm:$0xff]  ;;  %v505_v8 = vld [vmem:[%s3761_s1 + $0x40] sm:$0xff]  ;;  %v504_v9 = vld [vmem:[%s3761_s1 + $0x38] sm:$0xff] }
   0xe   : > { %771 = vmatprep.subr.mxu0 %v2452_v1  ;;  %2370 = vmatprep.subr.mxu1 %v2452_v1  ;;  %v503_v10 = vld [vmem:[%s3761_s1 + $0x30] sm:$0xff]  ;;  %v502_v11 = vld [vmem:[%s3761_s1 + $0x28] sm:$0xff]  ;;  %v501_v12 = vld [vmem:[%s3761_s1 + $0x20] sm:$0xff]  ;;  %s3793_s8 = smov (!%p165_p3, %s2114_s8), 255 }
   0xf   : > { %772 = vmatpush1.msra.mxu0 %v511_v2  ;;  %2402 = vmatpush1.msra.mxu1 %v511_v2  ;;  %v500_v13 = vld [vmem:[%s3761_s1 + $0x18] sm:$0xff]  ;;  %v499_v14 = vld [vmem:[%s3761_s1 + $0x10] sm:$0xff]  ;;  %v498_v15 = vld [vmem:[%s3761_s1 + $0x8] sm:$0xff]  ;;  %s2433_s22 = smul.u32 40, %s3793_s8 }
  0x10   : > { %773 = vmatprep.subr.mxu0 %v2452_v1  ;;  %2371 = vmatprep.subr.mxu1 %v2452_v1  ;;  %v497_v16 = vld [vmem:[%s3761_s1] sm:$0xff]  ;;  %v528_v17 = vld [vmem:[%s3761_s1 + $0xf8] sm:$0xff]  ;;  %v527_v18 = vld [vmem:[%s3761_s1 + $0xf0] sm:$0xff] }
  0x11   : > { %774 = vmatpush1.msra.mxu0 %v510_v3  ;;  %2403 = vmatpush1.msra.mxu1 %v510_v3  ;;  %v526_v19 = vld [vmem:[%s3761_s1 + $0xe8] sm:$0xff]  ;;  %v525_v20 = vld [vmem:[%s3761_s1 + $0xe0] sm:$0xff]  ;;  %v524_v21 = vld [vmem:[%s3761_s1 + $0xd8] sm:$0xff]  ;;  %s2642_s29 = scalar_lea.vmem %s3760_s0, %s2433_s22 }
  0x12   : > { %775 = vmatprep.subr.mxu0 %v2452_v1  ;;  %2372 = vmatprep.subr.mxu1 %v2452_v1  ;;  %v523_v22 = vld [vmem:[%s3761_s1 + $0xd0] sm:$0xff]  ;;  %v522_v23 = vld [vmem:[%s3761_s1 + $0xc8] sm:$0xff]  ;;  %v521_v24 = vld [vmem:[%s3761_s1 + $0xc0] sm:$0xff] }
  0x13   : > { %776 = vmatpush1.msra.mxu0 %v509_v4  ;;  %2404 = vmatpush1.msra.mxu1 %v509_v4  ;;  %v520_v25 = vld [vmem:[%s3761_s1 + $0xb8] sm:$0xff]  ;;  %v519_v26 = vld [vmem:[%s3761_s1 + $0xb0] sm:$0xff]  ;;  %v518_v27 = vld [vmem:[%s3761_s1 + $0xa8] sm:$0xff] }
  0x14   : > { %777 = vmatprep.subr.mxu0 %v2452_v1  ;;  %2373 = vmatprep.subr.mxu1 %v2452_v1  ;;  %v517_v28 = vld [vmem:[%s3761_s1 + $0xa0] sm:$0xff]  ;;  %v516_v29 = vld [vmem:[%s3761_s1 + $0x98] sm:$0xff]  ;;  %v515_v30 = vld [vmem:[%s3761_s1 + $0x90] sm:$0xff] }
  0x15   : > { %778 = vmatpush1.msra.mxu0 %v508_v5  ;;  %2405 = vmatpush1.msra.mxu1 %v508_v5  ;;  %v514_v31 = vld [vmem:[%s3761_s1 + $0x88] sm:$0xff]  ;;  %v513_v32 = vld [vmem:[%s3761_s1 + $0x80] sm:$0xff]  ;;  %v568_v37 = vld [vmem:[%s3761_s1 + $0x238] sm:$0xff] }
  0x16   : > { %779 = vmatprep.subr.mxu0 %v2452_v1  ;;  %2374 = vmatprep.subr.mxu1 %v2452_v1  ;;  %v178_v33 = vld [vmem:[%s2642_s29 + $0x8] sm:$0xff]  ;;  %v177_v35 = vld [vmem:[%s2642_s29] sm:$0xff]  ;;  %v544_v38 = vld [vmem:[%s3761_s1 + $0x178] sm:$0xff] }
  0x17   : > { %780 = vmatpush1.msra.mxu0 %v507_v6  ;;  %2406 = vmatpush1.msra.mxu1 %v507_v6  ;;  %v418_v34 = vld [vmem:[%s2642_s29 + $0x788] sm:$0xff]  ;;  %v417_v36 = vld [vmem:[%s2642_s29 + $0x780] sm:$0xff]  ;;  %v183_v39 = vld [vmem:[%s2642_s29 + $0x30] sm:$0xff] }
  0x18   : > { %781 = vmatprep.subr.mxu0 %v2452_v1  ;;  %2375 = vmatprep.subr.mxu1 %v2452_v1  ;;  %v423_v40 = vld [vmem:[%s2642_s29 + $0x7b0] sm:$0xff]  ;;  %v182_v42 = vld [vmem:[%s2642_s29 + $0x28] sm:$0xff]  ;;  %v188_v44 = vld [vmem:[%s2642_s29 + $0x58] sm:$0xff] }
  0x19   : > { %782 = vmatpush1.msra.mxu0 %v506_v7  ;;  %2407 = vmatpush1.msra.mxu1 %v506_v7  ;;  %v543_v41 = vld [vmem:[%s3761_s1 + $0x170] sm:$0xff]  ;;  %v422_v43 = vld [vmem:[%s2642_s29 + $0x7a8] sm:$0xff]  ;;  %v428_v46 = vld [vmem:[%s2642_s29 + $0x7d8] sm:$0xff] }
  0x1a   : > { %783 = vmatprep.subr.mxu0 %v2452_v1  ;;  %2376 = vmatprep.subr.mxu1 %v2452_v1  ;;  %v542_v45 = vld [vmem:[%s3761_s1 + $0x168] sm:$0xff]  ;;  %v2678_v47 = vld [vmem:[%s3761_s1 + $0x230] sm:$0xff]  ;;  %v541_v48 = vld [vmem:[%s3761_s1 + $0x160] sm:$0xff] }
  0x1b   : > { %784 = vmatpush1.msra.mxu0 %v505_v8  ;;  %2408 = vmatpush1.msra.mxu1 %v505_v8  ;;  %v187_v49 = vld [vmem:[%s2642_s29 + $0x50] sm:$0xff]  ;;  %v540_v51 = vld [vmem:[%s3761_s1 + $0x158] sm:$0xff]  ;;  %v193_v52 = vld [vmem:[%s2642_s29 + $0x80] sm:$0xff] }
  0x1c   : > { %785 = vmatprep.subr.mxu0 %v2452_v1  ;;  %2377 = vmatprep.subr.mxu1 %v2452_v1  ;;  %v427_v50 = vld [vmem:[%s2642_s29 + $0x7d0] sm:$0xff]  ;;  %v433_v53 = vld [vmem:[%s2642_s29 + $0x800] sm:$0xff]  ;;  %v192_v55 = vld [vmem:[%s2642_s29 + $0x78] sm:$0xff] }
  0x1d   : > { %786 = vmatpush1.msra.mxu0 %v504_v9  ;;  %2409 = vmatpush1.msra.mxu1 %v504_v9  ;;  %v539_v54 = vld [vmem:[%s3761_s1 + $0x150] sm:$0xff]  ;;  %v432_v56 = vld [vmem:[%s2642_s29 + $0x7f8] sm:$0xff]  ;;  %v538_v57 = vld [vmem:[%s3761_s1 + $0x148] sm:$0xff] }
  0x1e   : > { %787 = vmatprep.subr.mxu0 %v2452_v1  ;;  %2378 = vmatprep.subr.mxu1 %v2452_v1  ;;  %v198_v58 = vld [vmem:[%s2642_s29 + $0xa8] sm:$0xff]  ;;  %v537_v60 = vld [vmem:[%s3761_s1 + $0x140] sm:$0xff]  ;;  %v536_v63 = vld [vmem:[%s3761_s1 + $0x138] sm:$0xff] }
  0x1f   : > { %788 = vmatpush1.msra.mxu0 %v503_v10  ;;  %2410 = vmatpush1.msra.mxu1 %v503_v10  ;;  %v438_v59 = vld [vmem:[%s2642_s29 + $0x828] sm:$0xff]  ;;  %v197_v61 = vld [vmem:[%s2642_s29 + $0xa0] sm:$0xff]  ;;  %v203_v0 = vld [vmem:[%s2642_s29 + $0xd0] sm:$0xff] }
  0x20   : > { %789 = vmatprep.subr.mxu0 %v2452_v1  ;;  %2379 = vmatprep.subr.mxu1 %v2452_v1  ;;  %v437_v62 = vld [vmem:[%s2642_s29 + $0x820] sm:$0xff]  ;;  %v443_v2 = vld [vmem:[%s2642_s29 + $0x850] sm:$0xff]  ;;  %v202_v4 = vld [vmem:[%s2642_s29 + $0xc8] sm:$0xff] }
  0x21   : > { %790 = vmatpush1.msra.mxu0 %v502_v11  ;;  %2411 = vmatpush1.msra.mxu1 %v502_v11  ;;  %v535_v3 = vld [vmem:[%s3761_s1 + $0x130] sm:$0xff]  ;;  %v442_v5 = vld [vmem:[%s2642_s29 + $0x848] sm:$0xff]  ;;  %v208_v7 = vld [vmem:[%s2642_s29 + $0xf8] sm:$0xff] }
  0x22   : > { %791 = vmatprep.subr.mxu0 %v2452_v1  ;;  %2380 = vmatprep.subr.mxu1 %v2452_v1  ;;  %v534_v6 = vld [vmem:[%s3761_s1 + $0x128] sm:$0xff]  ;;  %v448_v8 = vld [vmem:[%s2642_s29 + $0x878] sm:$0xff]  ;;  %v533_v9 = vld [vmem:[%s3761_s1 + $0x120] sm:$0xff] }
  0x23   : > { %792 = vmatpush1.msra.mxu0 %v501_v12  ;;  %2412 = vmatpush1.msra.mxu1 %v501_v12  ;;  %v207_v10 = vld [vmem:[%s2642_s29 + $0xf0] sm:$0xff]  ;;  %v532_v12 = vld [vmem:[%s3761_s1 + $0x118] sm:$0xff] }
  0x24   : > { %793 = vmatprep.subr.mxu0 %v2452_v1  ;;  %2381 = vmatprep.subr.mxu1 %v2452_v1  ;;  %v447_v11 = vld [vmem:[%s2642_s29 + $0x870] sm:$0xff] }
  0x25   : > { %794 = vmatpush1.msra.mxu0 %v500_v13  ;;  %2413 = vmatpush1.msra.mxu1 %v500_v13  ;;  %v213_v13 = vld [vmem:[%s2642_s29 + $0x120] sm:$0xff] }
  0x26   : > { %795 = vmatprep.subr.mxu0 %v2452_v1  ;;  %2382 = vmatprep.subr.mxu1 %v2452_v1 }
  0x27   : > { %796 = vmatpush1.msra.mxu0 %v499_v14  ;;  %2414 = vmatpush1.msra.mxu1 %v499_v14  ;;  %v453_v14 = vld [vmem:[%s2642_s29 + $0x8a0] sm:$0xff] }
  0x28   : > { %797 = vmatprep.subr.mxu0 %v2452_v1  ;;  %2383 = vmatprep.subr.mxu1 %v2452_v1 }
  0x29   : > { %798 = vmatpush1.msra.mxu0 %v498_v15  ;;  %2415 = vmatpush1.msra.mxu1 %v498_v15  ;;  %v531_v15 = vld [vmem:[%s3761_s1 + $0x110] sm:$0xff] }
  0x2a   : > { %799 = vmatprep.subr.mxu0 %v2452_v1  ;;  %2384 = vmatprep.subr.mxu1 %v2452_v1 }
  0x2b   : > { %800 = vmatpush1.msra.mxu0 %v497_v16  ;;  %2416 = vmatpush1.msra.mxu1 %v497_v16  ;;  %v212_v16 = vld [vmem:[%s2642_s29 + $0x118] sm:$0xff] }
  0x2c   : > { %801 = vmatprep.subr.mxu0 %v2452_v1  ;;  %2385 = vmatprep.subr.mxu1 %v2452_v1 }
  0x2d   : > { %802 = vmatpush2.msra.mxu0 %v528_v17  ;;  %2417 = vmatpush2.msra.mxu1 %v528_v17  ;;  %v452_v17 = vld [vmem:[%s2642_s29 + $0x898] sm:$0xff] }
  0x2e   : > { %803 = vmatprep.subr.mxu0 %v2452_v1  ;;  %2386 = vmatprep.subr.mxu1 %v2452_v1 }
  0x2f   : > { %804 = vmatpush2.msra.mxu0 %v527_v18  ;;  %2418 = vmatpush2.msra.mxu1 %v527_v18  ;;  %v218_v18 = vld [vmem:[%s2642_s29 + $0x148] sm:$0xff] }
  0x30   : > { %805 = vmatprep.subr.mxu0 %v2452_v1  ;;  %2387 = vmatprep.subr.mxu1 %v2452_v1 }
  0x31   : > { %806 = vmatpush2.msra.mxu0 %v526_v19  ;;  %2419 = vmatpush2.msra.mxu1 %v526_v19  ;;  %v530_v19 = vld [vmem:[%s3761_s1 + $0x108] sm:$0xff] }
  0x32   : > { %807 = vmatprep.subr.mxu0 %v2452_v1  ;;  %2388 = vmatprep.subr.mxu1 %v2452_v1 }
  0x33   : > { %808 = vmatpush2.msra.mxu0 %v525_v20  ;;  %2420 = vmatpush2.msra.mxu1 %v525_v20  ;;  %v458_v20 = vld [vmem:[%s2642_s29 + $0x8c8] sm:$0xff] }
  0x34   : > { %809 = vmatprep.subr.mxu0 %v2452_v1  ;;  %2389 = vmatprep.subr.mxu1 %v2452_v1 }
  0x35   : > { %810 = vmatpush2.msra.mxu0 %v524_v21  ;;  %2421 = vmatpush2.msra.mxu1 %v524_v21  ;;  %v2757_v21 = vld [vmem:[%s3761_s1 + $0x228] sm:$0xff] }
  0x36   : > { %811 = vmatprep.subr.mxu0 %v2452_v1  ;;  %2390 = vmatprep.subr.mxu1 %v2452_v1 }
  0x37   : > { %812 = vmatpush2.msra.mxu0 %v523_v22  ;;  %2422 = vmatpush2.msra.mxu1 %v523_v22  ;;  %v529_v22 = vld [vmem:[%s3761_s1 + $0x100] sm:$0xff] }
  0x38   : > { %813 = vmatprep.subr.mxu0 %v2452_v1  ;;  %2391 = vmatprep.subr.mxu1 %v2452_v1 }
  0x39   : > { %814 = vmatpush2.msra.mxu0 %v522_v23  ;;  %2423 = vmatpush2.msra.mxu1 %v522_v23  ;;  %v217_v23 = vld [vmem:[%s2642_s29 + $0x140] sm:$0xff] }
  0x3a   : > { %815 = vmatprep.subr.mxu0 %v2452_v1  ;;  %2392 = vmatprep.subr.mxu1 %v2452_v1 }
  0x3b   : > { %816 = vmatpush2.msra.mxu0 %v521_v24  ;;  %2424 = vmatpush2.msra.mxu1 %v521_v24  ;;  %v457_v24 = vld [vmem:[%s2642_s29 + $0x8c0] sm:$0xff] }
  0x3c   : > { %817 = vmatprep.subr.mxu0 %v2452_v1  ;;  %2393 = vmatprep.subr.mxu1 %v2452_v1 }
  0x3d   : > { %818 = vmatpush2.msra.mxu0 %v520_v25  ;;  %2425 = vmatpush2.msra.mxu1 %v520_v25  ;;  %v560_v25 = vld [vmem:[%s3761_s1 + $0x1f8] sm:$0xff] }
  0x3e   : > { %819 = vmatprep.subr.mxu0 %v2452_v1  ;;  %2394 = vmatprep.subr.mxu1 %v2452_v1 }
  0x3f   : > { %820 = vmatpush2.msra.mxu0 %v519_v26  ;;  %2426 = vmatpush2.msra.mxu1 %v519_v26  ;;  %v223_v26 = vld [vmem:[%s2642_s29 + $0x170] sm:$0xff] }
  0x40   : > { %821 = vmatprep.subr.mxu0 %v2452_v1  ;;  %2395 = vmatprep.subr.mxu1 %v2452_v1 }
  0x41   : > { %822 = vmatpush2.msra.mxu0 %v518_v27  ;;  %2427 = vmatpush2.msra.mxu1 %v518_v27  ;;  %v463_v27 = vld [vmem:[%s2642_s29 + $0x8f0] sm:$0xff] }
  0x42   : > { %823 = vmatprep.subr.mxu0 %v2452_v1  ;;  %2396 = vmatprep.subr.mxu1 %v2452_v1 }
  0x43   : > { %824 = vmatpush2.msra.mxu0 %v517_v28  ;;  %2428 = vmatpush2.msra.mxu1 %v517_v28  ;;  %v559_v28 = vld [vmem:[%s3761_s1 + $0x1f0] sm:$0xff] }
  0x44   : > { %825 = vmatprep.subr.mxu0 %v2452_v1  ;;  %2397 = vmatprep.subr.mxu1 %v2452_v1 }
  0x45   : > { %826 = vmatpush2.msra.mxu0 %v516_v29  ;;  %2429 = vmatpush2.msra.mxu1 %v516_v29  ;;  %v222_v29 = vld [vmem:[%s2642_s29 + $0x168] sm:$0xff] }
  0x46   : > { %827 = vmatprep.subr.mxu0 %v2452_v1  ;;  %2398 = vmatprep.subr.mxu1 %v2452_v1 }
  0x47   : > { %828 = vmatpush2.msra.mxu0 %v515_v30  ;;  %2430 = vmatpush2.msra.mxu1 %v515_v30  ;;  %v462_v30 = vld [vmem:[%s2642_s29 + $0x8e8] sm:$0xff] }
  0x48   : > { %829 = vmatprep.subr.mxu0 %v2452_v1  ;;  %2399 = vmatprep.subr.mxu1 %v2452_v1 }
  0x49   : > { %830 = vmatpush2.msra.mxu0 %v514_v31  ;;  %2431 = vmatpush2.msra.mxu1 %v514_v31  ;;  %v558_v31 = vld [vmem:[%s3761_s1 + $0x1e8] sm:$0xff] }
  0x4a   : > { %831 = vmatprep.subr.mxu0 %v2452_v1  ;;  %2400 = vmatprep.subr.mxu1 %v2452_v1 }
  0x4b   : > { %832 = vmatpush2.msra.mxu0 %v513_v32  ;;  %2432 = vmatpush2.msra.mxu1 %v513_v32  ;;  %v228_v32 = vld [vmem:[%s2642_s29 + $0x198] sm:$0xff] }
  0x4c   : > { %833 = vmatprep.mubr.f32.mxu0 %v178_v33  ;;  %1073 = vmatprep.mubr.f32.mxu1 %v418_v34  ;;  %v468_v33 = vld [vmem:[%s2642_s29 + $0x918] sm:$0xff]  ;;  %v557_v34 = vld [vmem:[%s3761_s1 + $0x1e0] sm:$0xff] }
  0x4d   : > { %834 = vmatmul.mubr.f32.vlgmr.msra.gmra.mxu0 %v177_v35  ;;  %1074 = vmatmul.mubr.f32.vlgmr.msra.gmra.mxu1 %v417_v36  ;;  %v227_v35 = vld [vmem:[%s2642_s29 + $0x190] sm:$0xff] }
  0x4e   : > { %1154 = vmatprep.subr.mxu1 %v2452_v1  ;;  %2257 = vmatprep.subr.mxu0 %v568_v37  ;;  %v467_v36 = vld [vmem:[%s2642_s29 + $0x910] sm:$0xff] }
  0x4f   : > { %1155 = vmatpush1.msra.mxu1 %v544_v38  ;;  %2258 = vmatpush3.msra.mxu0 %v568_v37  ;;  %v556_v37 = vld [vmem:[%s3761_s1 + $0x1d8] sm:$0xff]  ;;  %v233_v38 = vld [vmem:[%s2642_s29 + $0x1c0] sm:$0xff] }
  0x50   : > { %1156 = vmatprep.subr.mxu1 %v2452_v1  ;;  %838 = vmatprep.mubr.f32.mxu0 %v183_v39  ;;  %v473_v39 = vld [vmem:[%s2642_s29 + $0x940] sm:$0xff] }
  0x51   : > { %1078 = vmatprep.mubr.f32.mxu1 %v423_v40  ;;  %1157 = vmatpush1.msra.mxu1 %v543_v41  ;;  %v555_v40 = vld [vmem:[%s3761_s1 + $0x1d0] sm:$0xff]  ;;  %v232_v41 = vld [vmem:[%s2642_s29 + $0x1b8] sm:$0xff] }
  0x52   : > { %839 = vmatmul.mubr.f32.gmra.mxu0 %v182_v42  ;;  %1079 = vmatmul.mubr.f32.gmra.mxu1 %v422_v43  ;;  %v472_v42 = vld [vmem:[%s2642_s29 + $0x938] sm:$0xff]  ;;  %v554_v43 = vld [vmem:[%s3761_s1 + $0x1c8] sm:$0xff] }
  0x53   : > { %1158 = vmatprep.subr.mxu1 %v2452_v1  ;;  %843 = vmatprep.mubr.f32.mxu0 %v188_v44  ;;  %v238_v44 = vld [vmem:[%s2642_s29 + $0x1e8] sm:$0xff] }
  0x54   : > { %1159 = vmatpush1.msra.mxu1 %v542_v45  ;;  %1083 = vmatprep.mubr.f32.mxu1 %v428_v46  ;;  %v478_v45 = vld [vmem:[%s2642_s29 + $0x968] sm:$0xff]  ;;  %v553_v46 = vld [vmem:[%s3761_s1 + $0x1c0] sm:$0xff] }
  0x55   : > { %1160 = vmatprep.subr.mxu1 %v2452_v1  ;;  %2259 = vmatprep.subr.mxu0 %v2678_v47 }
  0x56   : > { %1161 = vmatpush1.msra.mxu1 %v541_v48  ;;  %844 = vmatmul.mubr.f32.gmra.mxu0 %v187_v49  ;;  %v477_v48 = vld [vmem:[%s2642_s29 + $0x960] sm:$0xff]  ;;  %v552_v49 = vld [vmem:[%s3761_s1 + $0x1b8] sm:$0xff] }
  0x57   : > { %1084 = vmatmul.mubr.f32.gmra.mxu1 %v427_v50  ;;  %1162 = vmatprep.subr.mxu1 %v2452_v1  ;;  %v243_v50 = vld [vmem:[%s2642_s29 + $0x210] sm:$0xff] }
  0x58   : > { %1163 = vmatpush1.msra.mxu1 %v540_v51  ;;  %848 = vmatprep.mubr.f32.mxu0 %v193_v52  ;;  %v483_v51 = vld [vmem:[%s2642_s29 + $0x990] sm:$0xff] }
  0x59   : > { %1164 = vmatprep.subr.mxu1 %v2452_v1  ;;  %1088 = vmatprep.mubr.f32.mxu1 %v433_v53  ;;  %v551_v52 = vld [vmem:[%s3761_s1 + $0x1b0] sm:$0xff]  ;;  %v242_v53 = vld [vmem:[%s2642_s29 + $0x208] sm:$0xff] }
  0x5a   : > { %1165 = vmatpush1.msra.mxu1 %v539_v54  ;;  %849 = vmatmul.mubr.f32.gmra.mxu0 %v192_v55  ;;  %v482_v54 = vld [vmem:[%s2642_s29 + $0x988] sm:$0xff]  ;;  %v248_v55 = vld [vmem:[%s2642_s29 + $0x238] sm:$0xff] }
  0x5b   : > { %1089 = vmatmul.mubr.f32.gmra.mxu1 %v432_v56  ;;  %1166 = vmatprep.subr.mxu1 %v2452_v1  ;;  %v550_v56 = vld [vmem:[%s3761_s1 + $0x1a8] sm:$0xff] }
  0x5c   : > { %1167 = vmatpush1.msra.mxu1 %v538_v57  ;;  %853 = vmatprep.mubr.f32.mxu0 %v198_v58  ;;  %v488_v57 = vld [vmem:[%s2642_s29 + $0x9b8] sm:$0xff]  ;;  %v565_v58 = vld [vmem:[%s3761_s1 + $0x220] sm:$0xff] }
  0x5d   : > { %1168 = vmatprep.subr.mxu1 %v2452_v1  ;;  %1093 = vmatprep.mubr.f32.mxu1 %v438_v59  ;;  %v549_v59 = vld [vmem:[%s3761_s1 + $0x1a0] sm:$0xff] }
  0x5e   : > { %1169 = vmatpush1.msra.mxu1 %v537_v60  ;;  %854 = vmatmul.mubr.f32.gmra.mxu0 %v197_v61  ;;  %v247_v60 = vld [vmem:[%s2642_s29 + $0x230] sm:$0xff] }
  0x5f   : > { %1094 = vmatmul.mubr.f32.gmra.mxu1 %v437_v62  ;;  %1170 = vmatprep.subr.mxu1 %v2452_v1  ;;  %v487_v61 = vld [vmem:[%s2642_s29 + $0x9b0] sm:$0xff]  ;;  %v548_v62 = vld [vmem:[%s3761_s1 + $0x198] sm:$0xff] }
  0x60   : > { %1171 = vmatpush1.msra.mxu1 %v536_v63  ;;  %858 = vmatprep.mubr.f32.mxu0 %v203_v0  ;;  %v253_v63 = vld [vmem:[%s2642_s29 + $0x260] sm:$0xff] }
  0x61   : > { %1172 = vmatprep.subr.mxu1 %v2452_v1  ;;  %1098 = vmatprep.mubr.f32.mxu1 %v443_v2  ;;  %v493_v0 = vld [vmem:[%s2642_s29 + $0x9e0] sm:$0xff]  ;;  %v547_v2 = vld [vmem:[%s3761_s1 + $0x190] sm:$0xff] }
  0x62   : > { %1173 = vmatpush1.msra.mxu1 %v535_v3  ;;  %859 = vmatmul.mubr.f32.gmra.mxu0 %v202_v4  ;;  %v252_v3 = vld [vmem:[%s2642_s29 + $0x258] sm:$0xff] }
  0x63   : > { %1099 = vmatmul.mubr.f32.gmra.mxu1 %v442_v5  ;;  %1174 = vmatprep.subr.mxu1 %v2452_v1  ;;  %v492_v4 = vld [vmem:[%s2642_s29 + $0x9d8] sm:$0xff]  ;;  %v546_v5 = vld [vmem:[%s3761_s1 + $0x188] sm:$0xff] }
  0x64   : > { %1175 = vmatpush1.msra.mxu1 %v534_v6  ;;  %863 = vmatprep.mubr.f32.mxu0 %v208_v7  ;;  %v258_v6 = vld [vmem:[%s2642_s29 + $0x288] sm:$0xff]  ;;  %v180_v7 = vld [vmem:[%s2642_s29 + $0x18] sm:$0xff] }
  0x65   : > { %1176 = vmatprep.subr.mxu1 %v2452_v1  ;;  %1103 = vmatprep.mubr.f32.mxu1 %v448_v8  ;;  %v545_v8 = vld [vmem:[%s3761_s1 + $0x180] sm:$0xff] }
  0x66   : > { %1177 = vmatpush1.msra.mxu1 %v533_v9  ;;  %864 = vmatmul.mubr.f32.gmra.mxu0 %v207_v10  ;;  %v257_v9 = vld [vmem:[%s2642_s29 + $0x280] sm:$0xff]  ;;  %v179_v10 = vld [vmem:[%s2642_s29 + $0x10] sm:$0xff] }
  0x67   : > { %1104 = vmatmul.mubr.f32.gmra.mxu1 %v447_v11  ;;  %1178 = vmatprep.subr.mxu1 %v2452_v1  ;;  %v263_v11 = vld [vmem:[%s2642_s29 + $0x2b0] sm:$0xff] }
  0x68   : > { %1179 = vmatpush1.msra.mxu1 %v532_v12  ;;  %2260 = vmatpush3.msra.mxu0 %v2678_v47  ;;  %v237_v47 = vld [vmem:[%s2642_s29 + $0x1e0] sm:$0xff] }
  0x69   : > { %1180 = vmatprep.subr.mxu1 %v2452_v1  ;;  %868 = vmatprep.mubr.f32.mxu0 %v213_v13  ;;  %v185_v12 = vld [vmem:[%s2642_s29 + $0x40] sm:$0xff]  ;;  %v564_v13 = vld [vmem:[%s3761_s1 + $0x218] sm:$0xff] }
  0x6a   : > { %1108 = vmatprep.mubr.f32.mxu1 %v453_v14  ;;  %1181 = vmatpush1.msra.mxu1 %v531_v15  ;;  %v262_v14 = vld [vmem:[%s2642_s29 + $0x2a8] sm:$0xff]  ;;  %v184_v15 = vld [vmem:[%s2642_s29 + $0x38] sm:$0xff] }
  0x6b   : > { %869 = vmatmul.mubr.f32.gmra.mxu0 %v212_v16  ;;  %1109 = vmatmul.mubr.f32.gmra.mxu1 %v452_v17  ;;  %v268_v16 = vld [vmem:[%s2642_s29 + $0x2d8] sm:$0xff]  ;;  %v563_v17 = vld [vmem:[%s3761_s1 + $0x210] sm:$0xff] }
  0x6c   : > { %1182 = vmatprep.subr.mxu1 %v2452_v1  ;;  %873 = vmatprep.mubr.f32.mxu0 %v218_v18  ;;  %v267_v18 = vld [vmem:[%s2642_s29 + $0x2d0] sm:$0xff] }
  0x6d   : > { %1183 = vmatpush1.msra.mxu1 %v530_v19  ;;  %1113 = vmatprep.mubr.f32.mxu1 %v458_v20  ;;  %v189_v19 = vld [vmem:[%s2642_s29 + $0x60] sm:$0xff] }
  0x6e   : > { %1184 = vmatprep.subr.mxu1 %v2452_v1  ;;  %2261 = vmatprep.subr.mxu0 %v2757_v21  ;;  %v273_v20 = vld [vmem:[%s2642_s29 + $0x300] sm:$0xff] }
  0x6f   : > { %1185 = vmatpush1.msra.mxu1 %v529_v22  ;;  %874 = vmatmul.mubr.f32.gmra.mxu0 %v217_v23  ;;  %v562_v22 = vld [vmem:[%s3761_s1 + $0x208] sm:$0xff]  ;;  %v272_v23 = vld [vmem:[%s2642_s29 + $0x2f8] sm:$0xff] }
  0x70   : > { %1114 = vmatmul.mubr.f32.gmra.mxu1 %v457_v24  ;;  %1186 = vmatprep.subr.mxu1 %v2452_v1  ;;  %v194_v24 = vld [vmem:[%s2642_s29 + $0x88] sm:$0xff] }
  0x71   : > { %1187 = vmatpush2.msra.mxu1 %v560_v25  ;;  %878 = vmatprep.mubr.f32.mxu0 %v223_v26  ;;  %v278_v25 = vld [vmem:[%s2642_s29 + $0x328] sm:$0xff]  ;;  %v200_v26 = vld [vmem:[%s2642_s29 + $0xb8] sm:$0xff] }
  0x72   : > { %1188 = vmatprep.subr.mxu1 %v2452_v1  ;;  %1118 = vmatprep.mubr.f32.mxu1 %v463_v27  ;;  %v561_v27 = vld [vmem:[%s3761_s1 + $0x200] sm:$0xff] }
  0x73   : > { %1189 = vmatpush2.msra.mxu1 %v559_v28  ;;  %879 = vmatmul.mubr.f32.gmra.mxu0 %v222_v29  ;;  %v277_v28 = vld [vmem:[%s2642_s29 + $0x320] sm:$0xff]  ;;  %v199_v29 = vld [vmem:[%s2642_s29 + $0xb0] sm:$0xff] }
  0x74   : > { %1119 = vmatmul.mubr.f32.gmra.mxu1 %v462_v30  ;;  %1190 = vmatprep.subr.mxu1 %v2452_v1  ;;  %v283_v30 = vld [vmem:[%s2642_s29 + $0x350] sm:$0xff] }
  0x75   : > { %1191 = vmatpush2.msra.mxu1 %v558_v31  ;;  %883 = vmatprep.mubr.f32.mxu0 %v228_v32  ;;  %v205_v31 = vld [vmem:[%s2642_s29 + $0xe0] sm:$0xff]  ;;  %v282_v32 = vld [vmem:[%s2642_s29 + $0x348] sm:$0xff] }
  0x76   : > { %1192 = vmatprep.subr.mxu1 %v2452_v1  ;;  %1123 = vmatprep.mubr.f32.mxu1 %v468_v33  ;;  %v204_v33 = vld [vmem:[%s2642_s29 + $0xd8] sm:$0xff] }
  0x77   : > { %1193 = vmatpush2.msra.mxu1 %v557_v34  ;;  %884 = vmatmul.mubr.f32.gmra.mxu0 %v227_v35  ;;  %v288_v34 = vld [vmem:[%s2642_s29 + $0x378] sm:$0xff]  ;;  %v210_v35 = vld [vmem:[%s2642_s29 + $0x108] sm:$0xff] }
  0x78   : > { %1124 = vmatmul.mubr.f32.gmra.mxu1 %v467_v36  ;;  %1194 = vmatprep.subr.mxu1 %v2452_v1  ;;  %v287_v36 = vld [vmem:[%s2642_s29 + $0x370] sm:$0xff] }
  0x79   : > { %1195 = vmatpush2.msra.mxu1 %v556_v37  ;;  %888 = vmatprep.mubr.f32.mxu0 %v233_v38  ;;  %v209_v37 = vld [vmem:[%s2642_s29 + $0x100] sm:$0xff] }
  0x7a   : > { %1196 = vmatprep.subr.mxu1 %v2452_v1  ;;  %1128 = vmatprep.mubr.f32.mxu1 %v473_v39  ;;  %v293_v38 = vld [vmem:[%s2642_s29 + $0x3a0] sm:$0xff]  ;;  %v215_v39 = vld [vmem:[%s2642_s29 + $0x130] sm:$0xff] }
  0x7b   : > { %1197 = vmatpush2.msra.mxu1 %v555_v40  ;;  %889 = vmatmul.mubr.f32.gmra.mxu0 %v232_v41  ;;  %v292_v40 = vld [vmem:[%s2642_s29 + $0x398] sm:$0xff]  ;;  %v214_v41 = vld [vmem:[%s2642_s29 + $0x128] sm:$0xff] }
  0x7c   : > { %1129 = vmatmul.mubr.f32.gmra.mxu1 %v472_v42  ;;  %1198 = vmatprep.subr.mxu1 %v2452_v1  ;;  %v298_v42 = vld [vmem:[%s2642_s29 + $0x3c8] sm:$0xff] }
  0x7d   : > { %1199 = vmatpush2.msra.mxu1 %v554_v43  ;;  %893 = vmatprep.mubr.f32.mxu0 %v238_v44  ;;  %v220_v43 = vld [vmem:[%s2642_s29 + $0x158] sm:$0xff]  ;;  %v297_v44 = vld [vmem:[%s2642_s29 + $0x3c0] sm:$0xff] }
  0x7e   : > { %1200 = vmatprep.subr.mxu1 %v2452_v1  ;;  %1133 = vmatprep.mubr.f32.mxu1 %v478_v45  ;;  %v219_v45 = vld [vmem:[%s2642_s29 + $0x150] sm:$0xff] }
  0x7f   : > { %1201 = vmatpush2.msra.mxu1 %v553_v46  ;;  %894 = vmatmul.mubr.f32.gmra.mxu0 %v237_v47  ;;  %v303_v46 = vld [vmem:[%s2642_s29 + $0x3f0] sm:$0xff]  ;;  %v225_v47 = vld [vmem:[%s2642_s29 + $0x180] sm:$0xff] }
  0x80   : > { %1134 = vmatmul.mubr.f32.gmra.mxu1 %v477_v48  ;;  %1202 = vmatprep.subr.mxu1 %v2452_v1  ;;  %v302_v48 = vld [vmem:[%s2642_s29 + $0x3e8] sm:$0xff] }
  0x81   : > { %1203 = vmatpush2.msra.mxu1 %v552_v49  ;;  %2262 = vmatpush3.msra.mxu0 %v2757_v21  ;;  %v195_v21 = vld [vmem:[%s2642_s29 + $0x90] sm:$0xff]  ;;  %v224_v49 = vld [vmem:[%s2642_s29 + $0x178] sm:$0xff] }
  0x82   : > { %1204 = vmatprep.subr.mxu1 %v2452_v1  ;;  %898 = vmatprep.mubr.f32.mxu0 %v243_v50  ;;  %v308_v50 = vld [vmem:[%s2642_s29 + $0x418] sm:$0xff] }
  0x83   : > { %1138 = vmatprep.mubr.f32.mxu1 %v483_v51  ;;  %1205 = vmatpush2.msra.mxu1 %v551_v52  ;;  %v230_v51 = vld [vmem:[%s2642_s29 + $0x1a8] sm:$0xff]  ;;  %v307_v52 = vld [vmem:[%s2642_s29 + $0x410] sm:$0xff] }
  0x84   : > { %899 = vmatmul.mubr.f32.gmra.mxu0 %v242_v53  ;;  %1139 = vmatmul.mubr.f32.gmra.mxu1 %v482_v54  ;;  %v229_v53 = vld [vmem:[%s2642_s29 + $0x1a0] sm:$0xff] }
  0x85   : > { %1206 = vmatprep.subr.mxu1 %v2452_v1  ;;  %903 = vmatprep.mubr.f32.mxu0 %v248_v55  ;;  %v313_v54 = vld [vmem:[%s2642_s29 + $0x440] sm:$0xff]  ;;  %v235_v55 = vld [vmem:[%s2642_s29 + $0x1d0] sm:$0xff] }
  0x86   : > { %1207 = vmatpush2.msra.mxu1 %v550_v56  ;;  %1143 = vmatprep.mubr.f32.mxu1 %v488_v57  ;;  %v312_v56 = vld [vmem:[%s2642_s29 + $0x438] sm:$0xff]  ;;  %v234_v57 = vld [vmem:[%s2642_s29 + $0x1c8] sm:$0xff] }
  0x87   : > { %1208 = vmatprep.subr.mxu1 %v2452_v1  ;;  %2263 = vmatprep.subr.mxu0 %v565_v58 }
  0x88   : > { %1209 = vmatpush2.msra.mxu1 %v549_v59  ;;  %904 = vmatmul.mubr.f32.gmra.mxu0 %v247_v60  ;;  %v240_v59 = vld [vmem:[%s2642_s29 + $0x1f8] sm:$0xff]  ;;  %v317_v60 = vld [vmem:[%s2642_s29 + $0x460] sm:$0xff] }
  0x89   : > { %1144 = vmatmul.mubr.f32.gmra.mxu1 %v487_v61  ;;  %1210 = vmatprep.subr.mxu1 %v2452_v1  ;;  %v239_v61 = vld [vmem:[%s2642_s29 + $0x1f0] sm:$0xff] }
  0x8a   : > { %1211 = vmatpush2.msra.mxu1 %v548_v62  ;;  %908 = vmatprep.mubr.f32.mxu0 %v253_v63  ;;  %v323_v62 = vld [vmem:[%s2642_s29 + $0x490] sm:$0xff]  ;;  %v245_v63 = vld [vmem:[%s2642_s29 + $0x220] sm:$0xff] }
  0x8b   : > { %1212 = vmatprep.subr.mxu1 %v2452_v1  ;;  %1148 = vmatprep.mubr.f32.mxu1 %v493_v0  ;;  %v322_v0 = vld [vmem:[%s2642_s29 + $0x488] sm:$0xff] }
  0x8c   : > { %1213 = vmatpush2.msra.mxu1 %v547_v2  ;;  %909 = vmatmul.mubr.f32.gmra.mxu0 %v252_v3  ;;  %v244_v2 = vld [vmem:[%s2642_s29 + $0x218] sm:$0xff] }
  0x8d   : > { %1149 = vmatmul.mubr.f32.gmra.mxu1 %v492_v4  ;;  %1214 = vmatprep.subr.mxu1 %v2452_v1  ;;  %v328_v3 = vld [vmem:[%s2642_s29 + $0x4b8] sm:$0xff]  ;;  %v250_v4 = vld [vmem:[%s2642_s29 + $0x248] sm:$0xff] }
  0x8e   : > { %1215 = vmatpush2.msra.mxu1 %v546_v5  ;;  %913 = vmatprep.mubr.f32.mxu0 %v258_v6  ;;  %v327_v5 = vld [vmem:[%s2642_s29 + $0x4b0] sm:$0xff]  ;;  %v249_v6 = vld [vmem:[%s2642_s29 + $0x240] sm:$0xff] }
  0x8f   : > { %1216 = vmatprep.subr.mxu1 %v2452_v1  ;;  %1218 = vmatprep.mubr.f32.mxu1 %v180_v7  ;;  %v190_v1 = vld [vmem:[%s2642_s29 + $0x68] sm:$0xff]  ;;  %v333_v7 = vld [vmem:[%s2642_s29 + $0x4e0] sm:$0xff] }
  0x90   : > { %1217 = vmatpush2.msra.mxu1 %v545_v8  ;;  %914 = vmatmul.mubr.f32.gmra.mxu0 %v257_v9  ;;  %v255_v8 = vld [vmem:[%s2642_s29 + $0x270] sm:$0xff]  ;;  %v332_v9 = vld [vmem:[%s2642_s29 + $0x4d8] sm:$0xff] }
  0x91   : > { %1219 = vmatmul.mubr.f32.vlgmr.msra.gmra.mxu1 %v179_v10  ;;  %918 = vmatprep.mubr.f32.mxu0 %v263_v11  ;;  %v254_v10 = vld [vmem:[%s2642_s29 + $0x268] sm:$0xff] }
  0x92   : > { %1223 = vmatprep.mubr.f32.mxu1 %v185_v12  ;;  %2264 = vmatpush3.msra.mxu0 %v565_v58  ;;  %v318_v58 = vld [vmem:[%s2642_s29 + $0x468] sm:$0xff]  ;;  %v260_v12 = vld [vmem:[%s2642_s29 + $0x298] sm:$0xff] }
  0x93   : > { %2265 = vmatprep.subr.mxu0 %v564_v13  ;;  %v338_v11 = vld [vmem:[%s2642_s29 + $0x508] sm:$0xff] }
  0x94   : > { %919 = vmatmul.mubr.f32.gmra.mxu0 %v262_v14  ;;  %v259_v14 = vld [vmem:[%s2642_s29 + $0x290] sm:$0xff] }
  0x95   : > { %1224 = vmatmul.mubr.f32.gmra.mxu1 %v184_v15  ;;  %923 = vmatprep.mubr.f32.mxu0 %v268_v16  ;;  %v343_v15 = vld [vmem:[%s2642_s29 + $0x530] sm:$0xff]  ;;  %v265_v16 = vld [vmem:[%s2642_s29 + $0x2c0] sm:$0xff] }
  0x96   : > { %1228 = vmatprep.mubr.f32.mxu1 %v190_v1  ;;  %2266 = vmatpush3.msra.mxu0 %v564_v13  ;;  %v337_v13 = vld [vmem:[%s2642_s29 + $0x500] sm:$0xff]  ;;  %v342_v1 = vld [vmem:[%s2642_s29 + $0x528] sm:$0xff] }
  0x97   : > { %2267 = vmatprep.subr.mxu0 %v563_v17 }
  0x98   : > { %924 = vmatmul.mubr.f32.gmra.mxu0 %v267_v18  ;;  %v348_v18 = vld [vmem:[%s2642_s29 + $0x558] sm:$0xff] }
  0x99   : > { %1229 = vmatmul.mubr.f32.gmra.mxu1 %v189_v19  ;;  %928 = vmatprep.mubr.f32.mxu0 %v273_v20  ;;  %v270_v19 = vld [vmem:[%s2642_s29 + $0x2e8] sm:$0xff]  ;;  %v347_v20 = vld [vmem:[%s2642_s29 + $0x550] sm:$0xff] }
  0x9a   : > { %1233 = vmatprep.mubr.f32.mxu1 %v195_v21  ;;  %2268 = vmatpush3.msra.mxu0 %v563_v17  ;;  %v264_v17 = vld [vmem:[%s2642_s29 + $0x2b8] sm:$0xff]  ;;  %v269_v21 = vld [vmem:[%s2642_s29 + $0x2e0] sm:$0xff] }
  0x9b   : > { %2269 = vmatprep.subr.mxu0 %v562_v22 }
  0x9c   : > { %929 = vmatmul.mubr.f32.gmra.mxu0 %v272_v23  ;;  %v275_v23 = vld [vmem:[%s2642_s29 + $0x310] sm:$0xff] }
  0x9d   : > { %1234 = vmatmul.mubr.f32.gmra.mxu1 %v194_v24  ;;  %933 = vmatprep.mubr.f32.mxu0 %v278_v25  ;;  %v352_v24 = vld [vmem:[%s2642_s29 + $0x578] sm:$0xff]  ;;  %v274_v25 = vld [vmem:[%s2642_s29 + $0x308] sm:$0xff] }
  0x9e   : > { %1238 = vmatprep.mubr.f32.mxu1 %v200_v26  ;;  %2270 = vmatpush3.msra.mxu0 %v562_v22  ;;  %v353_v22 = vld [vmem:[%s2642_s29 + $0x580] sm:$0xff]  ;;  %v358_v26 = vld [vmem:[%s2642_s29 + $0x5a8] sm:$0xff] }
  0x9f   : > { %2271 = vmatprep.subr.mxu0 %v561_v27 }
  0xa0   : > { %934 = vmatmul.mubr.f32.gmra.mxu0 %v277_v28  ;;  %v357_v28 = vld [vmem:[%s2642_s29 + $0x5a0] sm:$0xff] }
  0xa1   : > { %1239 = vmatmul.mubr.f32.gmra.mxu1 %v199_v29  ;;  %938 = vmatprep.mubr.f32.mxu0 %v283_v30  ;;  %v279_v29 = vld [vmem:[%s2642_s29 + $0x330] sm:$0xff] }
  0xa2   : > { %1243 = vmatprep.mubr.f32.mxu1 %v205_v31  ;;  %2272 = vmatpush3.msra.mxu0 %v561_v27  ;;  %v280_v27 = vld [vmem:[%s2642_s29 + $0x338] sm:$0xff]  ;;  %v363_v30 = vld [vmem:[%s2642_s29 + $0x5d0] sm:$0xff]  ;;  %v285_v31 = vld [vmem:[%s2642_s29 + $0x360] sm:$0xff] }
  0xa4   : > { %939 = vmatmul.mubr.f32.gmra.mxu0 %v282_v32  ;;  %v362_v32 = vld [vmem:[%s2642_s29 + $0x5c8] sm:$0xff] }
  0xa5   : > { %1244 = vmatmul.mubr.f32.gmra.mxu1 %v204_v33  ;;  %943 = vmatprep.mubr.f32.mxu0 %v288_v34  ;;  %v284_v33 = vld [vmem:[%s2642_s29 + $0x358] sm:$0xff] }
  0xa6   : > { %1248 = vmatprep.mubr.f32.mxu1 %v210_v35  ;;  %v368_v34 = vld [vmem:[%s2642_s29 + $0x5f8] sm:$0xff]  ;;  %v290_v35 = vld [vmem:[%s2642_s29 + $0x388] sm:$0xff] }
  0xa8   : > { %944 = vmatmul.mubr.f32.gmra.mxu0 %v287_v36  ;;  %v367_v36 = vld [vmem:[%s2642_s29 + $0x5f0] sm:$0xff] }
  0xa9   : > { %1249 = vmatmul.mubr.f32.gmra.mxu1 %v209_v37  ;;  %948 = vmatprep.mubr.f32.mxu0 %v293_v38  ;;  %v289_v37 = vld [vmem:[%s2642_s29 + $0x380] sm:$0xff] }
  0xaa   : > { %1253 = vmatprep.mubr.f32.mxu1 %v215_v39  ;;  %v373_v38 = vld [vmem:[%s2642_s29 + $0x620] sm:$0xff]  ;;  %v295_v39 = vld [vmem:[%s2642_s29 + $0x3b0] sm:$0xff] }
  0xac   : > { %949 = vmatmul.mubr.f32.gmra.mxu0 %v292_v40  ;;  %v372_v40 = vld [vmem:[%s2642_s29 + $0x618] sm:$0xff] }
  0xad   : > { %1254 = vmatmul.mubr.f32.gmra.mxu1 %v214_v41  ;;  %953 = vmatprep.mubr.f32.mxu0 %v298_v42  ;;  %v294_v41 = vld [vmem:[%s2642_s29 + $0x3a8] sm:$0xff] }
  0xae   : > { %1258 = vmatprep.mubr.f32.mxu1 %v220_v43  ;;  %v378_v42 = vld [vmem:[%s2642_s29 + $0x648] sm:$0xff]  ;;  %v300_v43 = vld [vmem:[%s2642_s29 + $0x3d8] sm:$0xff] }
  0xb0   : > { %954 = vmatmul.mubr.f32.gmra.mxu0 %v297_v44  ;;  %v377_v44 = vld [vmem:[%s2642_s29 + $0x640] sm:$0xff] }
  0xb1   : > { %1259 = vmatmul.mubr.f32.gmra.mxu1 %v219_v45  ;;  %958 = vmatprep.mubr.f32.mxu0 %v303_v46  ;;  %v299_v45 = vld [vmem:[%s2642_s29 + $0x3d0] sm:$0xff] }
  0xb2   : > { %1263 = vmatprep.mubr.f32.mxu1 %v225_v47  ;;  %v383_v46 = vld [vmem:[%s2642_s29 + $0x670] sm:$0xff]  ;;  %v305_v47 = vld [vmem:[%s2642_s29 + $0x400] sm:$0xff] }
  0xb4   : > { %959 = vmatmul.mubr.f32.gmra.mxu0 %v302_v48  ;;  %v382_v48 = vld [vmem:[%s2642_s29 + $0x668] sm:$0xff] }
  0xb5   : > { %1264 = vmatmul.mubr.f32.gmra.mxu1 %v224_v49  ;;  %963 = vmatprep.mubr.f32.mxu0 %v308_v50  ;;  %v304_v49 = vld [vmem:[%s2642_s29 + $0x3f8] sm:$0xff] }
  0xb6   : > { %1268 = vmatprep.mubr.f32.mxu1 %v230_v51  ;;  %v388_v50 = vld [vmem:[%s2642_s29 + $0x698] sm:$0xff]  ;;  %v310_v51 = vld [vmem:[%s2642_s29 + $0x428] sm:$0xff] }
  0xb8   : > { %964 = vmatmul.mubr.f32.gmra.mxu0 %v307_v52  ;;  %v387_v52 = vld [vmem:[%s2642_s29 + $0x690] sm:$0xff] }
  0xb9   : > { %1269 = vmatmul.mubr.f32.gmra.mxu1 %v229_v53  ;;  %968 = vmatprep.mubr.f32.mxu0 %v313_v54  ;;  %v309_v53 = vld [vmem:[%s2642_s29 + $0x420] sm:$0xff] }
  0xba   : > { %1273 = vmatprep.mubr.f32.mxu1 %v235_v55  ;;  %v393_v54 = vld [vmem:[%s2642_s29 + $0x6c0] sm:$0xff]  ;;  %v315_v55 = vld [vmem:[%s2642_s29 + $0x450] sm:$0xff] }
  0xbc   : > { %969 = vmatmul.mubr.f32.gmra.mxu0 %v312_v56  ;;  %v392_v56 = vld [vmem:[%s2642_s29 + $0x6b8] sm:$0xff] }
  0xbd   : > { %1274 = vmatmul.mubr.f32.gmra.mxu1 %v234_v57  ;;  %973 = vmatprep.mubr.f32.mxu0 %v318_v58  ;;  %v314_v57 = vld [vmem:[%s2642_s29 + $0x448] sm:$0xff] }
  0xbe   : > { %1278 = vmatprep.mubr.f32.mxu1 %v240_v59  ;;  %v398_v58 = vld [vmem:[%s2642_s29 + $0x6e8] sm:$0xff]  ;;  %v320_v59 = vld [vmem:[%s2642_s29 + $0x478] sm:$0xff] }
  0xc0   : > { %974 = vmatmul.mubr.f32.gmra.mxu0 %v317_v60  ;;  %v397_v60 = vld [vmem:[%s2642_s29 + $0x6e0] sm:$0xff] }
  0xc1   : > { %1279 = vmatmul.mubr.f32.gmra.mxu1 %v239_v61  ;;  %978 = vmatprep.mubr.f32.mxu0 %v323_v62  ;;  %v319_v61 = vld [vmem:[%s2642_s29 + $0x470] sm:$0xff] }
  0xc2   : > { %1283 = vmatprep.mubr.f32.mxu1 %v245_v63  ;;  %v403_v62 = vld [vmem:[%s2642_s29 + $0x710] sm:$0xff]  ;;  %v325_v63 = vld [vmem:[%s2642_s29 + $0x4a0] sm:$0xff] }
  0xc4   : > { %979 = vmatmul.mubr.f32.gmra.mxu0 %v322_v0  ;;  %v402_v0 = vld [vmem:[%s2642_s29 + $0x708] sm:$0xff] }
  0xc5   : > { %1284 = vmatmul.mubr.f32.gmra.mxu1 %v244_v2  ;;  %983 = vmatprep.mubr.f32.mxu0 %v328_v3  ;;  %v324_v2 = vld [vmem:[%s2642_s29 + $0x498] sm:$0xff] }
  0xc6   : > { %1288 = vmatprep.mubr.f32.mxu1 %v250_v4  ;;  %v408_v3 = vld [vmem:[%s2642_s29 + $0x738] sm:$0xff]  ;;  %v330_v4 = vld [vmem:[%s2642_s29 + $0x4c8] sm:$0xff] }
  0xc8   : > { %984 = vmatmul.mubr.f32.gmra.mxu0 %v327_v5  ;;  %v407_v5 = vld [vmem:[%s2642_s29 + $0x730] sm:$0xff] }
  0xc9   : > { %1289 = vmatmul.mubr.f32.gmra.mxu1 %v249_v6  ;;  %988 = vmatprep.mubr.f32.mxu0 %v333_v7  ;;  %v329_v6 = vld [vmem:[%s2642_s29 + $0x4c0] sm:$0xff] }
  0xca   : > { %1293 = vmatprep.mubr.f32.mxu1 %v255_v8  ;;  %v413_v7 = vld [vmem:[%s2642_s29 + $0x760] sm:$0xff]  ;;  %v335_v8 = vld [vmem:[%s2642_s29 + $0x4f0] sm:$0xff] }
  0xcc   : > { %989 = vmatmul.mubr.f32.gmra.mxu0 %v332_v9  ;;  %v412_v9 = vld [vmem:[%s2642_s29 + $0x758] sm:$0xff] }
  0xcd   : > { %1294 = vmatmul.mubr.f32.gmra.mxu1 %v254_v10  ;;  %993 = vmatprep.mubr.f32.mxu0 %v338_v11  ;;  %v334_v10 = vld [vmem:[%s2642_s29 + $0x4e8] sm:$0xff]  ;;  %v181_v11 = vld [vmem:[%s2642_s29 + $0x20] sm:$0xff] }
  0xce   : > { %1298 = vmatprep.mubr.f32.mxu1 %v260_v12  ;;  %v340_v12 = vld [vmem:[%s2642_s29 + $0x518] sm:$0xff] }
  0xd0   : > { %994 = vmatmul.mubr.f32.gmra.mxu0 %v337_v13 }
  0xd1   : > { %1299 = vmatmul.mubr.f32.gmra.mxu1 %v259_v14  ;;  %998 = vmatprep.mubr.f32.mxu0 %v343_v15  ;;  %v186_v15 = vld [vmem:[%s2642_s29 + $0x48] sm:$0xff] }
  0xd2   : > { %1303 = vmatprep.mubr.f32.mxu1 %v265_v16  ;;  %v339_v16 = vld [vmem:[%s2642_s29 + $0x510] sm:$0xff] }
  0xd4   : > { %999 = vmatmul.mubr.f32.gmra.mxu0 %v342_v1  ;;  %v191_v1 = vld [vmem:[%s2642_s29 + $0x70] sm:$0xff] }
  0xd5   : > { %1304 = vmatmul.mubr.f32.gmra.mxu1 %v264_v17  ;;  %1003 = vmatprep.mubr.f32.mxu0 %v348_v18 }
  0xd6   : > { %1308 = vmatprep.mubr.f32.mxu1 %v270_v19  ;;  %v345_v19 = vld [vmem:[%s2642_s29 + $0x540] sm:$0xff] }
  0xd8   : > { %1004 = vmatmul.mubr.f32.gmra.mxu0 %v347_v20  ;;  %v196_v20 = vld [vmem:[%s2642_s29 + $0x98] sm:$0xff] }
  0xd9   : > { %1309 = vmatmul.mubr.f32.gmra.mxu1 %v269_v21  ;;  %1008 = vmatprep.mubr.f32.mxu0 %v353_v22 }
  0xda   : > { %1313 = vmatprep.mubr.f32.mxu1 %v275_v23  ;;  %v344_v23 = vld [vmem:[%s2642_s29 + $0x538] sm:$0xff] }
  0xdc   : > { %1009 = vmatmul.mubr.f32.gmra.mxu0 %v352_v24  ;;  %v201_v24 = vld [vmem:[%s2642_s29 + $0xc0] sm:$0xff] }
  0xdd   : > { %1314 = vmatmul.mubr.f32.gmra.mxu1 %v274_v25  ;;  %1013 = vmatprep.mubr.f32.mxu0 %v358_v26  ;;  %v350_v25 = vld [vmem:[%s2642_s29 + $0x568] sm:$0xff] }
  0xde   : > { %1318 = vmatprep.mubr.f32.mxu1 %v280_v27 }
  0xe0   : > { %1014 = vmatmul.mubr.f32.gmra.mxu0 %v357_v28  ;;  %v206_v28 = vld [vmem:[%s2642_s29 + $0xe8] sm:$0xff] }
  0xe1   : > { %1319 = vmatmul.mubr.f32.gmra.mxu1 %v279_v29  ;;  %1018 = vmatprep.mubr.f32.mxu0 %v363_v30  ;;  %v349_v30 = vld [vmem:[%s2642_s29 + $0x560] sm:$0xff] }
  0xe2   : > { %1323 = vmatprep.mubr.f32.mxu1 %v285_v31  ;;  %v211_v31 = vld [vmem:[%s2642_s29 + $0x110] sm:$0xff] }
  0xe4   : > { %1019 = vmatmul.mubr.f32.gmra.mxu0 %v362_v32 }
  0xe5   : > { %1324 = vmatmul.mubr.f32.gmra.mxu1 %v284_v33  ;;  %1023 = vmatprep.mubr.f32.mxu0 %v368_v34  ;;  %v355_v33 = vld [vmem:[%s2642_s29 + $0x590] sm:$0xff] }
  0xe6   : > { %1328 = vmatprep.mubr.f32.mxu1 %v290_v35 }
  0xe8   : > { %1024 = vmatmul.mubr.f32.gmra.mxu0 %v367_v36  ;;  %v216_v36 = vld [vmem:[%s2642_s29 + $0x138] sm:$0xff] }
  0xe9   : > { %1329 = vmatmul.mubr.f32.gmra.mxu1 %v289_v37  ;;  %1028 = vmatprep.mubr.f32.mxu0 %v373_v38  ;;  %v354_v38 = vld [vmem:[%s2642_s29 + $0x588] sm:$0xff] }
  0xea   : > { %1333 = vmatprep.mubr.f32.mxu1 %v295_v39  ;;  %v221_v39 = vld [vmem:[%s2642_s29 + $0x160] sm:$0xff] }
  0xec   : > { %1029 = vmatmul.mubr.f32.gmra.mxu0 %v372_v40 }
  0xed   : > { %1334 = vmatmul.mubr.f32.gmra.mxu1 %v294_v41  ;;  %1033 = vmatprep.mubr.f32.mxu0 %v378_v42  ;;  %v360_v41 = vld [vmem:[%s2642_s29 + $0x5b8] sm:$0xff] }
  0xee   : > { %1338 = vmatprep.mubr.f32.mxu1 %v300_v43 }
  0xf0   : > { %1034 = vmatmul.mubr.f32.gmra.mxu0 %v377_v44  ;;  %v226_v44 = vld [vmem:[%s2642_s29 + $0x188] sm:$0xff] }
  0xf1   : > { %1339 = vmatmul.mubr.f32.gmra.mxu1 %v299_v45  ;;  %1038 = vmatprep.mubr.f32.mxu0 %v383_v46  ;;  %v359_v46 = vld [vmem:[%s2642_s29 + $0x5b0] sm:$0xff] }
  0xf2   : > { %1343 = vmatprep.mubr.f32.mxu1 %v305_v47  ;;  %v231_v47 = vld [vmem:[%s2642_s29 + $0x1b0] sm:$0xff] }
  0xf4   : > { %1039 = vmatmul.mubr.f32.gmra.mxu0 %v382_v48 }
  0xf5   : > { %1344 = vmatmul.mubr.f32.gmra.mxu1 %v304_v49  ;;  %1043 = vmatprep.mubr.f32.mxu0 %v388_v50  ;;  %v365_v49 = vld [vmem:[%s2642_s29 + $0x5e0] sm:$0xff] }
  0xf6   : > { %1348 = vmatprep.mubr.f32.mxu1 %v310_v51 }
  0xf8   : > { %1044 = vmatmul.mubr.f32.gmra.mxu0 %v387_v52  ;;  %v236_v52 = vld [vmem:[%s2642_s29 + $0x1d8] sm:$0xff] }
  0xf9   : > { %1349 = vmatmul.mubr.f32.gmra.mxu1 %v309_v53  ;;  %1048 = vmatprep.mubr.f32.mxu0 %v393_v54  ;;  %v364_v54 = vld [vmem:[%s2642_s29 + $0x5d8] sm:$0xff] }
  0xfa   : > { %1353 = vmatprep.mubr.f32.mxu1 %v315_v55  ;;  %v241_v55 = vld [vmem:[%s2642_s29 + $0x200] sm:$0xff] }
  0xfc   : > { %1049 = vmatmul.mubr.f32.gmra.mxu0 %v392_v56 }
  0xfd   : > { %1354 = vmatmul.mubr.f32.gmra.mxu1 %v314_v57  ;;  %1053 = vmatprep.mubr.f32.mxu0 %v398_v58  ;;  %v370_v57 = vld [vmem:[%s2642_s29 + $0x608] sm:$0xff] }
  0xfe   : > { %1358 = vmatprep.mubr.f32.mxu1 %v320_v59 }
 0x100   : > { %1054 = vmatmul.mubr.f32.gmra.mxu0 %v397_v60  ;;  %v246_v60 = vld [vmem:[%s2642_s29 + $0x228] sm:$0xff] }
 0x101   : > { %1359 = vmatmul.mubr.f32.gmra.mxu1 %v319_v61  ;;  %1058 = vmatprep.mubr.f32.mxu0 %v403_v62  ;;  %v369_v62 = vld [vmem:[%s2642_s29 + $0x600] sm:$0xff] }
 0x102   : > { %1363 = vmatprep.mubr.f32.mxu1 %v325_v63  ;;  %v251_v63 = vld [vmem:[%s2642_s29 + $0x250] sm:$0xff] }
 0x104   : > { %1059 = vmatmul.mubr.f32.gmra.mxu0 %v402_v0 }
 0x105   : > { %1364 = vmatmul.mubr.f32.gmra.mxu1 %v324_v2  ;;  %1063 = vmatprep.mubr.f32.mxu0 %v408_v3  ;;  %v375_v2 = vld [vmem:[%s2642_s29 + $0x630] sm:$0xff] }
 0x106   : > { %1368 = vmatprep.mubr.f32.mxu1 %v330_v4 }
 0x108   : > { %1064 = vmatmul.mubr.f32.gmra.mxu0 %v407_v5  ;;  %v256_v5 = vld [vmem:[%s2642_s29 + $0x278] sm:$0xff] }
 0x109   : > { %1369 = vmatmul.mubr.f32.gmra.mxu1 %v329_v6  ;;  %1068 = vmatprep.mubr.f32.mxu0 %v413_v7  ;;  %v374_v6 = vld [vmem:[%s2642_s29 + $0x628] sm:$0xff]  ;;  %v261_v7 = vld [vmem:[%s2642_s29 + $0x2a0] sm:$0xff] }
 0x10a   : > { %1373 = vmatprep.mubr.f32.mxu1 %v335_v8 }
 0x10c   : > { %1069 = vmatmul.mubr.f32.gmra.mxu0 %v412_v9 }
 0x10d   : > { %1374 = vmatmul.mubr.f32.gmra.mxu1 %v334_v10  ;;  %2273 = vmatprep.mubr.msk.f32.mxu0 %vm576_vm0, %v181_v11  ;;  %v3006_v13 = vpop.f32.mrf.mxu0  ;;  %v3008_v14 = vpop.f32.mrf.mxu1  ;;  %v380_v10 = vld [vmem:[%s2642_s29 + $0x658] sm:$0xff] }
 0x10e   : > { %1378 = vmatprep.mubr.f32.mxu1 %v340_v12 }
 0x10f   : > { %v837_v17 = vpop.f32.mrf.mxu0  ;;  %v1077_v18 = vpop.f32.mrf.mxu1 }
 0x110   : > { %2274 = vmatmul.mubr.msk.f32.vlgmr.msra.gmra.mxu0 %vm576_vm0, %v186_v15  ;;  %v266_v15 = vld [vmem:[%s2642_s29 + $0x2c8] sm:$0xff]  ;;  %v385_v18 = vld [vmem:[%s2642_s29 + $0x680] sm:$0xff] }
 0x111   : > { %1379 = vmatmul.mubr.f32.gmra.mxu1 %v339_v16  ;;  %2276 = vmatprep.mubr.msk.f32.mxu0 %vm576_vm0, %v191_v1  ;;  %v379_v16 = vld [vmem:[%s2642_s29 + $0x650] sm:$0xff] }
 0x112   : > { %1383 = vmatprep.mubr.f32.mxu1 %v345_v19  ;;  %v3017_v21 = vpop.f32.mrf.mxu0  ;;  %v3019_v22 = vpop.f32.mrf.mxu1  ;;  %v271_v1 = vld [vmem:[%s2642_s29 + $0x2f0] sm:$0xff] }
 0x114   : > { %2277 = vmatmul.mubr.msk.f32.gmra.mxu0 %vm576_vm0, %v196_v20  ;;  %v842_v26 = vpop.f32.mrf.mxu0  ;;  %v1082_v27 = vpop.f32.mrf.mxu1 }
 0x115   : > { %1384 = vmatmul.mubr.f32.gmra.mxu1 %v344_v23  ;;  %2279 = vmatprep.mubr.msk.f32.mxu0 %vm576_vm0, %v201_v24  ;;  %v276_v23 = vld [vmem:[%s2642_s29 + $0x318] sm:$0xff]  ;;  %v281_v26 = vld [vmem:[%s2642_s29 + $0x340] sm:$0xff] }
 0x116   : > { %1388 = vmatprep.mubr.f32.mxu1 %v350_v25  ;;  %v3027_v29 = vpop.f32.mrf.mxu0  ;;  %v384_v25 = vld [vmem:[%s2642_s29 + $0x678] sm:$0xff] }
 0x117   : > { %v3031_v32 = vpop.f32.mrf.mxu1 }
 0x118   : > { %3764 = vst [vmem:[#allocation2_spill] sm:$0xff] %v3031_v32  ;;  %2280 = vmatmul.mubr.msk.f32.gmra.mxu0 %vm576_vm0, %v206_v28  ;;  %v847_v34 = vpop.f32.mrf.mxu0  ;;  %v390_v28 = vld [vmem:[%s2642_s29 + $0x6a8] sm:$0xff] }
 0x119   : > { %1389 = vmatmul.mubr.f32.gmra.mxu1 %v349_v30  ;;  %v1087_v35 = vpop.f32.mrf.mxu1  ;;  %2282 = vmatprep.mubr.msk.f32.mxu0 %vm576_vm0, %v211_v31 }
 0x11a   : > { %1393 = vmatprep.mubr.f32.mxu1 %v355_v33  ;;  %v3037_v37 = vpop.f32.mrf.mxu0  ;;  %v286_v33 = vld [vmem:[%s2642_s29 + $0x368] sm:$0xff]  ;;  %v389_v35 = vld [vmem:[%s2642_s29 + $0x6a0] sm:$0xff] }
 0x11b   : > { %v3041_v40 = vpop.f32.mrf.mxu1 }
 0x11c   : > { %3765 = vst [vmem:[#allocation3_spill] sm:$0xff] %v3041_v40  ;;  %2283 = vmatmul.mubr.msk.f32.gmra.mxu0 %vm576_vm0, %v216_v36  ;;  %v852_v42 = vpop.f32.mrf.mxu0  ;;  %v291_v36 = vld [vmem:[%s2642_s29 + $0x390] sm:$0xff] }
 0x11d   : > { %1394 = vmatmul.mubr.f32.gmra.mxu1 %v354_v38  ;;  %v1092_v43 = vpop.f32.mrf.mxu1  ;;  %2285 = vmatprep.mubr.msk.f32.mxu0 %vm576_vm0, %v221_v39  ;;  %v395_v39 = vld [vmem:[%s2642_s29 + $0x6d0] sm:$0xff] }
 0x11e   : > { %1398 = vmatprep.mubr.f32.mxu1 %v360_v41  ;;  %v3047_v45 = vpop.f32.mrf.mxu0  ;;  %v296_v43 = vld [vmem:[%s2642_s29 + $0x3b8] sm:$0xff] }
 0x11f   : > { %v3051_v48 = vpop.f32.mrf.mxu1 }
 0x120   : > { %3766 = vst [vmem:[#allocation4_spill] sm:$0xff] %v3051_v48  ;;  %2286 = vmatmul.mubr.msk.f32.gmra.mxu0 %vm576_vm0, %v226_v44  ;;  %v857_v50 = vpop.f32.mrf.mxu0 }
 0x121   : > { %1399 = vmatmul.mubr.f32.gmra.mxu1 %v359_v46  ;;  %v1097_v51 = vpop.f32.mrf.mxu1  ;;  %2288 = vmatprep.mubr.msk.f32.mxu0 %vm576_vm0, %v231_v47  ;;  %v394_v46 = vld [vmem:[%s2642_s29 + $0x6c8] sm:$0xff]  ;;  %v301_v47 = vld [vmem:[%s2642_s29 + $0x3e0] sm:$0xff]  ;;  %v400_v50 = vld [vmem:[%s2642_s29 + $0x6f8] sm:$0xff] }
 0x122   : > { %1403 = vmatprep.mubr.f32.mxu1 %v365_v49  ;;  %v3057_v53 = vpop.f32.mrf.mxu0 }
 0x123   : > { %v3061_v56 = vpop.f32.mrf.mxu1 }
 0x124   : > { %3767 = vst [vmem:[#allocation5_spill] sm:$0xff] %v3061_v56  ;;  %2289 = vmatmul.mubr.msk.f32.gmra.mxu0 %vm576_vm0, %v236_v52  ;;  %v862_v58 = vpop.f32.mrf.mxu0 }
 0x125   : > { %1404 = vmatmul.mubr.f32.gmra.mxu1 %v364_v54  ;;  %v1102_v59 = vpop.f32.mrf.mxu1  ;;  %2291 = vmatprep.mubr.msk.f32.mxu0 %vm576_vm0, %v241_v55  ;;  %v306_v54 = vld [vmem:[%s2642_s29 + $0x408] sm:$0xff]  ;;  %v311_v58 = vld [vmem:[%s2642_s29 + $0x430] sm:$0xff] }
 0x126   : > { %1408 = vmatprep.mubr.f32.mxu1 %v370_v57  ;;  %v3067_v61 = vpop.f32.mrf.mxu0  ;;  %v399_v57 = vld [vmem:[%s2642_s29 + $0x6f0] sm:$0xff] }
 0x127   : > { %v3071_v0 = vpop.f32.mrf.mxu1 }
 0x128   : > { %3768 = vst [vmem:[#allocation6_spill] sm:$0xff] %v3071_v0  ;;  %2292 = vmatmul.mubr.msk.f32.gmra.mxu0 %vm576_vm0, %v246_v60  ;;  %v867_v3 = vpop.f32.mrf.mxu0  ;;  %v405_v60 = vld [vmem:[%s2642_s29 + $0x720] sm:$0xff] }
 0x129   : > { %1409 = vmatmul.mubr.f32.gmra.mxu1 %v369_v62  ;;  %v1107_v4 = vpop.f32.mrf.mxu1  ;;  %2294 = vmatprep.mubr.msk.f32.mxu0 %vm576_vm0, %v251_v63 }
 0x12a   : > { %1413 = vmatprep.mubr.f32.mxu1 %v375_v2  ;;  %v316_v2 = vld [vmem:[%s2642_s29 + $0x458] sm:$0xff] }
 0x12b   : > { %v3079_v8 = vpop.f32.mrf.mxu0  ;;  %v3081_v9 = vpop.f32.mrf.mxu1  ;;  %v404_v4 = vld [vmem:[%s2642_s29 + $0x718] sm:$0xff] }
 0x12c   : > { %3769 = vst [vmem:[#allocation7_spill] sm:$0xff] %v3081_v9  ;;  %2295 = vmatmul.mubr.msk.f32.gmra.mxu0 %vm576_vm0, %v256_v5  ;;  %v321_v5 = vld [vmem:[%s2642_s29 + $0x480] sm:$0xff] }
 0x12d   : > { %1414 = vmatmul.mubr.f32.gmra.mxu1 %v374_v6  ;;  %v872_v11 = vpop.f32.mrf.mxu0  ;;  %v1112_v12 = vpop.f32.mrf.mxu1  ;;  %2297 = vmatprep.mubr.msk.f32.mxu0 %vm576_vm0, %v261_v7  ;;  %v410_v6 = vld [vmem:[%s2642_s29 + $0x748] sm:$0xff] }
 0x12e   : > { %1418 = vmatprep.mubr.f32.mxu1 %v380_v10  ;;  %v326_v11 = vld [vmem:[%s2642_s29 + $0x4a8] sm:$0xff] }
 0x12f   : > { %v3089_v17 = vpop.f32.mrf.mxu0 }
 0x130   : > { %v3092_v19 = vpop.f32.mrf.mxu1  ;;  %2298 = vmatmul.mubr.msk.f32.gmra.mxu0 %vm576_vm0, %v266_v15 }
 0x131   : > { %3770 = vst [vmem:[#allocation8_spill] sm:$0xff] %v3092_v19  ;;  %1419 = vmatmul.mubr.f32.gmra.mxu1 %v379_v16  ;;  %v877_v20 = vpop.f32.mrf.mxu0  ;;  %2300 = vmatprep.mubr.msk.f32.mxu0 %vm576_vm0, %v271_v1  ;;  %v409_v16 = vld [vmem:[%s2642_s29 + $0x740] sm:$0xff]  ;;  %v331_v1 = vld [vmem:[%s2642_s29 + $0x4d0] sm:$0xff] }
 0x132   : > { %v1117_v24 = vpop.f32.mrf.mxu1  ;;  %1423 = vmatprep.mubr.f32.mxu1 %v385_v18  ;;  %v415_v18 = vld [vmem:[%s2642_s29 + $0x770] sm:$0xff] }
 0x133   : > { %v3099_v27 = vpop.f32.mrf.mxu0  ;;  %v336_v24 = vld [vmem:[%s2642_s29 + $0x4f8] sm:$0xff] }
 0x134   : > { %v3102_v30 = vpop.f32.mrf.mxu1  ;;  %2301 = vmatmul.mubr.msk.f32.gmra.mxu0 %vm576_vm0, %v276_v23 }
 0x135   : > { %3771 = vst [vmem:[#allocation9_spill] sm:$0xff] %v3102_v30  ;;  %1424 = vmatmul.mubr.f32.gmra.mxu1 %v384_v25  ;;  %v882_v31 = vpop.f32.mrf.mxu0  ;;  %2303 = vmatprep.mubr.msk.f32.mxu0 %vm576_vm0, %v281_v26  ;;  %v414_v26 = vld [vmem:[%s2642_s29 + $0x768] sm:$0xff] }
 0x136   : > { %v1122_v34 = vpop.f32.mrf.mxu1  ;;  %1428 = vmatprep.mubr.f32.mxu1 %v390_v28  ;;  %v341_v28 = vld [vmem:[%s2642_s29 + $0x520] sm:$0xff] }
 0x137   : > { %v3109_v38 = vpop.f32.mrf.mxu0 }
 0x138   : > { %v3112_v41 = vpop.f32.mrf.mxu1  ;;  %2304 = vmatmul.mubr.msk.f32.gmra.mxu0 %vm576_vm0, %v286_v33  ;;  %v420_v33 = vld [vmem:[%s2642_s29 + $0x798] sm:$0xff] }
 0x139   : > { %3772 = vst [vmem:[#allocation10_spill] sm:$0xff] %v3112_v41  ;;  %1429 = vmatmul.mubr.f32.gmra.mxu1 %v389_v35  ;;  %v887_v42 = vpop.f32.mrf.mxu0  ;;  %2306 = vmatprep.mubr.msk.f32.mxu0 %vm576_vm0, %v291_v36  ;;  %v3166_v35 = vld [vmem:[%s3762_s2] ss:$0 sm:$0xff] }
 0x13a   : > { %v1127_v44 = vpop.f32.mrf.mxu1  ;;  %1433 = vmatprep.mubr.f32.mxu1 %v395_v39  ;;  %v346_v39 = vld [vmem:[%s2642_s29 + $0x548] sm:$0xff] }
 0x13b   : > { %v3119_v49 = vpop.f32.mrf.mxu0  ;;  %v351_v44 = vld [vmem:[%s2642_s29 + $0x570] sm:$0xff] }
 0x13c   : > { %v3122_v51 = vpop.f32.mrf.mxu1  ;;  %2307 = vmatmul.mubr.msk.f32.gmra.mxu0 %vm576_vm0, %v296_v43  ;;  %v419_v43 = vld [vmem:[%s2642_s29 + $0x790] sm:$0xff] }
 0x13d   : > { %3773 = vst [vmem:[#allocation11_spill] sm:$0xff] %v3122_v51  ;;  %1434 = vmatmul.mubr.f32.gmra.mxu1 %v394_v46  ;;  %v892_v52 = vpop.f32.mrf.mxu0  ;;  %2309 = vmatprep.mubr.msk.f32.mxu0 %vm576_vm0, %v301_v47  ;;  %v425_v47 = vld [vmem:[%s2642_s29 + $0x7c0] sm:$0xff] }
 0x13e   : > { %v1132_v55 = vpop.f32.mrf.mxu1  ;;  %1438 = vmatprep.mubr.f32.mxu1 %v400_v50  ;;  %v836_v50 = vadd.f32 %v3166_v35, %v3006_v13 }
 0x13f   : > { %v3129_v59 = vpop.f32.mrf.mxu0  ;;  %v356_v55 = vld [vmem:[%s2642_s29 + $0x598] sm:$0xff] }
 0x140   : > { %v3132_v62 = vpop.f32.mrf.mxu1  ;;  %2310 = vmatmul.mubr.msk.f32.gmra.mxu0 %vm576_vm0, %v306_v54 }
 0x141   : > { %3774 = vst [vmem:[#allocation12_spill] sm:$0xff] %v3132_v62  ;;  %1439 = vmatmul.mubr.f32.gmra.mxu1 %v399_v57  ;;  %v897_v63 = vpop.f32.mrf.mxu0  ;;  %2312 = vmatprep.mubr.msk.f32.mxu0 %vm576_vm0, %v311_v58 }
 0x142   : > { %v1137_v3 = vpop.f32.mrf.mxu1  ;;  %1443 = vmatprep.mubr.f32.mxu1 %v405_v60  ;;  %v424_v60 = vld [vmem:[%s2642_s29 + $0x7b8] sm:$0xff]  ;;  %v361_v63 = vld [vmem:[%s2642_s29 + $0x5c0] sm:$0xff] }
 0x143   : > { %v841_v3 = vadd.f32 %v3166_v35, %v3017_v21 }
 0x144   : > { %v3140_v7 = vpop.f32.mrf.mxu0  ;;  %v3142_v10 = vpop.f32.mrf.mxu1  ;;  %2313 = vmatmul.mubr.msk.f32.gmra.mxu0 %vm576_vm0, %v316_v2  ;;  %v430_v2 = vld [vmem:[%s2642_s29 + $0x7e8] sm:$0xff] }
 0x145   : > { %3775 = vst [vmem:[#allocation13_spill] sm:$0xff] %v3142_v10  ;;  %1444 = vmatmul.mubr.f32.gmra.mxu1 %v404_v4  ;;  %2315 = vmatprep.mubr.msk.f32.mxu0 %vm576_vm0, %v321_v5 }
 0x146   : > { %v902_v12 = vpop.f32.mrf.mxu0  ;;  %v1142_v15 = vpop.f32.mrf.mxu1  ;;  %1448 = vmatprep.mubr.f32.mxu1 %v410_v6  ;;  %v366_v6 = vld [vmem:[%s2642_s29 + $0x5e8] sm:$0xff] }
 0x147   : > { %v429_v15 = vld [vmem:[%s2642_s29 + $0x7e0] sm:$0xff] }
 0x148   : > { %v3150_v20 = vpop.f32.mrf.mxu0  ;;  %2316 = vmatmul.mubr.msk.f32.gmra.mxu0 %vm576_vm0, %v326_v11 }
 0x149   : > { %v3153_v23 = vpop.f32.mrf.mxu1  ;;  %1449 = vmatmul.mubr.f32.gmra.mxu1 %v409_v16  ;;  %2318 = vmatprep.mubr.msk.f32.mxu0 %vm576_vm0, %v331_v1  ;;  %v371_v16 = vld [vmem:[%s2642_s29 + $0x610] sm:$0xff] }
 0x14a   : > { %3776 = vst [vmem:[#allocation14_spill] sm:$0xff] %v3153_v23  ;;  %v907_v25 = vpop.f32.mrf.mxu0  ;;  %1453 = vmatprep.mubr.f32.mxu1 %v415_v18  ;;  %v435_v1 = vld [vmem:[%s2642_s29 + $0x810] sm:$0xff]  ;;  %v846_v18 = vadd.f32 %v3166_v35, %v3027_v29 }
 0x14b   : > { %v1147_v31 = vpop.f32.mrf.mxu1 }
 0x14c   : > { %v3160_v34 = vpop.f32.mrf.mxu0  ;;  %2319 = vmatmul.mubr.msk.f32.gmra.mxu0 %vm576_vm0, %v336_v24 }
 0x14d   : > { %v3168_v36 = vpop.f32.mrf.mxu1  ;;  %1454 = vmatmul.mubr.f32.gmra.mxu1 %v414_v26  ;;  %2321 = vmatprep.mubr.msk.f32.mxu0 %vm576_vm0, %v341_v28  ;;  %v376_v26 = vld [vmem:[%s2642_s29 + $0x638] sm:$0xff] }
 0x14e   : > { %3777 = vst [vmem:[#allocation15_spill] sm:$0xff] %v3168_v36  ;;  %v912_v42 = vpop.f32.mrf.mxu0  ;;  %1458 = vmatprep.mubr.f32.mxu1 %v420_v33  ;;  %v434_v33 = vld [vmem:[%s2642_s29 + $0x808] sm:$0xff] }
 0x14f   : > { %v1152_v46 = vpop.f32.mrf.mxu1  ;;  %v440_v42 = vld [vmem:[%s2642_s29 + $0x838] sm:$0xff] }
 0x150   : > { %v3177_v52 = vpop.f32.mrf.mxu0  ;;  %2322 = vmatmul.mubr.msk.f32.gmra.mxu0 %vm576_vm0, %v346_v39  ;;  %v381_v39 = vld [vmem:[%s2642_s29 + $0x660] sm:$0xff] }
 0x151   : > { %v1220_v54 = vpop.f32.mrf.mxu1  ;;  %1459 = vmatmul.mubr.f32.gmra.mxu1 %v419_v43  ;;  %2324 = vmatprep.mubr.msk.f32.mxu0 %vm576_vm0, %v351_v44  ;;  %v851_v43 = vadd.f32 %v3166_v35, %v3037_v37 }
 0x152   : > { %v3182_v57 = vadd.f32 %v1220_v54, %v836_v50  ;;  %v917_v58 = vpop.f32.mrf.mxu0  ;;  %1463 = vmatprep.mubr.f32.mxu1 %v425_v47  ;;  %v386_v47 = vld [vmem:[%s2642_s29 + $0x688] sm:$0xff] }
 0x153   : > { %v1222_v13 = vpop.f32.mrf.mxu1  ;;  %v391_v58 = vld [vmem:[%s2642_s29 + $0x6b0] sm:$0xff] }
 0x154   : > { %v3189_v4 = vpop.f32.mrf.mxu0  ;;  %2325 = vmatmul.mubr.msk.f32.gmra.mxu0 %vm576_vm0, %v356_v55  ;;  %v439_v55 = vld [vmem:[%s2642_s29 + $0x830] sm:$0xff] }
 0x155   : > { %v1225_v5 = vpop.f32.mrf.mxu1  ;;  %1464 = vmatmul.mubr.f32.gmra.mxu1 %v424_v60  ;;  %2327 = vmatprep.mubr.msk.f32.mxu0 %vm576_vm0, %v361_v63  ;;  %v445_v60 = vld [vmem:[%s2642_s29 + $0x860] sm:$0xff]  ;;  %v856_v63 = vadd.f32 %v3166_v35, %v3047_v45 }
 0x156   : > { %v3194_v11 = vadd.f32 %v1225_v5, %v841_v3  ;;  %v922_v12 = vpop.f32.mrf.mxu0  ;;  %1468 = vmatprep.mubr.f32.mxu1 %v430_v2  ;;  %v396_v3 = vld [vmem:[%s2642_s29 + $0x6d8] sm:$0xff] }
 0x157   : > { %v1227_v21 = vpop.f32.mrf.mxu1  ;;  %v444_v12 = vld [vmem:[%s2642_s29 + $0x858] sm:$0xff] }
 0x158   : > { %v3201_v24 = vpop.f32.mrf.mxu0  ;;  %2328 = vmatmul.mubr.msk.f32.gmra.mxu0 %vm576_vm0, %v366_v6  ;;  %v861_v21 = vadd.f32 %v3166_v35, %v3057_v53 }
 0x159   : > { %v1230_v25 = vpop.f32.mrf.mxu1  ;;  %1469 = vmatmul.mubr.f32.gmra.mxu1 %v429_v15  ;;  %2330 = vmatprep.mubr.msk.f32.mxu0 %vm576_vm0, %v371_v16  ;;  %v401_v15 = vld [vmem:[%s2642_s29 + $0x700] sm:$0xff]  ;;  %v450_v16 = vld [vmem:[%s2642_s29 + $0x888] sm:$0xff] }
 0x15a   : > { %v3206_v28 = vadd.f32 %v1230_v25, %v846_v18  ;;  %v927_v31 = vpop.f32.mrf.mxu0  ;;  %1473 = vmatprep.mubr.f32.mxu1 %v435_v1  ;;  %v406_v25 = vld [vmem:[%s2642_s29 + $0x728] sm:$0xff] }
 0x15b   : > { %v1232_v29 = vpop.f32.mrf.mxu1 }
 0x15c   : > { %v3213_v44 = vpop.f32.mrf.mxu0  ;;  %2331 = vmatmul.mubr.msk.f32.gmra.mxu0 %vm576_vm0, %v376_v26  ;;  %v455_v29 = vld [vmem:[%s2642_s29 + $0x8b0] sm:$0xff] }
 0x15d   : > { %v1235_v46 = vpop.f32.mrf.mxu1  ;;  %1474 = vmatmul.mubr.f32.gmra.mxu1 %v434_v33  ;;  %2333 = vmatprep.mubr.msk.f32.mxu0 %vm576_vm0, %v381_v39  ;;  %v449_v33 = vld [vmem:[%s2642_s29 + $0x880] sm:$0xff]  ;;  %v411_v39 = vld [vmem:[%s2642_s29 + $0x750] sm:$0xff] }
 0x15e   : > { %v3218_v50 = vadd.f32 %v1235_v46, %v851_v43  ;;  %v932_v54 = vpop.f32.mrf.mxu0  ;;  %1478 = vmatprep.mubr.f32.mxu1 %v440_v42  ;;  %v866_v42 = vadd.f32 %v3166_v35, %v3067_v61 }
 0x15f   : > { %v1237_v37 = vpop.f32.mrf.mxu1 }
 0x160   : > { %v3225_v13 = vpop.f32.mrf.mxu0  ;;  %2334 = vmatmul.mubr.msk.f32.gmra.mxu0 %vm576_vm0, %v386_v47  ;;  %v416_v47 = vld [vmem:[%s2642_s29 + $0x778] sm:$0xff]  ;;  %v421_v37 = vld [vmem:[%s2642_s29 + $0x7a0] sm:$0xff] }
 0x161   : > { %v1240_v2 = vpop.f32.mrf.mxu1  ;;  %1479 = vmatmul.mubr.f32.gmra.mxu1 %v439_v55  ;;  %2336 = vmatprep.mubr.msk.f32.mxu0 %vm576_vm0, %v391_v58  ;;  %v454_v58 = vld [vmem:[%s2642_s29 + $0x8a8] sm:$0xff] }
 0x162   : > { %v3230_v5 = vadd.f32 %v1240_v2, %v856_v63  ;;  %v937_v6 = vpop.f32.mrf.mxu0  ;;  %1483 = vmatprep.mubr.f32.mxu1 %v445_v60  ;;  %v460_v60 = vld [vmem:[%s2642_s29 + $0x8d8] sm:$0xff]  ;;  %v871_v63 = vadd.f32 %v3166_v35, %v3079_v8 }
 0x163   : > { %v1242_v45 = vpop.f32.mrf.mxu1  ;;  %v426_v6 = vld [vmem:[%s2642_s29 + $0x7c8] sm:$0xff] }
 0x164   : > { %v3237_v1 = vpop.f32.mrf.mxu0  ;;  %2337 = vmatmul.mubr.msk.f32.gmra.mxu0 %vm576_vm0, %v396_v3  ;;  %v459_v45 = vld [vmem:[%s2642_s29 + $0x8d0] sm:$0xff] }
 0x165   : > { %v1245_v18 = vpop.f32.mrf.mxu1  ;;  %1484 = vmatmul.mubr.f32.gmra.mxu1 %v444_v12  ;;  %2339 = vmatprep.mubr.msk.f32.mxu0 %vm576_vm0, %v401_v15 }
 0x166   : > { %v3242_v26 = vadd.f32 %v1245_v18, %v861_v21  ;;  %v942_v31 = vpop.f32.mrf.mxu0  ;;  %1488 = vmatprep.mubr.f32.mxu1 %v450_v16  ;;  %v431_v16 = vld [vmem:[%s2642_s29 + $0x7f0] sm:$0xff]  ;;  %v465_v21 = vld [vmem:[%s2642_s29 + $0x900] sm:$0xff]  ;;  %v876_v18 = vadd.f32 %v3166_v35, %v3089_v17 }
 0x167   : > { %v1247_v53 = vpop.f32.mrf.mxu1 }
 0x168   : > { %v3249_v43 = vpop.f32.mrf.mxu0  ;;  %2340 = vmatmul.mubr.msk.f32.gmra.mxu0 %vm576_vm0, %v406_v25 }
 0x169   : > { %v1250_v46 = vpop.f32.mrf.mxu1  ;;  %1489 = vmatmul.mubr.f32.gmra.mxu1 %v449_v33  ;;  %2342 = vmatprep.mubr.msk.f32.mxu0 %vm576_vm0, %v411_v39  ;;  %v436_v33 = vld [vmem:[%s2642_s29 + $0x818] sm:$0xff] }
 0x16a   : > { %v3254_v54 = vadd.f32 %v1250_v46, %v866_v42  ;;  %v947_v55 = vpop.f32.mrf.mxu0  ;;  %1493 = vmatprep.mubr.f32.mxu1 %v455_v29  ;;  %v464_v29 = vld [vmem:[%s2642_s29 + $0x8f8] sm:$0xff]  ;;  %v441_v42 = vld [vmem:[%s2642_s29 + $0x840] sm:$0xff]  ;;  %v470_v46 = vld [vmem:[%s2642_s29 + $0x928] sm:$0xff] }
 0x16b   : > { %v1252_v61 = vpop.f32.mrf.mxu1 }
 0x16c   : > { %v3261_v2 = vpop.f32.mrf.mxu0  ;;  %2343 = vmatmul.mubr.msk.f32.gmra.mxu0 %vm576_vm0, %v416_v47  ;;  %v881_v47 = vadd.f32 %v3166_v35, %v3099_v27 }
 0x16d   : > { %v1255_v3 = vpop.f32.mrf.mxu1  ;;  %1494 = vmatmul.mubr.f32.gmra.mxu1 %v454_v58  ;;  %2345 = vmatprep.mubr.msk.f32.mxu0 %vm576_vm0, %v421_v37  ;;  %v446_v37 = vld [vmem:[%s2642_s29 + $0x868] sm:$0xff] }
 0x16e   : > { %v3266_v12 = vadd.f32 %v1255_v3, %v871_v63  ;;  %v952_v15 = vpop.f32.mrf.mxu0  ;;  %1498 = vmatprep.mubr.f32.mxu1 %v460_v60  ;;  %v469_v63 = vld [vmem:[%s2642_s29 + $0x920] sm:$0xff]  ;;  %v451_v3 = vld [vmem:[%s2642_s29 + $0x890] sm:$0xff] }
 0x16f   : > { %v1257_v8 = vpop.f32.mrf.mxu1  ;;  %v886_v15 = vadd.f32 %v3166_v35, %v3109_v38 }
 0x170   : > { %v3273_v25 = vpop.f32.mrf.mxu0  ;;  %2346 = vmatmul.mubr.msk.f32.gmra.mxu0 %vm576_vm0, %v426_v6  ;;  %v475_v6 = vld [vmem:[%s2642_s29 + $0x950] sm:$0xff]  ;;  %v456_v8 = vld [vmem:[%s2642_s29 + $0x8b8] sm:$0xff] }
 0x171   : > { %v1260_v31 = vpop.f32.mrf.mxu1  ;;  %1499 = vmatmul.mubr.f32.gmra.mxu1 %v459_v45  ;;  %2348 = vmatprep.mubr.msk.f32.mxu0 %vm576_vm0, %v431_v16 }
 0x172   : > { %v3278_v39 = vadd.f32 %v1260_v31, %v876_v18  ;;  %v957_v53 = vpop.f32.mrf.mxu0  ;;  %1503 = vmatprep.mubr.f32.mxu1 %v465_v21  ;;  %v474_v31 = vld [vmem:[%s2642_s29 + $0x948] sm:$0xff] }
 0x173   : > { %v1262_v17 = vpop.f32.mrf.mxu1  ;;  %v480_v53 = vld [vmem:[%s2642_s29 + $0x978] sm:$0xff] }
 0x174   : > { %v3285_v55 = vpop.f32.mrf.mxu0  ;;  %2349 = vmatmul.mubr.msk.f32.gmra.mxu0 %vm576_vm0, %v436_v33  ;;  %v461_v33 = vld [vmem:[%s2642_s29 + $0x8e0] sm:$0xff] }
 0x175   : > { %v1265_v58 = vpop.f32.mrf.mxu1  ;;  %1504 = vmatmul.mubr.f32.gmra.mxu1 %v464_v29  ;;  %2351 = vmatprep.mubr.msk.f32.mxu0 %vm576_vm0, %v441_v42  ;;  %v891_v29 = vadd.f32 %v3166_v35, %v3119_v49 }
 0x176   : > { %v3290_v61 = vadd.f32 %v1265_v58, %v881_v47  ;;  %v962_v60 = vpop.f32.mrf.mxu0  ;;  %1508 = vmatprep.mubr.f32.mxu1 %v470_v46  ;;  %v466_v46 = vld [vmem:[%s2642_s29 + $0x908] sm:$0xff] }
 0x177   : > { %v1267_v27 = vpop.f32.mrf.mxu1  ;;  %v471_v60 = vld [vmem:[%s2642_s29 + $0x930] sm:$0xff] }
 0x178   : > { %v3297_v45 = vpop.f32.mrf.mxu0  ;;  %2352 = vmatmul.mubr.msk.f32.gmra.mxu0 %vm576_vm0, %v446_v37  ;;  %v479_v37 = vld [vmem:[%s2642_s29 + $0x970] sm:$0xff] }
 0x179   : > { %v1270_v16 = vpop.f32.mrf.mxu1  ;;  %1509 = vmatmul.mubr.f32.gmra.mxu1 %v469_v63  ;;  %2354 = vmatprep.mubr.msk.f32.mxu0 %vm576_vm0, %v451_v3  ;;  %v485_v63 = vld [vmem:[%s2642_s29 + $0x9a0] sm:$0xff]  ;;  %v896_v3 = vadd.f32 %v3166_v35, %v3129_v59 }
 0x17a   : > { %v3302_v21 = vadd.f32 %v1270_v16, %v886_v15  ;;  %v967_v18 = vpop.f32.mrf.mxu0  ;;  %1513 = vmatprep.mubr.f32.mxu1 %v475_v6  ;;  %v476_v15 = vld [vmem:[%s2642_s29 + $0x958] sm:$0xff] }
 0x17b   : > { %v1272_v38 = vpop.f32.mrf.mxu1  ;;  %v484_v18 = vld [vmem:[%s2642_s29 + $0x998] sm:$0xff] }
 0x17c   : > { %v3309_v42 = vpop.f32.mrf.mxu0  ;;  %2355 = vmatmul.mubr.msk.f32.gmra.mxu0 %vm576_vm0, %v456_v8  ;;  %v901_v38 = vadd.f32 %v3166_v35, %v3140_v7  ;;  %v906_v7 = vadd.f32 %v3166_v35, %v3150_v20 }
 0x17d   : > { %v1275_v17 = vpop.f32.mrf.mxu1  ;;  %1514 = vmatmul.mubr.f32.gmra.mxu1 %v474_v31  ;;  %2357 = vmatprep.mubr.msk.f32.mxu0 %vm576_vm0, %v461_v33  ;;  %v481_v31 = vld [vmem:[%s2642_s29 + $0x980] sm:$0xff]  ;;  %v490_v33 = vld [vmem:[%s2642_s29 + $0x9c8] sm:$0xff] }
 0x17e   : > { %v3314_v47 = vadd.f32 %v1275_v17, %v891_v29  ;;  %v972_v58 = vpop.f32.mrf.mxu0  ;;  %1518 = vmatprep.mubr.f32.mxu1 %v480_v53  ;;  %v486_v17 = vld [vmem:[%s2642_s29 + $0x9a8] sm:$0xff] }
 0x17f   : > { %v1277_v49 = vpop.f32.mrf.mxu1 }
 0x180   : > { %v3321_v27 = vpop.f32.mrf.mxu0  ;;  %2358 = vmatmul.mubr.msk.f32.gmra.mxu0 %vm576_vm0, %v466_v46 }
 0x181   : > { %v1280_v6 = vpop.f32.mrf.mxu1  ;;  %1519 = vmatmul.mubr.f32.gmra.mxu1 %v479_v37  ;;  %2360 = vmatprep.mubr.msk.f32.mxu0 %vm576_vm0, %v471_v60  ;;  %v489_v37 = vld [vmem:[%s2642_s29 + $0x9c0] sm:$0xff]  ;;  %v491_v60 = vld [vmem:[%s2642_s29 + $0x9d0] sm:$0xff] }
 0x182   : > { %v3326_v16 = vadd.f32 %v1280_v6, %v896_v3  ;;  %v977_v8 = vpop.f32.mrf.mxu0  ;;  %1523 = vmatprep.mubr.f32.mxu1 %v485_v63  ;;  %v495_v63 = vld [vmem:[%s2642_s29 + $0x9f0] sm:$0xff] }
 0x183   : > { %v1282_v59 = vpop.f32.mrf.mxu1 }
 0x184   : > { %v3333_v53 = vpop.f32.mrf.mxu0  ;;  %2361 = vmatmul.mubr.msk.f32.gmra.mxu0 %vm576_vm0, %v476_v15  ;;  %v496_v15 = vld [vmem:[%s2642_s29 + $0x9f8] sm:$0xff] }
 0x185   : > { %v1285_v29 = vpop.f32.mrf.mxu1  ;;  %1524 = vmatmul.mubr.f32.gmra.mxu1 %v484_v18  ;;  %2363 = vmatprep.mubr.msk.f32.mxu0 %vm576_vm0, %v481_v31  ;;  %v494_v31 = vld [vmem:[%s2642_s29 + $0x9e8] sm:$0xff]  ;;  %s2117_s29 = sshll.u32 %s3793_s8, 3 }
 0x186   : > { %v3338_v46 = vadd.f32 %v1285_v29, %v901_v38  ;;  %v982_v58 = vpop.f32.mrf.mxu0  ;;  %1528 = vmatprep.mubr.f32.mxu1 %v490_v33  ;;  %v911_v33 = vadd.f32 %v3166_v35, %v3160_v34  ;;  %s3461_s19 = scalar_lea.vmem %s3763_s3, %s2117_s29 }
 0x187   : > { %v1287_v49 = vpop.f32.mrf.mxu1 }
 0x188   : > { %v3345_v3 = vpop.f32.mrf.mxu0  ;;  %2364 = vmatmul.mubr.msk.f32.gmra.mxu0 %vm576_vm0, %v486_v17 }
 0x189   : > { %v1290_v6 = vpop.f32.mrf.mxu1  ;;  %1529 = vmatmul.mubr.f32.gmra.mxu1 %v489_v37  ;;  %2366 = vmatprep.mubr.msk.f32.mxu0 %vm576_vm0, %v491_v60  ;;  %v916_v37 = vadd.f32 %v3166_v35, %v3177_v52  ;;  %v926_v52 = vadd.f32 %v3166_v35, %v3201_v24  ;;  %v936_v24 = vadd.f32 %v3166_v35, %v3225_v13 }
 0x18a   : > { %v3350_v8 = vadd.f32 %v1290_v6, %v906_v7  ;;  %v987_v18 = vpop.f32.mrf.mxu0  ;;  %1533 = vmatprep.mubr.f32.mxu1 %v495_v63  ;;  %v921_v6 = vadd.f32 %v3166_v35, %v3189_v4  ;;  %v931_v4 = vadd.f32 %v3166_v35, %v3213_v44  ;;  %v941_v44 = vadd.f32 %v3166_v35, %v3237_v1 }
 0x18b   : > { %v1292_v59 = vpop.f32.mrf.mxu1  ;;  %v946_v13 = vadd.f32 %v3166_v35, %v3249_v43  ;;  %v951_v1 = vadd.f32 %v3166_v35, %v3261_v2  ;;  %v956_v43 = vadd.f32 %v3166_v35, %v3273_v25  ;;  %v961_v2 = vadd.f32 %v3166_v35, %v3285_v55 }
 0x18c   : > { %v3355_v38 = vpop.f32.mrf.mxu0  ;;  %2367 = vmatmul.mubr.msk.f32.gmra.mxu0 %vm576_vm0, %v496_v15  ;;  %v966_v25 = vadd.f32 %v3166_v35, %v3297_v45  ;;  %v971_v55 = vadd.f32 %v3166_v35, %v3309_v42  ;;  %v976_v45 = vadd.f32 %v3166_v35, %v3321_v27  ;;  %v981_v42 = vadd.f32 %v3166_v35, %v3333_v53 }
 0x18d   : > { %v1295_v20 = vpop.f32.mrf.mxu1  ;;  %1534 = vmatmul.mubr.f32.gmra.mxu1 %v494_v31  ;;  %v986_v27 = vadd.f32 %v3166_v35, %v3345_v3 }
 0x18e   : > { %v3358_v29 = vadd.f32 %v1295_v20, %v911_v33  ;;  %v992_v17 = vpop.f32.mrf.mxu0 }
 0x18f   : > { %v1297_v58 = vpop.f32.mrf.mxu1 }
 0x190   : > { %v3362_v60 = vpop.f32.mrf.mxu0 }
 0x191   : > { %v1300_v49 = vpop.f32.mrf.mxu1 }
 0x192   : > { %v3364_v63 = vadd.f32 %v1300_v49, %v916_v37  ;;  %v997_v7 = vpop.f32.mrf.mxu0 }
 0x193   : > { %v1302_v34 = vpop.f32.mrf.mxu1 }
 0x194   : > { %v3368_v15 = vpop.f32.mrf.mxu0 }
 0x195   : > { %v1305_v18 = vpop.f32.mrf.mxu1 }
 0x196   : > { %v3370_v31 = vadd.f32 %v1305_v18, %v921_v6  ;;  %v1002_v59 = vpop.f32.mrf.mxu0 }
 0x197   : > { %v1307_v33 = vpop.f32.mrf.mxu1 }
 0x198   : > { %v3374_v20 = vpop.f32.mrf.mxu0 }
 0x199   : > { %v1310_v17 = vpop.f32.mrf.mxu1 }
 0x19a   : > { %v3376_v58 = vadd.f32 %v1310_v17, %v926_v52  ;;  %v1007_v37 = vpop.f32.mrf.mxu0 }
 0x19b   : > { %v1312_v49 = vpop.f32.mrf.mxu1 }
 0x19c   : > { %v3380_v7 = vpop.f32.mrf.mxu0 }
 0x19d   : > { %v1315_v34 = vpop.f32.mrf.mxu1 }
 0x19e   : > { %v3382_v6 = vadd.f32 %v1315_v34, %v931_v4  ;;  %v1012_v18 = vpop.f32.mrf.mxu0 }
 0x19f   : > { %v1317_v59 = vpop.f32.mrf.mxu1 }
 0x1a0   : > { %v3386_v33 = vpop.f32.mrf.mxu0 }
 0x1a1   : > { %v1320_v36 = vpop.f32.mrf.mxu1 }
 0x1a2   : > { %v3388_v52 = vadd.f32 %v1320_v36, %v936_v24  ;;  %v1017_v17 = vpop.f32.mrf.mxu0 }
 0x1a3   : > { %v1322_v37 = vpop.f32.mrf.mxu1 }
 0x1a4   : > { %v3392_v49 = vpop.f32.mrf.mxu0 }
 0x1a5   : > { %v1325_v23 = vpop.f32.mrf.mxu1 }
 0x1a6   : > { %v3394_v4 = vadd.f32 %v1325_v23, %v941_v44  ;;  %v1022_v34 = vpop.f32.mrf.mxu0 }
 0x1a7   : > { %v1327_v18 = vpop.f32.mrf.mxu1 }
 0x1a8   : > { %v3398_v59 = vpop.f32.mrf.mxu0 }
 0x1a9   : > { %v1330_v62 = vpop.f32.mrf.mxu1 }
 0x1aa   : > { %v3400_v36 = vadd.f32 %v1330_v62, %v946_v13  ;;  %v1027_v24 = vpop.f32.mrf.mxu0 }
 0x1ab   : > { %v1332_v17 = vpop.f32.mrf.mxu1 }
 0x1ac   : > { %v3404_v37 = vpop.f32.mrf.mxu0 }
 0x1ad   : > { %v1335_v10 = vpop.f32.mrf.mxu1 }
 0x1ae   : > { %v3406_v23 = vadd.f32 %v1335_v10, %v951_v1  ;;  %v1032_v44 = vpop.f32.mrf.mxu0 }
 0x1af   : > { %v1337_v34 = vpop.f32.mrf.mxu1 }
 0x1b0   : > { %v3410_v18 = vpop.f32.mrf.mxu0 }
 0x1b1   : > { %v1340_v41 = vpop.f32.mrf.mxu1 }
 0x1b2   : > { %v3412_v62 = vadd.f32 %v1340_v41, %v956_v43  ;;  %v1037_v13 = vpop.f32.mrf.mxu0 }
 0x1b3   : > { %v1342_v24 = vpop.f32.mrf.mxu1 }
 0x1b4   : > { %v3416_v17 = vpop.f32.mrf.mxu0 }
 0x1b5   : > { %v1345_v51 = vpop.f32.mrf.mxu1 }
 0x1b6   : > { %v3418_v10 = vadd.f32 %v1345_v51, %v961_v2  ;;  %v1042_v1 = vpop.f32.mrf.mxu0 }
 0x1b7   : > { %v1347_v44 = vpop.f32.mrf.mxu1 }
 0x1b8   : > { %v3422_v34 = vpop.f32.mrf.mxu0 }
 0x1b9   : > { %v1350_v19 = vpop.f32.mrf.mxu1 }
 0x1ba   : > { %v3424_v41 = vadd.f32 %v1350_v19, %v966_v25  ;;  %v1047_v43 = vpop.f32.mrf.mxu0 }
 0x1bb   : > { %v1352_v13 = vpop.f32.mrf.mxu1 }
 0x1bc   : > { %v3428_v24 = vpop.f32.mrf.mxu0 }
 0x1bd   : > { %v1355_v30 = vpop.f32.mrf.mxu1 }
 0x1be   : > { %v3430_v51 = vadd.f32 %v1355_v30, %v971_v55  ;;  %v1052_v2 = vpop.f32.mrf.mxu0 }
 0x1bf   : > { %v1357_v1 = vpop.f32.mrf.mxu1 }
 0x1c0   : > { %v3434_v44 = vpop.f32.mrf.mxu0 }
 0x1c1   : > { %v1360_v0 = vpop.f32.mrf.mxu1 }
 0x1c2   : > { %v3436_v19 = vadd.f32 %v1360_v0, %v976_v45  ;;  %v1057_v25 = vpop.f32.mrf.mxu0 }
 0x1c3   : > { %v1362_v43 = vpop.f32.mrf.mxu1 }
 0x1c4   : > { %v3440_v13 = vpop.f32.mrf.mxu0 }
 0x1c5   : > { %v1365_v30 = vpop.f32.mrf.mxu1 }
 0x1c6   : > { %v3442_v55 = vadd.f32 %v1365_v30, %v981_v42  ;;  %v1062_v2 = vpop.f32.mrf.mxu0 }
 0x1c7   : > { %v1367_v1 = vpop.f32.mrf.mxu1 }
 0x1c8   : > { %v3446_v9 = vpop.f32.mrf.mxu0 }
 0x1c9   : > { %v1370_v0 = vpop.f32.mrf.mxu1 }
 0x1ca   : > { %v3448_v45 = vadd.f32 %v1370_v0, %v986_v27  ;;  %v1067_v25 = vpop.f32.mrf.mxu0 }
 0x1cb   : > { %v1372_v43 = vpop.f32.mrf.mxu1 }
 0x1cc   : > { %v3450_v48 = vpop.f32.mrf.mxu0 }
 0x1cd   : > { %v3452_v53 = vpop.f32.mrf.mxu1 }
 0x1ce   : > { %v1072_v56 = vpop.f32.mrf.mxu0 }
 0x1cf   : > { %v1377_v32 = vpop.f32.mrf.mxu1 }
 0x1d0   : > { %v2275_v42 = vpop.f32.mrf.mxu0 }
 0x1d1   : > { %v3455_v30 = vpop.f32.mrf.mxu1  ;;  %v1611_v2 = vadd.f32 %v2275_v42, %v3194_v11 }
 0x1d2   : > { %v1605_v3 = vpop.f32.mrf.mxu0 }
 0x1d3   : > { %v1925_v1 = vmax.f32 %v1611_v2, 0.0  ;;  %v1382_v27 = vpop.f32.mrf.mxu1  ;;  %v1606_v32 = vadd.f32 %v1605_v3, %v3182_v57 }
 0x1d4   : > { %v2278_v56 = vpop.f32.mrf.mxu0 }
 0x1d5   : > { %1990 = vst.msk [vmem:[%s3461_s19 + $0x8] sm:$0xff] %vm1988_vm1, %v1925_v1  ;;  %v1924_v0 = vmax.f32 %v1606_v32, 0.0  ;;  %v3466_v11 = vpop.f32.mrf.mxu1  ;;  %v1621_v25 = vadd.f32 %v2278_v56, %v3218_v50 }
 0x1d6   : > { %v1615_v43 = vpop.f32.mrf.mxu0 }
 0x1d7   : > { %1989 = vst.msk [vmem:[%s3461_s19] sm:$0xff] %vm1988_vm1, %v1924_v0  ;;  %v1927_v42 = vmax.f32 %v1621_v25, 0.0  ;;  %v1387_v40 = vpop.f32.mrf.mxu1  ;;  %v1616_v2 = vadd.f32 %v1615_v43, %v3206_v28 }
 0x1d8   : > { %v2281_v27 = vpop.f32.mrf.mxu0 }
 0x1d9   : > { %1992 = vst.msk [vmem:[%s3461_s19 + $0x18] sm:$0xff] %vm1988_vm1, %v1927_v42  ;;  %v1926_v57 = vmax.f32 %v1616_v2, 0.0  ;;  %v3474_v3 = vpop.f32.mrf.mxu1  ;;  %v1631_v1 = vadd.f32 %v2281_v27, %v3242_v26 }
 0x1da   : > { %v1625_v32 = vpop.f32.mrf.mxu0 }
 0x1db   : > { %1991 = vst.msk [vmem:[%s3461_s19 + $0x10] sm:$0xff] %vm1988_vm1, %v1926_v57  ;;  %v1929_v50 = vmax.f32 %v1631_v1, 0.0  ;;  %v1392_v56 = vpop.f32.mrf.mxu1  ;;  %v1626_v0 = vadd.f32 %v1625_v32, %v3230_v5 }
 0x1dc   : > { %v2284_v40 = vpop.f32.mrf.mxu0 }
 0x1dd   : > { %1994 = vst.msk [vmem:[%s3461_s19 + $0x28] sm:$0xff] %vm1988_vm1, %v1929_v50  ;;  %v1928_v28 = vmax.f32 %v1626_v0, 0.0  ;;  %v3482_v25 = vpop.f32.mrf.mxu1  ;;  %v1641_v43 = vadd.f32 %v2284_v40, %v3266_v12 }
 0x1de   : > { %v1635_v42 = vpop.f32.mrf.mxu0 }
 0x1df   : > { %1993 = vst.msk [vmem:[%s3461_s19 + $0x20] sm:$0xff] %vm1988_vm1, %v1928_v28  ;;  %v1931_v26 = vmax.f32 %v1641_v43, 0.0  ;;  %v1397_v2 = vpop.f32.mrf.mxu1  ;;  %v1636_v27 = vadd.f32 %v1635_v42, %v3254_v54 }
 0x1e0   : > { %v2287_v57 = vpop.f32.mrf.mxu0 }
 0x1e1   : > { %1996 = vst.msk [vmem:[%s3461_s19 + $0x38] sm:$0xff] %vm1988_vm1, %v1931_v26  ;;  %v1930_v5 = vmax.f32 %v1636_v27, 0.0  ;;  %v3490_v1 = vpop.f32.mrf.mxu1  ;;  %v1651_v32 = vadd.f32 %v2287_v57, %v3290_v61 }
 0x1e2   : > { %v1645_v50 = vpop.f32.mrf.mxu0 }
 0x1e3   : > { %1995 = vst.msk [vmem:[%s3461_s19 + $0x30] sm:$0xff] %vm1988_vm1, %v1930_v5  ;;  %v1933_v12 = vmax.f32 %v1651_v32, 0.0  ;;  %v1402_v56 = vpop.f32.mrf.mxu1  ;;  %v1646_v0 = vadd.f32 %v1645_v50, %v3278_v39 }
 0x1e4   : > { %v2290_v40 = vpop.f32.mrf.mxu0 }
 0x1e5   : > { %1998 = vst.msk [vmem:[%s3461_s19 + $0x48] sm:$0xff] %vm1988_vm1, %v1933_v12  ;;  %v1932_v54 = vmax.f32 %v1646_v0, 0.0  ;;  %v3498_v28 = vpop.f32.mrf.mxu1  ;;  %v1661_v43 = vadd.f32 %v2290_v40, %v3314_v47 }
 0x1e6   : > { %v1655_v42 = vpop.f32.mrf.mxu0 }
 0x1e7   : > { %1997 = vst.msk [vmem:[%s3461_s19 + $0x40] sm:$0xff] %vm1988_vm1, %v1932_v54  ;;  %v1935_v61 = vmax.f32 %v1661_v43, 0.0  ;;  %v1407_v26 = vpop.f32.mrf.mxu1  ;;  %v1656_v2 = vadd.f32 %v1655_v42, %v3302_v21 }
 0x1e8   : > { %v2293_v27 = vpop.f32.mrf.mxu0 }
 0x1e9   : > { %2000 = vst.msk [vmem:[%s3461_s19 + $0x58] sm:$0xff] %vm1988_vm1, %v1935_v61  ;;  %v1934_v39 = vmax.f32 %v1656_v2, 0.0  ;;  %v3506_v57 = vpop.f32.mrf.mxu1  ;;  %v1671_v5 = vadd.f32 %v2293_v27, %v3338_v46 }
 0x1ea   : > { %v1665_v32 = vpop.f32.mrf.mxu0 }
 0x1eb   : > { %1999 = vst.msk [vmem:[%s3461_s19 + $0x50] sm:$0xff] %vm1988_vm1, %v1934_v39  ;;  %v1937_v47 = vmax.f32 %v1671_v5, 0.0  ;;  %v1412_v50 = vpop.f32.mrf.mxu1  ;;  %v1666_v12 = vadd.f32 %v1665_v32, %v3326_v16 }
 0x1ec   : > { %v2296_v56 = vpop.f32.mrf.mxu0 }
 0x1ed   : > { %2002 = vst.msk [vmem:[%s3461_s19 + $0x68] sm:$0xff] %vm1988_vm1, %v1937_v47  ;;  %v1936_v21 = vmax.f32 %v1666_v12, 0.0  ;;  %v3514_v0 = vpop.f32.mrf.mxu1  ;;  %v1681_v40 = vadd.f32 %v2296_v56, %v3358_v29 }
 0x1ee   : > { %v1675_v54 = vpop.f32.mrf.mxu0 }
 0x1ef   : > { %2001 = vst.msk [vmem:[%s3461_s19 + $0x60] sm:$0xff] %vm1988_vm1, %v1936_v21  ;;  %v1939_v46 = vmax.f32 %v1681_v40, 0.0  ;;  %v1417_v43 = vpop.f32.mrf.mxu1  ;;  %v1676_v42 = vadd.f32 %v1675_v54, %v3350_v8 }
 0x1f0   : > { %v2299_v61 = vpop.f32.mrf.mxu0 }
 0x1f1   : > { %2004 = vst.msk [vmem:[%s3461_s19 + $0x78] sm:$0xff] %vm1988_vm1, %v1939_v46  ;;  %v1938_v16 = vmax.f32 %v1676_v42, 0.0  ;;  %v3522_v26 = vpop.f32.mrf.mxu1  ;;  %v1691_v2 = vadd.f32 %v2299_v61, %v3370_v31 }
 0x1f2   : > { %v1685_v27 = vpop.f32.mrf.mxu0 }
 0x1f3   : > { %2003 = vst.msk [vmem:[%s3461_s19 + $0x70] sm:$0xff] %vm1988_vm1, %v1938_v16  ;;  %v1941_v29 = vmax.f32 %v1691_v2, 0.0  ;;  %v1422_v39 = vpop.f32.mrf.mxu1  ;;  %v1686_v5 = vadd.f32 %v1685_v27, %v3364_v63 }
 0x1f4   : > { %v2302_v32 = vpop.f32.mrf.mxu0 }
 0x1f5   : > { %2006 = vst.msk [vmem:[%s3461_s19 + $0x88] sm:$0xff] %vm1988_vm1, %v1941_v29  ;;  %v1940_v8 = vmax.f32 %v1686_v5, 0.0  ;;  %v3530_v47 = vpop.f32.mrf.mxu1  ;;  %v1701_v50 = vadd.f32 %v2302_v32, %v3382_v6 }
 0x1f6   : > { %v1695_v12 = vpop.f32.mrf.mxu0 }
 0x1f7   : > { %2005 = vst.msk [vmem:[%s3461_s19 + $0x80] sm:$0xff] %vm1988_vm1, %v1940_v8  ;;  %v1943_v31 = vmax.f32 %v1701_v50, 0.0  ;;  %v1427_v56 = vpop.f32.mrf.mxu1  ;;  %v1696_v21 = vadd.f32 %v1695_v12, %v3376_v58 }
 0x1f8   : > { %v2305_v40 = vpop.f32.mrf.mxu0 }
 0x1f9   : > { %2008 = vst.msk [vmem:[%s3461_s19 + $0x98] sm:$0xff] %vm1988_vm1, %v1943_v31  ;;  %v1942_v63 = vmax.f32 %v1696_v21, 0.0  ;;  %v3538_v54 = vpop.f32.mrf.mxu1  ;;  %v1711_v46 = vadd.f32 %v2305_v40, %v3394_v4 }
 0x1fa   : > { %v1705_v43 = vpop.f32.mrf.mxu0 }
 0x1fb   : > { %2007 = vst.msk [vmem:[%s3461_s19 + $0x90] sm:$0xff] %vm1988_vm1, %v1942_v63  ;;  %v1945_v6 = vmax.f32 %v1711_v46, 0.0  ;;  %v1432_v42 = vpop.f32.mrf.mxu1  ;;  %v1706_v61 = vadd.f32 %v1705_v43, %v3388_v52 }
 0x1fc   : > { %v2308_v16 = vpop.f32.mrf.mxu0 }
 0x1fd   : > { %2010 = vst.msk [vmem:[%s3461_s19 + $0xa8] sm:$0xff] %vm1988_vm1, %v1945_v6  ;;  %v1944_v58 = vmax.f32 %v1706_v61, 0.0  ;;  %v3546_v2 = vpop.f32.mrf.mxu1  ;;  %v1721_v27 = vadd.f32 %v2308_v16, %v3406_v23 }
 0x1fe   : > { %v1715_v29 = vpop.f32.mrf.mxu0 }
 0x1ff   : > { %2009 = vst.msk [vmem:[%s3461_s19 + $0xa0] sm:$0xff] %vm1988_vm1, %v1944_v58  ;;  %v1947_v4 = vmax.f32 %v1721_v27, 0.0  ;;  %v1437_v39 = vpop.f32.mrf.mxu1  ;;  %v1716_v5 = vadd.f32 %v1715_v29, %v3400_v36 }
 0x200   : > { %v2311_v32 = vpop.f32.mrf.mxu0 }
 0x201   : > { %2012 = vst.msk [vmem:[%s3461_s19 + $0xb8] sm:$0xff] %vm1988_vm1, %v1947_v4  ;;  %v1946_v52 = vmax.f32 %v1716_v5, 0.0  ;;  %v3554_v8 = vpop.f32.mrf.mxu1  ;;  %v1731_v50 = vadd.f32 %v2311_v32, %v3418_v10 }
 0x202   : > { %v1725_v12 = vpop.f32.mrf.mxu0 }
 0x203   : > { %2011 = vst.msk [vmem:[%s3461_s19 + $0xb0] sm:$0xff] %vm1988_vm1, %v1946_v52  ;;  %v1949_v23 = vmax.f32 %v1731_v50, 0.0  ;;  %v1442_v31 = vpop.f32.mrf.mxu1  ;;  %v1726_v56 = vadd.f32 %v1725_v12, %v3412_v62  ;;  %v991_v62 = vadd.f32 %v3166_v35, %v3355_v38  ;;  %v1001_v38 = vadd.f32 %v3166_v35, %v3368_v15 }
 0x204   : > { %v2314_v21 = vpop.f32.mrf.mxu0  ;;  %v1011_v31 = vadd.f32 %v3166_v35, %v3380_v7 }
 0x205   : > { %2014 = vst.msk [vmem:[%s3461_s19 + $0xc8] sm:$0xff] %vm1988_vm1, %v1949_v23  ;;  %v1948_v36 = vmax.f32 %v1726_v56, 0.0  ;;  %v3562_v40 = vpop.f32.mrf.mxu1  ;;  %v1741_v63 = vadd.f32 %v2314_v21, %v3430_v51  ;;  %v1376_v27 = vadd.f32 %v3452_v53, %v991_v62  ;;  %v996_v53 = vadd.f32 %v3166_v35, %v3362_v60 }
 0x206   : > { %v1735_v46 = vpop.f32.mrf.mxu0  ;;  %v1386_v50 = vadd.f32 %v3466_v11, %v1001_v38 }
 0x207   : > { %2013 = vst.msk [vmem:[%s3461_s19 + $0xc0] sm:$0xff] %vm1988_vm1, %v1948_v36  ;;  %v1951_v10 = vmax.f32 %v1741_v63, 0.0  ;;  %v1447_v43 = vpop.f32.mrf.mxu1  ;;  %v1736_v6 = vadd.f32 %v1735_v46, %v3424_v41  ;;  %v1381_v56 = vadd.f32 %v3455_v30, %v996_v53  ;;  %v1006_v63 = vadd.f32 %v3166_v35, %v3374_v20 }
 0x208   : > { %v2317_v42 = vpop.f32.mrf.mxu0  ;;  %v1021_v30 = vadd.f32 %v3166_v35, %v3392_v49 }
 0x209   : > { %2016 = vst.msk [vmem:[%s3461_s19 + $0xd8] sm:$0xff] %vm1988_vm1, %v1951_v10  ;;  %v1950_v61 = vmax.f32 %v1736_v6, 0.0  ;;  %v3572_v16 = vpop.f32.mrf.mxu1  ;;  %v1751_v58 = vadd.f32 %v2317_v42, %v3442_v55  ;;  %v1391_v6 = vadd.f32 %v3474_v3, %v1006_v63 }
 0x20a   : > { %v1745_v51 = vpop.f32.mrf.mxu0 }
 0x20b   : > { %2015 = vst.msk [vmem:[%s3461_s19 + $0xd0] sm:$0xff] %vm1988_vm1, %v1950_v61  ;;  %v1953_v29 = vmax.f32 %v1751_v58, 0.0  ;;  %v1452_v4 = vpop.f32.mrf.mxu1  ;;  %v1746_v41 = vadd.f32 %v1745_v51, %v3436_v19  ;;  %v1406_v58 = vadd.f32 %v3498_v28, %v1021_v30 }
 0x20c   : > { %v2320_v39 = vpop.f32.mrf.mxu0 }
 0x20d   : > { %2018 = vst.msk [vmem:[%s3461_s19 + $0xe8] sm:$0xff] %vm1988_vm1, %v1953_v29  ;;  %v1952_v5 = vmax.f32 %v1746_v41, 0.0  ;;  %v3583_v32 = vpop.f32.mrf.mxu1  ;;  %v1761_v55 = vadd.f32 %v2320_v39, %v1376_v27  ;;  %v3618_v29 = vld [vmem:[%s3762_s2] ss:$0 sm:$0xff] }
 0x20e   : > { %v1755_v52 = vpop.f32.mrf.mxu0  ;;  %v1031_v4 = vadd.f32 %v3618_v29, %v3404_v37  ;;  %v1026_v38 = vadd.f32 %v3618_v29, %v3398_v59 }
 0x20f   : > { %2017 = vst.msk [vmem:[%s3461_s19 + $0xe0] sm:$0xff] %vm1988_vm1, %v1952_v5  ;;  %v1955_v19 = vmax.f32 %v1761_v55, 0.0  ;;  %v1457_v12 = vpop.f32.mrf.mxu1  ;;  %v1756_v23 = vadd.f32 %v1755_v52, %v3448_v45  ;;  %v1396_v45 = vadd.f32 %v3482_v25, %v1011_v31  ;;  %v1016_v25 = vadd.f32 %v3166_v35, %v3386_v33 }
 0x210   : > { %v2323_v15 = vpop.f32.mrf.mxu0  ;;  %v1416_v5 = vadd.f32 %v3514_v0, %v1031_v4  ;;  %v1036_v0 = vadd.f32 %v3618_v29, %v3410_v18 }
 0x211   : > { %2020 = vst.msk [vmem:[%s3461_s19 + $0xf8] sm:$0xff] %vm1988_vm1, %v1955_v19  ;;  %v1954_v21 = vmax.f32 %v1756_v23, 0.0  ;;  %v3596_v60 = vpop.f32.mrf.mxu1  ;;  %v1771_v36 = vadd.f32 %v2323_v15, %v1386_v50  ;;  %v1401_v35 = vadd.f32 %v3490_v1, %v1016_v25  ;;  %v1041_v1 = vadd.f32 %v3618_v29, %v3416_v17 }
 0x212   : > { %v1765_v11 = vpop.f32.mrf.mxu0  ;;  %v1411_v50 = vadd.f32 %v3506_v57, %v1026_v38  ;;  %v1051_v57 = vadd.f32 %v3618_v29, %v3428_v24 }
 0x213   : > { %2019 = vst.msk [vmem:[%s3461_s19 + $0xf0] sm:$0xff] %vm1988_vm1, %v1954_v21  ;;  %v1957_v46 = vmax.f32 %v1771_v36, 0.0  ;;  %v1462_v7 = vpop.f32.mrf.mxu1  ;;  %v1766_v10 = vadd.f32 %v1765_v11, %v1381_v56  ;;  %v1426_v15 = vadd.f32 %v3530_v47, %v1041_v1  ;;  %v1421_v36 = vadd.f32 %v3522_v26, %v1036_v0 }
 0x214   : > { %v2326_v43 = vpop.f32.mrf.mxu0  ;;  %v1046_v47 = vadd.f32 %v3618_v29, %v3422_v34  ;;  %v1061_v26 = vadd.f32 %v3618_v29, %v3440_v13 }
 0x215   : > { %2022 = vst.msk [vmem:[%s3461_s19 + $0x108] sm:$0xff] %vm1988_vm1, %v1957_v46  ;;  %v1956_v42 = vmax.f32 %v1766_v10, 0.0  ;;  %v3608_v62 = vpop.f32.mrf.mxu1  ;;  %v1781_v20 = vadd.f32 %v2326_v43, %v1396_v45  ;;  %v1436_v46 = vadd.f32 %v3546_v2, %v1051_v57  ;;  %v1056_v2 = vadd.f32 %v3618_v29, %v3434_v44 }
 0x216   : > { %v1775_v61 = vpop.f32.mrf.mxu0  ;;  %v1431_v30 = vadd.f32 %v3538_v54, %v1046_v47  ;;  %v1071_v54 = vadd.f32 %v3618_v29, %v3450_v48 }
 0x217   : > { %2021 = vst.msk [vmem:[%s3461_s19 + $0x100] sm:$0xff] %vm1988_vm1, %v1956_v42  ;;  %v1959_v51 = vmax.f32 %v1781_v20, 0.0  ;;  %v1467_v49 = vpop.f32.mrf.mxu1  ;;  %v1776_v27 = vadd.f32 %v1775_v61, %v1391_v6  ;;  %v1446_v61 = vadd.f32 %v3562_v40, %v1061_v26  ;;  %v1066_v40 = vadd.f32 %v3618_v29, %v3446_v9 }
 0x218   : > { %v2329_v3 = vpop.f32.mrf.mxu0  ;;  %v1441_v49 = vadd.f32 %v3554_v8, %v1056_v2  ;;  %v1081_v8 = vadd.f32 %v3618_v29, %v3019_v22 }
 0x219   : > { %2024 = vst.msk [vmem:[%s3461_s19 + $0x118] sm:$0xff] %vm1988_vm1, %v1959_v51  ;;  %v1958_v33 = vmax.f32 %v1776_v27, 0.0  ;;  %v3625_v28 = vpop.f32.mrf.mxu1  ;;  %v1791_v41 = vadd.f32 %v2329_v3, %v1406_v58  ;;  %v1451_v38 = vadd.f32 %v3572_v16, %v1066_v40 }
 0x21a   : > { %v1785_v39 = vpop.f32.mrf.mxu0 }
 0x21b   : > { %2023 = vst.msk [vmem:[%s3461_s19 + $0x110] sm:$0xff] %vm1988_vm1, %v1958_v33  ;;  %v1961_v55 = vmax.f32 %v1791_v41, 0.0  ;;  %v1472_v37 = vpop.f32.mrf.mxu1  ;;  %v1786_v52 = vadd.f32 %v1785_v39, %v1401_v35  ;;  %v1456_v35 = vadd.f32 %v3583_v32, %v1071_v54  ;;  %v1076_v32 = vadd.f32 %v3618_v29, %v3008_v14 }
 0x21c   : > { %v2332_v53 = vpop.f32.mrf.mxu0 }
 0x21d   : > { %2026 = vst.msk [vmem:[%s3461_s19 + $0x128] sm:$0xff] %vm1988_vm1, %v1961_v55  ;;  %v1960_v19 = vmax.f32 %v1786_v52, 0.0  ;;  %v3637_v12 = vpop.f32.mrf.mxu1  ;;  %v1801_v59 = vadd.f32 %v2332_v53, %v1416_v5  ;;  %v1466_v52 = vadd.f32 %v3608_v62, %v1081_v8 }
 0x21e   : > { %v1795_v23 = vpop.f32.mrf.mxu0 }
 0x21f   : > { %2025 = vst.msk [vmem:[%s3461_s19 + $0x120] sm:$0xff] %vm1988_vm1, %v1960_v19  ;;  %v1963_v31 = vmax.f32 %v1801_v59, 0.0  ;;  %v1477_v17 = vpop.f32.mrf.mxu1  ;;  %v1796_v56 = vadd.f32 %v1795_v23, %v1411_v50  ;;  %v3778_v19 = vld [vmem:[#allocation3_spill] sm:$0xff]  ;;  %v1461_v59 = vadd.f32 %v3596_v60, %v1076_v32 }
 0x220   : > { %v2335_v21 = vpop.f32.mrf.mxu0  ;;  %v1091_v16 = vadd.f32 %v3618_v29, %v3778_v19  ;;  %v3786_v32 = vld [vmem:[#allocation11_spill] sm:$0xff]  ;;  %v3787_v19 = vld [vmem:[#allocation10_spill] sm:$0xff] }
 0x221   : > { %2028 = vst.msk [vmem:[%s3461_s19 + $0x138] sm:$0xff] %vm1988_vm1, %v1963_v31  ;;  %v1962_v11 = vmax.f32 %v1796_v56, 0.0  ;;  %v3649_v63 = vpop.f32.mrf.mxu1  ;;  %v1811_v18 = vadd.f32 %v2335_v21, %v1426_v15  ;;  %v3779_v31 = vld [vmem:[#allocation2_spill] sm:$0xff] }
 0x222   : > { %v1805_v45 = vpop.f32.mrf.mxu0  ;;  %v1086_v62 = vadd.f32 %v3618_v29, %v3779_v31  ;;  %v1476_v17 = vadd.f32 %v3637_v12, %v1091_v16  ;;  %v1126_v16 = vadd.f32 %v3618_v29, %v3787_v19 }
 0x223   : > { %2027 = vst.msk [vmem:[%s3461_s19 + $0x130] sm:$0xff] %vm1988_vm1, %v1962_v11  ;;  %v1965_v7 = vmax.f32 %v1811_v18, 0.0  ;;  %v1482_v24 = vpop.f32.mrf.mxu1  ;;  %v1806_v10 = vadd.f32 %v1805_v45, %v1421_v36  ;;  %v3780_v11 = vld [vmem:[#allocation5_spill] sm:$0xff] }
 0x224   : > { %v2338_v43 = vpop.f32.mrf.mxu0  ;;  %v1101_v60 = vadd.f32 %v3618_v29, %v3780_v11  ;;  %v1471_v18 = vadd.f32 %v3625_v28, %v1086_v62  ;;  %v3781_v24 = vld [vmem:[#allocation4_spill] sm:$0xff]  ;;  %v3788_v62 = vld [vmem:[#allocation13_spill] sm:$0xff] }
 0x225   : > { %2030 = vst.msk [vmem:[%s3461_s19 + $0x148] sm:$0xff] %vm1988_vm1, %v1965_v7  ;;  %v1964_v6 = vmax.f32 %v1806_v10, 0.0  ;;  %v1485_v42 = vpop.f32.mrf.mxu1  ;;  %v1821_v34 = vadd.f32 %v2338_v43, %v1436_v46  ;;  %v1096_v12 = vadd.f32 %v3618_v29, %v3781_v24  ;;  %v3789_v11 = vld [vmem:[#allocation12_spill] sm:$0xff] }
 0x226   : > { %v1815_v20 = vpop.f32.mrf.mxu0  ;;  %v1486_v10 = vadd.f32 %v1485_v42, %v1101_v60  ;;  %v1136_v60 = vadd.f32 %v3618_v29, %v3789_v11 }
 0x227   : > { %2029 = vst.msk [vmem:[%s3461_s19 + $0x140] sm:$0xff] %vm1988_vm1, %v1964_v6  ;;  %v1967_v25 = vmax.f32 %v1821_v34, 0.0  ;;  %v1487_v58 = vpop.f32.mrf.mxu1  ;;  %v1816_v13 = vadd.f32 %v1815_v20, %v1431_v30  ;;  %v3782_v34 = vld [vmem:[#allocation7_spill] sm:$0xff]  ;;  %v1481_v20 = vadd.f32 %v3649_v63, %v1096_v12 }
 0x228   : > { %v2341_v51 = vpop.f32.mrf.mxu0  ;;  %v1111_v28 = vadd.f32 %v3618_v29, %v3782_v34 }
 0x229   : > { %2032 = vst.msk [vmem:[%s3461_s19 + $0x158] sm:$0xff] %vm1988_vm1, %v1967_v25  ;;  %v1966_v27 = vmax.f32 %v1816_v13, 0.0  ;;  %v3671_v3 = vpop.f32.mrf.mxu1  ;;  %v1831_v44 = vadd.f32 %v2341_v51, %v1446_v61  ;;  %v3783_v13 = vld [vmem:[#allocation6_spill] sm:$0xff] }
 0x22a   : > { %v1825_v4 = vpop.f32.mrf.mxu0  ;;  %v1106_v42 = vadd.f32 %v3618_v29, %v3783_v13 }
 0x22b   : > { %2031 = vst.msk [vmem:[%s3461_s19 + $0x150] sm:$0xff] %vm1988_vm1, %v1966_v27  ;;  %v1969_v33 = vmax.f32 %v1831_v44, 0.0  ;;  %v1492_v48 = vpop.f32.mrf.mxu1  ;;  %v1826_v41 = vadd.f32 %v1825_v4, %v1441_v49  ;;  %v3784_v4 = vld [vmem:[#allocation9_spill] sm:$0xff] }
 0x22c   : > { %v2344_v39 = vpop.f32.mrf.mxu0  ;;  %v1121_v63 = vadd.f32 %v3618_v29, %v3784_v4  ;;  %v1491_v40 = vadd.f32 %v3671_v3, %v1106_v42  ;;  %v1131_v3 = vadd.f32 %v3618_v29, %v3786_v32 }
 0x22d   : > { %2034 = vst.msk [vmem:[%s3461_s19 + $0x168] sm:$0xff] %vm1988_vm1, %v1969_v33  ;;  %v1968_v5 = vmax.f32 %v1826_v41, 0.0  ;;  %v1495_v55 = vpop.f32.mrf.mxu1  ;;  %v1841_v9 = vadd.f32 %v2344_v39, %v1456_v35  ;;  %v3785_v39 = vld [vmem:[#allocation8_spill] sm:$0xff] }
 0x22e   : > { %v1835_v37 = vpop.f32.mrf.mxu0  ;;  %v1496_v51 = vadd.f32 %v1495_v55, %v1111_v28  ;;  %v1116_v8 = vadd.f32 %v3618_v29, %v3785_v39 }
 0x22f   : > { %2033 = vst.msk [vmem:[%s3461_s19 + $0x160] sm:$0xff] %vm1988_vm1, %v1968_v5  ;;  %v1971_v53 = vmax.f32 %v1841_v9, 0.0  ;;  %v1497_v1 = vpop.f32.mrf.mxu1  ;;  %v1836_v22 = vadd.f32 %v1835_v37, %v1451_v38 }
 0x230   : > { %v2347_v50 = vpop.f32.mrf.mxu0 }
 0x231   : > { %2036 = vst.msk [vmem:[%s3461_s19 + $0x178] sm:$0xff] %vm1988_vm1, %v1971_v53  ;;  %v1970_v23 = vmax.f32 %v1836_v22, 0.0  ;;  %v1500_v0 = vpop.f32.mrf.mxu1  ;;  %v1851_v14 = vadd.f32 %v2347_v50, %v1466_v52 }
 0x232   : > { %v1845_v15 = vpop.f32.mrf.mxu0  ;;  %v1501_v52 = vadd.f32 %v1500_v0, %v1116_v8  ;;  %v1141_v0 = vadd.f32 %v3618_v29, %v3788_v62 }
 0x233   : > { %2035 = vst.msk [vmem:[%s3461_s19 + $0x170] sm:$0xff] %vm1988_vm1, %v1970_v23  ;;  %v1973_v56 = vmax.f32 %v1851_v14, 0.0  ;;  %v1502_v21 = vpop.f32.mrf.mxu1  ;;  %v1846_v57 = vadd.f32 %v1845_v15, %v1461_v59 }
 0x234   : > { %v2350_v36 = vpop.f32.mrf.mxu0 }
 0x235   : > { %2038 = vst.msk [vmem:[%s3461_s19 + $0x188] sm:$0xff] %vm1988_vm1, %v1973_v56  ;;  %v1972_v45 = vmax.f32 %v1846_v57, 0.0  ;;  %v1505_v47 = vpop.f32.mrf.mxu1  ;;  %v1861_v46 = vadd.f32 %v2350_v36, %v1476_v17 }
 0x236   : > { %v1855_v7 = vpop.f32.mrf.mxu0  ;;  %v1506_v38 = vadd.f32 %v1505_v47, %v1121_v63 }
 0x237   : > { %2037 = vst.msk [vmem:[%s3461_s19 + $0x180] sm:$0xff] %vm1988_vm1, %v1972_v45  ;;  %v1975_v43 = vmax.f32 %v1861_v46, 0.0  ;;  %v1507_v26 = vpop.f32.mrf.mxu1  ;;  %v1856_v30 = vadd.f32 %v1855_v7, %v1471_v18 }
 0x238   : > { %v2353_v6 = vpop.f32.mrf.mxu0 }
 0x239   : > { %2040 = vst.msk [vmem:[%s3461_s19 + $0x198] sm:$0xff] %vm1988_vm1, %v1975_v43  ;;  %v1974_v2 = vmax.f32 %v1856_v30, 0.0  ;;  %v1510_v61 = vpop.f32.mrf.mxu1  ;;  %v1871_v25 = vadd.f32 %v2353_v6, %v1486_v10  ;;  %v3790_v30 = vld [vmem:[#allocation14_spill] sm:$0xff] }
 0x23a   : > { %v1865_v58 = vpop.f32.mrf.mxu0  ;;  %v1511_v17 = vadd.f32 %v1510_v61, %v1126_v16  ;;  %v1146_v6 = vadd.f32 %v3618_v29, %v3790_v30 }
 0x23b   : > { %2039 = vst.msk [vmem:[%s3461_s19 + $0x190] sm:$0xff] %vm1988_vm1, %v1974_v2  ;;  %v1977_v54 = vmax.f32 %v1871_v25, 0.0  ;;  %v1512_v49 = vpop.f32.mrf.mxu1  ;;  %v1866_v27 = vadd.f32 %v1865_v58, %v1481_v20  ;;  %v3791_v2 = vld [vmem:[#allocation15_spill] sm:$0xff] }
 0x23c   : > { %v2356_v44 = vpop.f32.mrf.mxu0  ;;  %v1151_v61 = vadd.f32 %v3618_v29, %v3791_v2 }
 0x23d   : > { %2042 = vst.msk [vmem:[%s3461_s19 + $0x1a8] sm:$0xff] %vm1988_vm1, %v1977_v54  ;;  %v1976_v35 = vmax.f32 %v1866_v27, 0.0  ;;  %v1515_v33 = vpop.f32.mrf.mxu1  ;;  %v1881_v48 = vadd.f32 %v2356_v44, %v1496_v51 }
 0x23e   : > { %v1875_v41 = vpop.f32.mrf.mxu0  ;;  %v1516_v59 = vadd.f32 %v1515_v33, %v1131_v3 }
 0x23f   : > { %2041 = vst.msk [vmem:[%s3461_s19 + $0x1a0] sm:$0xff] %vm1988_vm1, %v1976_v35  ;;  %v1979_v5 = vmax.f32 %v1881_v48, 0.0  ;;  %v1517_v55 = vpop.f32.mrf.mxu1  ;;  %v1876_v9 = vadd.f32 %v1875_v41, %v1491_v40 }
 0x240   : > { %v2359_v37 = vpop.f32.mrf.mxu0 }
 0x241   : > { %2044 = vst.msk [vmem:[%s3461_s19 + $0x1b8] sm:$0xff] %vm1988_vm1, %v1979_v5  ;;  %v1978_v53 = vmax.f32 %v1876_v9, 0.0  ;;  %v1520_v1 = vpop.f32.mrf.mxu1  ;;  %v1891_v22 = vadd.f32 %v2359_v37, %v1506_v38 }
 0x242   : > { %v1885_v50 = vpop.f32.mrf.mxu0  ;;  %v1521_v24 = vadd.f32 %v1520_v1, %v1136_v60 }
 0x243   : > { %2043 = vst.msk [vmem:[%s3461_s19 + $0x1b0] sm:$0xff] %vm1988_vm1, %v1978_v53  ;;  %v1981_v23 = vmax.f32 %v1891_v22, 0.0  ;;  %v1522_v14 = vpop.f32.mrf.mxu1  ;;  %v1886_v15 = vadd.f32 %v1885_v50, %v1501_v52 }
 0x244   : > { %v2362_v31 = vpop.f32.mrf.mxu0 }
 0x245   : > { %2046 = vst.msk [vmem:[%s3461_s19 + $0x1c8] sm:$0xff] %vm1988_vm1, %v1981_v23  ;;  %v1980_v56 = vmax.f32 %v1886_v15, 0.0  ;;  %v1525_v21 = vpop.f32.mrf.mxu1  ;;  %v1901_v57 = vadd.f32 %v2362_v31, %v1516_v59 }
 0x246   : > { %v1895_v36 = vpop.f32.mrf.mxu0  ;;  %v1526_v18 = vadd.f32 %v1525_v21, %v1141_v0 }
 0x247   : > { %2045 = vst.msk [vmem:[%s3461_s19 + $0x1c0] sm:$0xff] %vm1988_vm1, %v1980_v56  ;;  %v1983_v45 = vmax.f32 %v1901_v57, 0.0  ;;  %v1527_v47 = vpop.f32.mrf.mxu1  ;;  %v1896_v46 = vadd.f32 %v1895_v36, %v1511_v17 }
 0x248   : > { %v2365_v7 = vpop.f32.mrf.mxu0 }
 0x249   : > { %2048 = vst.msk [vmem:[%s3461_s19 + $0x1d8] sm:$0xff] %vm1988_vm1, %v1983_v45  ;;  %v1982_v12 = vmax.f32 %v1896_v46, 0.0  ;;  %v1530_v10 = vpop.f32.mrf.mxu1  ;;  %v1911_v43 = vadd.f32 %v2365_v7, %v1526_v18 }
 0x24a   : > { %v1905_v26 = vpop.f32.mrf.mxu0  ;;  %v1531_v58 = vadd.f32 %v1530_v10, %v1146_v6 }
 0x24b   : > { %2047 = vst.msk [vmem:[%s3461_s19 + $0x1d0] sm:$0xff] %vm1988_vm1, %v1982_v12  ;;  %v1985_v34 = vmax.f32 %v1911_v43, 0.0  ;;  %v1532_v28 = vpop.f32.mrf.mxu1  ;;  %v1906_v20 = vadd.f32 %v1905_v26, %v1521_v24 }
 0x24c   : > { %v2368_v25 = vpop.f32.mrf.mxu0 }
 0x24d   : > { %2050 = vst.msk [vmem:[%s3461_s19 + $0x1e8] sm:$0xff] %vm1988_vm1, %v1985_v34  ;;  %v1984_v13 = vmax.f32 %v1906_v20, 0.0  ;;  %v1535_v42 = vpop.f32.mrf.mxu1 }
 0x24e   : > { %v1536_v51 = vadd.f32 %v1535_v42, %v1151_v61  ;;  %v1915_v54 = vpop.f32.mrf.mxu0 }
 0x24f   : > { %2049 = vst.msk [vmem:[%s3461_s19 + $0x1e0] sm:$0xff] %vm1988_vm1, %v1984_v13  ;;  %v1537_v49 = vpop.f32.mrf.mxu1  ;;  %v1916_v27 = vadd.f32 %v1915_v54, %v1531_v58 }
 0x250   : > { %v1921_v44 = vadd.f32 %v2368_v25, %v1536_v51 }
 0x251   : > { %v1986_v4 = vmax.f32 %v1916_v27, 0.0 }
 0x252   : > { %v1987_v63 = vmax.f32 %v1921_v44, 0.0 }
 0x253   : > { %2051 = vst.msk [vmem:[%s3461_s19 + $0x1f0] sm:$0xff] %vm1988_vm1, %v1986_v4 }
 0x254   : > { %2052 = vst.msk [vmem:[%s3461_s19 + $0x1f8] sm:$0xff] %vm1988_vm1, %v1987_v63 }
 0x255 PF: > { %s13_s12 = sadd.s32 1, %s2450_s12  }
 0x256   : > { %p10_p4 = scmp.ge.s32.totalorder %s13_s12, 6  }
 0x258   :  { %12 = sbr.rel (!%p10_p4) target bundleno = 1 (0x1), region = 62 }

// kernel: forward.15
= control target key start
LH: loop header
LB: loop body
LE: loop exit
PB: predicated region body
PF: predicated region fallthrough
CT: control target
= control target key end

     0   :  { %s1997_s12 = smov 0   ;;  %s2398_s0 = inlined_call_operand.vmem [shape: f32[2048,91], index: 0, kind: input, shape index: {}]   ;;  %s2399_s1 = inlined_call_operand.vmem [shape: f32[91,3], index: 1, kind: input, shape index: {}]   ;;  %s2400_s2 = inlined_call_operand.vmem [shape: f32[1,3], index: 2, kind: input, shape index: {}]   ;;  %s2401_s3 = inlined_call_operand.vmem [shape: f32[2048,3], index: 3, kind: output, shape index: {}]  }
   0x1 LB: > { %s1344_s13 = sadd.s32 4294967295, %s1975_s12   ;;  %p1348_p0 = scmp.ge.s32.totalorder %s1975_s12, 1  ;;  %s1975_s12 = sphi %s1997_s12, %s13_s12  }
   0x2   : > { %p138_p1 = scmp.lt.s32.totalorder %s1975_s12, 5 }
   0x4   : > { %p139_p2 = pnand %p1348_p0, %p138_p1 }
   0x5   : > { %s1349_s22 = sshll.u32 (!%p139_p2), %s1344_s13, 6 }
   0x6   : > { %142 = sbr.rel (%p139_p2) target bundleno = 376 (0x178), region = 32  ;;  %p163_p3 = scmp.lt.s32.totalorder (!%p139_p2), %s1349_s22, 255 }
   0xb   : > { %v249_v0 = vld [vmem:[%s2399_s1 + $0x58] sm:$0x7]  ;;  %vm450_vm0 = vcmask 1042432   ;;  %v248_v1 = vld [vmem:[%s2399_s1 + $0x50] sm:$0xff]  ;;  %v247_v2 = vld [vmem:[%s2399_s1 + $0x48] sm:$0xff]  ;;  %s2403_s22 = smov (!%p163_p3, %s1349_s22), 255 }
   0xc   : > { %1561 = vmatprep.subr.msk.mxu0 %vm450_vm0, %v249_v0  ;;  %1681 = vmatprep.subr.msk.mxu1 %vm450_vm0, %v249_v0  ;;  %v246_v3 = vld [vmem:[%s2399_s1 + $0x40] sm:$0xff]  ;;  %v245_v4 = vld [vmem:[%s2399_s1 + $0x38] sm:$0xff]  ;;  %v244_v5 = vld [vmem:[%s2399_s1 + $0x30] sm:$0xff]  ;;  %s1350_s8 = sshll.u32 %s2403_s22, 3  ;;  %vm257_vm1 = vcmask 744448   ;;  %vm1223_vm2 = vcmask 23552  }
   0xd   : > { %1562 = vmatpush3.msk.msra.mxu0 %vm450_vm0, %v249_v0  ;;  %1693 = vmatpush3.msk.msra.mxu1 %vm450_vm0, %v249_v0  ;;  %v243_v6 = vld [vmem:[%s2399_s1 + $0x28] sm:$0xff]  ;;  %v242_v7 = vld [vmem:[%s2399_s1 + $0x20] sm:$0xff]  ;;  %v241_v8 = vld [vmem:[%s2399_s1 + $0x18] sm:$0xff]  ;;  %s2046_s14 = scalar_lea.vmem %s2398_s0, %s1350_s8  ;;  %s2208_s21 = scalar_lea.vmem %s2401_s3, %s1350_s8 }
   0xe   : > { %1563 = vmatprep.subr.mxu0 %v248_v1  ;;  %1682 = vmatprep.subr.mxu1 %v248_v1  ;;  %v240_v9 = vld [vmem:[%s2399_s1 + $0x10] sm:$0xff]  ;;  %v239_v10 = vld [vmem:[%s2399_s1 + $0x8] sm:$0xff]  ;;  %v238_v11 = vld [vmem:[%s2399_s1] sm:$0xff] }
   0xf   : > { %1564 = vmatpush3.msra.mxu0 %v248_v1  ;;  %1694 = vmatpush3.msra.mxu1 %v248_v1  ;;  %v174_v12 = vld [vmem:[%s2046_s14] sm:$0xff]  ;;  %v175_v14 = vld [vmem:[%s2046_s14 + $0x8] sm:$0xff]  ;;  %v176_v16 = vld [vmem:[%s2046_s14 + $0x10] sm:$0xff] }
  0x10   : > { %1565 = vmatprep.subr.mxu0 %v247_v2  ;;  %1683 = vmatprep.subr.mxu1 %v247_v2  ;;  %v206_v13 = vld [vmem:[%s2046_s14 + $0x100] sm:$0xff]  ;;  %v207_v15 = vld [vmem:[%s2046_s14 + $0x108] sm:$0xff]  ;;  %v208_v17 = vld [vmem:[%s2046_s14 + $0x110] sm:$0xff] }
  0x11   : > { %1566 = vmatpush3.msra.mxu0 %v247_v2  ;;  %1695 = vmatpush3.msra.mxu1 %v247_v2  ;;  %v177_v18 = vld [vmem:[%s2046_s14 + $0x18] sm:$0xff]  ;;  %v178_v20 = vld [vmem:[%s2046_s14 + $0x20] sm:$0xff]  ;;  %v179_v22 = vld [vmem:[%s2046_s14 + $0x28] sm:$0xff] }
  0x12   : > { %1567 = vmatprep.subr.mxu0 %v246_v3  ;;  %1684 = vmatprep.subr.mxu1 %v246_v3  ;;  %v209_v19 = vld [vmem:[%s2046_s14 + $0x118] sm:$0xff]  ;;  %v210_v21 = vld [vmem:[%s2046_s14 + $0x120] sm:$0xff]  ;;  %v211_v23 = vld [vmem:[%s2046_s14 + $0x128] sm:$0xff] }
  0x13   : > { %1568 = vmatpush3.msra.mxu0 %v246_v3  ;;  %1696 = vmatpush3.msra.mxu1 %v246_v3  ;;  %v180_v24 = vld [vmem:[%s2046_s14 + $0x30] sm:$0xff]  ;;  %v181_v26 = vld [vmem:[%s2046_s14 + $0x38] sm:$0xff]  ;;  %v182_v28 = vld [vmem:[%s2046_s14 + $0x40] sm:$0xff] }
  0x14   : > { %1569 = vmatprep.subr.mxu0 %v245_v4  ;;  %1685 = vmatprep.subr.mxu1 %v245_v4  ;;  %v212_v25 = vld [vmem:[%s2046_s14 + $0x130] sm:$0xff]  ;;  %v213_v27 = vld [vmem:[%s2046_s14 + $0x138] sm:$0xff]  ;;  %v214_v29 = vld [vmem:[%s2046_s14 + $0x140] sm:$0xff] }
  0x15   : > { %1570 = vmatpush3.msra.mxu0 %v245_v4  ;;  %1697 = vmatpush3.msra.mxu1 %v245_v4  ;;  %v183_v30 = vld [vmem:[%s2046_s14 + $0x48] sm:$0xff]  ;;  %v184_v32 = vld [vmem:[%s2046_s14 + $0x50] sm:$0xff]  ;;  %v185_v34 = vld [vmem:[%s2046_s14 + $0x58] sm:$0xff] }
  0x16   : > { %1571 = vmatprep.subr.mxu0 %v244_v5  ;;  %1686 = vmatprep.subr.mxu1 %v244_v5  ;;  %v215_v31 = vld [vmem:[%s2046_s14 + $0x148] sm:$0xff]  ;;  %v216_v33 = vld [vmem:[%s2046_s14 + $0x150] sm:$0xff]  ;;  %v217_v35 = vld [vmem:[%s2046_s14 + $0x158] sm:$0xff] }
  0x17   : > { %1572 = vmatpush3.msra.mxu0 %v244_v5  ;;  %1698 = vmatpush3.msra.mxu1 %v244_v5  ;;  %v186_v36 = vld [vmem:[%s2046_s14 + $0x60] sm:$0xff]  ;;  %v187_v38 = vld [vmem:[%s2046_s14 + $0x68] sm:$0xff]  ;;  %v188_v40 = vld [vmem:[%s2046_s14 + $0x70] sm:$0xff] }
  0x18   : > { %1573 = vmatprep.subr.mxu0 %v243_v6  ;;  %1687 = vmatprep.subr.mxu1 %v243_v6  ;;  %v218_v37 = vld [vmem:[%s2046_s14 + $0x160] sm:$0xff]  ;;  %v219_v39 = vld [vmem:[%s2046_s14 + $0x168] sm:$0xff]  ;;  %v220_v41 = vld [vmem:[%s2046_s14 + $0x170] sm:$0xff] }
  0x19   : > { %1574 = vmatpush3.msra.mxu0 %v243_v6  ;;  %1699 = vmatpush3.msra.mxu1 %v243_v6  ;;  %v189_v42 = vld [vmem:[%s2046_s14 + $0x78] sm:$0xff]  ;;  %v190_v44 = vld [vmem:[%s2046_s14 + $0x80] sm:$0xff]  ;;  %v191_v46 = vld [vmem:[%s2046_s14 + $0x88] sm:$0xff] }
  0x1a   : > { %1575 = vmatprep.subr.mxu0 %v242_v7  ;;  %1688 = vmatprep.subr.mxu1 %v242_v7  ;;  %v221_v43 = vld [vmem:[%s2046_s14 + $0x178] sm:$0xff]  ;;  %v222_v45 = vld [vmem:[%s2046_s14 + $0x180] sm:$0xff]  ;;  %v223_v47 = vld [vmem:[%s2046_s14 + $0x188] sm:$0xff] }
  0x1b   : > { %1576 = vmatpush3.msra.mxu0 %v242_v7  ;;  %1700 = vmatpush3.msra.mxu1 %v242_v7  ;;  %v192_v48 = vld [vmem:[%s2046_s14 + $0x90] sm:$0xff]  ;;  %v193_v50 = vld [vmem:[%s2046_s14 + $0x98] sm:$0xff]  ;;  %v194_v52 = vld [vmem:[%s2046_s14 + $0xa0] sm:$0xff] }
  0x1c   : > { %1577 = vmatprep.subr.mxu0 %v241_v8  ;;  %1689 = vmatprep.subr.mxu1 %v241_v8  ;;  %v224_v49 = vld [vmem:[%s2046_s14 + $0x190] sm:$0xff]  ;;  %v225_v51 = vld [vmem:[%s2046_s14 + $0x198] sm:$0xff]  ;;  %v226_v53 = vld [vmem:[%s2046_s14 + $0x1a0] sm:$0xff] }
  0x1d   : > { %1578 = vmatpush3.msra.mxu0 %v241_v8  ;;  %1701 = vmatpush3.msra.mxu1 %v241_v8  ;;  %v195_v54 = vld [vmem:[%s2046_s14 + $0xa8] sm:$0xff]  ;;  %v196_v56 = vld [vmem:[%s2046_s14 + $0xb0] sm:$0xff]  ;;  %v197_v58 = vld [vmem:[%s2046_s14 + $0xb8] sm:$0xff] }
  0x1e   : > { %1579 = vmatprep.subr.mxu0 %v240_v9  ;;  %1690 = vmatprep.subr.mxu1 %v240_v9  ;;  %v227_v55 = vld [vmem:[%s2046_s14 + $0x1a8] sm:$0xff]  ;;  %v228_v57 = vld [vmem:[%s2046_s14 + $0x1b0] sm:$0xff]  ;;  %v229_v59 = vld [vmem:[%s2046_s14 + $0x1b8] sm:$0xff] }
  0x1f   : > { %1580 = vmatpush3.msra.mxu0 %v240_v9  ;;  %1702 = vmatpush3.msra.mxu1 %v240_v9  ;;  %v198_v60 = vld [vmem:[%s2046_s14 + $0xc0] sm:$0xff]  ;;  %v199_v62 = vld [vmem:[%s2046_s14 + $0xc8] sm:$0xff]  ;;  %v200_v0 = vld [vmem:[%s2046_s14 + $0xd0] sm:$0xff] }
  0x20   : > { %1581 = vmatprep.subr.mxu0 %v239_v10  ;;  %1691 = vmatprep.subr.mxu1 %v239_v10  ;;  %v230_v61 = vld [vmem:[%s2046_s14 + $0x1c0] sm:$0xff]  ;;  %v231_v63 = vld [vmem:[%s2046_s14 + $0x1c8] sm:$0xff]  ;;  %v232_v1 = vld [vmem:[%s2046_s14 + $0x1d0] sm:$0xff] }
  0x21   : > { %1582 = vmatpush3.msra.mxu0 %v239_v10  ;;  %1703 = vmatpush3.msra.mxu1 %v239_v10  ;;  %v201_v2 = vld [vmem:[%s2046_s14 + $0xd8] sm:$0xff]  ;;  %v202_v4 = vld [vmem:[%s2046_s14 + $0xe0] sm:$0xff]  ;;  %v203_v6 = vld [vmem:[%s2046_s14 + $0xe8] sm:$0xff] }
  0x22   : > { %1583 = vmatprep.subr.mxu0 %v238_v11  ;;  %1692 = vmatprep.subr.mxu1 %v238_v11  ;;  %v233_v3 = vld [vmem:[%s2046_s14 + $0x1d8] sm:$0xff]  ;;  %v234_v5 = vld [vmem:[%s2046_s14 + $0x1e0] sm:$0xff]  ;;  %v235_v7 = vld [vmem:[%s2046_s14 + $0x1e8] sm:$0xff] }
  0x23   : > { %1584 = vmatpush3.msra.mxu0 %v238_v11  ;;  %1704 = vmatpush3.msra.mxu1 %v238_v11  ;;  %v204_v8 = vld [vmem:[%s2046_s14 + $0xf0] sm:$0xff]  ;;  %v205_v10 = vld [vmem:[%s2046_s14 + $0xf8] sm:$0xff] }
  0x24   : > { %1585 = vmatprep.mubr.msk.f32.mxu0 %vm257_vm1, %v174_v12  ;;  %1633 = vmatprep.mubr.msk.f32.mxu1 %vm257_vm1, %v206_v13  ;;  %v236_v9 = vld [vmem:[%s2046_s14 + $0x1f0] sm:$0xff]  ;;  %v237_v11 = vld [vmem:[%s2046_s14 + $0x1f8] sm:$0xff]  ;;  %v2182_v12 = vld [vmem:[%s2400_s2] ss:$0 sm:$0xff] }
  0x25   : > { %1586 = vmatmul.mubr.msk.f32.vlgmr.msra.gmra.mxu0 %vm257_vm1, %v175_v14  ;;  %1634 = vmatmul.mubr.msk.f32.vlgmr.msra.gmra.mxu1 %vm257_vm1, %v207_v15 }
  0x26   : > { %1588 = vmatprep.mubr.msk.f32.mxu0 %vm257_vm1, %v176_v16  ;;  %1636 = vmatprep.mubr.msk.f32.mxu1 %vm257_vm1, %v208_v17 }
  0x29   : > { %1589 = vmatmul.mubr.msk.f32.gmra.mxu0 %vm257_vm1, %v177_v18  ;;  %1637 = vmatmul.mubr.msk.f32.gmra.mxu1 %vm257_vm1, %v209_v19 }
  0x2a   : > { %1591 = vmatprep.mubr.msk.f32.mxu0 %vm257_vm1, %v178_v20  ;;  %1639 = vmatprep.mubr.msk.f32.mxu1 %vm257_vm1, %v210_v21 }
  0x2d   : > { %1592 = vmatmul.mubr.msk.f32.gmra.mxu0 %vm257_vm1, %v179_v22  ;;  %1640 = vmatmul.mubr.msk.f32.gmra.mxu1 %vm257_vm1, %v211_v23 }
  0x2e   : > { %1594 = vmatprep.mubr.msk.f32.mxu0 %vm257_vm1, %v180_v24  ;;  %1642 = vmatprep.mubr.msk.f32.mxu1 %vm257_vm1, %v212_v25 }
  0x31   : > { %1595 = vmatmul.mubr.msk.f32.gmra.mxu0 %vm257_vm1, %v181_v26  ;;  %1643 = vmatmul.mubr.msk.f32.gmra.mxu1 %vm257_vm1, %v213_v27 }
  0x32   : > { %1597 = vmatprep.mubr.msk.f32.mxu0 %vm257_vm1, %v182_v28  ;;  %1645 = vmatprep.mubr.msk.f32.mxu1 %vm257_vm1, %v214_v29 }
  0x35   : > { %1598 = vmatmul.mubr.msk.f32.gmra.mxu0 %vm257_vm1, %v183_v30  ;;  %1646 = vmatmul.mubr.msk.f32.gmra.mxu1 %vm257_vm1, %v215_v31 }
  0x36   : > { %1600 = vmatprep.mubr.msk.f32.mxu0 %vm257_vm1, %v184_v32  ;;  %1648 = vmatprep.mubr.msk.f32.mxu1 %vm257_vm1, %v216_v33 }
  0x39   : > { %1601 = vmatmul.mubr.msk.f32.gmra.mxu0 %vm257_vm1, %v185_v34  ;;  %1649 = vmatmul.mubr.msk.f32.gmra.mxu1 %vm257_vm1, %v217_v35 }
  0x3a   : > { %1603 = vmatprep.mubr.msk.f32.mxu0 %vm257_vm1, %v186_v36  ;;  %1651 = vmatprep.mubr.msk.f32.mxu1 %vm257_vm1, %v218_v37 }
  0x3d   : > { %1604 = vmatmul.mubr.msk.f32.gmra.mxu0 %vm257_vm1, %v187_v38  ;;  %1652 = vmatmul.mubr.msk.f32.gmra.mxu1 %vm257_vm1, %v219_v39 }
  0x3e   : > { %1606 = vmatprep.mubr.msk.f32.mxu0 %vm257_vm1, %v188_v40  ;;  %1654 = vmatprep.mubr.msk.f32.mxu1 %vm257_vm1, %v220_v41 }
  0x41   : > { %1607 = vmatmul.mubr.msk.f32.gmra.mxu0 %vm257_vm1, %v189_v42  ;;  %1655 = vmatmul.mubr.msk.f32.gmra.mxu1 %vm257_vm1, %v221_v43 }
  0x42   : > { %1609 = vmatprep.mubr.msk.f32.mxu0 %vm257_vm1, %v190_v44  ;;  %1657 = vmatprep.mubr.msk.f32.mxu1 %vm257_vm1, %v222_v45 }
  0x45   : > { %1610 = vmatmul.mubr.msk.f32.gmra.mxu0 %vm257_vm1, %v191_v46  ;;  %1658 = vmatmul.mubr.msk.f32.gmra.mxu1 %vm257_vm1, %v223_v47 }
  0x46   : > { %1612 = vmatprep.mubr.msk.f32.mxu0 %vm257_vm1, %v192_v48  ;;  %1660 = vmatprep.mubr.msk.f32.mxu1 %vm257_vm1, %v224_v49 }
  0x49   : > { %1613 = vmatmul.mubr.msk.f32.gmra.mxu0 %vm257_vm1, %v193_v50  ;;  %1661 = vmatmul.mubr.msk.f32.gmra.mxu1 %vm257_vm1, %v225_v51 }
  0x4a   : > { %1615 = vmatprep.mubr.msk.f32.mxu0 %vm257_vm1, %v194_v52  ;;  %1663 = vmatprep.mubr.msk.f32.mxu1 %vm257_vm1, %v226_v53 }
  0x4d   : > { %1616 = vmatmul.mubr.msk.f32.gmra.mxu0 %vm257_vm1, %v195_v54  ;;  %1664 = vmatmul.mubr.msk.f32.gmra.mxu1 %vm257_vm1, %v227_v55 }
  0x4e   : > { %1618 = vmatprep.mubr.msk.f32.mxu0 %vm257_vm1, %v196_v56  ;;  %1666 = vmatprep.mubr.msk.f32.mxu1 %vm257_vm1, %v228_v57 }
  0x51   : > { %1619 = vmatmul.mubr.msk.f32.gmra.mxu0 %vm257_vm1, %v197_v58  ;;  %1667 = vmatmul.mubr.msk.f32.gmra.mxu1 %vm257_vm1, %v229_v59 }
  0x52   : > { %1621 = vmatprep.mubr.msk.f32.mxu0 %vm257_vm1, %v198_v60  ;;  %1669 = vmatprep.mubr.msk.f32.mxu1 %vm257_vm1, %v230_v61 }
  0x55   : > { %1622 = vmatmul.mubr.msk.f32.gmra.mxu0 %vm257_vm1, %v199_v62  ;;  %1670 = vmatmul.mubr.msk.f32.gmra.mxu1 %vm257_vm1, %v231_v63 }
  0x56   : > { %1624 = vmatprep.mubr.msk.f32.mxu0 %vm257_vm1, %v200_v0  ;;  %1672 = vmatprep.mubr.msk.f32.mxu1 %vm257_vm1, %v232_v1 }
  0x59   : > { %1625 = vmatmul.mubr.msk.f32.gmra.mxu0 %vm257_vm1, %v201_v2  ;;  %1673 = vmatmul.mubr.msk.f32.gmra.mxu1 %vm257_vm1, %v233_v3 }
  0x5a   : > { %1627 = vmatprep.mubr.msk.f32.mxu0 %vm257_vm1, %v202_v4  ;;  %1675 = vmatprep.mubr.msk.f32.mxu1 %vm257_vm1, %v234_v5 }
  0x5d   : > { %1628 = vmatmul.mubr.msk.f32.gmra.mxu0 %vm257_vm1, %v203_v6  ;;  %1676 = vmatmul.mubr.msk.f32.gmra.mxu1 %vm257_vm1, %v235_v7 }
  0x5e   : > { %1630 = vmatprep.mubr.msk.f32.mxu0 %vm257_vm1, %v204_v8  ;;  %1678 = vmatprep.mubr.msk.f32.mxu1 %vm257_vm1, %v236_v9 }
  0x61   : > { %1631 = vmatmul.mubr.msk.f32.gmra.mxu0 %vm257_vm1, %v205_v10  ;;  %1679 = vmatmul.mubr.msk.f32.gmra.mxu1 %vm257_vm1, %v237_v11 }
  0xe5   : > { %v1587_v13 = vpop.f32.mrf.mxu0  ;;  %v1635_v14 = vpop.f32.mrf.mxu1 }
  0xe6   : > { %v526_v15 = vadd.f32 %v1587_v13, %v2182_v12  ;;  %v686_v16 = vadd.f32 %v1635_v14, %v2182_v12 }
  0xe7   : > { %v520_v17 = vpop.f32.mrf.mxu0  ;;  %v680_v18 = vpop.f32.mrf.mxu1 }
  0xe8   : > { %v1420_v19 = vmul.f32 -1.442695, %v526_v15  ;;  %v1452_v20 = vmul.f32 -1.442695, %v686_v16  ;;  %v521_v21 = vadd.f32 %v2182_v12, %v520_v17  ;;  %v681_v22 = vadd.f32 %v2182_v12, %v680_v18 }
  0xe9   : > { %v1590_v23 = vpop.f32.mrf.mxu0  ;;  %v1638_v24 = vpop.f32.mrf.mxu1 }
  0xea   : > { %1713 = vpow2.f32 %v1420_v19  ;;  %v1419_v25 = vmul.f32 -1.442695, %v521_v21  ;;  %v1451_v26 = vmul.f32 -1.442695, %v681_v22  ;;  %v536_v27 = vadd.f32 %v1590_v23, %v2182_v12 }
  0xeb   : > { %1715 = vpow2.f32 %v1452_v20  ;;  %v696_v28 = vadd.f32 %v1638_v24, %v2182_v12  ;;  %v530_v29 = vpop.f32.mrf.mxu0  ;;  %v690_v30 = vpop.f32.mrf.mxu1 }
  0xec   : > { %1717 = vpow2.f32 %v1419_v25  ;;  %v1422_v31 = vmul.f32 -1.442695, %v536_v27  ;;  %v531_v32 = vadd.f32 %v2182_v12, %v530_v29  ;;  %v691_v33 = vadd.f32 %v2182_v12, %v690_v30 }
  0xed   : > { %1719 = vpow2.f32 %v1451_v26  ;;  %v1454_v34 = vmul.f32 -1.442695, %v696_v28  ;;  %v1593_v35 = vpop.f32.mrf.mxu0  ;;  %v1641_v36 = vpop.f32.mrf.mxu1 }
  0xee   : > { %1721 = vpow2.f32 %v1422_v31  ;;  %v1421_v37 = vmul.f32 -1.442695, %v531_v32  ;;  %v1453_v38 = vmul.f32 -1.442695, %v691_v33  ;;  %v546_v39 = vadd.f32 %v1593_v35, %v2182_v12 }
  0xef   : > { %1723 = vpow2.f32 %v1454_v34  ;;  %v706_v40 = vadd.f32 %v1641_v36, %v2182_v12  ;;  %v540_v41 = vpop.f32.mrf.mxu0  ;;  %v700_v42 = vpop.f32.mrf.mxu1 }
  0xf0   : > { %1725 = vpow2.f32 %v1421_v37  ;;  %v1424_v43 = vmul.f32 -1.442695, %v546_v39  ;;  %v541_v44 = vadd.f32 %v2182_v12, %v540_v41  ;;  %v701_v45 = vadd.f32 %v2182_v12, %v700_v42 }
  0xf1   : > { %1727 = vpow2.f32 %v1453_v38  ;;  %v1456_v46 = vmul.f32 -1.442695, %v706_v40  ;;  %v1596_v47 = vpop.f32.mrf.mxu0  ;;  %v1644_v48 = vpop.f32.mrf.mxu1 }
  0xf2   : > { %1729 = vpow2.f32 %v1424_v43  ;;  %v1423_v49 = vmul.f32 -1.442695, %v541_v44  ;;  %v1455_v50 = vmul.f32 -1.442695, %v701_v45  ;;  %v556_v51 = vadd.f32 %v1596_v47, %v2182_v12 }
  0xf3   : > { %1731 = vpow2.f32 %v1456_v46  ;;  %v716_v52 = vadd.f32 %v1644_v48, %v2182_v12  ;;  %v550_v53 = vpop.f32.mrf.mxu0  ;;  %v710_v54 = vpop.f32.mrf.mxu1 }
  0xf4   : > { %1733 = vpow2.f32 %v1423_v49  ;;  %v1426_v55 = vmul.f32 -1.442695, %v556_v51  ;;  %v551_v56 = vadd.f32 %v2182_v12, %v550_v53  ;;  %v711_v57 = vadd.f32 %v2182_v12, %v710_v54 }
  0xf5   : > { %1735 = vpow2.f32 %v1455_v50  ;;  %v1458_v58 = vmul.f32 -1.442695, %v716_v52  ;;  %v1599_v59 = vpop.f32.mrf.mxu0  ;;  %v1647_v60 = vpop.f32.mrf.mxu1 }
  0xf6   : > { %1737 = vpow2.f32 %v1426_v55  ;;  %v1425_v61 = vmul.f32 -1.442695, %v551_v56  ;;  %v1457_v62 = vmul.f32 -1.442695, %v711_v57  ;;  %v566_v30 = vadd.f32 %v1599_v59, %v2182_v12 }
  0xf7   : > { %v1714_v63 = vpop.eup %1713  ;;  %1739 = vpow2.f32 %v1458_v58  ;;  %v560_v0 = vpop.f32.mrf.mxu0  ;;  %v726_v34 = vadd.f32 %v1647_v60, %v2182_v12 }
  0xf8   : > { %v720_v1 = vpop.f32.mrf.mxu1  ;;  %v1716_v2 = vpop.eup %1715  ;;  %v1032_v3 = vadd.f32 1.0, %v1714_v63  ;;  %1741 = vpow2.f32 %v1425_v61  ;;  %v561_v37 = vadd.f32 %v2182_v12, %v560_v0  ;;  %v1428_v44 = vmul.f32 -1.442695, %v566_v30 }
  0xf9   : > { %v1718_v4 = vpop.eup %1717  ;;  %v1064_v5 = vadd.f32 1.0, %v1716_v2  ;;  %1743 = vpow2.f32 %v1457_v62  ;;  %v1602_v6 = vpop.f32.mrf.mxu0  ;;  %v721_v40 = vadd.f32 %v2182_v12, %v720_v1  ;;  %v1460_v49 = vmul.f32 -1.442695, %v726_v34 }
  0xfa   : > { %v1720_v7 = vpop.eup %1719  ;;  %1745 = vrcp.f32 %v1032_v3  ;;  %v1031_v8 = vadd.f32 1.0, %v1718_v4  ;;  %v1650_v9 = vpop.f32.mrf.mxu1  ;;  %v576_v45 = vadd.f32 %v1602_v6, %v2182_v12  ;;  %v1427_v52 = vmul.f32 -1.442695, %v561_v37 }
  0xfb   : > { %v1722_v10 = vpop.eup %1721  ;;  %1747 = vrcp.f32 %v1064_v5  ;;  %v1063_v11 = vadd.f32 1.0, %v1720_v7  ;;  %v570_v17 = vpop.f32.mrf.mxu0  ;;  %v736_v50 = vadd.f32 %v1650_v9, %v2182_v12  ;;  %v1459_v55 = vmul.f32 -1.442695, %v721_v40 }
  0xfc   : > { %v1724_v13 = vpop.eup %1723  ;;  %1749 = vrcp.f32 %v1031_v8  ;;  %v1034_v14 = vadd.f32 1.0, %v1722_v10  ;;  %v730_v20 = vpop.f32.mrf.mxu1  ;;  %v571_v53 = vadd.f32 %v2182_v12, %v570_v17  ;;  %v1430_v59 = vmul.f32 -1.442695, %v576_v45 }
  0xfd   : > { %v1726_v15 = vpop.eup %1725  ;;  %1751 = vrcp.f32 %v1063_v11  ;;  %v1066_v16 = vadd.f32 1.0, %v1724_v13  ;;  %v1605_v27 = vpop.f32.mrf.mxu0  ;;  %v731_v56 = vadd.f32 %v2182_v12, %v730_v20  ;;  %v1462_v63 = vmul.f32 -1.442695, %v736_v50 }
  0xfe   : > { %v1728_v18 = vpop.eup %1727  ;;  %1753 = vrcp.f32 %v1034_v14  ;;  %v1033_v19 = vadd.f32 1.0, %v1726_v15  ;;  %v1653_v31 = vpop.f32.mrf.mxu1  ;;  %v586_v60 = vadd.f32 %v1605_v27, %v2182_v12  ;;  %v1429_v2 = vmul.f32 -1.442695, %v571_v53 }
  0xff   : > { %v1730_v21 = vpop.eup %1729  ;;  %1755 = vrcp.f32 %v1066_v16  ;;  %v1065_v22 = vadd.f32 1.0, %v1728_v18  ;;  %v580_v41 = vpop.f32.mrf.mxu0  ;;  %v746_v0 = vadd.f32 %v1653_v31, %v2182_v12  ;;  %v1461_v5 = vmul.f32 -1.442695, %v731_v56 }
 0x100   : > { %v1732_v23 = vpop.eup %1731  ;;  %1757 = vrcp.f32 %v1033_v19  ;;  %v1036_v24 = vadd.f32 1.0, %v1730_v21  ;;  %v740_v46 = vpop.f32.mrf.mxu1  ;;  %v581_v3 = vadd.f32 %v2182_v12, %v580_v41  ;;  %v1432_v9 = vmul.f32 -1.442695, %v586_v60 }
 0x101   : > { %v1734_v25 = vpop.eup %1733  ;;  %1759 = vrcp.f32 %v1065_v22  ;;  %v1068_v26 = vadd.f32 1.0, %v1732_v23  ;;  %v1608_v57 = vpop.f32.mrf.mxu0  ;;  %v741_v6 = vadd.f32 %v2182_v12, %v740_v46  ;;  %v1464_v14 = vmul.f32 -1.442695, %v746_v0 }
 0x102   : > { %v1736_v28 = vpop.eup %1735  ;;  %1761 = vrcp.f32 %v1036_v24  ;;  %v1035_v29 = vadd.f32 1.0, %v1734_v25  ;;  %v1656_v61 = vpop.f32.mrf.mxu1  ;;  %v596_v10 = vadd.f32 %v1608_v57, %v2182_v12  ;;  %v1431_v17 = vmul.f32 -1.442695, %v581_v3 }
 0x103   : > { %v1738_v32 = vpop.eup %1737  ;;  %1763 = vrcp.f32 %v1068_v26  ;;  %v1067_v33 = vadd.f32 1.0, %v1736_v28  ;;  %v590_v7 = vpop.f32.mrf.mxu0  ;;  %v756_v15 = vadd.f32 %v1656_v61, %v2182_v12  ;;  %v1463_v20 = vmul.f32 -1.442695, %v741_v6 }
 0x104   : > { %v1740_v35 = vpop.eup %1739  ;;  %1765 = vrcp.f32 %v1035_v29  ;;  %v1038_v36 = vadd.f32 1.0, %v1738_v32  ;;  %v750_v11 = vpop.f32.mrf.mxu1  ;;  %v591_v18 = vadd.f32 %v2182_v12, %v590_v7  ;;  %v1434_v24 = vmul.f32 -1.442695, %v596_v10 }
 0x105   : > { %v1742_v38 = vpop.eup %1741  ;;  %1767 = vrcp.f32 %v1067_v33  ;;  %v1070_v39 = vadd.f32 1.0, %v1740_v35  ;;  %v751_v21 = vadd.f32 %v2182_v12, %v750_v11  ;;  %v2243_v22 = vpop.f32.mrf.mxu0  ;;  %v1466_v27 = vmul.f32 -1.442695, %v756_v15 }
 0x106   : > { %v1744_v42 = vpop.eup %1743  ;;  %1769 = vrcp.f32 %v1038_v36  ;;  %v1037_v43 = vadd.f32 1.0, %v1742_v38  ;;  %v2247_v25 = vpop.f32.mrf.mxu1  ;;  %v1433_v29 = vmul.f32 -1.442695, %v591_v18 }
 0x107   : > { %v1746_v47 = vpop.eup %1745  ;;  %1771 = vrcp.f32 %v1070_v39  ;;  %v1069_v48 = vadd.f32 1.0, %v1744_v42  ;;  %v1465_v31 = vmul.f32 -1.442695, %v751_v21  ;;  %v600_v32 = vpop.f32.mrf.mxu0  ;;  %v766_v3 = vadd.f32 %v2247_v25, %v2182_v12 }
 0x108   : > { %v1748_v51 = vpop.eup %1747  ;;  %1225 = vst.msk [vmem:[%s2208_s21 + $0x8] sm:$0xff] %vm1223_vm2, %v1746_v47  ;;  %1773 = vrcp.f32 %v1037_v43  ;;  %v760_v34 = vpop.f32.mrf.mxu1  ;;  %v601_v6 = vadd.f32 %v2182_v12, %v600_v32 }
 0x109   : > { %v1750_v54 = vpop.eup %1749  ;;  %1257 = vst.msk [vmem:[%s2208_s21 + $0x108] sm:$0xff] %vm1223_vm2, %v1748_v51  ;;  %1775 = vrcp.f32 %v1069_v48  ;;  %v1614_v40 = vpop.f32.mrf.mxu0 }
 0x10a   : > { %v1752_v58 = vpop.eup %1751  ;;  %1224 = vst.msk [vmem:[%s2208_s21] sm:$0xff] %vm1223_vm2, %v1750_v54  ;;  %1777 = vpow2.f32 %v1428_v44  ;;  %v1662_v43 = vpop.f32.mrf.mxu1  ;;  %v616_v15 = vadd.f32 %v1614_v40, %v2182_v12 }
 0x10b   : > { %v1754_v62 = vpop.eup %1753  ;;  %1256 = vst.msk [vmem:[%s2208_s21 + $0x100] sm:$0xff] %vm1223_vm2, %v1752_v58  ;;  %1779 = vpow2.f32 %v1460_v49  ;;  %v610_v50 = vpop.f32.mrf.mxu0 }
 0x10c   : > { %v1756_v1 = vpop.eup %1755  ;;  %1227 = vst.msk [vmem:[%s2208_s21 + $0x18] sm:$0xff] %vm1223_vm2, %v1754_v62  ;;  %1781 = vpow2.f32 %v1427_v52  ;;  %v770_v53 = vpop.f32.mrf.mxu1 }
 0x10d   : > { %v1758_v4 = vpop.eup %1757  ;;  %1259 = vst.msk [vmem:[%s2208_s21 + $0x118] sm:$0xff] %vm1223_vm2, %v1756_v1  ;;  %1783 = vpow2.f32 %v1459_v55  ;;  %v1617_v60 = vpop.f32.mrf.mxu0 }
 0x10e   : > { %v1760_v8 = vpop.eup %1759  ;;  %1226 = vst.msk [vmem:[%s2208_s21 + $0x10] sm:$0xff] %vm1223_vm2, %v1758_v4  ;;  %1785 = vpow2.f32 %v1430_v59  ;;  %v1665_v0 = vpop.f32.mrf.mxu1 }
 0x10f   : > { %v1762_v13 = vpop.eup %1761  ;;  %1258 = vst.msk [vmem:[%s2208_s21 + $0x110] sm:$0xff] %vm1223_vm2, %v1760_v8  ;;  %1787 = vpow2.f32 %v1462_v63  ;;  %v606_v63 = vadd.f32 %v2243_v22, %v2182_v12  ;;  %v620_v10 = vpop.f32.mrf.mxu0  ;;  %v1435_v22 = vmul.f32 -1.442695, %v601_v6 }
 0x110   : > { %v1764_v16 = vpop.eup %1763  ;;  %1229 = vst.msk [vmem:[%s2208_s21 + $0x28] sm:$0xff] %vm1223_vm2, %v1762_v13  ;;  %1789 = vpow2.f32 %v1429_v2 }
 0x111   : > { %v1766_v19 = vpop.eup %1765  ;;  %1261 = vst.msk [vmem:[%s2208_s21 + $0x128] sm:$0xff] %vm1223_vm2, %v1764_v16  ;;  %1791 = vpow2.f32 %v1461_v5  ;;  %v780_v16 = vpop.f32.mrf.mxu1 }
 0x112   : > { %v1768_v23 = vpop.eup %1767  ;;  %1228 = vst.msk [vmem:[%s2208_s21 + $0x20] sm:$0xff] %vm1223_vm2, %v1766_v19  ;;  %1793 = vpow2.f32 %v1432_v9  ;;  %v761_v9 = vadd.f32 %v2182_v12, %v760_v34  ;;  %v1468_v19 = vmul.f32 -1.442695, %v766_v3  ;;  %v786_v34 = vadd.f32 %v1665_v0, %v2182_v12 }
 0x113   : > { %v1770_v26 = vpop.eup %1769  ;;  %1260 = vst.msk [vmem:[%s2208_s21 + $0x120] sm:$0xff] %vm1223_vm2, %v1768_v23  ;;  %1795 = vpow2.f32 %v1464_v14  ;;  %v1436_v14 = vmul.f32 -1.442695, %v606_v63  ;;  %v611_v23 = vadd.f32 %v2182_v12, %v610_v50  ;;  %v781_v40 = vadd.f32 %v2182_v12, %v780_v16 }
 0x114   : > { %v1772_v28 = vpop.eup %1771  ;;  %1231 = vst.msk [vmem:[%s2208_s21 + $0x38] sm:$0xff] %vm1223_vm2, %v1770_v26  ;;  %1797 = vpow2.f32 %v1431_v17  ;;  %v1467_v25 = vmul.f32 -1.442695, %v761_v9  ;;  %v771_v26 = vadd.f32 %v2182_v12, %v770_v53 }
 0x115   : > { %v1774_v30 = vpop.eup %1773  ;;  %1263 = vst.msk [vmem:[%s2208_s21 + $0x138] sm:$0xff] %vm1223_vm2, %v1772_v28  ;;  %1799 = vpow2.f32 %v1463_v20  ;;  %v776_v20 = vadd.f32 %v1662_v43, %v2182_v12  ;;  %v1471_v53 = vmul.f32 -1.442695, %v781_v40 }
 0x116   : > { %v1776_v33 = vpop.eup %1775  ;;  %1230 = vst.msk [vmem:[%s2208_s21 + $0x30] sm:$0xff] %vm1223_vm2, %v1774_v30  ;;  %1801 = vpow2.f32 %v1434_v24  ;;  %v626_v30 = vadd.f32 %v1617_v60, %v2182_v12 }
 0x117   : > { %v1778_v35 = vpop.eup %1777  ;;  %1262 = vst.msk [vmem:[%s2208_s21 + $0x130] sm:$0xff] %vm1223_vm2, %v1776_v33  ;;  %1803 = vpow2.f32 %v1466_v27  ;;  %v1620_v27 = vpop.f32.mrf.mxu0  ;;  %v1470_v33 = vmul.f32 -1.442695, %v776_v20 }
 0x118   : > { %v1780_v36 = vpop.eup %1779  ;;  %v1040_v37 = vadd.f32 1.0, %v1778_v35  ;;  %1805 = vpow2.f32 %v1433_v29  ;;  %v1438_v29 = vmul.f32 -1.442695, %v616_v15  ;;  %v1440_v43 = vmul.f32 -1.442695, %v626_v30 }
 0x119   : > { %v1782_v38 = vpop.eup %1781  ;;  %v1072_v39 = vadd.f32 1.0, %v1780_v36  ;;  %1807 = vpow2.f32 %v1465_v31  ;;  %v1668_v31 = vpop.f32.mrf.mxu1  ;;  %v1437_v36 = vmul.f32 -1.442695, %v611_v23 }
 0x11a   : > { %v1784_v41 = vpop.eup %1783  ;;  %1809 = vrcp.f32 %v1040_v37  ;;  %v1039_v42 = vadd.f32 1.0, %v1782_v38  ;;  %v621_v37 = vadd.f32 %v2182_v12, %v620_v10 }
 0x11b   : > { %v1786_v44 = vpop.eup %1785  ;;  %1811 = vrcp.f32 %v1072_v39  ;;  %v1071_v45 = vadd.f32 1.0, %v1784_v41  ;;  %v1469_v39 = vmul.f32 -1.442695, %v771_v26  ;;  %v630_v41 = vpop.f32.mrf.mxu0 }
 0x11c   : > { %v1788_v46 = vpop.eup %1787  ;;  %1813 = vrcp.f32 %v1039_v42  ;;  %v1042_v47 = vadd.f32 1.0, %v1786_v44  ;;  %v636_v44 = vadd.f32 %v1620_v27, %v2182_v12  ;;  %v1439_v50 = vmul.f32 -1.442695, %v621_v37 }
 0x11d   : > { %v1790_v48 = vpop.eup %1789  ;;  %1815 = vrcp.f32 %v1071_v45  ;;  %v1074_v49 = vadd.f32 1.0, %v1788_v46  ;;  %v790_v45 = vpop.f32.mrf.mxu1 }
 0x11e   : > { %v1792_v51 = vpop.eup %1791  ;;  %1817 = vrcp.f32 %v1042_v47  ;;  %v1041_v52 = vadd.f32 1.0, %v1790_v48  ;;  %v1472_v47 = vmul.f32 -1.442695, %v786_v34  ;;  %v796_v48 = vadd.f32 %v1668_v31, %v2182_v12 }
 0x11f   : > { %v1794_v54 = vpop.eup %1793  ;;  %1819 = vrcp.f32 %v1074_v49  ;;  %v1073_v55 = vadd.f32 1.0, %v1792_v51  ;;  %v631_v51 = vadd.f32 %v2182_v12, %v630_v41 }
 0x120   : > { %v1796_v56 = vpop.eup %1795  ;;  %1821 = vrcp.f32 %v1041_v52  ;;  %v1044_v57 = vadd.f32 1.0, %v1794_v54  ;;  %v791_v54 = vadd.f32 %v2182_v12, %v790_v45  ;;  %v1474_v60 = vmul.f32 -1.442695, %v796_v48 }
 0x121   : > { %v1798_v58 = vpop.eup %1797  ;;  %1823 = vrcp.f32 %v1073_v55  ;;  %v1076_v59 = vadd.f32 1.0, %v1796_v56  ;;  %v2297_v55 = vpop.f32.mrf.mxu0 }
 0x122   : > { %v1800_v61 = vpop.eup %1799  ;;  %1825 = vrcp.f32 %v1044_v57  ;;  %v1043_v62 = vadd.f32 1.0, %v1798_v58  ;;  %v1442_v57 = vmul.f32 -1.442695, %v636_v44  ;;  %v2301_v58 = vpop.f32.mrf.mxu1  ;;  %v1473_v0 = vmul.f32 -1.442695, %v791_v54 }
 0x123   : > { %v1802_v1 = vpop.eup %1801  ;;  %1827 = vrcp.f32 %v1076_v59  ;;  %v1075_v2 = vadd.f32 1.0, %v1800_v61  ;;  %v806_v37 = vadd.f32 %v2301_v58, %v2182_v12 }
 0x124   : > { %v1804_v4 = vpop.eup %1803  ;;  %1829 = vrcp.f32 %v1043_v62  ;;  %v1046_v5 = vadd.f32 1.0, %v1802_v1  ;;  %v1441_v62 = vmul.f32 -1.442695, %v631_v51  ;;  %v640_v1 = vpop.f32.mrf.mxu0 }
 0x125   : > { %v1806_v7 = vpop.eup %1805  ;;  %1831 = vrcp.f32 %v1075_v2  ;;  %v1078_v8 = vadd.f32 1.0, %v1804_v4  ;;  %v800_v3 = vpop.f32.mrf.mxu1  ;;  %v641_v40 = vadd.f32 %v2182_v12, %v640_v1 }
 0x126   : > { %v1808_v11 = vpop.eup %1807  ;;  %1833 = vrcp.f32 %v1046_v5  ;;  %v1045_v13 = vadd.f32 1.0, %v1806_v7  ;;  %v1626_v9 = vpop.f32.mrf.mxu0 }
 0x127   : > { %v1810_v17 = vpop.eup %1809  ;;  %1835 = vrcp.f32 %v1078_v8  ;;  %v1077_v18 = vadd.f32 1.0, %v1808_v11  ;;  %v656_v48 = vadd.f32 %v1626_v9, %v2182_v12 }
 0x128   : > { %v1812_v21 = vpop.eup %1811  ;;  %1233 = vst.msk [vmem:[%s2208_s21 + $0x48] sm:$0xff] %vm1223_vm2, %v1810_v17  ;;  %1837 = vrcp.f32 %v1045_v13  ;;  %v1674_v13 = vpop.f32.mrf.mxu1 }
 0x129   : > { %v1814_v24 = vpop.eup %1813  ;;  %1265 = vst.msk [vmem:[%s2208_s21 + $0x148] sm:$0xff] %vm1223_vm2, %v1812_v21  ;;  %1839 = vrcp.f32 %v1077_v18  ;;  %v650_v20 = vpop.f32.mrf.mxu0 }
 0x12a   : > { %v1816_v28 = vpop.eup %1815  ;;  %1232 = vst.msk [vmem:[%s2208_s21 + $0x40] sm:$0xff] %vm1223_vm2, %v1814_v24  ;;  %1841 = vpow2.f32 %v1436_v14  ;;  %v810_v23 = vpop.f32.mrf.mxu1 }
 0x12b   : > { %v1818_v32 = vpop.eup %1817  ;;  %1264 = vst.msk [vmem:[%s2208_s21 + $0x140] sm:$0xff] %vm1223_vm2, %v1816_v28  ;;  %1843 = vpow2.f32 %v1468_v19  ;;  %v1629_v30 = vpop.f32.mrf.mxu0 }
 0x12c   : > { %v1820_v35 = vpop.eup %1819  ;;  %1235 = vst.msk [vmem:[%s2208_s21 + $0x58] sm:$0xff] %vm1223_vm2, %v1818_v32  ;;  %1845 = vpow2.f32 %v1435_v22  ;;  %v1677_v34 = vpop.f32.mrf.mxu1 }
 0x12d   : > { %v1822_v38 = vpop.eup %1821  ;;  %1267 = vst.msk [vmem:[%s2208_s21 + $0x158] sm:$0xff] %vm1223_vm2, %v1820_v35  ;;  %1847 = vpow2.f32 %v1467_v25  ;;  %v660_v44 = vpop.f32.mrf.mxu0 }
 0x12e   : > { %v1824_v42 = vpop.eup %1823  ;;  %1234 = vst.msk [vmem:[%s2208_s21 + $0x50] sm:$0xff] %vm1223_vm2, %v1822_v38  ;;  %1849 = vpow2.f32 %v1438_v29 }
 0x12f   : > { %v1826_v46 = vpop.eup %1825  ;;  %1266 = vst.msk [vmem:[%s2208_s21 + $0x150] sm:$0xff] %vm1223_vm2, %v1824_v42  ;;  %1851 = vpow2.f32 %v1470_v33  ;;  %v646_v33 = vadd.f32 %v2297_v55, %v2182_v12  ;;  %v1443_v55 = vmul.f32 -1.442695, %v641_v40 }
 0x130   : > { %v1828_v49 = vpop.eup %1827  ;;  %1237 = vst.msk [vmem:[%s2208_s21 + $0x68] sm:$0xff] %vm1223_vm2, %v1826_v46  ;;  %1853 = vpow2.f32 %v1437_v36 }
 0x131   : > { %v1830_v52 = vpop.eup %1829  ;;  %1269 = vst.msk [vmem:[%s2208_s21 + $0x168] sm:$0xff] %vm1223_vm2, %v1828_v49  ;;  %1855 = vpow2.f32 %v1469_v39  ;;  %v820_v49 = vpop.f32.mrf.mxu1 }
 0x132   : > { %v1832_v56 = vpop.eup %1831  ;;  %1236 = vst.msk [vmem:[%s2208_s21 + $0x60] sm:$0xff] %vm1223_vm2, %v1830_v52  ;;  %1857 = vpow2.f32 %v1440_v43  ;;  %v801_v43 = vadd.f32 %v2182_v12, %v800_v3  ;;  %v1476_v52 = vmul.f32 -1.442695, %v806_v37  ;;  %v826_v3 = vadd.f32 %v1677_v34, %v2182_v12 }
 0x133   : > { %v1834_v59 = vpop.eup %1833  ;;  %1268 = vst.msk [vmem:[%s2208_s21 + $0x160] sm:$0xff] %vm1223_vm2, %v1832_v56  ;;  %1859 = vpow2.f32 %v1472_v47  ;;  %v1444_v47 = vmul.f32 -1.442695, %v646_v33  ;;  %v651_v56 = vadd.f32 %v2182_v12, %v650_v20  ;;  %v821_v9 = vadd.f32 %v2182_v12, %v820_v49 }
 0x134   : > { %v1836_v61 = vpop.eup %1835  ;;  %1239 = vst.msk [vmem:[%s2208_s21 + $0x78] sm:$0xff] %vm1223_vm2, %v1834_v59  ;;  %1861 = vpow2.f32 %v1439_v50  ;;  %v1475_v58 = vmul.f32 -1.442695, %v801_v43  ;;  %v811_v59 = vadd.f32 %v2182_v12, %v810_v23 }
 0x135   : > { %v1838_v63 = vpop.eup %1837  ;;  %1271 = vst.msk [vmem:[%s2208_s21 + $0x178] sm:$0xff] %vm1223_vm2, %v1836_v61  ;;  %1863 = vpow2.f32 %v1471_v53  ;;  %v816_v53 = vadd.f32 %v1674_v13, %v2182_v12  ;;  %v1479_v23 = vmul.f32 -1.442695, %v821_v9 }
 0x136   : > { %v1840_v2 = vpop.eup %1839  ;;  %1238 = vst.msk [vmem:[%s2208_s21 + $0x70] sm:$0xff] %vm1223_vm2, %v1838_v63  ;;  %1865 = vpow2.f32 %v1442_v57  ;;  %v666_v63 = vadd.f32 %v1629_v30, %v2182_v12 }
 0x137   : > { %v1842_v4 = vpop.eup %1841  ;;  %1270 = vst.msk [vmem:[%s2208_s21 + $0x170] sm:$0xff] %vm1223_vm2, %v1840_v2  ;;  %1867 = vpow2.f32 %v1474_v60  ;;  %v1632_v60 = vpop.f32.mrf.mxu0  ;;  %v1478_v2 = vmul.f32 -1.442695, %v816_v53 }
 0x138   : > { %v1844_v5 = vpop.eup %1843  ;;  %v1048_v6 = vadd.f32 1.0, %v1842_v4  ;;  %1869 = vpow2.f32 %v1441_v62  ;;  %v1446_v62 = vmul.f32 -1.442695, %v656_v48  ;;  %v1448_v13 = vmul.f32 -1.442695, %v666_v63 }
 0x139   : > { %v1846_v7 = vpop.eup %1845  ;;  %v1080_v8 = vadd.f32 1.0, %v1844_v5  ;;  %1871 = vpow2.f32 %v1473_v0  ;;  %v1680_v0 = vpop.f32.mrf.mxu1  ;;  %v1445_v5 = vmul.f32 -1.442695, %v651_v56 }
 0x13a   : > { %v1848_v10 = vpop.eup %1847  ;;  %1873 = vrcp.f32 %v1048_v6  ;;  %v1047_v11 = vadd.f32 1.0, %v1846_v7  ;;  %v661_v6 = vadd.f32 %v2182_v12, %v660_v44 }
 0x13b   : > { %v1850_v14 = vpop.eup %1849  ;;  %1875 = vrcp.f32 %v1080_v8  ;;  %v1079_v15 = vadd.f32 1.0, %v1848_v10  ;;  %v1477_v8 = vmul.f32 -1.442695, %v811_v59  ;;  %v670_v10 = vpop.f32.mrf.mxu0 }
 0x13c   : > { %v1852_v16 = vpop.eup %1851  ;;  %1877 = vrcp.f32 %v1047_v11  ;;  %v1050_v17 = vadd.f32 1.0, %v1850_v14  ;;  %v676_v14 = vadd.f32 %v1632_v60, %v2182_v12  ;;  %v1447_v20 = vmul.f32 -1.442695, %v661_v6 }
 0x13d   : > { %v1854_v18 = vpop.eup %1853  ;;  %1879 = vrcp.f32 %v1079_v15  ;;  %v1082_v19 = vadd.f32 1.0, %v1852_v16  ;;  %v830_v15 = vpop.f32.mrf.mxu1 }
 0x13e   : > { %v1856_v21 = vpop.eup %1855  ;;  %1881 = vrcp.f32 %v1050_v17  ;;  %v1049_v22 = vadd.f32 1.0, %v1854_v18  ;;  %v1480_v17 = vmul.f32 -1.442695, %v826_v3  ;;  %v836_v18 = vadd.f32 %v1680_v0, %v2182_v12 }
 0x13f   : > { %v1858_v24 = vpop.eup %1857  ;;  %1883 = vrcp.f32 %v1082_v19  ;;  %v1081_v25 = vadd.f32 1.0, %v1856_v21  ;;  %v671_v21 = vadd.f32 %v2182_v12, %v670_v10 }
 0x140   : > { %v1860_v26 = vpop.eup %1859  ;;  %1885 = vrcp.f32 %v1049_v22  ;;  %v1052_v27 = vadd.f32 1.0, %v1858_v24  ;;  %v831_v24 = vadd.f32 %v2182_v12, %v830_v15 }
 0x141   : > { %v1862_v28 = vpop.eup %1861  ;;  %1887 = vrcp.f32 %v1081_v25  ;;  %v1084_v29 = vadd.f32 1.0, %v1860_v26  ;;  %v1450_v26 = vmul.f32 -1.442695, %v676_v14  ;;  %v1449_v30 = vmul.f32 -1.442695, %v671_v21 }
 0x142   : > { %v1864_v31 = vpop.eup %1863  ;;  %1889 = vrcp.f32 %v1052_v27  ;;  %v1051_v32 = vadd.f32 1.0, %v1862_v28  ;;  %v1482_v28 = vmul.f32 -1.442695, %v836_v18  ;;  %v1481_v12 = vmul.f32 -1.442695, %v831_v24 }
 0x143   : > { %v1866_v35 = vpop.eup %1865  ;;  %1891 = vrcp.f32 %v1084_v29  ;;  %v1083_v36 = vadd.f32 1.0, %v1864_v31 }
 0x144   : > { %v1868_v38 = vpop.eup %1867  ;;  %1893 = vrcp.f32 %v1051_v32  ;;  %v1054_v39 = vadd.f32 1.0, %v1866_v35 }
 0x145   : > { %v1870_v41 = vpop.eup %1869  ;;  %1895 = vrcp.f32 %v1083_v36  ;;  %v1086_v42 = vadd.f32 1.0, %v1868_v38 }
 0x146   : > { %v1872_v45 = vpop.eup %1871  ;;  %1897 = vrcp.f32 %v1054_v39  ;;  %v1053_v46 = vadd.f32 1.0, %v1870_v41 }
 0x147   : > { %v1874_v50 = vpop.eup %1873  ;;  %1899 = vrcp.f32 %v1086_v42  ;;  %v1085_v51 = vadd.f32 1.0, %v1872_v45 }
 0x148   : > { %v1876_v54 = vpop.eup %1875  ;;  %1241 = vst.msk [vmem:[%s2208_s21 + $0x88] sm:$0xff] %vm1223_vm2, %v1874_v50  ;;  %1901 = vrcp.f32 %v1053_v46 }
 0x149   : > { %v1878_v57 = vpop.eup %1877  ;;  %1273 = vst.msk [vmem:[%s2208_s21 + $0x188] sm:$0xff] %vm1223_vm2, %v1876_v54  ;;  %1903 = vrcp.f32 %v1085_v51 }
 0x14a   : > { %v1880_v61 = vpop.eup %1879  ;;  %1240 = vst.msk [vmem:[%s2208_s21 + $0x80] sm:$0xff] %vm1223_vm2, %v1878_v57  ;;  %1905 = vpow2.f32 %v1444_v47 }
 0x14b   : > { %v1882_v1 = vpop.eup %1881  ;;  %1272 = vst.msk [vmem:[%s2208_s21 + $0x180] sm:$0xff] %vm1223_vm2, %v1880_v61  ;;  %1907 = vpow2.f32 %v1476_v52 }
 0x14c   : > { %v1884_v4 = vpop.eup %1883  ;;  %1243 = vst.msk [vmem:[%s2208_s21 + $0x98] sm:$0xff] %vm1223_vm2, %v1882_v1  ;;  %1909 = vpow2.f32 %v1443_v55 }
 0x14d   : > { %v1886_v7 = vpop.eup %1885  ;;  %1275 = vst.msk [vmem:[%s2208_s21 + $0x198] sm:$0xff] %vm1223_vm2, %v1884_v4  ;;  %1911 = vpow2.f32 %v1475_v58 }
 0x14e   : > { %v1888_v11 = vpop.eup %1887  ;;  %1242 = vst.msk [vmem:[%s2208_s21 + $0x90] sm:$0xff] %vm1223_vm2, %v1886_v7  ;;  %1913 = vpow2.f32 %v1446_v62 }
 0x14f   : > { %v1890_v16 = vpop.eup %1889  ;;  %1274 = vst.msk [vmem:[%s2208_s21 + $0x190] sm:$0xff] %vm1223_vm2, %v1888_v11  ;;  %1915 = vpow2.f32 %v1478_v2 }
 0x150   : > { %v1892_v19 = vpop.eup %1891  ;;  %1245 = vst.msk [vmem:[%s2208_s21 + $0xa8] sm:$0xff] %vm1223_vm2, %v1890_v16  ;;  %1917 = vpow2.f32 %v1445_v5 }
 0x151   : > { %v1894_v22 = vpop.eup %1893  ;;  %1277 = vst.msk [vmem:[%s2208_s21 + $0x1a8] sm:$0xff] %vm1223_vm2, %v1892_v19  ;;  %1919 = vpow2.f32 %v1477_v8 }
 0x152   : > { %v1896_v25 = vpop.eup %1895  ;;  %1244 = vst.msk [vmem:[%s2208_s21 + $0xa0] sm:$0xff] %vm1223_vm2, %v1894_v22  ;;  %1921 = vpow2.f32 %v1448_v13 }
 0x153   : > { %v1898_v27 = vpop.eup %1897  ;;  %1276 = vst.msk [vmem:[%s2208_s21 + $0x1a0] sm:$0xff] %vm1223_vm2, %v1896_v25  ;;  %1923 = vpow2.f32 %v1480_v17 }
 0x154   : > { %v1900_v29 = vpop.eup %1899  ;;  %1247 = vst.msk [vmem:[%s2208_s21 + $0xb8] sm:$0xff] %vm1223_vm2, %v1898_v27  ;;  %1925 = vpow2.f32 %v1447_v20 }
 0x155   : > { %v1902_v31 = vpop.eup %1901  ;;  %1279 = vst.msk [vmem:[%s2208_s21 + $0x1b8] sm:$0xff] %vm1223_vm2, %v1900_v29  ;;  %1927 = vpow2.f32 %v1479_v23 }
 0x156   : > { %v1904_v32 = vpop.eup %1903  ;;  %1246 = vst.msk [vmem:[%s2208_s21 + $0xb0] sm:$0xff] %vm1223_vm2, %v1902_v31  ;;  %1929 = vpow2.f32 %v1450_v26 }
 0x157   : > { %v1906_v33 = vpop.eup %1905  ;;  %1278 = vst.msk [vmem:[%s2208_s21 + $0x1b0] sm:$0xff] %vm1223_vm2, %v1904_v32  ;;  %1931 = vpow2.f32 %v1482_v28 }
 0x158   : > { %v1908_v34 = vpop.eup %1907  ;;  %v1056_v35 = vadd.f32 1.0, %v1906_v33  ;;  %1933 = vpow2.f32 %v1449_v30 }
 0x159   : > { %v1910_v36 = vpop.eup %1909  ;;  %v1088_v37 = vadd.f32 1.0, %v1908_v34  ;;  %1935 = vpow2.f32 %v1481_v12 }
 0x15a   : > { %v1912_v38 = vpop.eup %1911  ;;  %1937 = vrcp.f32 %v1056_v35  ;;  %v1055_v39 = vadd.f32 1.0, %v1910_v36 }
 0x15b   : > { %v1914_v40 = vpop.eup %1913  ;;  %1939 = vrcp.f32 %v1088_v37  ;;  %v1087_v41 = vadd.f32 1.0, %v1912_v38 }
 0x15c   : > { %v1916_v42 = vpop.eup %1915  ;;  %1941 = vrcp.f32 %v1055_v39  ;;  %v1058_v43 = vadd.f32 1.0, %v1914_v40 }
 0x15d   : > { %v1918_v44 = vpop.eup %1917  ;;  %1943 = vrcp.f32 %v1087_v41  ;;  %v1090_v45 = vadd.f32 1.0, %v1916_v42 }
 0x15e   : > { %v1920_v46 = vpop.eup %1919  ;;  %1945 = vrcp.f32 %v1058_v43  ;;  %v1057_v47 = vadd.f32 1.0, %v1918_v44 }
 0x15f   : > { %v1922_v48 = vpop.eup %1921  ;;  %1947 = vrcp.f32 %v1090_v45  ;;  %v1089_v49 = vadd.f32 1.0, %v1920_v46 }
 0x160   : > { %v1924_v50 = vpop.eup %1923  ;;  %1949 = vrcp.f32 %v1057_v47  ;;  %v1060_v51 = vadd.f32 1.0, %v1922_v48 }
 0x161   : > { %v1926_v52 = vpop.eup %1925  ;;  %1951 = vrcp.f32 %v1089_v49  ;;  %v1092_v53 = vadd.f32 1.0, %v1924_v50 }
 0x162   : > { %v1928_v54 = vpop.eup %1927  ;;  %1953 = vrcp.f32 %v1060_v51  ;;  %v1059_v55 = vadd.f32 1.0, %v1926_v52 }
 0x163   : > { %v1930_v56 = vpop.eup %1929  ;;  %1955 = vrcp.f32 %v1092_v53  ;;  %v1091_v57 = vadd.f32 1.0, %v1928_v54 }
 0x164   : > { %v1932_v58 = vpop.eup %1931  ;;  %1957 = vrcp.f32 %v1059_v55  ;;  %v1062_v59 = vadd.f32 1.0, %v1930_v56 }
 0x165   : > { %v1934_v60 = vpop.eup %1933  ;;  %1959 = vrcp.f32 %v1091_v57  ;;  %v1094_v61 = vadd.f32 1.0, %v1932_v58 }
 0x166   : > { %v1936_v62 = vpop.eup %1935  ;;  %1961 = vrcp.f32 %v1062_v59  ;;  %v1061_v63 = vadd.f32 1.0, %v1934_v60 }
 0x167   : > { %v1938_v0 = vpop.eup %1937  ;;  %1963 = vrcp.f32 %v1094_v61  ;;  %v1093_v1 = vadd.f32 1.0, %v1936_v62 }
 0x168   : > { %v1940_v2 = vpop.eup %1939  ;;  %1249 = vst.msk [vmem:[%s2208_s21 + $0xc8] sm:$0xff] %vm1223_vm2, %v1938_v0  ;;  %1965 = vrcp.f32 %v1061_v63 }
 0x169   : > { %v1942_v3 = vpop.eup %1941  ;;  %1281 = vst.msk [vmem:[%s2208_s21 + $0x1c8] sm:$0xff] %vm1223_vm2, %v1940_v2  ;;  %1967 = vrcp.f32 %v1093_v1 }
 0x16a   : > { %v1944_v4 = vpop.eup %1943  ;;  %1248 = vst.msk [vmem:[%s2208_s21 + $0xc0] sm:$0xff] %vm1223_vm2, %v1942_v3 }
 0x16b   : > { %v1946_v5 = vpop.eup %1945  ;;  %1280 = vst.msk [vmem:[%s2208_s21 + $0x1c0] sm:$0xff] %vm1223_vm2, %v1944_v4 }
 0x16c   : > { %v1948_v6 = vpop.eup %1947  ;;  %1251 = vst.msk [vmem:[%s2208_s21 + $0xd8] sm:$0xff] %vm1223_vm2, %v1946_v5 }
 0x16d   : > { %v1950_v7 = vpop.eup %1949  ;;  %1283 = vst.msk [vmem:[%s2208_s21 + $0x1d8] sm:$0xff] %vm1223_vm2, %v1948_v6 }
 0x16e   : > { %v1952_v8 = vpop.eup %1951  ;;  %1250 = vst.msk [vmem:[%s2208_s21 + $0xd0] sm:$0xff] %vm1223_vm2, %v1950_v7 }
 0x16f   : > { %v1954_v9 = vpop.eup %1953  ;;  %1282 = vst.msk [vmem:[%s2208_s21 + $0x1d0] sm:$0xff] %vm1223_vm2, %v1952_v8 }
 0x170   : > { %v1956_v10 = vpop.eup %1955  ;;  %1253 = vst.msk [vmem:[%s2208_s21 + $0xe8] sm:$0xff] %vm1223_vm2, %v1954_v9 }
 0x171   : > { %v1958_v11 = vpop.eup %1957  ;;  %1285 = vst.msk [vmem:[%s2208_s21 + $0x1e8] sm:$0xff] %vm1223_vm2, %v1956_v10 }
 0x172   : > { %v1960_v13 = vpop.eup %1959  ;;  %1252 = vst.msk [vmem:[%s2208_s21 + $0xe0] sm:$0xff] %vm1223_vm2, %v1958_v11 }
 0x173   : > { %v1962_v14 = vpop.eup %1961  ;;  %1284 = vst.msk [vmem:[%s2208_s21 + $0x1e0] sm:$0xff] %vm1223_vm2, %v1960_v13 }
 0x174   : > { %v1964_v15 = vpop.eup %1963  ;;  %1255 = vst.msk [vmem:[%s2208_s21 + $0xf8] sm:$0xff] %vm1223_vm2, %v1962_v14 }
 0x175   : > { %v1966_v16 = vpop.eup %1965  ;;  %1287 = vst.msk [vmem:[%s2208_s21 + $0x1f8] sm:$0xff] %vm1223_vm2, %v1964_v15 }
 0x176   : > { %v1968_v17 = vpop.eup %1967  ;;  %1254 = vst.msk [vmem:[%s2208_s21 + $0xf0] sm:$0xff] %vm1223_vm2, %v1966_v16 }
 0x177   : > { %1286 = vst.msk [vmem:[%s2208_s21 + $0x1f0] sm:$0xff] %vm1223_vm2, %v1968_v17 }
 0x178 PF: > { %s13_s12 = sadd.s32 1, %s1975_s12  }
 0x179   : > { %p10_p4 = scmp.ge.s32.totalorder %s13_s12, 6  }
 0x17b   :  { %12 = sbr.rel (!%p10_p4) target bundleno = 1 (0x1), region = 62 }

</bundles_post_ra>
